<compile_context>
chip_gen: v7x
topology: tpu7x:2x2x1
jax: 0.10.0
libtpu: 0.0.40
codegen_flags: <defaults>
</compile_context>

<pallas_src>
import jax
import jax.numpy as jnp
from jax.experimental import pallas as pl
from jax.experimental.pallas import tpu as pltpu

EPS = 1e-5


def _instance_norm(y, inv_hw):
    # y: (C, H*W) float32. Per-channel biased mean/var over the spatial (lane) axis,
    # computed in a single pass (sum + sum of squares) off the live conv output.
    s = jnp.sum(y, axis=1, keepdims=True)
    ss = jnp.sum(y * y, axis=1, keepdims=True)
    mean = s * inv_hw
    var = ss * inv_hw - mean * mean            # biased variance, matches nn.InstanceNorm2d
    return (y - mean) * jax.lax.rsqrt(var + EPS)


def _im2col(get_tap, H, W, C):
    # Build the (9C, H*W) im2col matrix; get_tap(dh, dw) -> (C, H, W) window of the padded input.
    # Row order is (dh*3 + dw)*C + ci, matching the weight repack in the wrapper.
    taps = []
    for dh in range(3):
        for dw in range(3):
            taps.append(get_tap(dh, dw).reshape(C, H * W))
    return jnp.concatenate(taps, axis=0)


def resnet_block_kernel(xpad_ref, xres_ref, w1_ref, w2_ref, o_ref, hpad_ref):
    C, Hp2, Wp2 = hpad_ref.shape
    H, W = Hp2 - 2, Wp2 - 2
    HW = H * W
    inv_hw = 1.0 / HW

    # ---- conv1: im2col -> single bf16 MXU matmul with f32 accumulation ----
    xp = xpad_ref[0]                                                 # (C, H+2, W+2) bf16
    patch1 = _im2col(lambda dh, dw: xp[:, dh:dh + H, dw:dw + W], H, W, C)   # (9C, HW) bf16
    y1 = jnp.dot(w1_ref[...], patch1, preferred_element_type=jnp.float32)  # (C, HW) f32

    # ---- instance norm + ReLU (f32 elementwise) ----
    h = jnp.maximum(_instance_norm(y1, inv_hw), 0.0)
    # TODO(synk): nn.Dropout(0.5) is identity in eval mode; train-mode stochastic dropout not implemented.

    # ---- reflect-pad h into the VMEM scratch (no concatenates) ----
    hr = h.astype(jnp.bfloat16).reshape(C, H, W)
    hpad_ref[:, 1:H + 1, 1:W + 1] = hr
    hpad_ref[:, 0:1, 1:W + 1] = hr[:, 1:2, :]                   # top row    <- row 1
    hpad_ref[:, H + 1:H + 2, 1:W + 1] = hr[:, H - 2:H - 1, :]   # bottom row <- row H-2
    hpad_ref[:, :, 0:1] = hpad_ref[:, :, 2:3]                   # left col   (corners correct)
    hpad_ref[:, :, W + 1:W + 2] = hpad_ref[:, :, W - 1:W]       # right col  (corners correct)

    # ---- conv2: im2col -> single bf16 MXU matmul ----
    patch2 = _im2col(lambda dh, dw: hpad_ref[:, dh:dh + H, dw:dw + W], H, W, C)
    y2 = jnp.dot(w2_ref[...], patch2, preferred_element_type=jnp.float32)   # (C, HW) f32

    # ---- instance norm + residual add fused with the lane-dense store ----
    o_ref[0] = (xres_ref[0] + _instance_norm(y2, inv_hw)).astype(o_ref.dtype)


@jax.jit
def resnet_block(x_nchw, w1_oihw, w2_oihw):
    """x_nchw: (N, C, H, W) float32; weights: (C, C, 3, 3) PyTorch OIHW layout."""
    N, C, H, W = x_nchw.shape
    assert H >= 2 and W >= 2, "ReflectionPad2d(1) requires H >= 2 and W >= 2"
    HW = H * W

    # Reflection-pad once in XLA. bf16 copy feeds the MXU; f32 flat copy feeds the residual add.
    xpad = jnp.pad(x_nchw, ((0, 0), (0, 0), (1, 1), (1, 1)), mode="reflect").astype(jnp.bfloat16)
    xres = x_nchw.reshape(N, C, HW)

    # (O, I, 3, 3) -> (O, 9*I) with column index (dh*3 + dw)*C + i (matches im2col row order).
    def prep(w):
        return jnp.transpose(w, (0, 2, 3, 1)).reshape(C, 9 * C).astype(jnp.bfloat16)

    w1 = prep(w1_oihw)
    w2 = prep(w2_oihw)

    out = pl.pallas_call(
        resnet_block_kernel,
        out_shape=jax.ShapeDtypeStruct((N, C, HW), x_nchw.dtype),
        grid_spec=pltpu.PrefetchScalarGridSpec(
            num_scalar_prefetch=0,
            grid=(N,),                                             # one image per grid step
            in_specs=[
                pl.BlockSpec((1, C, H + 2, W + 2), lambda b: (b, 0, 0, 0)),  # padded x (bf16)
                pl.BlockSpec((1, C, HW), lambda b: (b, 0, 0)),               # residual x (f32)
                pl.BlockSpec((C, 9 * C), lambda b: (0, 0)),                  # conv1 weight
                pl.BlockSpec((C, 9 * C), lambda b: (0, 0)),                  # conv2 weight
            ],
            out_specs=pl.BlockSpec((1, C, HW), lambda b: (b, 0, 0)),         # lane-dense output
            scratch_shapes=[pltpu.VMEM((C, H + 2, W + 2), jnp.bfloat16)],    # padded h scratch
        ),
        compiler_params=pltpu.CompilerParams(
            dimension_semantics=("parallel",),
            # Above the 16/32 MiB scoped defaults, comfortably below v7x's 64 MiB physical VMEM.
            vmem_limit_bytes=48 * 1024 * 1024,
        ),
    )(xpad, xres, w1, w2)

    return out.reshape(N, C, H, W)


# ----------------------------- pure-JAX reference ----------------------------
def _reference(x_nchw, w1, w2, mxu_dtype=jnp.float32):
    """Reference forward. mxu_dtype=bfloat16 mirrors the kernel's MXU operand precision."""
    def half(x, w):
        xp = jnp.pad(x, ((0, 0), (0, 0), (1, 1), (1, 1)), mode="reflect")
        y = jax.lax.conv_general_dilated(
            xp.astype(mxu_dtype), w.astype(mxu_dtype),
            window_strides=(1, 1), padding="VALID",
            dimension_numbers=("NCHW", "OIHW", "NCHW"),
            preferred_element_type=jnp.float32)
        mean = jnp.mean(y, axis=(2, 3), keepdims=True)
        var = jnp.mean((y - mean) ** 2, axis=(2, 3), keepdims=True)
        return (y - mean) * jax.lax.rsqrt(var + EPS)

    h = jnp.maximum(half(x_nchw, w1), 0.0)
    h = half(h, w2)
    return x_nchw + h


if __name__ == "__main__":
    N, C, H, W = 2, 8, 16, 16   # nc = 8
    key = jax.random.PRNGKey(0)
    kx, k1, k2 = jax.random.split(key, 3)

    x = jax.random.normal(kx, (N, C, H, W), dtype=jnp.float32)
    w1 = jax.random.normal(k1, (C, C, 3, 3), dtype=jnp.float32) * 0.1
    w2 = jax.random.normal(k2, (C, C, 3, 3), dtype=jnp.float32) * 0.1

    out = jax.block_until_ready(resnet_block(x, w1, w2))
    assert out.shape == (N, C, H, W)

    # Tight check vs a reference that uses the same bf16 MXU operand precision as the kernel.
    ref_q = jax.block_until_ready(_reference(x, w1, w2, mxu_dtype=jnp.bfloat16))
    err_q = float(jnp.max(jnp.abs(out - ref_q)))
    assert err_q < 5e-3, err_q

    # Coarse sanity bound vs the full-f32 reference (difference is pure bf16 quantization noise).
    ref_f = jax.block_until_ready(_reference(x, w1, w2, mxu_dtype=jnp.float32))
    err_f = float(jnp.max(jnp.abs(out - ref_f)))
    assert err_f < 1e-1, err_f

    print("KERNEL_OK")
</pallas_src>

<mosaic_0001>
module attributes {stable_mosaic.version = 11 : i64} {
  func.func @resnet_block_kernel(%arg0: i32, %arg1: memref<1x8x18x18xbf16, #tpu.memory_space<vmem>>, %arg2: memref<1x8x256xf32, #tpu.memory_space<vmem>>, %arg3: memref<8x72xbf16, #tpu.memory_space<vmem>>, %arg4: memref<8x72xbf16, #tpu.memory_space<vmem>>, %arg5: memref<1x8x256xf32, #tpu.memory_space<vmem>>, %arg6: memref<8x18x18xbf16, #tpu.memory_space<vmem>>) attributes {dimension_semantics = [#tpu.dimension_semantics<parallel>], iteration_bounds = array<i64: 2>, scalar_prefetch = 0 : i64, scratch_operands = 1 : i64, tpu.core_type = #tpu.core_type<tc>, window_params = [{transform_indices = @transform_0, window_bounds = array<i64: 1, 8, 18, 18>}, {transform_indices = @transform_1, window_bounds = array<i64: 1, 8, 256>}, {pipeline_mode = #tpu.pipeline_mode<synchronous>, transform_indices = @transform_2, window_bounds = array<i64: 8, 72>}, {pipeline_mode = #tpu.pipeline_mode<synchronous>, transform_indices = @transform_3, window_bounds = array<i64: 8, 72>}, {transform_indices = @transform_4, window_bounds = array<i64: 1, 8, 256>}]} {
    %c0 = arith.constant 0 : index
    %c0_0 = arith.constant 0 : index
    %c0_1 = arith.constant 0 : index
    %c0_2 = arith.constant 0 : index
    %0 = vector.load %arg1[%c0, %c0_0, %c0_1, %c0_2] : memref<1x8x18x18xbf16, #tpu.memory_space<vmem>>, vector<1x8x18x18xbf16>
    %1 = vector.shape_cast %0 : vector<1x8x18x18xbf16> to vector<8x18x18xbf16>
    %2 = vector.extract_strided_slice %1 {offsets = [0, 0, 0], sizes = [8, 16, 16], strides = [1, 1, 1]} : vector<8x18x18xbf16> to vector<8x16x16xbf16>
    %3 = vector.shape_cast %2 : vector<8x16x16xbf16> to vector<8x256xbf16>
    %4 = vector.extract_strided_slice %1 {offsets = [0, 0, 1], sizes = [8, 16, 16], strides = [1, 1, 1]} : vector<8x18x18xbf16> to vector<8x16x16xbf16>
    %5 = vector.shape_cast %4 : vector<8x16x16xbf16> to vector<8x256xbf16>
    %6 = vector.extract_strided_slice %1 {offsets = [0, 0, 2], sizes = [8, 16, 16], strides = [1, 1, 1]} : vector<8x18x18xbf16> to vector<8x16x16xbf16>
    %7 = vector.shape_cast %6 : vector<8x16x16xbf16> to vector<8x256xbf16>
    %8 = vector.extract_strided_slice %1 {offsets = [0, 1, 0], sizes = [8, 16, 16], strides = [1, 1, 1]} : vector<8x18x18xbf16> to vector<8x16x16xbf16>
    %9 = vector.shape_cast %8 : vector<8x16x16xbf16> to vector<8x256xbf16>
    %10 = vector.extract_strided_slice %1 {offsets = [0, 1, 1], sizes = [8, 16, 16], strides = [1, 1, 1]} : vector<8x18x18xbf16> to vector<8x16x16xbf16>
    %11 = vector.shape_cast %10 : vector<8x16x16xbf16> to vector<8x256xbf16>
    %12 = vector.extract_strided_slice %1 {offsets = [0, 1, 2], sizes = [8, 16, 16], strides = [1, 1, 1]} : vector<8x18x18xbf16> to vector<8x16x16xbf16>
    %13 = vector.shape_cast %12 : vector<8x16x16xbf16> to vector<8x256xbf16>
    %14 = vector.extract_strided_slice %1 {offsets = [0, 2, 0], sizes = [8, 16, 16], strides = [1, 1, 1]} : vector<8x18x18xbf16> to vector<8x16x16xbf16>
    %15 = vector.shape_cast %14 : vector<8x16x16xbf16> to vector<8x256xbf16>
    %16 = vector.extract_strided_slice %1 {offsets = [0, 2, 1], sizes = [8, 16, 16], strides = [1, 1, 1]} : vector<8x18x18xbf16> to vector<8x16x16xbf16>
    %17 = vector.shape_cast %16 : vector<8x16x16xbf16> to vector<8x256xbf16>
    %18 = vector.extract_strided_slice %1 {offsets = [0, 2, 2], sizes = [8, 16, 16], strides = [1, 1, 1]} : vector<8x18x18xbf16> to vector<8x16x16xbf16>
    %19 = vector.shape_cast %18 : vector<8x16x16xbf16> to vector<8x256xbf16>
    %20 = tpu.concatenate %3, %5, %7, %9, %11, %13, %15, %17, %19 in 0 : vector<8x256xbf16>, vector<8x256xbf16>, vector<8x256xbf16>, vector<8x256xbf16>, vector<8x256xbf16>, vector<8x256xbf16>, vector<8x256xbf16>, vector<8x256xbf16>, vector<8x256xbf16> -> vector<72x256xbf16>
    %c0_3 = arith.constant 0 : index
    %c0_4 = arith.constant 0 : index
    %21 = vector.load %arg3[%c0_3, %c0_4] : memref<8x72xbf16, #tpu.memory_space<vmem>>, vector<8x72xbf16>
    %cst = arith.constant dense<0.000000e+00> : vector<8x256xf32>
    %22 = tpu.matmul %21, %20, %cst {dimension_numbers = #tpu.dot_dimension_numbers<[1], [0], [0], [1], [0, 0, 1, 1], [], []>} : vector<8x72xbf16>, vector<72x256xbf16>, vector<8x256xf32> -> vector<8x256xf32>
    %cst_5 = arith.constant dense<0.000000e+00> : vector<8xf32>
    %23 = vector.multi_reduction <add>, %22, %cst_5 [1] : vector<8x256xf32> to vector<8xf32>
    %24 = vector.shape_cast %23 : vector<8xf32> to vector<8x1xf32>
    %25 = arith.mulf %22, %22 : vector<8x256xf32>
    %cst_6 = arith.constant dense<0.000000e+00> : vector<8xf32>
    %26 = vector.multi_reduction <add>, %25, %cst_6 [1] : vector<8x256xf32> to vector<8xf32>
    %27 = vector.shape_cast %26 : vector<8xf32> to vector<8x1xf32>
    %cst_7 = arith.constant 3.906250e-03 : f32
    %28 = vector.broadcast %cst_7 : f32 to vector<8x1xf32>
    %29 = arith.mulf %24, %28 : vector<8x1xf32>
    %cst_8 = arith.constant 3.906250e-03 : f32
    %30 = vector.broadcast %cst_8 : f32 to vector<8x1xf32>
    %31 = arith.mulf %27, %30 : vector<8x1xf32>
    %32 = arith.mulf %29, %29 : vector<8x1xf32>
    %33 = arith.subf %31, %32 : vector<8x1xf32>
    %34 = vector.broadcast %29 : vector<8x1xf32> to vector<8x256xf32>
    %35 = arith.subf %22, %34 : vector<8x256xf32>
    %cst_9 = arith.constant 9.99999974E-6 : f32
    %36 = vector.broadcast %cst_9 : f32 to vector<8x1xf32>
    %37 = arith.addf %33, %36 : vector<8x1xf32>
    %38 = math.rsqrt %37 : vector<8x1xf32>
    %39 = vector.broadcast %38 : vector<8x1xf32> to vector<8x256xf32>
    %40 = arith.mulf %35, %39 : vector<8x256xf32>
    %cst_10 = arith.constant 0.000000e+00 : f32
    %41 = vector.broadcast %cst_10 : f32 to vector<8x256xf32>
    %42 = arith.maximumf %40, %41 : vector<8x256xf32>
    %43 = arith.truncf %42 : vector<8x256xf32> to vector<8x256xbf16>
    %44 = vector.shape_cast %43 : vector<8x256xbf16> to vector<8x16x16xbf16>
    %c0_11 = arith.constant 0 : index
    %c1 = arith.constant 1 : index
    %c1_12 = arith.constant 1 : index
    %45 = vector.load %arg6[%c0_11, %c1, %c1_12] : memref<8x18x18xbf16, #tpu.memory_space<vmem>>, vector<8x16x16xbf16>
    tpu.vector_store %arg6[%c0_11, %c1, %c1_12], %44 {strides = array<i32>} : memref<8x18x18xbf16, #tpu.memory_space<vmem>>, vector<8x16x16xbf16>,
    %46 = vector.extract_strided_slice %44 {offsets = [0, 1, 0], sizes = [8, 1, 16], strides = [1, 1, 1]} : vector<8x16x16xbf16> to vector<8x1x16xbf16>
    %c0_13 = arith.constant 0 : index
    %c0_14 = arith.constant 0 : index
    %c1_15 = arith.constant 1 : index
    %47 = vector.load %arg6[%c0_13, %c0_14, %c1_15] : memref<8x18x18xbf16, #tpu.memory_space<vmem>>, vector<8x1x16xbf16>
    tpu.vector_store %arg6[%c0_13, %c0_14, %c1_15], %46 {strides = array<i32>} : memref<8x18x18xbf16, #tpu.memory_space<vmem>>, vector<8x1x16xbf16>,
    %48 = vector.extract_strided_slice %44 {offsets = [0, 14, 0], sizes = [8, 1, 16], strides = [1, 1, 1]} : vector<8x16x16xbf16> to vector<8x1x16xbf16>
    %c0_16 = arith.constant 0 : index
    %c17 = arith.constant 17 : index
    %c1_17 = arith.constant 1 : index
    %49 = vector.load %arg6[%c0_16, %c17, %c1_17] : memref<8x18x18xbf16, #tpu.memory_space<vmem>>, vector<8x1x16xbf16>
    tpu.vector_store %arg6[%c0_16, %c17, %c1_17], %48 {strides = array<i32>} : memref<8x18x18xbf16, #tpu.memory_space<vmem>>, vector<8x1x16xbf16>,
    %c0_18 = arith.constant 0 : index
    %c0_19 = arith.constant 0 : index
    %c2 = arith.constant 2 : index
    %50 = vector.load %arg6[%c0_18, %c0_19, %c2] : memref<8x18x18xbf16, #tpu.memory_space<vmem>>, vector<8x18x1xbf16>
    %c0_20 = arith.constant 0 : index
    %c0_21 = arith.constant 0 : index
    %c0_22 = arith.constant 0 : index
    %51 = vector.load %arg6[%c0_20, %c0_21, %c0_22] : memref<8x18x18xbf16, #tpu.memory_space<vmem>>, vector<8x18x1xbf16>
    tpu.vector_store %arg6[%c0_20, %c0_21, %c0_22], %50 {strides = array<i32>} : memref<8x18x18xbf16, #tpu.memory_space<vmem>>, vector<8x18x1xbf16>,
    %c0_23 = arith.constant 0 : index
    %c0_24 = arith.constant 0 : index
    %c15 = arith.constant 15 : index
    %52 = vector.load %arg6[%c0_23, %c0_24, %c15] : memref<8x18x18xbf16, #tpu.memory_space<vmem>>, vector<8x18x1xbf16>
    %c0_25 = arith.constant 0 : index
    %c0_26 = arith.constant 0 : index
    %c17_27 = arith.constant 17 : index
    %53 = vector.load %arg6[%c0_25, %c0_26, %c17_27] : memref<8x18x18xbf16, #tpu.memory_space<vmem>>, vector<8x18x1xbf16>
    tpu.vector_store %arg6[%c0_25, %c0_26, %c17_27], %52 {strides = array<i32>} : memref<8x18x18xbf16, #tpu.memory_space<vmem>>, vector<8x18x1xbf16>,
    %c0_28 = arith.constant 0 : index
    %c0_29 = arith.constant 0 : index
    %c0_30 = arith.constant 0 : index
    %54 = vector.load %arg6[%c0_28, %c0_29, %c0_30] : memref<8x18x18xbf16, #tpu.memory_space<vmem>>, vector<8x16x16xbf16>
    %55 = vector.shape_cast %54 : vector<8x16x16xbf16> to vector<8x256xbf16>
    %c0_31 = arith.constant 0 : index
    %c0_32 = arith.constant 0 : index
    %c1_33 = arith.constant 1 : index
    %56 = vector.load %arg6[%c0_31, %c0_32, %c1_33] : memref<8x18x18xbf16, #tpu.memory_space<vmem>>, vector<8x16x16xbf16>
    %57 = vector.shape_cast %56 : vector<8x16x16xbf16> to vector<8x256xbf16>
    %c0_34 = arith.constant 0 : index
    %c0_35 = arith.constant 0 : index
    %c2_36 = arith.constant 2 : index
    %58 = vector.load %arg6[%c0_34, %c0_35, %c2_36] : memref<8x18x18xbf16, #tpu.memory_space<vmem>>, vector<8x16x16xbf16>
    %59 = vector.shape_cast %58 : vector<8x16x16xbf16> to vector<8x256xbf16>
    %c0_37 = arith.constant 0 : index
    %c1_38 = arith.constant 1 : index
    %c0_39 = arith.constant 0 : index
    %60 = vector.load %arg6[%c0_37, %c1_38, %c0_39] : memref<8x18x18xbf16, #tpu.memory_space<vmem>>, vector<8x16x16xbf16>
    %61 = vector.shape_cast %60 : vector<8x16x16xbf16> to vector<8x256xbf16>
    %c0_40 = arith.constant 0 : index
    %c1_41 = arith.constant 1 : index
    %c1_42 = arith.constant 1 : index
    %62 = vector.load %arg6[%c0_40, %c1_41, %c1_42] : memref<8x18x18xbf16, #tpu.memory_space<vmem>>, vector<8x16x16xbf16>
    %63 = vector.shape_cast %62 : vector<8x16x16xbf16> to vector<8x256xbf16>
    %c0_43 = arith.constant 0 : index
    %c1_44 = arith.constant 1 : index
    %c2_45 = arith.constant 2 : index
    %64 = vector.load %arg6[%c0_43, %c1_44, %c2_45] : memref<8x18x18xbf16, #tpu.memory_space<vmem>>, vector<8x16x16xbf16>
    %65 = vector.shape_cast %64 : vector<8x16x16xbf16> to vector<8x256xbf16>
    %c0_46 = arith.constant 0 : index
    %c2_47 = arith.constant 2 : index
    %c0_48 = arith.constant 0 : index
    %66 = vector.load %arg6[%c0_46, %c2_47, %c0_48] : memref<8x18x18xbf16, #tpu.memory_space<vmem>>, vector<8x16x16xbf16>
    %67 = vector.shape_cast %66 : vector<8x16x16xbf16> to vector<8x256xbf16>
    %c0_49 = arith.constant 0 : index
    %c2_50 = arith.constant 2 : index
    %c1_51 = arith.constant 1 : index
    %68 = vector.load %arg6[%c0_49, %c2_50, %c1_51] : memref<8x18x18xbf16, #tpu.memory_space<vmem>>, vector<8x16x16xbf16>
    %69 = vector.shape_cast %68 : vector<8x16x16xbf16> to vector<8x256xbf16>
    %c0_52 = arith.constant 0 : index
    %c2_53 = arith.constant 2 : index
    %c2_54 = arith.constant 2 : index
    %70 = vector.load %arg6[%c0_52, %c2_53, %c2_54] : memref<8x18x18xbf16, #tpu.memory_space<vmem>>, vector<8x16x16xbf16>
    %71 = vector.shape_cast %70 : vector<8x16x16xbf16> to vector<8x256xbf16>
    %72 = tpu.concatenate %55, %57, %59, %61, %63, %65, %67, %69, %71 in 0 : vector<8x256xbf16>, vector<8x256xbf16>, vector<8x256xbf16>, vector<8x256xbf16>, vector<8x256xbf16>, vector<8x256xbf16>, vector<8x256xbf16>, vector<8x256xbf16>, vector<8x256xbf16> -> vector<72x256xbf16>
    %c0_55 = arith.constant 0 : index
    %c0_56 = arith.constant 0 : index
    %73 = vector.load %arg4[%c0_55, %c0_56] : memref<8x72xbf16, #tpu.memory_space<vmem>>, vector<8x72xbf16>
    %cst_57 = arith.constant dense<0.000000e+00> : vector<8x256xf32>
    %74 = tpu.matmul %73, %72, %cst_57 {dimension_numbers = #tpu.dot_dimension_numbers<[1], [0], [0], [1], [0, 0, 1, 1], [], []>} : vector<8x72xbf16>, vector<72x256xbf16>, vector<8x256xf32> -> vector<8x256xf32>
    %c0_58 = arith.constant 0 : index
    %c0_59 = arith.constant 0 : index
    %c0_60 = arith.constant 0 : index
    %75 = vector.load %arg2[%c0_58, %c0_59, %c0_60] : memref<1x8x256xf32, #tpu.memory_space<vmem>>, vector<1x8x256xf32>
    %76 = vector.shape_cast %75 : vector<1x8x256xf32> to vector<8x256xf32>
    %cst_61 = arith.constant dense<0.000000e+00> : vector<8xf32>
    %77 = vector.multi_reduction <add>, %74, %cst_61 [1] : vector<8x256xf32> to vector<8xf32>
    %78 = vector.shape_cast %77 : vector<8xf32> to vector<8x1xf32>
    %79 = arith.mulf %74, %74 : vector<8x256xf32>
    %cst_62 = arith.constant dense<0.000000e+00> : vector<8xf32>
    %80 = vector.multi_reduction <add>, %79, %cst_62 [1] : vector<8x256xf32> to vector<8xf32>
    %81 = vector.shape_cast %80 : vector<8xf32> to vector<8x1xf32>
    %cst_63 = arith.constant 3.906250e-03 : f32
    %82 = vector.broadcast %cst_63 : f32 to vector<8x1xf32>
    %83 = arith.mulf %78, %82 : vector<8x1xf32>
    %cst_64 = arith.constant 3.906250e-03 : f32
    %84 = vector.broadcast %cst_64 : f32 to vector<8x1xf32>
    %85 = arith.mulf %81, %84 : vector<8x1xf32>
    %86 = arith.mulf %83, %83 : vector<8x1xf32>
    %87 = arith.subf %85, %86 : vector<8x1xf32>
    %88 = vector.broadcast %83 : vector<8x1xf32> to vector<8x256xf32>
    %89 = arith.subf %74, %88 : vector<8x256xf32>
    %cst_65 = arith.constant 9.99999974E-6 : f32
    %90 = vector.broadcast %cst_65 : f32 to vector<8x1xf32>
    %91 = arith.addf %87, %90 : vector<8x1xf32>
    %92 = math.rsqrt %91 : vector<8x1xf32>
    %93 = vector.broadcast %92 : vector<8x1xf32> to vector<8x256xf32>
    %94 = arith.mulf %89, %93 : vector<8x256xf32>
    %95 = arith.addf %76, %94 : vector<8x256xf32>
    %c0_66 = arith.constant 0 : index
    %c0_67 = arith.constant 0 : index
    %c0_68 = arith.constant 0 : index
    %96 = vector.load %arg5[%c0_66, %c0_67, %c0_68] : memref<1x8x256xf32, #tpu.memory_space<vmem>>, vector<1x8x256xf32>
    %97 = vector.shape_cast %96 : vector<1x8x256xf32> to vector<8x256xf32>
    %98 = vector.shape_cast %95 : vector<8x256xf32> to vector<1x8x256xf32>
    tpu.vector_store %arg5[%c0_66, %c0_67, %c0_68], %98 {strides = array<i32>} : memref<1x8x256xf32, #tpu.memory_space<vmem>>, vector<1x8x256xf32>,
    return
  }
  func.func @transform_0(%arg0: i32) -> (i32, i32, i32, i32) {
    %c0_i32 = arith.constant 0 : i32
    %c0_i32_0 = arith.constant 0 : i32
    %c0_i32_1 = arith.constant 0 : i32
    %c0_i32_2 = arith.constant 0 : i32
    return %arg0, %c0_i32, %c0_i32_0, %c0_i32_1 : i32, i32, i32, i32
  }
  func.func @transform_1(%arg0: i32) -> (i32, i32, i32) {
    %c0_i32 = arith.constant 0 : i32
    %c0_i32_0 = arith.constant 0 : i32
    %c0_i32_1 = arith.constant 0 : i32
    return %arg0, %c0_i32, %c0_i32_0 : i32, i32, i32
  }
  func.func @transform_2(%arg0: i32) -> (i32, i32) {
    %c0_i32 = arith.constant 0 : i32
    %c0_i32_0 = arith.constant 0 : i32
    %c0_i32_1 = arith.constant 0 : i32
    return %c0_i32, %c0_i32_0 : i32, i32
  }
  func.func @transform_3(%arg0: i32) -> (i32, i32) {
    %c0_i32 = arith.constant 0 : i32
    %c0_i32_0 = arith.constant 0 : i32
    %c0_i32_1 = arith.constant 0 : i32
    return %c0_i32, %c0_i32_0 : i32, i32
  }
  func.func @transform_4(%arg0: i32) -> (i32, i32, i32) {
    %c0_i32 = arith.constant 0 : i32
    %c0_i32_0 = arith.constant 0 : i32
    %c0_i32_1 = arith.constant 0 : i32
    return %arg0, %c0_i32, %c0_i32_0 : i32, i32, i32
  }
}

</mosaic_0001>

<bundles_post_ra>
// kernel: resnet_block.1
= control target key start
LH: loop header
LB: loop body
LE: loop exit
PB: predicated region body
PF: predicated region fallthrough
CT: control target
= control target key end

     0   :  { %s7984_s15 = smov 0   ;;  %s12745_s0 = inlined_call_operand.vmem [shape: bf16[2,8,18,18], index: 0, kind: input, shape index: {}]   ;;  %s12746_s1 = inlined_call_operand.vmem [shape: f32[2,8,256], index: 1, kind: input, shape index: {}]   ;;  %s12747_s2 = inlined_call_operand.vmem [shape: bf16[8,72], index: 2, kind: input, shape index: {}]   ;;  %s12748_s3 = inlined_call_operand.vmem [shape: bf16[8,72], index: 3, kind: input, shape index: {}]   ;;  %s12749_s4 = inlined_call_operand.vmem [shape: f32[2,8,256], index: 4, kind: output, shape index: {}]  }
   0x1 LB: > { %s7563_s16 = sadd.s32 4294967295, %s7943_s15   ;;  %p7567_p0 = scmp.ge.s32.totalorder %s7943_s15, 1  ;;  %s7943_s15 = sphi %s7984_s15, %s14_s15  }
   0x2   : > { %p172_p1 = scmp.lt.s32.totalorder %s7943_s15, 3 }
   0x4   : > { %p173_p2 = pnand %p7567_p0, %p172_p1 }
   0x6   : > { %176 = sbr.rel (%p173_p2) target bundleno = 2485 (0x9b5), region = 36 }
   0xd   : > { %p203_p3 = scmp.lt.s32.totalorder %s7563_s16, 1  ;;  %s7945_s21 = smov 127   ;;  %v7946_v28 = vmov 1983009808   ;;  %v247_v30 = vlaneseq  ;;  %vm1172_vm0 = vsmask.f32 3328 }
   0xe   : > { %v245_v29 = vunpack.c.l.s4 %v7946_v28  ;;  %s7947_s22 = smov 126   ;;  %vm1173_vm1 = vsmask.f32 7440  ;;  %vm2297_vm2 = vcmask 1042432   ;;  %vm2298_vm3 = vcmask 1046532   ;;  %s7950_s23 = smov 16  }
   0xf   : > { %s13377_s16 = smov (!%p203_p3, %s7563_s16), 1  ;;  %v8108_v40 = vshrl.u32 %v247_v30, 7  ;;  %vm8129_vm4 = vmor %vm1172_vm0, %vm1173_vm1  ;;  %v12932_v55 = vmov 0  ;;  %v12935_v63 = vmov 0  ;;  %s7951_s24 = smov 32   ;;  %vm483_vm6 = vcmask 130048  }
  0x10   : > { %s7881_s17 = smul.u32 96, %s13377_s16  ;;  %v246_v39 = vunpack.c.0.s8 %v245_v29  ;;  %v12933_v55 = vsel %vm8129_vm4, 4294967295, %v12932_v55  ;;  %vm8140_vm5 = vmor %vm2297_vm2, %vm2298_vm3  ;;  %s7952_s25 = smov 48   ;;  %vm487_vm7 = vcmask 261120   ;;  %vm490_vm8 = vcmask 392192  }
  0x11   : > { %12934 = vst [vmem:[#allocation4_spill] sm:$0xff] %v12933_v55  ;;  %v12936_v63 = vsel %vm8140_vm5, 4294967295, %v12935_v63  ;;  %s7953_s26 = smov 64   ;;  %s7954_s27 = smov 80   ;;  %vm493_vm9 = vcmask 523264   ;;  %vm496_vm10 = vcmask 654336  }
  0x12   : > { %s7998_s20 = scalar_lea.vmem %s12745_s0, %s7881_s17  ;;  %v8122_v50 = vsub.s32 %v246_v39, %v8108_v40  ;;  %12937 = vst [vmem:[#allocation5_spill] sm:$0xff] %v12936_v63  ;;  %s7955_s28 = smov 96   ;;  %vm499_vm11 = vcmask 785408   ;;  %vm502_vm12 = vcmask 916480   ;;  %vm3294_vm13 = vcmask 1043456  }
  0x13   : > { %v8001_v0 = vld [vmem:[%s7998_s20 + $0x1c] sm:$0xf]  ;;  %v8004_v1 = vld [vmem:[%s7998_s20 + $0x4] sm:$0xf]  ;;  %v8007_v2 = vld [vmem:[%s7998_s20 + $0x28] sm:$0xf] }
  0x14   : > { %546 = vrot.lane.b32.xlu1 %v8001_v0, %s7945_s21  ;;  %538 = vrot.lane.b32.xlu0 %v8004_v1, %s7945_s21  ;;  %v8014_v3 = vld [vmem:[%s7998_s20 + $0x10] sm:$0xf]  ;;  %v8017_v4 = vld [vmem:[%s7998_s20 + $0x40] sm:$0xf]  ;;  %v1185_v26 = vshll.u32 %v8004_v1, 16  ;;  %v1189_v27 = vshrl.u32 %v8004_v1, 16 }
  0x15   : > { %v8022_v6 = vld [vmem:[%s7998_s20 + $0x34] sm:$0xf]  ;;  %v8025_v7 = vld [vmem:[%s7998_s20 + $0x58] sm:$0xf]  ;;  %v8028_v8 = vld [vmem:[%s7998_s20 + $0x4c] sm:$0xf] }
  0x16   : > { %v8037_v12 = vld [vmem:[%s7998_s20 + $0xc] sm:$0xf]  ;;  %v8040_v13 = vld [vmem:[%s7998_s20] sm:$0xf]  ;;  %v8043_v14 = vld [vmem:[%s7998_s20 + $0x24] sm:$0xf] }
  0x17   : > { %v8046_v15 = vld [vmem:[%s7998_s20 + $0x18] sm:$0xf]  ;;  %v8049_v16 = vld [vmem:[%s7998_s20 + $0x3c] sm:$0xf]  ;;  %v8052_v17 = vld [vmem:[%s7998_s20 + $0x30] sm:$0xf] }
  0x18   : > { %550 = vrot.lane.b32.xlu1 %v8007_v2, %s7945_s21  ;;  %542 = vrot.lane.b32.xlu0 %v8014_v3, %s7945_s21  ;;  %v8063_v20 = vld [vmem:[%s7998_s20 + $0x54] sm:$0xf]  ;;  %v8066_v21 = vld [vmem:[%s7998_s20 + $0x48] sm:$0xf]  ;;  %v1209_v24 = vshll.u32 %v8014_v3, 16  ;;  %v1213_v25 = vshrl.u32 %v8014_v3, 16 }
  0x19   : > { %v224_v31 = vld [vmem:[%s7998_s20 + $0x14] sm:$0x1]  ;;  %v221_v34 = vld [vmem:[%s7998_s20 + $0x8] sm:$0x1]  ;;  %v8104_v35 = vrot.slane %v1185_v26, 5  ;;  %v1191_v36 = vrot.slane %v1189_v27, 4 }
  0x1a   : > { %v8101_v32 = vrot.slane %v1209_v24, 5  ;;  %v1215_v33 = vrot.slane %v1213_v25, 4  ;;  %v1257_v37 = vshll.u32 %v8007_v2, 16  ;;  %v1261_v38 = vshrl.u32 %v8007_v2, 16  ;;  %v230_v45 = vld [vmem:[%s7998_s20 + $0x2c] sm:$0x1] }
  0x1b   : > { %v1219_v41 = vshll.u32 %v224_v31, 16  ;;  %v1195_v42 = vshll.u32 %v221_v34, 16  ;;  %v1192_v44 = vor.u32 %v1191_v36, %v8104_v35  ;;  %v1233_v46 = vshll.u32 %v8001_v0, 16  ;;  %v227_v49 = vld [vmem:[%s7998_s20 + $0x20] sm:$0x1]  ;;  %12931 = vst [vmem:[#allocation3_spill] sm:$0xff] %v8122_v50 }
  0x1c   : > { %558 = vrot.lane.b32.xlu1 %v8017_v4, %s7945_s21  ;;  %554 = vrot.lane.b32.xlu0 %v8022_v6, %s7945_s21  ;;  %v1216_v43 = vor.u32 %v1215_v33, %v8101_v32  ;;  %v8118_v47 = vrot.slane %v1257_v37, 5  ;;  %v1263_v48 = vrot.slane %v1261_v38, 4  ;;  %v1267_v53 = vshll.u32 %v230_v45, 16  ;;  %v236_v59 = vld [vmem:[%s7998_s20 + $0x44] sm:$0x1]  ;;  %s7956_s29 = smov 112  }
  0x1d   : > { %v1221_v51 = vrot.slane %v1219_v41, 5  ;;  %v1197_v52 = vrot.slane %v1195_v42, 5  ;;  %v1237_v54 = vshrl.u32 %v8001_v0, 16  ;;  %v1193_v57 = vrot.slane %v1192_v44, 4  ;;  %s7957_s6 = smov 1   ;;  %s7958_s7 = smov 2  }
  0x1e   : > { %v1217_v56 = vrot.slane %v1216_v43, 4  ;;  %v8133_v58 = vrot.slane %v1233_v46, 5  ;;  %v2309_v60 = vrot.slane %v8014_v3, 5  ;;  %v1264_v61 = vor.u32 %v1263_v48, %v8118_v47  ;;  %s7879_s10 = sshll.u32 %s13377_s16, 4 }
  0x1f   : > { %v1243_v62 = vshll.u32 %v227_v49, 16  ;;  %v2312_v24 = vrot.slane %v224_v31, 5  ;;  %v12752_v25 = vrot.slane %v8004_v1, 5  ;;  %v1305_v26 = vshll.u32 %v8017_v4, 16  ;;  %s212_s13 = scalar_lea.vmem %s12746_s1, %s7879_s10  ;;  %s217_s18 = scalar_lea.vmem %s12749_s4, %s7879_s10 }
  0x20   : > { %566 = vrot.lane.b32.xlu1 %v8025_v7, %s7945_s21  ;;  %562 = vrot.lane.b32.xlu0 %v8028_v8, %s7945_s21  ;;  %v1309_v27 = vshrl.u32 %v8017_v4, 16  ;;  %v2311_v28 = vrot.slane %v2309_v60, 4  ;;  %v2305_v29 = vrot.slane %v221_v34, 5  ;;  %v1239_v30 = vrot.slane %v1237_v54, 4 }
  0x21   : > { %v1315_v33 = vshll.u32 %v236_v59, 16  ;;  %v2304_v31 = vrot.slane %v12752_v25, 4  ;;  %v12751_v36 = vrot.slane %v8007_v2, 5  ;;  %v8158_v37 = vsel %vm8129_vm4, %v1217_v56, %v1221_v51  ;;  %v233_v51 = vld [vmem:[%s7998_s20 + $0x38] sm:$0x1] }
  0x22   : > { %v8162_v34 = vsel %vm8129_vm4, %v1193_v57, %v1197_v52  ;;  %v1269_v38 = vrot.slane %v1267_v53, 5  ;;  %v8166_v39 = vsel %vm8140_vm5, %v2311_v28, %v2312_v24  ;;  %v1265_v41 = vrot.slane %v1264_v61, 4 }
  0x23   : > { %12938 = vst [vmem:[#allocation6_spill] sm:$0xff] %v8166_v39  ;;  %v8168_v42 = vrot.slane %v1243_v62, 5  ;;  %v8172_v43 = vsel %vm8140_vm5, %v2304_v31, %v2305_v29  ;;  %v2325_v44 = vrot.slane %v12751_v36, 4  ;;  %v8176_v46 = vrot.slane %v1305_v26, 5  ;;  %v8199_v31 = vld [vmem:[%s7998_s20 + $0x5c] sm:$0x1] }
  0x24   : > { %540 = vrot.lane.b32.xlu1 %v8037_v12, %s7945_s21  ;;  %536 = vrot.lane.b32.xlu0 %v8040_v13, %s7945_s21  ;;  %12939 = vst [vmem:[#allocation7_spill] sm:$0xff] %v8172_v43  ;;  %v1311_v48 = vrot.slane %v1309_v27, 4  ;;  %v2326_v52 = vrot.slane %v230_v45, 5  ;;  %v12750_v53 = vrot.slane %v8001_v0, 5  ;;  %v1240_v54 = vor.u32 %v1239_v30, %v8133_v58 }
  0x25   : > { %v8185_v56 = vrot.slane %v1315_v33, 5  ;;  %v1281_v57 = vshll.u32 %v8022_v6, 16  ;;  %v2319_v61 = vrot.slane %v227_v49, 5  ;;  %v1285_v62 = vshrl.u32 %v8022_v6, 16 }
  0x26   : > { %v8191_v45 = vsel %vm8140_vm5, %v2325_v44, %v2326_v52  ;;  %v2318_v24 = vrot.slane %v12750_v53, 4  ;;  %v2337_v26 = vrot.slane %v8017_v4, 5  ;;  %v1291_v27 = vshll.u32 %v233_v51, 16  ;;  %v239_v53 = vld [vmem:[%s7998_s20 + $0x50] sm:$0x1] }
  0x27   : > { %12940 = vst [vmem:[#allocation8_spill] sm:$0xff] %v8191_v45  ;;  %v2340_v28 = vrot.slane %v236_v59, 5  ;;  %v2330_v29 = vrot.slane %v8022_v6, 5  ;;  %v2333_v30 = vrot.slane %v233_v51, 5  ;;  %v1312_v33 = vor.u32 %v1311_v48, %v8176_v46 }
  0x28   : > { %548 = vrot.lane.b32.xlu1 %v8043_v14, %s7945_s21  ;;  %544 = vrot.lane.b32.xlu0 %v8046_v15, %s7945_s21  ;;  %v8203_v49 = vsel %vm8140_vm5, %v2318_v24, %v2319_v61  ;;  %v2339_v44 = vrot.slane %v2337_v26, 4  ;;  %v2351_v52 = vrot.slane %v8025_v7, 5  ;;  %v1353_v59 = vshll.u32 %v8025_v7, 16 }
  0x29   : > { %12941 = vst [vmem:[#allocation9_spill] sm:$0xff] %v8203_v49  ;;  %v1357_v48 = vshrl.u32 %v8025_v7, 16  ;;  %v2332_v51 = vrot.slane %v2330_v29, 4  ;;  %v2354_v22 = vrot.slane %v8199_v31, 5  ;;  %v8215_v61 = vsel %vm8129_vm4, %v1265_v41, %v1269_v38 }
  0x2a   : > { %v1329_v24 = vshll.u32 %v8028_v8, 16  ;;  %v8220_v18 = vsel %vm8140_vm5, %v2339_v44, %v2340_v28  ;;  %v2353_v23 = vrot.slane %v2351_v52, 4  ;;  %v1241_v19 = vrot.slane %v1240_v54, 4 }
  0x2b   : > { %12942 = vst [vmem:[#allocation10_spill] sm:$0xff] %v8220_v18  ;;  %v8222_v10 = vrot.slane %v1281_v57, 5  ;;  %v1333_v5 = vshrl.u32 %v8028_v8, 16  ;;  %v8227_v11 = vsel %vm8140_vm5, %v2332_v51, %v2333_v30  ;;  %v8229_v9 = vrot.slane %v1312_v33, 4 }
  0x2c   : > { %556 = vrot.lane.b32.xlu1 %v8049_v16, %s7945_s21  ;;  %552 = vrot.lane.b32.xlu0 %v8052_v17, %s7945_s21  ;;  %12943 = vst [vmem:[#allocation11_spill] sm:$0xff] %v8227_v11  ;;  %v1287_v38 = vrot.slane %v1285_v62, 4  ;;  %v8231_v41 = vrot.slane %v1291_v27, 5  ;;  %v8236_v28 = vsel %vm8140_vm5, %v2353_v23, %v2354_v22  ;;  %v8242_v54 = vrot.slane %v1353_v59, 5 }
  0x2d   : > { %12944 = vst [vmem:[#allocation12_spill] sm:$0xff] %v8236_v28  ;;  %v1359_v57 = vrot.slane %v1357_v48, 4  ;;  %v2344_v30 = vrot.slane %v8028_v8, 5  ;;  %v2347_v33 = vrot.slane %v239_v53, 5  ;;  %v8245_v62 = vrot.slane %v1329_v24, 5 }
  0x2e   : > { %v7658_v27 = vrot.slane %v8037_v12, 9  ;;  %v7657_v44 = vrot.slane %v8040_v13, 9  ;;  %v7660_v22 = vrot.slane %v8043_v14, 9  ;;  %v1335_v23 = vrot.slane %v1333_v5, 4 }
  0x2f   : > { %v2346_v51 = vrot.slane %v2344_v30, 4  ;;  %v7659_v36 = vrot.slane %v8046_v15, 9  ;;  %v7662_v25 = vrot.slane %v8049_v16, 9  ;;  %v12946_v48 = vrot.slane %v8004_v1, 5 }
  0x30   : > { %564 = vrot.lane.b32.xlu1 %v8063_v20, %s7945_s21  ;;  %560 = vrot.lane.b32.xlu0 %v8066_v21, %s7945_s21  ;;  %v8256_v59 = vsel %vm8140_vm5, %v7658_v27, %v2309_v60  ;;  %v12948_v28 = vrot.slane %v8007_v2, 5  ;;  %v7661_v11 = vrot.slane %v8052_v17, 9  ;;  %v1200_v60 = vshrl.u32 %v8037_v12, 16 }
  0x31   : > { %12945 = vst [vmem:[#allocation13_spill] sm:$0xff] %v8256_v59  ;;  %v8262_v24 = vsel %vm8140_vm5, %v7657_v44, %v12946_v48  ;;  %v1203_v27 = vshll.u32 %v8037_v12, 16  ;;  %v8279_v44 = vsel %vm8140_vm5, %v2346_v51, %v2347_v33  ;;  %v7664_v48 = vrot.slane %v8063_v20, 9 }
  0x32   : > { %12947 = vst [vmem:[#allocation14_spill] sm:$0xff] %v8262_v24  ;;  %v8268_v5 = vsel %vm8140_vm5, %v7660_v22, %v12948_v28  ;;  %12950 = vst [vmem:[#allocation16_spill] sm:$0xff] %v8279_v44  ;;  %v1176_v28 = vshrl.u32 %v8040_v13, 16  ;;  %v12951_v22 = vrot.slane %v8001_v0, 5  ;;  %v8291_v24 = vsel %vm8140_vm5, %v7662_v25, %v2337_v26 }
  0x33   : > { %12949 = vst [vmem:[#allocation15_spill] sm:$0xff] %v8268_v5  ;;  %12953 = vst [vmem:[#allocation18_spill] sm:$0xff] %v8291_v24  ;;  %v8295_v59 = vsel %vm8140_vm5, %v7661_v11, %v2330_v29  ;;  %v1288_v33 = vor.u32 %v1287_v38, %v8222_v10  ;;  %v1363_v51 = vshll.u32 %v8199_v31, 16  ;;  %v1339_v44 = vshll.u32 %v239_v53, 16 }
  0x34   : > { %860 = vrot.lane.b32.xlu1 %v8014_v3, %s7947_s22  ;;  %856 = vrot.lane.b32.xlu0 %v8004_v1, %s7947_s22  ;;  %v8287_v5 = vsel %vm8140_vm5, %v7659_v36, %v12951_v22  ;;  %12954 = vst [vmem:[#allocation19_spill] sm:$0xff] %v8295_v59  ;;  %v1179_v18 = vshll.u32 %v8040_v13, 16  ;;  %v1360_v49 = vor.u32 %v1359_v57, %v8242_v54  ;;  %v7663_v25 = vrot.slane %v8066_v21, 9  ;;  %v12980_v63 = vld [vmem:[#allocation12_spill] sm:$0xff] }
  0x35   : > { %12952 = vst [vmem:[#allocation17_spill] sm:$0xff] %v8287_v5  ;;  %v8303_v36 = vsel %vm8140_vm5, %v7664_v48, %v2351_v52  ;;  %v12956_v11 = vcombine.low %v8004_v1, %v8022_v6  ;;  %v1336_v53 = vor.u32 %v1335_v23, %v8245_v62  ;;  %v1202_v29 = vrot.slane %v1200_v60, 4 }
  0x36   : > { %12955 = vst [vmem:[#allocation20_spill] sm:$0xff] %v8303_v36  ;;  %v1205_v31 = vrot.slane %v1203_v27, 5  ;;  %v1178_v52 = vrot.slane %v1176_v28, 4  ;;  %v1248_v38 = vshrl.u32 %v8043_v14, 16  ;;  %v8320_v57 = vsel %vm8140_vm5, %v7663_v25, %v2344_v30 }
  0x37   : > { %v8310_v26 = vrot.slane %v12956_v11, %v8122_v50  ;;  %12957 = vst [vmem:[#allocation21_spill] sm:$0xff] %v8320_v57  ;;  %v12958_v1 = vcombine.low %v8001_v0, %v8028_v8  ;;  %v12761_v48 = vmov 0   ;;  %v1181_v22 = vrot.slane %v1179_v18, 5 }
  0x38   : > { %868 = vrot.lane.b32.xlu1 %v8007_v2, %s7947_s22  ;;  %864 = vrot.lane.b32.xlu0 %v8001_v0, %s7947_s22  ;;  %v1251_v23 = vshll.u32 %v8043_v14, 16  ;;  %v12959_v60 = vcombine.low %v8014_v3, %v8017_v4  ;;  %v12960_v30 = vcombine.low %v8007_v2, %v8025_v7  ;;  %v8346_v0 = vsel %vm8129_vm4, %v1241_v19, %v8168_v42 }
  0x39   : > { %3360 = vmatprep.mubr.bf16.mxu0 %v12761_v48  ;;  %7463 = vmatprep.mubr.bf16.mxu1 %v12761_v48  ;;  %v1224_v18 = vshrl.u32 %v8046_v15, 16  ;;  %v1289_v2 = vrot.slane %v1288_v33, 4  ;;  %v1227_v25 = vshll.u32 %v8046_v15, 16  ;;  %v1337_v11 = vrot.slane %v1336_v53, 4 }
  0x3a   : > { %v8334_v27 = vrot.slane %v12959_v60, %v8122_v50  ;;  %v8340_v28 = vrot.slane %v12960_v30, %v8122_v50  ;;  %v12961_v42 = vcombine.low %v8040_v13, %v8052_v17  ;;  %v1250_v33 = vrot.slane %v1248_v38, 4 }
  0x3b   : > { %v1253_v30 = vrot.slane %v1251_v23, 5  ;;  %v1226_v53 = vrot.slane %v1224_v18, 4  ;;  %v1296_v3 = vshrl.u32 %v8049_v16, 16  ;;  %vm12847_vm14 = vcmask 588800  }
  0x3c   : > { %876 = vrot.lane.b32.xlu1 %v8017_v4, %s7947_s22  ;;  %872 = vrot.lane.b32.xlu0 %v8022_v6, %s7947_s22  ;;  %v8326_v6 = vrot.slane %v12958_v1, %v8122_v50  ;;  %v1361_v4 = vrot.slane %v1360_v49, 4  ;;  %v12962_v1 = vcombine.low %v8046_v15, %v8066_v21  ;;  %v1206_v49 = vor.u32 %v1205_v31, %v1202_v29 }
  0x3d   : > { %v1299_v29 = vshll.u32 %v8049_v16, 16  ;;  %v1272_v31 = vshrl.u32 %v8052_v17, 16  ;;  %vm3627_vm15 = vsmask.f32 256  ;;  %vm3628_vm0 = vsmask.f32 4368 }
  0x3e   : > { %v8368_v60 = vrot.slane %v12962_v1, %v8122_v50  ;;  %v1298_v1 = vrot.slane %v1296_v3, 4  ;;  %vm10295_vm1 = vmor %vm3627_vm15, %vm3628_vm0  ;;  %vm3838_vm2 = vcmask 134152   ;;  %vm3839_vm3 = vsmask.f32 7938 }
  0x3f   : > { %vm10347_vm0 = vmand %vm3838_vm2, %vm3839_vm3 }
  0x40   : > { %884 = vrot.lane.b32.xlu1 %v8025_v7, %s7947_s22  ;;  %880 = vrot.lane.b32.xlu0 %v8028_v8, %s7947_s22  ;;  %v1365_v8 = vrot.slane %v1363_v51, 5  ;;  %v1341_v7 = vrot.slane %v1339_v44, 5  ;;  %v8362_v51 = vrot.slane %v12961_v42, %v8122_v50  ;;  %v1182_v44 = vor.u32 %v1181_v22, %v1178_v52 }
  0x41   : > { %v12964_v52 = vcombine.low %v8043_v14, %v8063_v20  ;;  %v8400_v22 = vsel %vm8129_vm4, %v1289_v2, %v8231_v41  ;;  %v1301_v41 = vrot.slane %v1299_v29, 5  ;;  %v1344_v2 = vshrl.u32 %v8063_v20, 16 }
  0x42   : > { %v8405_v23 = vsel %vm8129_vm4, %v1361_v4, %v1365_v8  ;;  %v1274_v8 = vrot.slane %v1272_v31, 4  ;;  %v7949_v29 = vmov 1934713408  }
  0x43   : > { %v8389_v38 = vrot.slane %v12964_v52, %v8122_v50  ;;  %v262_v31 = vunpack.c.l.s4 %v7949_v29 }
  0x44   : > { %858 = vrot.lane.b32.xlu1 %v8037_v12, %s7947_s22  ;;  %854 = vrot.lane.b32.xlu0 %v8040_v13, %s7947_s22  ;;  %v12963_v13 = vcombine.low %v8037_v12, %v8049_v16  ;;  %v8395_v12 = vsel %vm8129_vm4, %v8229_v9, %v8185_v56  ;;  %v1207_v9 = vrot.slane %v1206_v49, 4  ;;  %v1183_v56 = vrot.slane %v1182_v44, 4 }
  0x45   : > { %v1323_v49 = vshll.u32 %v8066_v21, 16 }
  0x46   : > { %v8377_v42 = vrot.slane %v12963_v13, %v8122_v50  ;;  %v8424_v3 = vsel %vm8129_vm4, %v1207_v9, %v8101_v32  ;;  %v8429_v44 = vsel %vm8129_vm4, %v1183_v56, %v8104_v35 }
  0x47   : > { %v1325_v32 = vrot.slane %v1323_v49, 5 }
  0x48   : > { %866 = vrot.lane.b32.xlu1 %v8043_v14, %s7947_s22  ;;  %862 = vrot.lane.b32.xlu0 %v8046_v15, %s7947_s22  ;;  %v1229_v15 = vrot.slane %v1227_v25, 5  ;;  %v8409_v14 = vsel %vm8129_vm4, %v1337_v11, %v1341_v7  ;;  %v1254_v25 = vor.u32 %v1253_v30, %v1250_v33  ;;  %v1347_v7 = vshll.u32 %v8063_v20, 16 }
  0x49   : > { %v1320_v11 = vshrl.u32 %v8066_v21, 16  ;;  %v1302_v30 = vor.u32 %v1301_v41, %v1298_v1  ;;  %v263_v1 = vunpack.c.0.s8 %v262_v31 }
  0x4a   : > { %v1349_v13 = vrot.slane %v1347_v7, 5 }
  0x4c   : > { %874 = vrot.lane.b32.xlu1 %v8049_v16, %s7947_s22  ;;  %870 = vrot.lane.b32.xlu0 %v8052_v17, %s7947_s22  ;;  %v1275_v16 = vshll.u32 %v8052_v17, 16  ;;  %v1230_v17 = vor.u32 %v1229_v15, %v1226_v53  ;;  %v1322_v15 = vrot.slane %v1320_v11, 4  ;;  %v294_v11 = vcombine.high %v8377_v42, %v8389_v38 }
  0x4e   : > { %v1277_v4 = vrot.slane %v1275_v16, 5  ;;  %v1231_v33 = vrot.slane %v1230_v17, 4  ;;  %v1303_v16 = vrot.slane %v1302_v30, 4 }
  0x50   : > { %882 = vrot.lane.b32.xlu1 %v8063_v20, %s7947_s22  ;;  %878 = vrot.lane.b32.xlu0 %v8066_v21, %s7947_s22  ;;  %v1255_v20 = vrot.slane %v1254_v25, 4  ;;  %v1346_v21 = vrot.slane %v1344_v2, 4  ;;  %v1278_v53 = vor.u32 %v1277_v4, %v1274_v8  ;;  %v8447_v52 = vsel %vm8129_vm4, %v1231_v33, %v8133_v58 }
  0x51   : > { %12965 = vst [vmem:[#allocation22_spill] sm:$0xff] %v8447_v52  ;;  %v1326_v25 = vor.u32 %v1325_v32, %v1322_v15  ;;  %v8464_v8 = vsub.s32 %v263_v1, %v8108_v40  ;;  %v328_v40 = vcombine.high %v8310_v26, %v8326_v6  ;;  %v362_v2 = vcombine.high %v8334_v27, %v8340_v28 }
  0x52   : > { %v8442_v35 = vsel %vm8129_vm4, %v1255_v20, %v8118_v47  ;;  %v1279_v9 = vrot.slane %v1278_v53, 4  ;;  %v1350_v56 = vor.u32 %v1349_v13, %v1346_v21  ;;  %v8456_v47 = vsel %vm8129_vm4, %v1303_v16, %v8176_v46 }
  0x53   : > { %v1327_v41 = vrot.slane %v1326_v25, 4  ;;  %v342_v4 = vrot.slane %v328_v40, %v8464_v8  ;;  %v376_v7 = vrot.slane %v362_v2, %v8464_v8  ;;  %v308_v20 = vrot.slane %v294_v11, %v8464_v8 }
  0x54   : > { %1977 = vrot.lane.b32.xlu1 %v8158_v37, %s7947_s22  ;;  %1973 = vrot.lane.b32.xlu0 %v8162_v34, %s7947_s22  ;;  %v8461_v58 = vsel %vm8129_vm4, %v1279_v9, %v8222_v10  ;;  %v1351_v17 = vrot.slane %v1350_v56, 4 }
  0x55   : > { %v8478_v10 = vsel %vm8129_vm4, %v1327_v41, %v8245_v62  ;;  %v260_v62 = vcombine.high %v8362_v51, %v8368_v60  ;;  %v418_v30 = vshrl.u32 %v342_v4, 16  ;;  %v419_v21 = vshrl.u32 %v376_v7, 16 }
  0x56   : > { %v8473_v46 = vsel %vm8129_vm4, %v1351_v17, %v8242_v54  ;;  %12966 = vst [vmem:[#allocation23_spill] sm:$0xff] %v8478_v10  ;;  %v8490_v54 = vpack.i.b16 %v376_v7, %v342_v4  ;;  %v344_v32 = vcombine.high %v342_v4, %v12761_v48  ;;  %v378_v29 = vcombine.high %v376_v7, %v12761_v48 }
  0x57   : > { %v274_v49 = vrot.slane %v260_v62, %v8464_v8  ;;  %v8512_v53 = vpack.i.b16 %v419_v21, %v418_v30  ;;  %v395_v56 = vshrl.u32 %v308_v20, 16 }
  0x58   : > { %1985 = vrot.lane.b32.xlu1 %v8215_v61, %s7947_s22  ;;  %1981 = vrot.lane.b32.xlu0 %v8346_v0, %s7947_s22  ;;  %12967 = vst [vmem:[#allocation24_spill] sm:$0xff] %v8490_v54  ;;  %v8528_v25 = vpack.i.b16 %v378_v29, %v344_v32 }
  0x59   : > { %v8506_v33 = vpack.i.b16 %v308_v20, %v274_v49  ;;  %12969 = vst [vmem:[#allocation26_spill] sm:$0xff] %v8512_v53  ;;  %v394_v9 = vshrl.u32 %v274_v49, 16  ;;  %v276_v62 = vcombine.high %v274_v49, %v12761_v48 }
  0x5a   : > { %12970 = vst [vmem:[#allocation27_spill] sm:$0xff] %v8528_v25 }
  0x5b   : > { %12968 = vst [vmem:[#allocation25_spill] sm:$0xff] %v8506_v33  ;;  %v8534_v1 = vpack.i.b16 %v395_v56, %v394_v9  ;;  %v310_v56 = vcombine.high %v308_v20, %v12761_v48  ;;  %v12983_v33 = vld [vmem:[#allocation13_spill] sm:$0xff] }
  0x5c   : > { %1993 = vrot.lane.b32.xlu1 %v8395_v12, %s7947_s22  ;;  %1989 = vrot.lane.b32.xlu0 %v8400_v22, %s7947_s22 }
  0x5d   : > { %12971 = vst [vmem:[#allocation28_spill] sm:$0xff] %v8534_v1 }
  0x60   : > { %2001 = vrot.lane.b32.xlu1 %v8405_v23, %s7947_s22  ;;  %1997 = vrot.lane.b32.xlu0 %v8409_v14, %s7947_s22 }
  0x64   : > { %1975 = vrot.lane.b32.xlu1 %v8424_v3, %s7947_s22  ;;  %1971 = vrot.lane.b32.xlu0 %v8429_v44, %s7947_s22 }
  0x68   : > { %1983 = vrot.lane.b32.xlu1 %v8442_v35, %s7947_s22  ;;  %1979 = vrot.lane.b32.xlu0 %v8447_v52, %s7947_s22 }
  0x6c   : > { %1991 = vrot.lane.b32.xlu1 %v8456_v47, %s7947_s22  ;;  %1987 = vrot.lane.b32.xlu0 %v8461_v58, %s7947_s22 }
  0x70   : > { %1999 = vrot.lane.b32.xlu1 %v8473_v46, %s7947_s22  ;;  %1995 = vrot.lane.b32.xlu0 %v8478_v10, %s7947_s22 }
  0x74   : > { %1659 = vrot.lane.b32.xlu1 %v8158_v37, %s7945_s21  ;;  %1655 = vrot.lane.b32.xlu0 %v8162_v34, %s7945_s21 }
  0x78   : > { %1667 = vrot.lane.b32.xlu1 %v8215_v61, %s7945_s21  ;;  %1663 = vrot.lane.b32.xlu0 %v8346_v0, %s7945_s21 }
  0x7c   : > { %1675 = vrot.lane.b32.xlu1 %v8395_v12, %s7945_s21  ;;  %1671 = vrot.lane.b32.xlu0 %v8400_v22, %s7945_s21 }
  0x80   : > { %1683 = vrot.lane.b32.xlu1 %v8405_v23, %s7945_s21  ;;  %1679 = vrot.lane.b32.xlu0 %v8409_v14, %s7945_s21 }
  0x84   : > { %1657 = vrot.lane.b32.xlu1 %v8424_v3, %s7945_s21  ;;  %1653 = vrot.lane.b32.xlu0 %v8429_v44, %s7945_s21 }
  0x86   : > { %v547_v13 = vpop.permute.xlu1 %546  ;;  %v539_v15 = vpop.permute.xlu0 %538 }
  0x88   : > { %1665 = vrot.lane.b32.xlu1 %v8442_v35, %s7945_s21  ;;  %1661 = vrot.lane.b32.xlu0 %v8447_v52, %s7945_s21 }
  0x8a   : > { %v551_v31 = vpop.permute.xlu1 %550  ;;  %v543_v16 = vpop.permute.xlu0 %542 }
  0x8c   : > { %1673 = vrot.lane.b32.xlu1 %v8456_v47, %s7945_s21  ;;  %1669 = vrot.lane.b32.xlu0 %v8461_v58, %s7945_s21 }
  0x8e   : > { %v559_v17 = vpop.permute.xlu1 %558  ;;  %v555_v41 = vpop.permute.xlu0 %554 }
  0x8f   : > { %v686_v11 = vcombine.low %v543_v16, %v559_v17  ;;  %v652_v30 = vcombine.low %v539_v15, %v555_v41 }
  0x90   : > { %1681 = vrot.lane.b32.xlu1 %v8473_v46, %s7945_s21  ;;  %1677 = vrot.lane.b32.xlu0 %v8478_v10, %s7945_s21  ;;  %v400_v10 = vshrl.u32 %v276_v62, 16 }
  0x91   : > { %v8559_v49 = vrot.slane %v686_v11, %v8122_v50  ;;  %v8562_v15 = vrot.slane %v652_v30, %v8122_v50  ;;  %v425_v11 = vshrl.u32 %v378_v29, 16 }
  0x92   : > { %v567_v40 = vpop.permute.xlu1 %566  ;;  %v563_v2 = vpop.permute.xlu0 %562 }
  0x93   : > { %v694_v4 = vcombine.low %v551_v31, %v567_v40  ;;  %v660_v7 = vcombine.low %v547_v13, %v563_v2  ;;  %v12973_v13 = vld [vmem:[#allocation9_spill] sm:$0xff]  ;;  %v8556_v40 = vpack.i.b16 %v310_v56, %v276_v62  ;;  %12975 = vst [vmem:[#allocation31_spill] sm:$0xff] %v8562_v15  ;;  %v12976_v2 = vld [vmem:[#allocation10_spill] sm:$0xff] }
  0x94   : > { %2648 = vrot.lane.b32.xlu1 %v8166_v39, %s7945_s21  ;;  %2644 = vrot.lane.b32.xlu0 %v8172_v43, %s7945_s21 }
  0x95   : > { %v8547_v18 = vrot.slane %v694_v4, %v8122_v50  ;;  %v8550_v31 = vrot.slane %v660_v7, %v8122_v50  ;;  %12974 = vst [vmem:[#allocation30_spill] sm:$0xff] %v8556_v40  ;;  %v12977_v4 = vld [vmem:[#allocation11_spill] sm:$0xff]  ;;  %v424_v7 = vshrl.u32 %v344_v32, 16  ;;  %v12981_v40 = vld [vmem:[#allocation16_spill] sm:$0xff] }
  0x96   : > { %v541_v21 = vpop.permute.xlu1 %540  ;;  %v537_v9 = vpop.permute.xlu0 %536 }
  0x97   : > { %12972 = vst [vmem:[#allocation29_spill] sm:$0xff] %v8550_v31  ;;  %v702_v17 = vcombine.low %v8559_v49, %v8547_v18  ;;  %v668_v41 = vcombine.low %v8562_v15, %v8550_v31  ;;  %v8582_v1 = vpack.i.b16 %v425_v11, %v424_v7  ;;  %v401_v15 = vshrl.u32 %v310_v56, 16 }
  0x98   : > { %2656 = vrot.lane.b32.xlu1 %v8191_v45, %s7945_s21  ;;  %2652 = vrot.lane.b32.xlu0 %v12973_v13, %s7945_s21 }
  0x99   : > { %v8573_v30 = vrot.slane %v702_v17, %v8464_v8  ;;  %v8576_v55 = vrot.slane %v668_v41, %v8464_v8  ;;  %12982 = vst [vmem:[#allocation34_spill] sm:$0xff] %v8582_v1  ;;  %v12984_v17 = vld [vmem:[#allocation14_spill] sm:$0xff] }
  0x9a   : > { %v549_v20 = vpop.permute.xlu1 %548  ;;  %v545_v16 = vpop.permute.xlu0 %544 }
  0x9b   : > { %12978 = vst [vmem:[#allocation32_spill] sm:$0xff] %v8573_v30  ;;  %12979 = vst [vmem:[#allocation33_spill] sm:$0xff] %v8576_v55 }
  0x9c   : > { %2664 = vrot.lane.b32.xlu1 %v12976_v2, %s7945_s21  ;;  %2660 = vrot.lane.b32.xlu0 %v12977_v4, %s7945_s21 }
  0x9e   : > { %v557_v48 = vpop.permute.xlu1 %556  ;;  %v553_v19 = vpop.permute.xlu0 %552 }
  0x9f   : > { %v618_v54 = vcombine.low %v541_v21, %v557_v48  ;;  %v584_v52 = vcombine.low %v537_v9, %v553_v19 }
  0xa0   : > { %2672 = vrot.lane.b32.xlu1 %v12980_v63, %s7945_s21  ;;  %2668 = vrot.lane.b32.xlu0 %v12981_v40, %s7945_s21 }
  0xa1   : > { %v8603_v48 = vrot.slane %v618_v54, %v8122_v50  ;;  %v8606_v19 = vrot.slane %v584_v52, %v8122_v50 }
  0xa2   : > { %v565_v25 = vpop.permute.xlu1 %564  ;;  %v561_v53 = vpop.permute.xlu0 %560 }
  0xa3   : > { %v626_v32 = vcombine.low %v549_v20, %v565_v25  ;;  %v592_v29 = vcombine.low %v545_v16, %v561_v53  ;;  %v12985_v25 = vld [vmem:[#allocation15_spill] sm:$0xff]  ;;  %v8600_v20 = vpack.i.b16 %v401_v15, %v400_v10  ;;  %12987 = vst [vmem:[#allocation36_spill] sm:$0xff] %v8606_v19 }
  0xa4   : > { %2646 = vrot.lane.b32.xlu1 %v12983_v33, %s7945_s21  ;;  %2642 = vrot.lane.b32.xlu0 %v12984_v17, %s7945_s21 }
  0xa5   : > { %v8591_v11 = vrot.slane %v626_v32, %v8122_v50  ;;  %v8594_v53 = vrot.slane %v592_v29, %v8122_v50  ;;  %12986 = vst [vmem:[#allocation35_spill] sm:$0xff] %v8600_v20 }
  0xa6   : > { %v861_v31 = vpop.permute.xlu1 %860  ;;  %v857_v7 = vpop.permute.xlu0 %856 }
  0xa7   : > { %v634_v9 = vcombine.low %v8603_v48, %v8591_v11  ;;  %v600_v56 = vcombine.low %v8606_v19, %v8594_v53 }
  0xa8   : > { %2654 = vrot.lane.b32.xlu1 %v12985_v25, %s7945_s21  ;;  %2650 = vrot.lane.b32.xlu0 %v8287_v5, %s7945_s21 }
  0xa9   : > { %v8617_v15 = vrot.slane %v634_v9, %v8464_v8  ;;  %v8620_v52 = vrot.slane %v600_v56, %v8464_v8 }
  0xaa   : > { %v869_v62 = vpop.permute.xlu1 %868  ;;  %v865_v21 = vpop.permute.xlu0 %864 }
  0xab   : > { %12988 = vst [vmem:[#allocation37_spill] sm:$0xff] %v8617_v15  ;;  %12989 = vst [vmem:[#allocation38_spill] sm:$0xff] %v8620_v52 }
  0xac   : > { %2662 = vrot.lane.b32.xlu1 %v8291_v24, %s7945_s21  ;;  %2658 = vrot.lane.b32.xlu0 %v8295_v59, %s7945_s21 }
  0xae   : > { %v877_v10 = vpop.permute.xlu1 %876  ;;  %v873_v54 = vpop.permute.xlu0 %872 }
  0xaf   : > { %v1004_v16 = vcombine.low %v861_v31, %v877_v10  ;;  %v970_v41 = vcombine.low %v857_v7, %v873_v54 }
  0xb0   : > { %2670 = vrot.lane.b32.xlu1 %v8303_v36, %s7945_s21  ;;  %2666 = vrot.lane.b32.xlu0 %v8320_v57, %s7945_s21 }
  0xb1   : > { %v8639_v7 = vrot.slane %v1004_v16, %v8122_v50 }
  0xb2   : > { %v885_v32 = vpop.permute.xlu1 %884  ;;  %v881_v29 = vpop.permute.xlu0 %880 }
  0xb3   : > { %v1012_v20 = vcombine.low %v869_v62, %v885_v32  ;;  %v978_v1 = vcombine.low %v865_v21, %v881_v29  ;;  %v8642_v62 = vrot.slane %v970_v41, %v8122_v50 }
  0xb4   : > { %2962 = vrot.lane.b32.xlu1 %v8172_v43, %s7947_s22  ;;  %2960 = vrot.lane.b32.xlu0 %v12984_v17, %s7947_s22 }
  0xb5   : > { %v8633_v9 = vrot.slane %v1012_v20, %v8122_v50  ;;  %v8636_v56 = vrot.slane %v978_v1, %v8122_v50 }
  0xb6   : > { %v859_v31 = vpop.permute.xlu1 %858  ;;  %v855_v10 = vpop.permute.xlu0 %854 }
  0xb7   : > { %v1020_v20 = vcombine.low %v8639_v7, %v8633_v9  ;;  %v986_v1 = vcombine.low %v8642_v62, %v8636_v56 }
  0xb8   : > { %2966 = vrot.lane.b32.xlu1 %v8166_v39, %s7947_s22  ;;  %2964 = vrot.lane.b32.xlu0 %v12983_v33, %s7947_s22 }
  0xb9   : > { %v8657_v41 = vrot.slane %v1020_v20, %v8464_v8  ;;  %v8660_v16 = vrot.slane %v986_v1, %v8464_v8  ;;  %v1485_v1 = vcombine.low %v8158_v37, %v8395_v12 }
  0xba   : > { %v867_v21 = vpop.permute.xlu1 %866  ;;  %v863_v54 = vpop.permute.xlu0 %862 }
  0xbb   : > { %12990 = vst [vmem:[#allocation39_spill] sm:$0xff] %v8657_v41  ;;  %12991 = vst [vmem:[#allocation40_spill] sm:$0xff] %v8660_v16 }
  0xbc   : > { %2970 = vrot.lane.b32.xlu1 %v12973_v13, %s7947_s22  ;;  %2968 = vrot.lane.b32.xlu0 %v8287_v5, %s7947_s22 }
  0xbe   : > { %v875_v32 = vpop.permute.xlu1 %874  ;;  %v871_v29 = vpop.permute.xlu0 %870 }
  0xbf   : > { %v936_v5 = vcombine.low %v859_v31, %v875_v32  ;;  %v902_v13 = vcombine.low %v855_v10, %v871_v29 }
  0xc0   : > { %2974 = vrot.lane.b32.xlu1 %v8191_v45, %s7947_s22  ;;  %2972 = vrot.lane.b32.xlu0 %v12985_v25, %s7947_s22  ;;  %v1451_v25 = vcombine.low %v8162_v34, %v8400_v22 }
  0xc1   : > { %v8691_v37 = vrot.slane %v936_v5, %v8122_v50  ;;  %v8694_v34 = vrot.slane %v902_v13, %v8122_v50  ;;  %v8713_v5 = vrot.slane %v1485_v1, %v8122_v50  ;;  %v747_v13 = vshrl.u32 %v8576_v55, 16 }
  0xc2   : > { %v883_v17 = vpop.permute.xlu1 %882  ;;  %v879_v33 = vpop.permute.xlu0 %878  ;;  %v8716_v22 = vrot.slane %v1451_v25, %v8122_v50  ;;  %v12996_v1 = vcombine.low %v8362_v51, %v8368_v60 }
  0xc3   : > { %v944_v20 = vcombine.low %v867_v21, %v883_v17  ;;  %v910_v43 = vcombine.low %v863_v54, %v879_v33  ;;  %v1493_v33 = vcombine.low %v8215_v61, %v8405_v23  ;;  %v1459_v17 = vcombine.low %v8346_v0, %v8409_v14 }
  0xc4   : > { %2978 = vrot.lane.b32.xlu1 %v12977_v4, %s7947_s22  ;;  %2976 = vrot.lane.b32.xlu0 %v8295_v59, %s7947_s22  ;;  %v12994_v61 = vcombine.low %v8334_v27, %v8340_v28  ;;  %v723_v23 = vshrl.u32 %v8620_v52, 16  ;;  %v724_v14 = vshrl.u32 %v8617_v15, 16  ;;  %v748_v54 = vshrl.u32 %v8573_v30, 16 }
  0xc5   : > { %v8677_v19 = vrot.slane %v944_v20, %v8122_v50  ;;  %v8680_v31 = vrot.slane %v910_v43, %v8122_v50  ;;  %v12992_v43 = vcombine.low %v8310_v26, %v8326_v6  ;;  %v8727_v32 = vrot.slane %v1493_v33, %v8122_v50 }
  0xc6   : > { %v8686_v10 = vpop.permute.xlu1 %1977  ;;  %v8688_v21 = vpop.permute.xlu0 %1973  ;;  %v8706_v0 = vrot.slane %v12994_v61, %v8464_v8  ;;  %v8730_v25 = vrot.slane %v1459_v17, %v8122_v50  ;;  %v12998_v33 = vcombine.low %v8377_v42, %v8389_v38  ;;  %v749_v45 = vpack.i.b16 %v748_v54, %v747_v13 }
  0xc7   : > { %v8700_v12 = vrot.slane %v12992_v43, %v8464_v8  ;;  %v952_v26 = vcombine.low %v8691_v37, %v8677_v19  ;;  %v918_v6 = vcombine.low %v8694_v34, %v8680_v31  ;;  %v8742_v43 = vrot.slane %v12996_v1, %v8464_v8 }
  0xc8   : > { %12995 = vst [vmem:[#allocation42_spill] sm:$0xff] %v8706_v0  ;;  %2982 = vrot.lane.b32.xlu1 %v12976_v2, %s7947_s22  ;;  %2980 = vrot.lane.b32.xlu0 %v8291_v24, %s7947_s22  ;;  %v407_v20 = vshrl.u32 %v8706_v0, 16  ;;  %v8748_v17 = vrot.slane %v12998_v33, %v8464_v8  ;;  %v13002_v24 = vmov 0  }
  0xc9   : > { %12993 = vst [vmem:[#allocation41_spill] sm:$0xff] %v8700_v12  ;;  %v406_v29 = vshrl.u32 %v8700_v12, 16  ;;  %12997 = vst [vmem:[#allocation43_spill] sm:$0xff] %v8742_v43  ;;  %v8751_v61 = vrot.slane %v952_v26, %v8464_v8  ;;  %v8754_v59 = vrot.slane %v918_v6, %v8464_v8  ;;  %v718_v51 = vcombine.high %v8573_v30, %v13002_v24 }
  0xca   : > { %v1986_v27 = vpop.permute.xlu1 %1985  ;;  %v1982_v28 = vpop.permute.xlu0 %1981  ;;  %12999 = vst [vmem:[#allocation44_spill] sm:$0xff] %v8748_v17  ;;  %v1417_v26 = vcombine.low %v8424_v3, %v8456_v47  ;;  %v382_v13 = vshrl.u32 %v8742_v43, 16  ;;  %v383_v54 = vshrl.u32 %v8748_v17, 16  ;;  %v616_v30 = vcombine.high %v8620_v52, %v13002_v24 }
  0xcb   : > { %13000 = vst [vmem:[#allocation45_spill] sm:$0xff] %v8751_v61  ;;  %13001 = vst [vmem:[#allocation46_spill] sm:$0xff] %v8754_v59  ;;  %v408_v6 = vpack.i.b16 %v407_v20, %v406_v29  ;;  %v754_v29 = vshrl.u32 %v718_v51, 16  ;;  %v1425_v20 = vcombine.low %v8442_v35, %v8473_v46  ;;  %v13006_v35 = vld [vmem:[#allocation22_spill] sm:$0xff] }
  0xcc   : > { %2986 = vrot.lane.b32.xlu1 %v12981_v40, %s7947_s22  ;;  %2984 = vrot.lane.b32.xlu0 %v8320_v57, %s7947_s22  ;;  %v684_v57 = vcombine.high %v8576_v55, %v13002_v24  ;;  %v725_v40 = vpack.i.b16 %v724_v14, %v723_v23  ;;  %v8772_v23 = vcombine.high %v8700_v12, %v13002_v24 }
  0xcd   : > { %v8776_v14 = vcombine.high %v8706_v0, %v13002_v24  ;;  %v7594_v55 = vcombine.low %v749_v45, %v749_v45  ;;  %v650_v0 = vcombine.high %v8617_v15, %v13002_v24  ;;  %v7580_v45 = vcombine.low %v408_v6, %v408_v6 }
  0xce   : > { %v1994_v60 = vpop.permute.xlu1 %1993  ;;  %v1990_v1 = vpop.permute.xlu0 %1989  ;;  %v752_v3 = vpack.i.b16 %v718_v51, %v684_v57  ;;  %v753_v47 = vshrl.u32 %v684_v57, 16  ;;  %v7587_v42 = vcombine.low %v725_v40, %v725_v40  ;;  %v1383_v51 = vcombine.low %v8429_v44, %v8461_v58  ;;  %v13005_v58 = vld [vmem:[#allocation23_spill] sm:$0xff] }
  0xcf   : > { %v2121_v12 = vcombine.low %v8686_v10, %v1994_v60  ;;  %v703_v40 = vcombine.high %v8559_v49, %v8547_v18  ;;  %v13003_v10 = vld [vmem:[#allocation29_spill] sm:$0xff]  ;;  %v13004_v60 = vld [vmem:[#allocation31_spill] sm:$0xff]  ;;  %v1391_v46 = vcombine.low %v13006_v35, %v13005_v58  ;;  %v384_v6 = vpack.i.b16 %v383_v54, %v382_v13 }
  0xd0   : > { %2990 = vrot.lane.b32.xlu1 %v12980_v63, %s7947_s22  ;;  %2988 = vrot.lane.b32.xlu0 %v8303_v36, %s7947_s22  ;;  %v2087_v36 = vcombine.low %v8688_v21, %v1990_v1  ;;  %v669_v21 = vcombine.high %v13004_v60, %v13003_v10  ;;  %v729_v10 = vshrl.u32 %v616_v30, 16  ;;  %v730_v60 = vshrl.u32 %v650_v0, 16 }
  0xd1   : > { %v8811_v18 = vrot.slane %v2121_v12, %v8122_v50  ;;  %v8824_v12 = vcombine.high %v8742_v43, %v13002_v24  ;;  %v8841_v58 = vrot.slane %v1417_v26, %v8122_v50  ;;  %v8850_v35 = vrot.slane %v1391_v46, %v8122_v50 }
  0xd2   : > { %v2002_v33 = vpop.permute.xlu1 %2001  ;;  %v1998_v38 = vpop.permute.xlu0 %1997  ;;  %v8814_v49 = vrot.slane %v2087_v36, %v8122_v50  ;;  %v8828_v36 = vcombine.high %v8748_v17, %v13002_v24  ;;  %v8834_v13 = vrot.slane %v669_v21, %v8464_v8  ;;  %v8847_v21 = vrot.slane %v1425_v20, %v8122_v50 }
  0xd3   : > { %v2129_v63 = vcombine.low %v1986_v27, %v2002_v33  ;;  %v2095_v57 = vcombine.low %v1982_v28, %v1998_v38  ;;  %v728_v38 = vpack.i.b16 %v650_v0, %v616_v30  ;;  %v412_v33 = vshrl.u32 %v8772_v23, 16 }
  0xd4   : > { %770 = vrot.lane.b32.xlu1 %v7587_v42, %s7950_s23  ;;  %798 = vrot.lane.b32.xlu0 %v7594_v55, %s7950_s23  ;;  %v7595_v55 = vcombine.low %v752_v3, %v752_v3  ;;  %v755_v42 = vpack.i.b16 %v754_v29, %v753_v47  ;;  %v413_v3 = vshrl.u32 %v8776_v14, 16  ;;  %v8831_v47 = vrot.slane %v703_v40, %v8464_v8 }
  0xd5   : > { %v8799_v27 = vrot.slane %v2129_v63, %v8122_v50  ;;  %v8802_v44 = vrot.slane %v2095_v57, %v8122_v50  ;;  %v411_v63 = vpack.i.b16 %v8776_v14, %v8772_v23  ;;  %v8844_v40 = vrot.slane %v1383_v51, %v8122_v50 }
  0xd6   : > { %v8806_v28 = vpop.permute.xlu1 %1975  ;;  %v8808_v1 = vpop.permute.xlu0 %1971  ;;  %v7596_v57 = vcombine.low %v755_v42, %v755_v42  ;;  %v7573_v30 = vcombine.low %v384_v6, %v384_v6  ;;  %v414_v0 = vpack.i.b16 %v413_v3, %v412_v33  ;;  %v387_v20 = vpack.i.b16 %v8828_v36, %v8824_v12  ;;  %v13009_v42 = vld [vmem:[#allocation36_spill] sm:$0xff] }
  0xd7   : > { %v2137_v54 = vcombine.low %v8811_v18, %v8799_v27  ;;  %v2103_v23 = vcombine.low %v8814_v49, %v8802_v44  ;;  %v635_v46 = vcombine.high %v8603_v48, %v8591_v11  ;;  %v731_v6 = vpack.i.b16 %v730_v60, %v729_v10 }
  0xd8   : > { %457 = vrot.lane.b32.xlu1 %v7580_v45, %s7950_s23  ;;  %802 = vrot.lane.b32.xlu0 %v7595_v55, %s7951_s24  ;;  %v7588_v45 = vcombine.low %v728_v38, %v728_v38  ;;  %v7581_v55 = vcombine.low %v411_v63, %v411_v63  ;;  %v601_v38 = vcombine.high %v13009_v42, %v8594_v53  ;;  %v759_v60 = vshrl.u32 %v8834_v13, 16 }
  0xd9   : > { %v8855_v26 = vrot.slane %v2137_v54, %v8464_v8  ;;  %v8858_v51 = vrot.slane %v2103_v23, %v8464_v8  ;;  %v758_v63 = vpack.i.b16 %v8831_v47, %v8834_v13  ;;  %v13010_v33 = vcombine.low %v8713_v5, %v8727_v32 }
  0xda   : > { %v1984_v14 = vpop.permute.xlu1 %1983  ;;  %v1980_v29 = vpop.permute.xlu0 %1979  ;;  %v13012_v54 = vcombine.low %v8716_v22, %v8730_v25  ;;  %v1433_v53 = vcombine.low %v8841_v58, %v8847_v21  ;;  %v1399_v48 = vcombine.low %v8844_v40, %v8850_v35  ;;  %v7582_v23 = vcombine.low %v414_v0, %v414_v0 }
  0xdb   : > { %13007 = vst [vmem:[#allocation29_spill] sm:$0xff] %v8855_v26  ;;  %13008 = vst [vmem:[#allocation31_spill] sm:$0xff] %v8858_v51  ;;  %v8872_v3 = vrot.slane %v13010_v33, %v8464_v8  ;;  %v7574_v10 = vcombine.low %v387_v20, %v387_v20  ;;  %v760_v42 = vshrl.u32 %v8831_v47, 16  ;;  %v8894_v52 = vrot.slane %v601_v38, %v8464_v8 }
  0xdc   : > { %806 = vrot.lane.b32.xlu1 %v7596_v57, %s7952_s25  ;;  %774 = vrot.lane.b32.xlu0 %v7588_v45, %s7951_s24  ;;  %v8878_v11 = vrot.slane %v13012_v54, %v8464_v8  ;;  %v8891_v54 = vrot.slane %v635_v46, %v8464_v8  ;;  %v7589_v43 = vcombine.low %v731_v6, %v731_v6  ;;  %v388_v46 = vshrl.u32 %v8824_v12, 16 }
  0xdd   : > { %13011 = vst [vmem:[#allocation23_spill] sm:$0xff] %v8872_v3  ;;  %v389_v38 = vshrl.u32 %v8828_v36, 16  ;;  %v8913_v12 = vrot.slane %v1433_v53, %v8464_v8  ;;  %v8916_v36 = vrot.slane %v1399_v48, %v8464_v8  ;;  %v685_v39 = vcombine.high %v8834_v13, %v13002_v24 }
  0xde   : > { %v1992_v57 = vpop.permute.xlu1 %1991  ;;  %v1988_v45 = vpop.permute.xlu0 %1987  ;;  %13013 = vst [vmem:[#allocation22_spill] sm:$0xff] %v8878_v11  ;;  %v1546_v33 = vshrl.u32 %v8878_v11, 16  ;;  %v719_v2 = vcombine.high %v8831_v47, %v13002_v24  ;;  %v8964_v13 = vcombine.high %v8891_v54, %v13002_v24 }
  0xdf   : > { %v2019_v0 = vcombine.low %v8808_v1, %v1988_v45  ;;  %v761_v1 = vpack.i.b16 %v760_v42, %v759_v60  ;;  %13015 = vst [vmem:[#allocation47_spill] sm:$0xff] %v8913_v12  ;;  %13016 = vst [vmem:[#allocation48_spill] sm:$0xff] %v8916_v36 }
  0xe0   : > { %461 = vrot.lane.b32.xlu1 %v7581_v55, %s7951_s24  ;;  %429 = vrot.lane.b32.xlu0 %v7573_v30, %s7950_s23  ;;  %v7597_v55 = vcombine.low %v758_v63, %v758_v63  ;;  %v2053_v30 = vcombine.low %v8806_v28, %v1992_v57  ;;  %v1547_v63 = vshrl.u32 %v8872_v3, 16 }
  0xe1   : > { %v7598_v42 = vcombine.low %v761_v1, %v761_v1 }
  0xe2   : > { %v2000_v15 = vpop.permute.xlu1 %1999  ;;  %v1996_v17 = vpop.permute.xlu0 %1995  ;;  %v1548_v57 = vpack.i.b16 %v1547_v63, %v1546_v33 }
  0xe3   : > { %v2061_v20 = vcombine.low %v1984_v14, %v2000_v15  ;;  %v2027_v4 = vcombine.low %v1980_v29, %v1996_v17  ;;  %v8919_v14 = vrot.slane %v2053_v30, %v8122_v50  ;;  %v8922_v29 = vrot.slane %v2019_v0, %v8122_v50 }
  0xe4   : > { %810 = vrot.lane.b32.xlu1 %v7597_v55, %s7953_s26  ;;  %778 = vrot.lane.b32.xlu0 %v7589_v43, %s7952_s25  ;;  %v734_v43 = vpack.i.b16 %v8891_v54, %v8894_v52  ;;  %v735_v30 = vshrl.u32 %v8894_v52, 16  ;;  %v736_v0 = vshrl.u32 %v8891_v54, 16 }
  0xe5   : > { %v8905_v6 = vrot.slane %v2061_v20, %v8122_v50  ;;  %v8908_v28 = vrot.slane %v2027_v4, %v8122_v50  ;;  %13017 = vst [vmem:[#allocation49_spill] sm:$0xff] %v8922_v29  ;;  %v390_v4 = vpack.i.b16 %v389_v38, %v388_v46  ;;  %v7622_v20 = vcombine.low %v1548_v57, %v1548_v57 }
  0xe6   : > { %v1660_v15 = vpop.permute.xlu1 %1659  ;;  %v1656_v17 = vpop.permute.xlu0 %1655  ;;  %v7590_v55 = vcombine.low %v734_v43, %v734_v43  ;;  %v737_v43 = vpack.i.b16 %v736_v0, %v735_v30  ;;  %v764_v0 = vpack.i.b16 %v719_v2, %v685_v39 }
  0xe7   : > { %13014 = vst [vmem:[#allocation36_spill] sm:$0xff] %v8908_v28  ;;  %v2069_v45 = vcombine.low %v8919_v14, %v8905_v6  ;;  %v2035_v53 = vcombine.low %v8922_v29, %v8908_v28  ;;  %v7575_v33 = vcombine.low %v390_v4, %v390_v4  ;;  %v13020_v4 = vld [vmem:[#allocation24_spill] sm:$0xff] }
  0xe8   : > { %465 = vrot.lane.b32.xlu1 %v7582_v23, %s7952_s25  ;;  %433 = vrot.lane.b32.xlu0 %v7574_v10, %s7951_s24  ;;  %v1522_v23 = vshrl.u32 %v8916_v36, 16  ;;  %v1523_v10 = vshrl.u32 %v8913_v12, 16  ;;  %v7583_v57 = vcombine.low %v13020_v4, %v13020_v4  ;;  %v7591_v47 = vcombine.low %v737_v43, %v737_v43 }
  0xe9   : > { %v8937_v46 = vrot.slane %v2069_v45, %v8464_v8  ;;  %v8940_v38 = vrot.slane %v2035_v53, %v8464_v8  ;;  %v1483_v45 = vcombine.high %v8878_v11, %v13002_v24  ;;  %v1517_v53 = vcombine.high %v8872_v3, %v13002_v24 }
  0xea   : > { %v1668_v48 = vpop.permute.xlu1 %1667  ;;  %v1664_v60 = vpop.permute.xlu0 %1663  ;;  %v8960_v3 = vcombine.high %v8894_v52, %v13002_v24 }
  0xeb   : > { %13018 = vst [vmem:[#allocation50_spill] sm:$0xff] %v8937_v46  ;;  %13019 = vst [vmem:[#allocation51_spill] sm:$0xff] %v8940_v38  ;;  %v1551_v4 = vpack.i.b16 %v1517_v53, %v1483_v45 }
  0xec   : > { %814 = vrot.lane.b32.xlu1 %v7598_v42, %s7954_s27  ;;  %782 = vrot.lane.b32.xlu0 %v7590_v55, %s7953_s26  ;;  %v1524_v42 = vpack.i.b16 %v1523_v10, %v1522_v23 }
  0xee   : > { %v1676_v63 = vpop.permute.xlu1 %1675  ;;  %v1672_v1 = vpop.permute.xlu0 %1671 }
  0xef   : > { %v1769_v29 = vcombine.low %v1656_v17, %v1672_v1 }
  0xf0   : > { %437 = vrot.lane.b32.xlu1 %v7575_v33, %s7952_s25  ;;  %1597 = vrot.lane.b32.xlu0 %v7622_v20, %s7950_s23  ;;  %v7615_v33 = vcombine.low %v1524_v42, %v1524_v42  ;;  %v1803_v20 = vcombine.low %v1660_v15, %v1676_v63  ;;  %v13023_v63 = vld [vmem:[#allocation25_spill] sm:$0xff]  ;;  %v7623_v42 = vcombine.low %v1551_v4, %v1551_v4 }
  0xf1   : > { %v7576_v1 = vcombine.low %v13023_v63, %v13023_v63  ;;  %v8982_v54 = vrot.slane %v1769_v29, %v8122_v50  ;;  %v1415_v4 = vcombine.high %v8916_v36, %v13002_v24  ;;  %v1449_v63 = vcombine.high %v8913_v12, %v13002_v24 }
  0xf2   : > { %v1684_v55 = vpop.permute.xlu1 %1683  ;;  %v1680_v30 = vpop.permute.xlu0 %1679  ;;  %v8979_v52 = vrot.slane %v1803_v20, %v8122_v50  ;;  %v1552_v20 = vshrl.u32 %v1483_v45, 16 }
  0xf3   : > { %v1811_v23 = vcombine.low %v1668_v48, %v1684_v55  ;;  %v1777_v10 = vcombine.low %v1664_v60, %v1680_v30  ;;  %v7599_v60 = vcombine.low %v764_v0, %v764_v0  ;;  %13025 = vst [vmem:[#allocation53_spill] sm:$0xff] %v8982_v54  ;;  %v765_v55 = vshrl.u32 %v685_v39, 16  ;;  %v13026_v39 = vld [vmem:[#allocation26_spill] sm:$0xff] }
  0xf4   : > { %786 = vrot.lane.b32.xlu1 %v7591_v47, %s7954_s27  ;;  %469 = vrot.lane.b32.xlu0 %v7583_v57, %s7953_s26  ;;  %13024 = vst [vmem:[#allocation25_spill] sm:$0xff] %v8979_v52  ;;  %v740_v57 = vpack.i.b16 %v8964_v13, %v8960_v3  ;;  %v766_v30 = vshrl.u32 %v719_v2, 16  ;;  %v7584_v2 = vcombine.low %v13026_v39, %v13026_v39 }
  0xf5   : > { %v8967_v43 = vrot.slane %v1811_v23, %v8122_v50  ;;  %v8970_v48 = vrot.slane %v1777_v10, %v8122_v50  ;;  %v1065_v10 = vshrl.u32 %v8660_v16, 16  ;;  %v1527_v39 = vpack.i.b16 %v1449_v63, %v1415_v4 }
  0xf6   : > { %v8972_v15 = vpop.permute.xlu1 %1657  ;;  %v8974_v17 = vpop.permute.xlu0 %1653  ;;  %v767_v11 = vpack.i.b16 %v766_v30, %v765_v55 }
  0xf7   : > { %13021 = vst [vmem:[#allocation24_spill] sm:$0xff] %v8967_v43  ;;  %13022 = vst [vmem:[#allocation52_spill] sm:$0xff] %v8970_v48  ;;  %v1819_v47 = vcombine.low %v8979_v52, %v8967_v43  ;;  %v1785_v0 = vcombine.low %v8982_v54, %v8970_v48  ;;  %v7592_v48 = vcombine.low %v740_v57, %v740_v57 }
  0xf8   : > { %1569 = vrot.lane.b32.xlu1 %v7615_v33, %s7950_s23  ;;  %818 = vrot.lane.b32.xlu0 %v7599_v60, %s7955_s28  ;;  %v1066_v33 = vshrl.u32 %v8657_v41, 16  ;;  %v1553_v60 = vshrl.u32 %v1517_v53, 16  ;;  %v7600_v55 = vcombine.low %v767_v11, %v767_v11  ;;  %v7616_v57 = vcombine.low %v1527_v39, %v1527_v39 }
  0xf9   : > { %v9003_v54 = vrot.slane %v1819_v47, %v8464_v8  ;;  %v9006_v45 = vrot.slane %v1785_v0, %v8464_v8  ;;  %v1036_v39 = vcombine.high %v8657_v41, %v13002_v24 }
  0xfa   : > { %v1666_v23 = vpop.permute.xlu1 %1665  ;;  %v1662_v29 = vpop.permute.xlu0 %1661  ;;  %v1554_v52 = vpack.i.b16 %v1553_v60, %v1552_v20 }
  0xfb   : > { %13027 = vst [vmem:[#allocation26_spill] sm:$0xff] %v9003_v54  ;;  %13028 = vst [vmem:[#allocation54_spill] sm:$0xff] %v9006_v45 }
  0xfc   : > { %441 = vrot.lane.b32.xlu1 %v7576_v1, %s7953_s26  ;;  %1601 = vrot.lane.b32.xlu0 %v7623_v42, %s7951_s24  ;;  %v1067_v42 = vpack.i.b16 %v1066_v33, %v1065_v10  ;;  %v7624_v47 = vcombine.low %v1554_v52, %v1554_v52  ;;  %v742_v10 = vshrl.u32 %v8964_v13, 16  ;;  %v13029_v52 = vld [vmem:[#allocation27_spill] sm:$0xff] }
  0xfd   : > { %v7585_v13 = vcombine.low %v13029_v52, %v13029_v52 }
  0xfe   : > { %v1674_v53 = vpop.permute.xlu1 %1673  ;;  %v1670_v1 = vpop.permute.xlu0 %1669  ;;  %v7608_v12 = vcombine.low %v1067_v42, %v1067_v42 }
  0xff   : > { %v1735_v33 = vcombine.low %v8972_v15, %v1674_v53  ;;  %v1701_v11 = vcombine.low %v8974_v17, %v1670_v1  ;;  %v13030_v15 = vld [vmem:[#allocation28_spill] sm:$0xff] }
 0x100   : > { %790 = vrot.lane.b32.xlu1 %v7592_v48, %s7955_s28  ;;  %473 = vrot.lane.b32.xlu0 %v7584_v2, %s7954_s27  ;;  %v741_v48 = vshrl.u32 %v8960_v3, 16  ;;  %v1468_v3 = vcombine.high %v8716_v22, %v8730_v25  ;;  %v7577_v17 = vcombine.low %v13030_v15, %v13030_v15  ;;  %v1002_v22 = vcombine.high %v8660_v16, %v13002_v24 }
 0x101   : > { %v9043_v25 = vrot.slane %v1735_v33, %v8122_v50  ;;  %v9046_v53 = vrot.slane %v1701_v11, %v8122_v50 }
 0x102   : > { %v1682_v36 = vpop.permute.xlu1 %1681  ;;  %v1678_v43 = vpop.permute.xlu0 %1677  ;;  %v743_v2 = vpack.i.b16 %v742_v10, %v741_v48  ;;  %v1070_v11 = vpack.i.b16 %v1036_v39, %v1002_v22 }
 0x103   : > { %v1743_v0 = vcombine.low %v1666_v23, %v1682_v36  ;;  %v1709_v28 = vcombine.low %v1662_v29, %v1678_v43  ;;  %v1041_v36 = vshrl.u32 %v8754_v59, 16  ;;  %v1502_v43 = vcombine.high %v8713_v5, %v8727_v32 }
 0x104   : > { %1116 = vrot.lane.b32.xlu1 %v7608_v12, %s7950_s23  ;;  %822 = vrot.lane.b32.xlu0 %v7600_v55, %s7956_s29  ;;  %v1042_v12 = vshrl.u32 %v8751_v61, 16  ;;  %v1528_v5 = vshrl.u32 %v1415_v4, 16  ;;  %v1529_v32 = vshrl.u32 %v1449_v63, 16  ;;  %v9054_v4 = vrot.slane %v1468_v3, %v8464_v8 }
 0x105   : > { %v9033_v23 = vrot.slane %v1743_v0, %v8122_v50  ;;  %v9036_v29 = vrot.slane %v1709_v28, %v8122_v50  ;;  %v9051_v55 = vrot.slane %v1502_v43, %v8464_v8  ;;  %v7593_v33 = vcombine.low %v743_v2, %v743_v2 }
 0x106   : > { %v9018_v20 = vpop.permute.xlu1 %2648  ;;  %v9020_v60 = vpop.permute.xlu0 %2644  ;;  %v1043_v28 = vpack.i.b16 %v1042_v12, %v1041_v36  ;;  %v1530_v0 = vpack.i.b16 %v1529_v32, %v1528_v5  ;;  %v1434_v36 = vcombine.high %v8841_v58, %v8847_v21  ;;  %v1400_v12 = vcombine.high %v8844_v40, %v8850_v35  ;;  %v13033_v32 = vld [vmem:[#allocation30_spill] sm:$0xff] }
 0x107   : > { %v1751_v63 = vcombine.low %v9043_v25, %v9033_v23  ;;  %v1557_v43 = vpack.i.b16 %v9051_v55, %v9054_v4  ;;  %v9078_v58 = vcombine.high %v8754_v59, %v13002_v24  ;;  %v9082_v40 = vcombine.high %v8751_v61, %v13002_v24 }
 0x108   : > { %1605 = vrot.lane.b32.xlu1 %v7624_v47, %s7952_s25  ;;  %1573 = vrot.lane.b32.xlu0 %v7616_v57, %s7951_s24  ;;  %v1717_v47 = vcombine.low %v9046_v53, %v9036_v29  ;;  %v7601_v10 = vcombine.low %v1043_v28, %v1043_v28  ;;  %v7609_v15 = vcombine.low %v1070_v11, %v1070_v11  ;;  %v1072_v11 = vshrl.u32 %v1036_v39, 16 }
 0x109   : > { %v9069_v3 = vrot.slane %v1751_v63, %v8464_v8  ;;  %v9088_v5 = vrot.slane %v1400_v12, %v8464_v8  ;;  %v7578_v2 = vcombine.low %v13033_v32, %v13033_v32  ;;  %v7625_v28 = vcombine.low %v1557_v43, %v1557_v43 }
 0x10a   : > { %v2657_v1 = vpop.permute.xlu1 %2656  ;;  %v2653_v42 = vpop.permute.xlu0 %2652  ;;  %v9072_v52 = vrot.slane %v1717_v47, %v8464_v8  ;;  %v1558_v43 = vshrl.u32 %v9054_v4, 16  ;;  %v1047_v16 = vshrl.u32 %v9078_v58, 16 }
 0x10b   : > { %13031 = vst [vmem:[#allocation27_spill] sm:$0xff] %v9069_v3 }
 0x10c   : > { %477 = vrot.lane.b32.xlu1 %v7585_v13, %s7955_s28  ;;  %445 = vrot.lane.b32.xlu0 %v7577_v17, %s7954_s27  ;;  %13032 = vst [vmem:[#allocation28_spill] sm:$0xff] %v9072_v52  ;;  %v7617_v13 = vcombine.low %v1530_v0, %v1530_v0  ;;  %v9085_v17 = vrot.slane %v1434_v36, %v8464_v8 }
 0x10e   : > { %v2665_v57 = vpop.permute.xlu1 %2664  ;;  %v2661_v48 = vpop.permute.xlu0 %2660 }
 0x10f   : > { %v2792_v36 = vcombine.low %v9018_v20, %v2665_v57  ;;  %v2758_v12 = vcombine.low %v9020_v60, %v2661_v48  ;;  %v13034_v20 = vld [vmem:[#allocation34_spill] sm:$0xff] }
 0x110   : > { %1088 = vrot.lane.b32.xlu1 %v7601_v10, %s7950_s23  ;;  %794 = vrot.lane.b32.xlu0 %v7593_v33, %s7956_s29  ;;  %v1046_v10 = vpack.i.b16 %v9082_v40, %v9078_v58  ;;  %v1071_v33 = vshrl.u32 %v1002_v22, 16  ;;  %v7586_v60 = vcombine.low %v13034_v20, %v13034_v20  ;;  %v1559_v22 = vshrl.u32 %v9051_v55, 16 }
 0x111   : > { %v9119_v48 = vrot.slane %v2792_v36, %v8122_v50  ;;  %v987_v36 = vcombine.high %v8642_v62, %v8636_v56 }
 0x112   : > { %v2673_v21 = vpop.permute.xlu1 %2672  ;;  %v2669_v35 = vpop.permute.xlu0 %2668  ;;  %v7602_v39 = vcombine.low %v1046_v10, %v1046_v10  ;;  %v1073_v57 = vpack.i.b16 %v1072_v11, %v1071_v33  ;;  %v1560_v33 = vpack.i.b16 %v1559_v22, %v1558_v43  ;;  %v1021_v11 = vcombine.high %v8639_v7, %v8633_v9 }
 0x113   : > { %v2800_v63 = vcombine.low %v2657_v1, %v2673_v21  ;;  %v2766_v47 = vcombine.low %v2653_v42, %v2669_v35  ;;  %v1533_v42 = vpack.i.b16 %v9085_v17, %v9088_v5  ;;  %v9122_v35 = vrot.slane %v2758_v12, %v8122_v50 }
 0x114   : > { %1577 = vrot.lane.b32.xlu1 %v7617_v13, %s7952_s25  ;;  %1120 = vrot.lane.b32.xlu0 %v7609_v15, %s7951_s24  ;;  %v1534_v12 = vshrl.u32 %v9088_v5, 16  ;;  %v7610_v59 = vcombine.low %v1073_v57, %v1073_v57  ;;  %v7626_v56 = vcombine.low %v1560_v33, %v1560_v33  ;;  %v9149_v7 = vrot.slane %v1021_v11, %v8464_v8  ;;  %v13037_v57 = vld [vmem:[#allocation35_spill] sm:$0xff] }
 0x115   : > { %v9108_v13 = vrot.slane %v2800_v63, %v8122_v50  ;;  %v9111_v21 = vrot.slane %v2766_v47, %v8122_v50  ;;  %v2182_v47 = vshrl.u32 %v8858_v51, 16  ;;  %v9152_v62 = vrot.slane %v987_v36, %v8464_v8 }
 0x116   : > { %v9100_v32 = vpop.permute.xlu1 %2646  ;;  %v9102_v1 = vpop.permute.xlu0 %2642  ;;  %v1484_v33 = vcombine.high %v9054_v4, %v13002_v24  ;;  %v919_v4 = vcombine.high %v8694_v34, %v8680_v31  ;;  %v2158_v11 = vshrl.u32 %v8940_v38, 16 }
 0x117   : > { %v2808_v20 = vcombine.low %v9119_v48, %v9108_v13  ;;  %v2774_v10 = vcombine.low %v9122_v35, %v9111_v21 }
 0x118   : > { %449 = vrot.lane.b32.xlu1 %v7578_v2, %s7955_s28  ;;  %1609 = vrot.lane.b32.xlu0 %v7625_v28, %s7953_s26  ;;  %v2183_v2 = vshrl.u32 %v8855_v26, 16  ;;  %v7618_v28 = vcombine.low %v1533_v42, %v1533_v42  ;;  %v1535_v42 = vshrl.u32 %v9085_v17, 16 }
 0x119   : > { %v9141_v43 = vrot.slane %v2808_v20, %v8464_v8  ;;  %v9144_v9 = vrot.slane %v2774_v10, %v8464_v8 }
 0x11a   : > { %v2655_v15 = vpop.permute.xlu1 %2654  ;;  %v2651_v63 = vpop.permute.xlu0 %2650  ;;  %v2184_v61 = vpack.i.b16 %v2183_v2, %v2182_v47  ;;  %v7579_v47 = vcombine.low %v13037_v57, %v13037_v57  ;;  %v1536_v2 = vpack.i.b16 %v1535_v42, %v1534_v12  ;;  %v2119_v57 = vcombine.high %v8858_v51, %v13002_v24 }
 0x11b   : > { %13035 = vst [vmem:[#allocation30_spill] sm:$0xff] %v9141_v43  ;;  %13036 = vst [vmem:[#allocation34_spill] sm:$0xff] %v9144_v9 }
 0x11c   : > { %1092 = vrot.lane.b32.xlu1 %v7602_v39, %s7951_s24  ;;  %481 = vrot.lane.b32.xlu0 %v7586_v60, %s7956_s29  ;;  %v1048_v39 = vshrl.u32 %v9082_v40, 16  ;;  %v7650_v40 = vcombine.low %v2184_v61, %v2184_v61  ;;  %v7619_v31 = vcombine.low %v1536_v2, %v1536_v2 }
 0x11e   : > { %v2663_v0 = vpop.permute.xlu1 %2662  ;;  %v2659_v30 = vpop.permute.xlu0 %2658  ;;  %v1049_v22 = vpack.i.b16 %v1048_v39, %v1047_v16  ;;  %v1518_v16 = vcombine.high %v9051_v55, %v13002_v24 }
 0x11f   : > { %v2724_v20 = vcombine.low %v9100_v32, %v2663_v0  ;;  %v953_v0 = vcombine.high %v8691_v37, %v8677_v19  ;;  %v2159_v19 = vshrl.u32 %v8937_v46, 16 }
 0x120   : > { %1581 = vrot.lane.b32.xlu1 %v7618_v28, %s7953_s26  ;;  %1124 = vrot.lane.b32.xlu0 %v7610_v59, %s7952_s25  ;;  %v2690_v28 = vcombine.low %v9102_v1, %v2659_v30  ;;  %v1076_v1 = vpack.i.b16 %v9149_v7, %v9152_v62  ;;  %v1563_v34 = vpack.i.b16 %v1518_v16, %v1484_v33 }
 0x121   : > { %v9185_v37 = vrot.slane %v2724_v20, %v8122_v50  ;;  %v9193_v12 = vrot.slane %v953_v0, %v8464_v8  ;;  %v9214_v20 = vcombine.high %v9088_v5, %v13002_v24  ;;  %v1077_v0 = vshrl.u32 %v9152_v62, 16 }
 0x122   : > { %v2671_v58 = vpop.permute.xlu1 %2670  ;;  %v2667_v60 = vpop.permute.xlu0 %2666  ;;  %v9188_v36 = vrot.slane %v2690_v28, %v8122_v50  ;;  %v7627_v2 = vcombine.low %v1563_v34, %v1563_v34  ;;  %v1450_v28 = vcombine.high %v9085_v17, %v13002_v24  ;;  %v1565_v34 = vshrl.u32 %v1518_v16, 16 }
 0x123   : > { %v2732_v59 = vcombine.low %v2655_v15, %v2671_v58  ;;  %v2698_v10 = vcombine.low %v2651_v63, %v2667_v60  ;;  %v7603_v63 = vcombine.low %v1049_v22, %v1049_v22  ;;  %13040 = vst [vmem:[#allocation56_spill] sm:$0xff] %v9185_v37  ;;  %v9200_v58 = vrot.slane %v919_v4, %v8464_v8 }
 0x124   : > { %2233 = vrot.lane.b32.xlu1 %v7650_v40, %s7950_s23  ;;  %1613 = vrot.lane.b32.xlu0 %v7626_v56, %s7954_s27  ;;  %13041 = vst [vmem:[#allocation57_spill] sm:$0xff] %v9188_v36  ;;  %v7611_v56 = vcombine.low %v1076_v1, %v1076_v1  ;;  %v2160_v22 = vpack.i.b16 %v2159_v19, %v2158_v11  ;;  %v1078_v1 = vshrl.u32 %v9149_v7, 16 }
 0x125   : > { %v9169_v30 = vrot.slane %v2732_v59, %v8122_v50  ;;  %v9172_v32 = vrot.slane %v2698_v10, %v8122_v50  ;;  %v1052_v5 = vpack.i.b16 %v9193_v12, %v9200_v58  ;;  %v1539_v17 = vpack.i.b16 %v1450_v28, %v9214_v20 }
 0x126   : > { %v9178_v15 = vpop.permute.xlu1 %2962  ;;  %v9180_v55 = vpop.permute.xlu0 %2960  ;;  %v7643_v11 = vcombine.low %v2160_v22, %v2160_v22 }
 0x127   : > { %13038 = vst [vmem:[#allocation35_spill] sm:$0xff] %v9169_v30  ;;  %13039 = vst [vmem:[#allocation55_spill] sm:$0xff] %v9172_v32  ;;  %v2740_v42 = vcombine.low %v9185_v37, %v9169_v30  ;;  %v2706_v39 = vcombine.low %v9188_v36, %v9172_v32  ;;  %v7604_v22 = vcombine.low %v1052_v5, %v1052_v5  ;;  %v1840_v37 = vshrl.u32 %v9072_v52, 16 }
 0x128   : > { %1096 = vrot.lane.b32.xlu1 %v7603_v63, %s7952_s25  ;;  %453 = vrot.lane.b32.xlu0 %v7579_v47, %s7956_s29  ;;  %v2153_v47 = vcombine.high %v8855_v26, %v13002_v24  ;;  %v1864_v26 = vshrl.u32 %v9006_v45, 16  ;;  %v2051_v5 = vcombine.high %v8940_v38, %v13002_v24  ;;  %v9284_v30 = vcombine.high %v9006_v45, %v13002_v24 }
 0x129   : > { %v9219_v59 = vrot.slane %v2740_v42, %v8464_v8  ;;  %v9222_v10 = vrot.slane %v2706_v39, %v8464_v8  ;;  %v1079_v42 = vpack.i.b16 %v1078_v1, %v1077_v0  ;;  %v2188_v0 = vshrl.u32 %v2119_v57, 16 }
 0x12a   : > { %v9202_v60 = vpop.permute.xlu1 %2966  ;;  %v9204_v40 = vpop.permute.xlu0 %2964  ;;  %v2187_v19 = vpack.i.b16 %v2153_v47, %v2119_v57  ;;  %v2189_v36 = vshrl.u32 %v2153_v47, 16  ;;  %v9257_v57 = vcombine.high %v9152_v62, %v13002_v24  ;;  %v1054_v47 = vshrl.u32 %v9193_v12, 16 }
 0x12b   : > { %13042 = vst [vmem:[#allocation58_spill] sm:$0xff] %v9219_v59  ;;  %13043 = vst [vmem:[#allocation59_spill] sm:$0xff] %v9222_v10 }
 0x12c   : > { %1585 = vrot.lane.b32.xlu1 %v7619_v31, %s7954_s27  ;;  %1128 = vrot.lane.b32.xlu0 %v7611_v56, %s7953_s26  ;;  %v1564_v31 = vshrl.u32 %v1484_v33, 16  ;;  %v7651_v51 = vcombine.low %v2187_v19, %v2187_v19  ;;  %v7620_v33 = vcombine.low %v1539_v17, %v1539_v17  ;;  %v2085_v19 = vcombine.high %v8937_v46, %v13002_v24 }
 0x12d   : > { %v9261_v17 = vcombine.high %v9149_v7, %v13002_v24 }
 0x12e   : > { %v9226_v4 = vpop.permute.xlu1 %2970  ;;  %v9228_v63 = vpop.permute.xlu0 %2968  ;;  %v1566_v16 = vpack.i.b16 %v1565_v34, %v1564_v31 }
 0x12f   : > { %v1082_v62 = vpack.i.b16 %v9261_v17, %v9257_v57 }
 0x130   : > { %2205 = vrot.lane.b32.xlu1 %v7643_v11, %s7950_s23  ;;  %1617 = vrot.lane.b32.xlu0 %v7627_v2, %s7955_s28  ;;  %v1865_v11 = vshrl.u32 %v9003_v54, 16  ;;  %v7612_v2 = vcombine.low %v1079_v42, %v1079_v42 }
 0x132   : > { %v9237_v56 = vpop.permute.xlu1 %2974  ;;  %v9239_v61 = vpop.permute.xlu0 %2972  ;;  %v1866_v41 = vpack.i.b16 %v1865_v11, %v1864_v26  ;;  %v1053_v26 = vshrl.u32 %v9200_v58, 16  ;;  %v2163_v11 = vpack.i.b16 %v2085_v19, %v2051_v5 }
 0x134   : > { %1100 = vrot.lane.b32.xlu1 %v7604_v22, %s7953_s26  ;;  %2237 = vrot.lane.b32.xlu0 %v7651_v51, %s7951_s24  ;;  %v7628_v51 = vcombine.low %v1566_v16, %v1566_v16  ;;  %v7636_v42 = vcombine.low %v1866_v41, %v1866_v41  ;;  %v2190_v22 = vpack.i.b16 %v2189_v36, %v2188_v0  ;;  %v1541_v16 = vshrl.u32 %v1450_v28, 16 }
 0x135   : > { %v1055_v7 = vpack.i.b16 %v1054_v47, %v1053_v26  ;;  %v7644_v32 = vcombine.low %v2163_v11, %v2163_v11  ;;  %v1841_v41 = vshrl.u32 %v9069_v3, 16  ;;  %v2164_v0 = vshrl.u32 %v2051_v5, 16 }
 0x136   : > { %v9245_v1 = vpop.permute.xlu1 %2978  ;;  %v9247_v39 = vpop.permute.xlu0 %2976  ;;  %v7652_v46 = vcombine.low %v2190_v22, %v2190_v22  ;;  %v2138_v26 = vcombine.high %v8811_v18, %v8799_v27  ;;  %v7613_v47 = vcombine.low %v1082_v62, %v1082_v62  ;;  %v2104_v11 = vcombine.high %v8814_v49, %v8802_v44 }
 0x137   : > { %v1842_v22 = vpack.i.b16 %v1841_v41, %v1840_v37  ;;  %v9294_v27 = vcombine.high %v9200_v58, %v13002_v24  ;;  %v9298_v18 = vcombine.high %v9193_v12, %v13002_v24  ;;  %v1083_v37 = vshrl.u32 %v9257_v57, 16 }
 0x138   : > { %1589 = vrot.lane.b32.xlu1 %v7620_v33, %s7955_s28  ;;  %1132 = vrot.lane.b32.xlu0 %v7612_v2, %s7954_s27  ;;  %v1540_v33 = vshrl.u32 %v9214_v20, 16  ;;  %v9303_v5 = vrot.slane %v2138_v26, %v8464_v8  ;;  %v9312_v12 = vrot.slane %v2104_v11, %v8464_v8 }
 0x139   : > { %v7629_v58 = vcombine.low %v1842_v22, %v1842_v22 }
 0x13a   : > { %v9265_v31 = vpop.permute.xlu1 %2982  ;;  %v9267_v34 = vpop.permute.xlu0 %2980  ;;  %v1542_v36 = vpack.i.b16 %v1541_v16, %v1540_v33  ;;  %v1084_v33 = vshrl.u32 %v9261_v17, 16  ;;  %v1058_v17 = vpack.i.b16 %v9298_v18, %v9294_v27 }
 0x13b   : > { %v3110_v41 = vcombine.low %v9202_v60, %v9265_v31 }
 0x13c   : > { %1915 = vrot.lane.b32.xlu1 %v7636_v42, %s7950_s23  ;;  %1621 = vrot.lane.b32.xlu0 %v7628_v51, %s7956_s29  ;;  %v2165_v51 = vshrl.u32 %v2085_v19, 16  ;;  %v7605_v42 = vcombine.low %v1055_v7, %v1055_v7  ;;  %v7621_v49 = vcombine.low %v1542_v36, %v1542_v36 }
 0x13d   : > { %v9361_v26 = vrot.slane %v3110_v41, %v8122_v50 }
 0x13e   : > { %v2987_v2 = vpop.permute.xlu1 %2986  ;;  %v2985_v38 = vpop.permute.xlu0 %2984 }
 0x13f   : > { %v3016_v57 = vcombine.low %v9228_v63, %v2985_v38  ;;  %v3084_v36 = vcombine.low %v9226_v4, %v2987_v2  ;;  %v3008_v38 = vcombine.low %v9180_v55, %v9247_v39  ;;  %v9346_v2 = vcombine.high %v9072_v52, %v13002_v24  ;;  %13050 = vst [vmem:[#allocation62_spill] sm:$0xff] %v9361_v26  ;;  %v13060_v52 = vld [vmem:[#allocation52_spill] sm:$0xff] }
 0x140   : > { %2241 = vrot.lane.b32.xlu1 %v7652_v46, %s7952_s25  ;;  %2209 = vrot.lane.b32.xlu0 %v7644_v32, %s7951_s24  ;;  %v9288_v46 = vcombine.high %v9003_v54, %v13002_v24  ;;  %v2166_v32 = vpack.i.b16 %v2165_v51, %v2164_v0  ;;  %v13044_v0 = vld [vmem:[#allocation36_spill] sm:$0xff]  ;;  %v9350_v55 = vcombine.high %v9069_v3, %v13002_v24  ;;  %v13062_v54 = vld [vmem:[#allocation10_spill] sm:$0xff] }
 0x141   : > { %v2193_v51 = vpack.i.b16 %v9303_v5, %v9312_v12  ;;  %v9374_v22 = vrot.slane %v3008_v38, %v8122_v50  ;;  %v2854_v38 = vshrl.u32 %v9141_v43, 16 }
 0x142   : > { %v2991_v20 = vpop.permute.xlu1 %2990  ;;  %v2989_v28 = vpop.permute.xlu0 %2988  ;;  %v1869_v16 = vpack.i.b16 %v9288_v46, %v9284_v30 }
 0x143   : > { %v3050_v44 = vcombine.low %v9239_v61, %v2989_v28  ;;  %v3118_v19 = vcombine.low %v9237_v56, %v2991_v20  ;;  %v3042_v61 = vcombine.low %v9204_v40, %v9267_v34  ;;  %v2070_v56 = vcombine.high %v8919_v14, %v8905_v6  ;;  %v13045_v40 = vld [vmem:[#allocation49_spill] sm:$0xff]  ;;  %13052 = vst [vmem:[#allocation64_spill] sm:$0xff] %v9374_v22 }
 0x144   : > { %1136 = vrot.lane.b32.xlu1 %v7613_v47, %s7955_s28  ;;  %1104 = vrot.lane.b32.xlu0 %v7605_v42, %s7954_s27  ;;  %v2036_v34 = vcombine.high %v13045_v40, %v13044_v0  ;;  %v7645_v6 = vcombine.low %v2166_v32, %v2166_v32  ;;  %v3076_v14 = vcombine.low %v9178_v15, %v9245_v1 }
 0x145   : > { %v9332_v63 = vrot.slane %v3050_v44, %v8122_v50  ;;  %v9338_v60 = vrot.slane %v3118_v19, %v8122_v50  ;;  %v9353_v39 = vrot.slane %v3042_v61, %v8122_v50  ;;  %v9356_v15 = vrot.slane %v3016_v57, %v8122_v50 }
 0x146   : > { %v9306_v62 = vpop.permute.xlu1 %770  ;;  %v9308_v7 = vpop.permute.xlu0 %798  ;;  %v7637_v1 = vcombine.low %v1869_v16, %v1869_v16  ;;  %v9364_v20 = vrot.slane %v3084_v36, %v8122_v50  ;;  %v1085_v28 = vpack.i.b16 %v1084_v33, %v1083_v37  ;;  %v9368_v47 = vrot.slane %v2070_v56, %v8464_v8 }
 0x147   : > { %13046 = vst [vmem:[#allocation36_spill] sm:$0xff] %v9332_v63  ;;  %13047 = vst [vmem:[#allocation49_spill] sm:$0xff] %v9338_v60  ;;  %v9371_v42 = vrot.slane %v2036_v34, %v8464_v8  ;;  %v3058_v11 = vcombine.low %v9353_v39, %v9332_v63  ;;  %v9380_v44 = vrot.slane %v3076_v14, %v8122_v50  ;;  %v1870_v57 = vshrl.u32 %v9284_v30, 16  ;;  %v13069_v63 = vld [vmem:[#allocation9_spill] sm:$0xff] }
 0x148   : > { %1887 = vrot.lane.b32.xlu1 %v7629_v58, %s7950_s23  ;;  %1593 = vrot.lane.b32.xlu0 %v7621_v49, %s7956_s29  ;;  %13048 = vst [vmem:[#allocation60_spill] sm:$0xff] %v9353_v39  ;;  %13049 = vst [vmem:[#allocation61_spill] sm:$0xff] %v9356_v15  ;;  %v3126_v49 = vcombine.low %v9361_v26, %v9338_v60  ;;  %v7606_v19 = vcombine.low %v1058_v17, %v1058_v17  ;;  %v1871_v16 = vshrl.u32 %v9288_v46, 16  ;;  %v13068_v39 = vld [vmem:[#allocation16_spill] sm:$0xff] }
 0x149   : > { %13051 = vst [vmem:[#allocation63_spill] sm:$0xff] %v9364_v20  ;;  %13053 = vst [vmem:[#allocation65_spill] sm:$0xff] %v9380_v44  ;;  %v1845_v58 = vpack.i.b16 %v9350_v55, %v9346_v2  ;;  %v3024_v33 = vcombine.low %v9374_v22, %v9356_v15  ;;  %v7653_v61 = vcombine.low %v2193_v51, %v2193_v51  ;;  %v2853_v34 = vshrl.u32 %v9144_v9, 16  ;;  %v13063_v22 = vld [vmem:[#allocation6_spill] sm:$0xff] }
 0x14a   : > { %v9340_v4 = vpop.permute.xlu1 %457  ;;  %v9342_v31 = vpop.permute.xlu0 %802  ;;  %v3092_v56 = vcombine.low %v9380_v44, %v9364_v20  ;;  %v9398_v41 = vrot.slane %v3058_v11, %v8464_v8  ;;  %v7614_v36 = vcombine.low %v1085_v28, %v1085_v28  ;;  %v2169_v17 = vpack.i.b16 %v9368_v47, %v9371_v42  ;;  %v13064_v44 = vld [vmem:[#allocation11_spill] sm:$0xff]  ;;  %v13067_v20 = vld [vmem:[#allocation8_spill] sm:$0xff] }
 0x14b   : > { %v9404_v0 = vrot.slane %v3126_v49, %v8464_v8  ;;  %v7630_v40 = vcombine.low %v1845_v58, %v1845_v58  ;;  %v1872_v14 = vpack.i.b16 %v1871_v16, %v1870_v57  ;;  %v2195_v51 = vshrl.u32 %v9303_v5, 16 }
 0x14c   : > { %2213 = vrot.lane.b32.xlu1 %v7645_v6, %s7952_s25  ;;  %1919 = vrot.lane.b32.xlu0 %v7637_v1, %s7951_s24  ;;  %13054 = vst [vmem:[#allocation66_spill] sm:$0xff] %v9398_v41  ;;  %v9413_v6 = vrot.slane %v3024_v33, %v8464_v8  ;;  %v2194_v1 = vshrl.u32 %v9312_v12, 16  ;;  %v9418_v28 = vrot.slane %v3092_v56, %v8464_v8  ;;  %v1059_v49 = vshrl.u32 %v9294_v27, 16 }
 0x14d   : > { %13055 = vst [vmem:[#allocation67_spill] sm:$0xff] %v9404_v0  ;;  %v7646_v11 = vcombine.low %v2169_v17, %v2169_v17  ;;  %v2855_v57 = vpack.i.b16 %v2854_v38, %v2853_v34  ;;  %v1846_v16 = vshrl.u32 %v9346_v2, 16  ;;  %v1847_v56 = vshrl.u32 %v9350_v55, 16  ;;  %v13058_v17 = vld [vmem:[#allocation24_spill] sm:$0xff]  ;;  %v13065_v34 = vld [vmem:[#allocation7_spill] sm:$0xff] }
 0x14e   : > { %v9384_v32 = vpop.permute.xlu1 %806  ;;  %v9386_v37 = vpop.permute.xlu0 %774  ;;  %13056 = vst [vmem:[#allocation68_spill] sm:$0xff] %v9413_v6  ;;  %13057 = vst [vmem:[#allocation69_spill] sm:$0xff] %v9418_v28  ;;  %v7638_v45 = vcombine.low %v1872_v14, %v1872_v14  ;;  %v2196_v58 = vpack.i.b16 %v2195_v51, %v2194_v1  ;;  %v2474_v15 = vcombine.low %v13063_v22, %v13062_v54  ;;  %v13066_v2 = vld [vmem:[#allocation12_spill] sm:$0xff]  ;;  %v2171_v14 = vshrl.u32 %v9368_v47, 16 }
 0x14f   : > { %v2440_v38 = vcombine.low %v13065_v34, %v13064_v44  ;;  %v2482_v55 = vcombine.low %v13067_v20, %v13066_v2  ;;  %v7686_v22 = vcombine.low %v2855_v57, %v2855_v57  ;;  %v1848_v44 = vpack.i.b16 %v1847_v56, %v1846_v16  ;;  %v13071_v34 = vld [vmem:[#allocation13_spill] sm:$0xff]  ;;  %v13072_v2 = vld [vmem:[#allocation19_spill] sm:$0xff] }
 0x150   : > { %1108 = vrot.lane.b32.xlu1 %v7606_v19, %s7955_s28  ;;  %2245 = vrot.lane.b32.xlu0 %v7653_v61, %s7953_s26  ;;  %v1060_v19 = vshrl.u32 %v9298_v18, 16  ;;  %v13061_v18 = vld [vmem:[#allocation53_spill] sm:$0xff]  ;;  %v2829_v56 = vshrl.u32 %v9222_v10, 16  ;;  %v2756_v41 = vcombine.high %v9219_v59, %v13002_v24 }
 0x151   : > { %v1786_v3 = vcombine.high %v13061_v18, %v13060_v52  ;;  %v2170_v52 = vshrl.u32 %v9371_v42, 16  ;;  %v7631_v16 = vcombine.low %v1848_v44, %v1848_v44  ;;  %v13070_v18 = vld [vmem:[#allocation18_spill] sm:$0xff] }
 0x152   : > { %v9406_v30 = vpop.permute.xlu1 %461  ;;  %v9408_v46 = vpop.permute.xlu0 %429 }
 0x153   : > { %v9458_v20 = vrot.slane %v1786_v3, %v8464_v8  ;;  %v1752_v3 = vcombine.high %v9043_v25, %v9033_v23  ;;  %v2120_v23 = vcombine.high %v9312_v12, %v13002_v24  ;;  %v2154_v25 = vcombine.high %v9303_v5, %v13002_v24 }
 0x154   : > { %1891 = vrot.lane.b32.xlu1 %v7630_v40, %s7951_s24  ;;  %1140 = vrot.lane.b32.xlu0 %v7614_v36, %s7956_s29  ;;  %v13059_v40 = vld [vmem:[#allocation25_spill] sm:$0xff]  ;;  %v2448_v36 = vcombine.low %v13069_v63, %v13068_v39  ;;  %v7654_v63 = vcombine.low %v2196_v58, %v2196_v58  ;;  %v1061_v39 = vpack.i.b16 %v1060_v19, %v1059_v49 }
 0x155   : > { %v1820_v27 = vcombine.high %v13059_v40, %v13058_v17  ;;  %v9467_v17 = vrot.slane %v2482_v55, %v8122_v50  ;;  %v2172_v49 = vpack.i.b16 %v2171_v14, %v2170_v52  ;;  %v13073_v55 = vld [vmem:[#allocation14_spill] sm:$0xff]  ;;  %v9501_v12 = vrot.slane %v1752_v3, %v8464_v8 }
 0x156   : > { %v9426_v33 = vpop.permute.xlu1 %810  ;;  %v9428_v61 = vpop.permute.xlu0 %778  ;;  %v9470_v57 = vrot.slane %v2448_v36, %v8122_v50  ;;  %v2830_v36 = vshrl.u32 %v9219_v59, 16  ;;  %v7607_v40 = vcombine.low %v1061_v39, %v1061_v39  ;;  %v2372_v52 = vcombine.low %v13073_v55, %v13072_v2  ;;  %v13077_v2 = vld [vmem:[#allocation15_spill] sm:$0xff] }
 0x157   : > { %v9455_v51 = vrot.slane %v1820_v27, %v8464_v8  ;;  %v7647_v44 = vcombine.low %v2172_v49, %v2172_v49  ;;  %v13079_v49 = vld [vmem:[#allocation17_spill] sm:$0xff] }
 0x158   : > { %2217 = vrot.lane.b32.xlu1 %v7646_v11, %s7953_s26  ;;  %1923 = vrot.lane.b32.xlu0 %v7638_v45, %s7952_s25  ;;  %v9461_v45 = vrot.slane %v2474_v15, %v8122_v50  ;;  %v9464_v11 = vrot.slane %v2440_v38, %v8122_v50  ;;  %v1718_v15 = vcombine.high %v9046_v53, %v9036_v29 }
 0x159   : > { %v1875_v27 = vpack.i.b16 %v9455_v51, %v9458_v20  ;;  %v2406_v38 = vcombine.low %v13071_v34, %v13070_v18  ;;  %v2790_v18 = vcombine.high %v9144_v9, %v13002_v24  ;;  %v13076_v34 = vld [vmem:[#allocation20_spill] sm:$0xff] }
 0x15a   : > { %v9450_v1 = vpop.permute.xlu1 %465  ;;  %v9452_v54 = vpop.permute.xlu0 %433  ;;  %v2490_v29 = vcombine.low %v9461_v45, %v9467_v17  ;;  %v2456_v53 = vcombine.low %v9464_v11, %v9470_v57  ;;  %v9504_v5 = vrot.slane %v1718_v15, %v8464_v8  ;;  %v2414_v55 = vcombine.low %v13077_v2, %v13076_v34 }
 0x15b   : > { %v7639_v39 = vcombine.low %v1875_v27, %v1875_v27  ;;  %v9529_v27 = vrot.slane %v2372_v52, %v8122_v50  ;;  %v1877_v2 = vshrl.u32 %v9455_v51, 16 }
 0x15c   : > { %2904 = vrot.lane.b32.xlu1 %v7686_v22, %s7950_s23  ;;  %2249 = vrot.lane.b32.xlu0 %v7654_v63, %s7954_s27  ;;  %v2831_v63 = vpack.i.b16 %v2830_v36, %v2829_v56  ;;  %v9515_v3 = vrot.slane %v2490_v29, %v8464_v8  ;;  %v9518_v15 = vrot.slane %v2456_v53, %v8464_v8 }
 0x15d   : > { %v9526_v36 = vrot.slane %v2406_v38, %v8122_v50  ;;  %v1851_v34 = vpack.i.b16 %v9501_v12, %v9504_v5  ;;  %v9544_v38 = vcombine.high %v9368_v47, %v13002_v24 }
 0x15e   : > { %v9478_v19 = vpop.permute.xlu1 %814  ;;  %v9480_v58 = vpop.permute.xlu0 %782  ;;  %13075 = vst [vmem:[#allocation25_spill] sm:$0xff] %v9515_v3  ;;  %v7679_v9 = vcombine.low %v2831_v63, %v2831_v63 }
 0x15f   : > { %v7632_v26 = vcombine.low %v1851_v34, %v1851_v34 }
 0x160   : > { %1895 = vrot.lane.b32.xlu1 %v7631_v16, %s7952_s25  ;;  %1112 = vrot.lane.b32.xlu0 %v7607_v40, %s7956_s29  ;;  %v2199_v16 = vpack.i.b16 %v2154_v25, %v2120_v23  ;;  %v2824_v40 = vcombine.high %v9141_v43, %v13002_v24  ;;  %v2536_v43 = vshrl.u32 %v9515_v3, 16 }
 0x162   : > { %v9506_v14 = vpop.permute.xlu1 %437  ;;  %v9508_v22 = vpop.permute.xlu0 %1597  ;;  %v7655_v52 = vcombine.low %v2199_v16, %v2199_v16 }
 0x163   : > { %13074 = vst [vmem:[#allocation24_spill] sm:$0xff] %v9508_v22  ;;  %v13078_v22 = vld [vmem:[#allocation21_spill] sm:$0xff] }
 0x164   : > { %v2380_v56 = vcombine.low %v13079_v49, %v13078_v22  ;;  %2221 = vrot.lane.b32.xlu1 %v7647_v44, %s7954_s27  ;;  %1927 = vrot.lane.b32.xlu0 %v7639_v39, %s7953_s26  ;;  %v9540_v22 = vcombine.high %v9371_v42, %v13002_v24  ;;  %v2858_v44 = vpack.i.b16 %v2824_v40, %v2790_v18  ;;  %v1876_v39 = vshrl.u32 %v9458_v20, 16 }
 0x165   : > { %v9549_v49 = vrot.slane %v2414_v55, %v8122_v50  ;;  %v2535_v42 = vshrl.u32 %v9518_v15, 16 }
 0x166   : > { %v9532_v29 = vpop.permute.xlu1 %786  ;;  %v9534_v53 = vpop.permute.xlu0 %469  ;;  %v9552_v63 = vrot.slane %v2380_v56, %v8122_v50  ;;  %v2175_v55 = vpack.i.b16 %v9544_v38, %v9540_v22  ;;  %v7687_v60 = vcombine.low %v2858_v44, %v2858_v44  ;;  %v1878_v28 = vpack.i.b16 %v1877_v2, %v1876_v39 }
 0x167   : > { %v2200_v56 = vshrl.u32 %v2120_v23, 16  ;;  %v2201_v50 = vshrl.u32 %v2154_v25, 16  ;;  %v2859_v44 = vshrl.u32 %v2790_v18, 16  ;;  %v2860_v39 = vshrl.u32 %v2824_v40, 16 }
 0x168   : > { %2876 = vrot.lane.b32.xlu1 %v7679_v9, %s7950_s23  ;;  %2253 = vrot.lane.b32.xlu0 %v7655_v52, %s7955_s28  ;;  %v2422_v9 = vcombine.low %v9526_v36, %v9549_v49  ;;  %v2388_v0 = vcombine.low %v9529_v27, %v9552_v63  ;;  %v2537_v52 = vpack.i.b16 %v2536_v43, %v2535_v42 }
 0x169   : > { %v7648_v6 = vcombine.low %v2175_v55, %v2175_v55  ;;  %v7640_v23 = vcombine.low %v1878_v28, %v1878_v28  ;;  %v2202_v25 = vpack.i.b16 %v2201_v50, %v2200_v56  ;;  %v2722_v2 = vcombine.high %v9222_v10, %v13002_v24 }
 0x16a   : > { %v9558_v47 = vpop.permute.xlu1 %1569  ;;  %v9560_v16 = vpop.permute.xlu0 %818  ;;  %v9582_v43 = vrot.slane %v2388_v0, %v8464_v8  ;;  %v2861_v28 = vpack.i.b16 %v2860_v39, %v2859_v44  ;;  %v9592_v40 = vcombine.high %v9458_v20, %v13002_v24  ;;  %v9596_v42 = vcombine.high %v9455_v51, %v13002_v24 }
 0x16b   : > { %13080 = vst [vmem:[#allocation52_spill] sm:$0xff] %v9558_v47  ;;  %v7656_v0 = vcombine.low %v2202_v25, %v2202_v25  ;;  %v2834_v55 = vpack.i.b16 %v2756_v41, %v2722_v2  ;;  %v1853_v56 = vshrl.u32 %v9501_v12, 16  ;;  %v2176_v10 = vshrl.u32 %v9540_v22, 16 }
 0x16c   : > { %1899 = vrot.lane.b32.xlu1 %v7632_v26, %s7953_s26  ;;  %2908 = vrot.lane.b32.xlu0 %v7687_v60, %s7951_s24  ;;  %v9579_v26 = vrot.slane %v2422_v9, %v8464_v8  ;;  %13082 = vst [vmem:[#allocation10_spill] sm:$0xff] %v9582_v43  ;;  %v7672_v60 = vcombine.low %v2537_v52, %v2537_v52  ;;  %v2511_v9 = vshrl.u32 %v9582_v43, 16 }
 0x16d   : > { %v7688_v51 = vcombine.low %v2861_v28, %v2861_v28  ;;  %v1881_v39 = vpack.i.b16 %v9596_v42, %v9592_v40  ;;  %v9620_v28 = vcombine.high %v9515_v3, %v13002_v24  ;;  %v2491_v3 = vcombine.high %v9461_v45, %v9467_v17 }
 0x16e   : > { %v9570_v47 = vpop.permute.xlu1 %441  ;;  %v9572_v34 = vpop.permute.xlu0 %1601  ;;  %13081 = vst [vmem:[#allocation53_spill] sm:$0xff] %v9579_v26  ;;  %v2512_v52 = vshrl.u32 %v9579_v26, 16  ;;  %v9657_v45 = vcombine.high %v9582_v43, %v13002_v24  ;;  %v9661_v17 = vcombine.high %v9579_v26, %v13002_v24  ;;  %v13088_v26 = vld [vmem:[#allocation41_spill] sm:$0xff] }
 0x16f   : > { %v7641_v22 = vcombine.low %v1881_v39, %v1881_v39 }
 0x170   : > { %2225 = vrot.lane.b32.xlu1 %v7648_v6, %s7955_s28  ;;  %1931 = vrot.lane.b32.xlu0 %v7640_v23, %s7954_s27  ;;  %v1852_v6 = vshrl.u32 %v9504_v5, 16  ;;  %v7680_v23 = vcombine.low %v2834_v55, %v2834_v55  ;;  %v2513_v59 = vpack.i.b16 %v2512_v52, %v2511_v9  ;;  %v2775_v9 = vcombine.high %v9122_v35, %v9111_v21 }
 0x171   : > { %v9642_v21 = vcombine.high %v9504_v5, %v13002_v24  ;;  %v1883_v5 = vshrl.u32 %v9596_v42, 16 }
 0x172   : > { %v9586_v18 = vpop.permute.xlu1 %790  ;;  %v9588_v50 = vpop.permute.xlu0 %473  ;;  %v1854_v25 = vpack.i.b16 %v1853_v56, %v1852_v6  ;;  %v2835_v6 = vshrl.u32 %v2722_v2, 16  ;;  %v2809_v56 = vcombine.high %v9119_v48, %v9108_v13  ;;  %v9646_v48 = vcombine.high %v9501_v12, %v13002_v24 }
 0x173   : > { %v1882_v12 = vshrl.u32 %v9592_v40, 16 }
 0x174   : > { %2586 = vrot.lane.b32.xlu1 %v7672_v60, %s7950_s23  ;;  %2257 = vrot.lane.b32.xlu0 %v7656_v0, %s7956_s29  ;;  %v2177_v60 = vshrl.u32 %v9544_v38, 16  ;;  %v9616_v0 = vcombine.high %v9518_v15, %v13002_v24  ;;  %v2836_v38 = vshrl.u32 %v2756_v41, 16  ;;  %v7633_v52 = vcombine.low %v1854_v25, %v1854_v25 }
 0x175   : > { %v9649_v35 = vrot.slane %v2809_v56, %v8464_v8  ;;  %v9666_v25 = vrot.slane %v2491_v3, %v8464_v8  ;;  %v13086_v56 = vld [vmem:[#allocation55_spill] sm:$0xff]  ;;  %v1857_v42 = vpack.i.b16 %v9646_v48, %v9642_v21  ;;  %v2457_v3 = vcombine.high %v9464_v11, %v9470_v57 }
 0x176   : > { %v9604_v20 = vpop.permute.xlu1 %1116  ;;  %v9606_v44 = vpop.permute.xlu0 %822  ;;  %v2540_v2 = vpack.i.b16 %v9620_v28, %v9616_v0  ;;  %v2837_v13 = vpack.i.b16 %v2836_v38, %v2835_v6  ;;  %v13085_v6 = vld [vmem:[#allocation56_spill] sm:$0xff]  ;;  %v2541_v57 = vshrl.u32 %v9616_v0, 16 }
 0x177   : > { %13083 = vst [vmem:[#allocation6_spill] sm:$0xff] %v9604_v20 }
 0x178   : > { %2912 = vrot.lane.b32.xlu1 %v7688_v51, %s7952_s25  ;;  %2880 = vrot.lane.b32.xlu0 %v7680_v23, %s7951_s24  ;;  %v2178_v51 = vpack.i.b16 %v2177_v60, %v2176_v10  ;;  %v7665_v23 = vcombine.low %v2513_v59, %v2513_v59  ;;  %v9652_v59 = vrot.slane %v2775_v9, %v8464_v8  ;;  %v13087_v9 = vld [vmem:[#allocation57_spill] sm:$0xff] }
 0x179   : > { %v7673_v60 = vcombine.low %v2540_v2, %v2540_v2  ;;  %v7681_v40 = vcombine.low %v2837_v13, %v2837_v13  ;;  %v2516_v13 = vpack.i.b16 %v9661_v17, %v9657_v45 }
 0x17a   : > { %v9622_v20 = vpop.permute.xlu1 %1605  ;;  %v9624_v55 = vpop.permute.xlu0 %1573  ;;  %v7649_v10 = vcombine.low %v2178_v51, %v2178_v51 }
 0x17c   : > { %1935 = vrot.lane.b32.xlu1 %v7641_v22, %s7955_s28  ;;  %1903 = vrot.lane.b32.xlu0 %v7633_v52, %s7954_s27  ;;  %v13084_v22 = vld [vmem:[#allocation35_spill] sm:$0xff]  ;;  %v2707_v52 = vcombine.high %v13087_v9, %v13086_v56  ;;  %v13090_v56 = vld [vmem:[#allocation32_spill] sm:$0xff]  ;;  %v13091_v9 = vld [vmem:[#allocation33_spill] sm:$0xff] }
 0x17d   : > { %v2741_v38 = vcombine.high %v13085_v6, %v13084_v22  ;;  %v2864_v22 = vpack.i.b16 %v9649_v35, %v9652_v59  ;;  %v1884_v6 = vpack.i.b16 %v1883_v5, %v1882_v12  ;;  %v13092_v43 = vpack.i.b16 %v13090_v56, %v13091_v9 }
 0x17e   : > { %v9636_v41 = vpop.permute.xlu1 %477  ;;  %v9638_v39 = vpop.permute.xlu0 %445 }
 0x17f   : > { %v841_v11 = vsel %vm483_vm6, %v13092_v43, %v9308_v7  ;;  %v7634_v7 = vcombine.low %v1857_v42, %v1857_v42  ;;  %v9709_v43 = vrot.slane %v2457_v3, %v8464_v8 }
 0x180   : > { %2558 = vrot.lane.b32.xlu1 %v7665_v23, %s7950_s23  ;;  %2229 = vrot.lane.b32.xlu0 %v7649_v10, %s7956_s29  ;;  %v13089_v10 = vld [vmem:[#allocation42_spill] sm:$0xff]  ;;  %v843_v12 = vsel %vm487_vm7, %v841_v11, %v9342_v31  ;;  %v7666_v31 = vcombine.low %v2516_v13, %v2516_v13 }
 0x181   : > { %v405_v2 = vpack.i.b16 %v13089_v10, %v13088_v26  ;;  %v2542_v26 = vshrl.u32 %v9620_v28, 16  ;;  %v9697_v10 = vrot.slane %v2741_v38, %v8464_v8  ;;  %v845_v0 = vsel %vm490_vm8, %v843_v12, %v9384_v32 }
 0x182   : > { %v9673_v51 = vpop.permute.xlu1 %1088  ;;  %v9675_v23 = vpop.permute.xlu0 %794  ;;  %v7689_v28 = vcombine.low %v2864_v22, %v2864_v22  ;;  %v7642_v38 = vcombine.low %v1884_v6, %v1884_v6  ;;  %v1858_v32 = vshrl.u32 %v9642_v21, 16  ;;  %v2866_v6 = vshrl.u32 %v9649_v35, 16 }
 0x183   : > { %v2543_v3 = vpack.i.b16 %v2542_v26, %v2541_v57  ;;  %v2518_v57 = vshrl.u32 %v9661_v17, 16 }
 0x184   : > { %2884 = vrot.lane.b32.xlu1 %v7681_v40, %s7952_s25  ;;  %2590 = vrot.lane.b32.xlu0 %v7673_v60, %s7951_s24  ;;  %v9700_v40 = vrot.slane %v2707_v52, %v8464_v8  ;;  %v847_v60 = vsel %vm493_vm9, %v845_v0, %v9426_v33  ;;  %v507_v52 = vsel %vm483_vm6, %v405_v2, %v9340_v4 }
 0x185   : > { %v849_v42 = vsel %vm496_vm10, %v847_v60, %v9478_v19  ;;  %v509_v22 = vsel %vm487_vm7, %v507_v52, %v9406_v30  ;;  %v1859_v19 = vshrl.u32 %v9646_v48, 16  ;;  %v2865_v30 = vshrl.u32 %v9652_v59, 16 }
 0x186   : > { %v9704_v5 = vpop.permute.xlu1 %1577  ;;  %v9706_v56 = vpop.permute.xlu0 %1120  ;;  %v851_v33 = vsel %vm499_vm11, %v849_v42, %v9560_v16  ;;  %v2840_v4 = vpack.i.b16 %v9697_v10, %v9700_v40  ;;  %v511_v2 = vsel %vm490_vm8, %v509_v22, %v9450_v1  ;;  %v2423_v16 = vcombine.high %v9526_v36, %v9549_v49 }
 0x187   : > { %v853_v21 = vsel %vm502_vm12, %v851_v33, %v9606_v44  ;;  %v513_v11 = vsel %vm493_vm9, %v511_v2, %v9534_v53  ;;  %v2517_v48 = vshrl.u32 %v9657_v45, 16  ;;  %v2389_v1 = vcombine.high %v9529_v27, %v9552_v63  ;;  %v13093_v27 = vld [vmem:[#allocation43_spill] sm:$0xff]  ;;  %v13094_v63 = vld [vmem:[#allocation44_spill] sm:$0xff] }
 0x188   : > { %1907 = vrot.lane.b32.xlu1 %v7634_v7, %s7955_s28  ;;  %2916 = vrot.lane.b32.xlu0 %v7689_v28, %s7953_s26  ;;  %v515_v44 = vsel %vm496_vm10, %v513_v11, %v9588_v50  ;;  %v7674_v26 = vcombine.low %v2543_v3, %v2543_v3  ;;  %v3281_v36 = vrot.slane %v853_v21, 4  ;;  %v7682_v45 = vcombine.low %v2840_v4, %v2840_v4 }
 0x189   : > { %v517_v53 = vsel %vm499_vm11, %v515_v44, %v9636_v41  ;;  %v1860_v7 = vpack.i.b16 %v1859_v19, %v1858_v32  ;;  %v2867_v0 = vpack.i.b16 %v2866_v6, %v2865_v30  ;;  %v381_v28 = vpack.i.b16 %v13094_v63, %v13093_v27  ;;  %v13095_v41 = vld [vmem:[#allocation37_spill] sm:$0xff] }
 0x18a   : > { %v9726_v9 = vpop.permute.xlu1 %449  ;;  %v9728_v13 = vpop.permute.xlu0 %1609  ;;  %v2546_v60 = vpack.i.b16 %v9666_v25, %v9709_v43  ;;  %v2791_v3 = vcombine.high %v9652_v59, %v13002_v24  ;;  %v2825_v32 = vcombine.high %v9649_v35, %v13002_v24  ;;  %v9773_v22 = vrot.slane %v2423_v16, %v8464_v8 }
 0x18b   : > { %v9776_v33 = vrot.slane %v2389_v1, %v8464_v8  ;;  %v7635_v2 = vcombine.low %v1860_v7, %v1860_v7  ;;  %v7690_v21 = vcombine.low %v2867_v0, %v2867_v0  ;;  %v2841_v35 = vshrl.u32 %v9700_v40, 16 }
 0x18c   : > { %2562 = vrot.lane.b32.xlu1 %v7666_v31, %s7951_s24  ;;  %1939 = vrot.lane.b32.xlu0 %v7642_v38, %s7956_s29  ;;  %v2519_v31 = vpack.i.b16 %v2518_v57, %v2517_v48  ;;  %v13096_v38 = vld [vmem:[#allocation38_spill] sm:$0xff]  ;;  %v2842_v30 = vshrl.u32 %v9697_v10, 16  ;;  %v7675_v16 = vcombine.low %v2546_v60, %v2546_v60  ;;  %v2548_v11 = vshrl.u32 %v9666_v25, 16 }
 0x18d   : > { %v13097_v52 = vpack.i.b16 %v13095_v41, %v13096_v38  ;;  %v486_v48 = vsel %vm483_vm6, %v381_v28, %v9408_v46  ;;  %v2870_v1 = vpack.i.b16 %v2825_v32, %v2791_v3  ;;  %v2522_v7 = vpack.i.b16 %v9773_v22, %v9776_v33 }
 0x18e   : > { %v9753_v49 = vpop.permute.xlu1 %1092  ;;  %v482_v12 = vpop.permute.xlu0 %481  ;;  %v7667_v57 = vcombine.low %v2519_v31, %v2519_v31  ;;  %v2872_v27 = vshrl.u32 %v2825_v32, 16  ;;  %v2507_v41 = vcombine.high %v9666_v25, %v13002_v24 }
 0x18f   : > { %v519_v17 = vsel %vm502_vm12, %v517_v53, %v482_v12  ;;  %v826_v42 = vsel %vm483_vm6, %v13097_v52, %v9306_v62  ;;  %v2843_v53 = vpack.i.b16 %v2842_v30, %v2841_v35  ;;  %v7668_v38 = vcombine.low %v2522_v7, %v2522_v7 }
 0x190   : > { %2888 = vrot.lane.b32.xlu1 %v7682_v45, %s7953_s26  ;;  %v3299_v50 = vsel %vm3294_vm13, %v519_v17, %v3281_v36  ;;  %2594 = vrot.lane.b32.xlu0 %v7674_v26, %s7952_s25  ;;  %v828_v4 = vsel %vm487_vm7, %v826_v42, %v9386_v37  ;;  %v2547_v37 = vshrl.u32 %v9709_v43, 16  ;;  %v7691_v45 = vcombine.low %v2870_v1, %v2870_v1 }
 0x191   : > { %3328 = vmatprep.subr.bf16.mxu0 %v3299_v50  ;;  %v830_v59 = vsel %vm490_vm8, %v828_v4, %v9428_v61  ;;  %v7683_v28 = vcombine.low %v2843_v53, %v2843_v53  ;;  %v2757_v50 = vcombine.high %v9697_v10, %v13002_v24  ;;  %v2524_v52 = vshrl.u32 %v9773_v22, 16  ;;  %v13100_v53 = vld [vmem:[#allocation67_spill] sm:$0xff] }
 0x192   : > { %v9780_v19 = vpop.permute.xlu1 %1581  ;;  %v9782_v62 = vpop.permute.xlu0 %1124  ;;  %v832_v6 = vsel %vm493_vm9, %v830_v59, %v9480_v58  ;;  %v489_v58 = vsel %vm487_vm7, %v486_v48, %v9452_v54  ;;  %v2549_v54 = vpack.i.b16 %v2548_v11, %v2547_v37  ;;  %v13099_v11 = vld [vmem:[#allocation68_spill] sm:$0xff] }
 0x193   : > { %v834_v61 = vsel %vm496_vm10, %v832_v6, %v9532_v29  ;;  %v492_v46 = vsel %vm490_vm8, %v489_v58, %v9506_v14  ;;  %v3147_v48 = vshrl.u32 %v13099_v11, 16 }
 0x194   : > { %1911 = vrot.lane.b32.xlu1 %v7635_v2, %s7956_s29  ;;  %2920 = vrot.lane.b32.xlu0 %v7690_v21, %s7954_s27  ;;  %v836_v44 = vsel %vm499_vm11, %v834_v61, %v9586_v18  ;;  %v495_v12 = vsel %vm493_vm9, %v492_v46, %v9570_v47  ;;  %v2871_v47 = vshrl.u32 %v2791_v3, 16  ;;  %v7676_v31 = vcombine.low %v2549_v54, %v2549_v54  ;;  %v13098_v21 = vld [vmem:[#allocation66_spill] sm:$0xff] }
 0x195   : > { %v838_v29 = vsel %vm502_vm12, %v836_v44, %v9675_v23  ;;  %v498_v18 = vsel %vm496_vm10, %v495_v12, %v9638_v39  ;;  %v2723_v39 = vcombine.high %v9700_v40, %v13002_v24  ;;  %v2523_v40 = vshrl.u32 %v9776_v33, 16 }
 0x196   : > { %v9802_v26 = vpop.permute.xlu1 %2233  ;;  %v9804_v36 = vpop.permute.xlu0 %1613  ;;  %v3280_v14 = vrot.slane %v838_v29, 4  ;;  %v501_v23 = vsel %vm499_vm11, %v498_v18, %v9726_v9  ;;  %v2473_v9 = vcombine.high %v9709_v43, %v13002_v24  ;;  %v2873_v3 = vpack.i.b16 %v2872_v27, %v2871_v47 }
 0x197   : > { %v2846_v32 = vpack.i.b16 %v2757_v50, %v2723_v39  ;;  %v2525_v25 = vpack.i.b16 %v2524_v52, %v2523_v40  ;;  %v3148_v35 = vshrl.u32 %v13098_v21, 16  ;;  %v2847_v6 = vshrl.u32 %v2723_v39, 16 }
 0x198   : > { %2598 = vrot.lane.b32.xlu1 %v7675_v16, %s7953_s26  ;;  %2566 = vrot.lane.b32.xlu0 %v7667_v57, %s7952_s25  ;;  %v2552_v43 = vpack.i.b16 %v2507_v41, %v2473_v9  ;;  %v7692_v59 = vcombine.low %v2873_v3, %v2873_v3  ;;  %v2848_v16 = vshrl.u32 %v2757_v50, 16  ;;  %v2405_v61 = vcombine.high %v9776_v33, %v13002_v24  ;;  %v13101_v33 = vld [vmem:[#allocation69_spill] sm:$0xff] }
 0x199   : > { %v7684_v30 = vcombine.low %v2846_v32, %v2846_v32  ;;  %v2439_v57 = vcombine.high %v9773_v22, %v13002_v24  ;;  %v7669_v1 = vcombine.low %v2525_v25, %v2525_v25  ;;  %v3149_v46 = vpack.i.b16 %v3148_v35, %v3147_v48  ;;  %v13102_v32 = vld [vmem:[#allocation49_spill] sm:$0xff]  ;;  %v13105_v35 = vld [vmem:[#allocation60_spill] sm:$0xff] }
 0x19a   : > { %v9820_v17 = vpop.permute.xlu1 %1096  ;;  %v454_v0 = vpop.permute.xlu0 %453  ;;  %v7677_v37 = vcombine.low %v2552_v43, %v2552_v43  ;;  %v2849_v29 = vpack.i.b16 %v2848_v16, %v2847_v6  ;;  %v3172_v12 = vshrl.u32 %v13100_v53, 16  ;;  %v3171_v18 = vshrl.u32 %v13101_v33, 16  ;;  %v13103_v43 = vld [vmem:[#allocation62_spill] sm:$0xff] }
 0x19b   : > { %v504_v63 = vsel %vm502_vm12, %v501_v23, %v454_v0  ;;  %v2528_v54 = vpack.i.b16 %v2439_v57, %v2405_v61  ;;  %v2554_v22 = vshrl.u32 %v2507_v41, 16  ;;  %v7693_v23 = vcombine.low %v3149_v46, %v3149_v46 }
 0x19c   : > { %2924 = vrot.lane.b32.xlu1 %v7691_v45, %s7955_s28  ;;  %v3296_v60 = vsel %vm3294_vm13, %v504_v63, %v3280_v14  ;;  %2892 = vrot.lane.b32.xlu0 %v7683_v28, %s7954_s27  ;;  %v2553_v45 = vshrl.u32 %v2473_v9, 16  ;;  %v3074_v0 = vcombine.high %v13098_v21, %v13002_v24  ;;  %v7685_v47 = vcombine.low %v2849_v29, %v2849_v29  ;;  %v13108_v29 = vld [vmem:[#allocation61_spill] sm:$0xff] }
 0x19d   : > { %3329 = vmatpush1.bf16.msra.mxu0 %v3296_v60  ;;  %v3173_v27 = vpack.i.b16 %v3172_v12, %v3171_v18  ;;  %v7670_v63 = vcombine.low %v2528_v54, %v2528_v54  ;;  %v3040_v28 = vcombine.high %v13099_v11, %v13002_v24  ;;  %v2529_v39 = vshrl.u32 %v2405_v61, 16  ;;  %v13109_v12 = vld [vmem:[#allocation64_spill] sm:$0xff] }
 0x19e   : > { %v9836_v10 = vpop.permute.xlu1 %1585  ;;  %v9838_v42 = vpop.permute.xlu0 %1128  ;;  %v2530_v50 = vshrl.u32 %v2439_v57, 16  ;;  %v2555_v60 = vpack.i.b16 %v2554_v22, %v2553_v45  ;;  %v3108_v3 = vcombine.high %v13101_v33, %v13002_v24  ;;  %v3127_v25 = vcombine.high %v13103_v43, %v13102_v32  ;;  %v13106_v57 = vld [vmem:[#allocation63_spill] sm:$0xff]  ;;  %v13110_v32 = vld [vmem:[#allocation22_spill] sm:$0xff] }
 0x19f   : > { %v3152_v41 = vpack.i.b16 %v3074_v0, %v3040_v28  ;;  %v7700_v40 = vcombine.low %v3173_v27, %v3173_v27  ;;  %v3025_v54 = vcombine.high %v13109_v12, %v13108_v29  ;;  %v3154_v45 = vshrl.u32 %v3074_v0, 16  ;;  %v13111_v43 = vld [vmem:[#allocation23_spill] sm:$0xff]  ;;  %v13112_v29 = vld [vmem:[#allocation24_spill] sm:$0xff] }
 0x1a0   : > { %2602 = vrot.lane.b32.xlu1 %v7676_v31, %s7954_s27  ;;  %2570 = vrot.lane.b32.xlu0 %v7668_v38, %s7953_s26  ;;  %v3142_v38 = vcombine.high %v13100_v53, %v13002_v24  ;;  %v2531_v52 = vpack.i.b16 %v2530_v50, %v2529_v39  ;;  %v7678_v6 = vcombine.low %v2555_v60, %v2555_v60 }
 0x1a1   : > { %v7694_v48 = vcombine.low %v3152_v41, %v3152_v41  ;;  %v3039_v0 = vrot.slane %v3025_v54, %v8464_v8 }
 0x1a2   : > { %v9842_v4 = vpop.permute.xlu1 %2205  ;;  %v9844_v2 = vpop.permute.xlu0 %1617  ;;  %v3178_v61 = vshrl.u32 %v3142_v38, 16  ;;  %v3176_v18 = vpack.i.b16 %v3142_v38, %v3108_v3  ;;  %v7671_v22 = vcombine.low %v2531_v52, %v2531_v52 }
 0x1a4   : > { %2928 = vrot.lane.b32.xlu1 %v7692_v59, %s7956_s29  ;;  %2896 = vrot.lane.b32.xlu0 %v7684_v30, %s7955_s28  ;;  %v13104_v59 = vld [vmem:[#allocation36_spill] sm:$0xff]  ;;  %v7701_v38 = vcombine.low %v3176_v18, %v3176_v18 }
 0x1a5   : > { %v3059_v30 = vcombine.high %v13105_v35, %v13104_v59 }
 0x1a6   : > { %v9854_v58 = vpop.permute.xlu1 %1100  ;;  %v9856_v44 = vpop.permute.xlu0 %2237 }
 0x1a7   : > { %v3073_v27 = vrot.slane %v3059_v30, %v8464_v8 }
 0x1a8   : > { %2606 = vrot.lane.b32.xlu1 %v7677_v37, %s7955_s28  ;;  %2574 = vrot.lane.b32.xlu0 %v7669_v1, %s7954_s27  ;;  %v13107_v1 = vld [vmem:[#allocation65_spill] sm:$0xff] }
 0x1a9   : > { %v3093_v46 = vcombine.high %v13107_v1, %v13106_v57  ;;  %v3159_v57 = vshrl.u32 %v3039_v0, 16 }
 0x1aa   : > { %v9862_v7 = vpop.permute.xlu1 %1589  ;;  %v9864_v14 = vpop.permute.xlu0 %1132 }
 0x1ab   : > { %v3107_v41 = vrot.slane %v3093_v46, %v8464_v8 }
 0x1ac   : > { %3194 = vrot.lane.b32.xlu1 %v7693_v23, %s7950_s23  ;;  %2900 = vrot.lane.b32.xlu0 %v7685_v47, %s7956_s29  ;;  %v3177_v23 = vshrl.u32 %v3108_v3, 16  ;;  %v3141_v47 = vrot.slane %v3127_v25, %v8464_v8  ;;  %v3160_v3 = vshrl.u32 %v3073_v27, 16 }
 0x1ae   : > { %v9872_v31 = vpop.permute.xlu1 %1915  ;;  %v9874_v9 = vpop.permute.xlu0 %1621  ;;  %v3179_v60 = vpack.i.b16 %v3178_v61, %v3177_v23  ;;  %v3184_v52 = vshrl.u32 %v3141_v47, 16  ;;  %v3182_v35 = vpack.i.b16 %v3141_v47, %v3107_v41  ;;  %v3183_v61 = vshrl.u32 %v3107_v41, 16 }
 0x1af   : > { %v3161_v46 = vpack.i.b16 %v3160_v3, %v3159_v57 }
 0x1b0   : > { %2578 = vrot.lane.b32.xlu1 %v7670_v63, %s7955_s28  ;;  %3222 = vrot.lane.b32.xlu0 %v7700_v40, %s7950_s23  ;;  %v3153_v63 = vshrl.u32 %v3040_v28, 16  ;;  %v1545_v28 = vpack.i.b16 %v13111_v43, %v13110_v32  ;;  %v7702_v59 = vcombine.low %v3179_v60, %v3179_v60  ;;  %v3185_v1 = vpack.i.b16 %v3184_v52, %v3183_v61  ;;  %v13113_v32 = vld [vmem:[#allocation6_spill] sm:$0xff]  ;;  %v13114_v43 = vld [vmem:[#allocation39_spill] sm:$0xff] }
 0x1b1   : > { %v7703_v18 = vcombine.low %v3182_v35, %v3182_v35  ;;  %v3075_v60 = vcombine.high %v3073_v27, %v13002_v24  ;;  %v7697_v3 = vcombine.low %v3161_v46, %v3161_v46 }
 0x1b2   : > { %v9886_v16 = vpop.permute.xlu1 %2241  ;;  %v9888_v37 = vpop.permute.xlu0 %2209  ;;  %v3155_v40 = vpack.i.b16 %v3154_v45, %v3153_v63  ;;  %v1640_v12 = vsel %vm483_vm6, %v1545_v28, %v13112_v29  ;;  %v3143_v45 = vcombine.high %v3141_v47, %v13002_v24  ;;  %v7704_v47 = vcombine.low %v3185_v1, %v3185_v1  ;;  %v13115_v28 = vld [vmem:[#allocation40_spill] sm:$0xff] }
 0x1b3   : > { %v3166_v57 = vshrl.u32 %v3075_v60, 16 }
 0x1b4   : > { %3198 = vrot.lane.b32.xlu1 %v7694_v48, %s7951_s24  ;;  %2610 = vrot.lane.b32.xlu0 %v7678_v6, %s7956_s29  ;;  %v7695_v6 = vcombine.low %v3155_v40, %v3155_v40  ;;  %v3158_v48 = vpack.i.b16 %v3073_v27, %v3039_v0  ;;  %v3109_v40 = vcombine.high %v3107_v41, %v13002_v24 }
 0x1b5   : > { %v13116_v27 = vpack.i.b16 %v13114_v43, %v13115_v28 }
 0x1b6   : > { %v9898_v39 = vpop.permute.xlu1 %1136  ;;  %v9900_v50 = vpop.permute.xlu0 %1104  ;;  %v7696_v63 = vcombine.low %v3158_v48, %v3158_v48  ;;  %v3188_v41 = vpack.i.b16 %v3143_v45, %v3109_v40 }
 0x1b8   : > { %2582 = vrot.lane.b32.xlu1 %v7671_v22, %s7956_s29  ;;  %3226 = vrot.lane.b32.xlu0 %v7701_v38, %s7951_s24  ;;  %v1642_v22 = vsel %vm487_vm7, %v1640_v12, %v9572_v34  ;;  %v3041_v34 = vcombine.high %v3039_v0, %v13002_v24  ;;  %v13118_v12 = vld [vmem:[#allocation47_spill] sm:$0xff] }
 0x1b9   : > { %v1644_v38 = vsel %vm490_vm8, %v1642_v22, %v9622_v20 }
 0x1ba   : > { %v9908_v25 = vpop.permute.xlu1 %1887  ;;  %v9910_v30 = vpop.permute.xlu0 %1593  ;;  %v1646_v52 = vsel %vm493_vm9, %v1644_v38, %v9728_v13  ;;  %v3164_v0 = vpack.i.b16 %v3075_v60, %v3041_v34 }
 0x1bb   : > { %v1648_v20 = vsel %vm496_vm10, %v1646_v52, %v9804_v36  ;;  %v3189_v36 = vshrl.u32 %v3109_v40, 16 }
 0x1bc   : > { %3230 = vrot.lane.b32.xlu1 %v7702_v59, %s7952_s25  ;;  %3202 = vrot.lane.b32.xlu0 %v7695_v6, %s7952_s25  ;;  %v1159_v59 = vsel %vm483_vm6, %v13116_v27, %v13113_v32  ;;  %v3190_v6 = vshrl.u32 %v3143_v45, 16  ;;  %v1650_v48 = vsel %vm499_vm11, %v1648_v20, %v9844_v2  ;;  %v13117_v2 = vld [vmem:[#allocation48_spill] sm:$0xff]  ;;  %v7698_v40 = vcombine.low %v3164_v0, %v3164_v0  ;;  %v13120_v20 = vld [vmem:[#allocation45_spill] sm:$0xff] }
 0x1bd   : > { %v1161_v13 = vsel %vm487_vm7, %v1159_v59, %v9706_v56  ;;  %v1652_v46 = vsel %vm502_vm12, %v1650_v48, %v9874_v9  ;;  %v3165_v56 = vshrl.u32 %v3041_v34, 16 }
 0x1be   : > { %v9916_v54 = vpop.permute.xlu1 %2213  ;;  %v9921_v23 = vpop.permute.xlu0 %1919  ;;  %v1163_v1 = vsel %vm490_vm8, %v1161_v13, %v9782_v62  ;;  %v7705_v62 = vcombine.low %v3188_v41, %v3188_v41  ;;  %v3285_v9 = vrot.slane %v1652_v46, 4  ;;  %v13121_v41 = vld [vmem:[#allocation46_spill] sm:$0xff] }
 0x1bf   : > { %v1165_v29 = vsel %vm493_vm9, %v1163_v1, %v9838_v42  ;;  %v3167_v42 = vpack.i.b16 %v3166_v57, %v3165_v56 }
 0x1c0   : > { %3234 = vrot.lane.b32.xlu1 %v7703_v18, %s7953_s26  ;;  %3206 = vrot.lane.b32.xlu0 %v7696_v63, %s7953_s26  ;;  %v1521_v18 = vpack.i.b16 %v13118_v12, %v13117_v2  ;;  %v1167_v45 = vsel %vm496_vm10, %v1165_v29, %v9864_v14  ;;  %v3191_v63 = vpack.i.b16 %v3190_v6, %v3189_v36  ;;  %v13119_v14 = vld [vmem:[#allocation52_spill] sm:$0xff] }
 0x1c1   : > { %v1169_v60 = vsel %vm499_vm11, %v1167_v45, %v9898_v39  ;;  %v7699_v28 = vcombine.low %v3167_v42, %v3167_v42  ;;  %v13122_v6 = vpack.i.b16 %v13120_v20, %v13121_v41  ;;  %v13126_v20 = vld [vmem:[#allocation26_spill] sm:$0xff] }
 0x1c2   : > { %v1109_v35 = vpop.permute.xlu1 %1108  ;;  %v9943_v61 = vpop.permute.xlu0 %2245  ;;  %v7706_v32 = vcombine.low %v3191_v63, %v3191_v63  ;;  %v13127_v41 = vld [vmem:[#allocation54_spill] sm:$0xff] }
 0x1c3   : > { %v1144_v13 = vsel %vm483_vm6, %v13122_v6, %v9673_v51  ;;  %v13128_v6 = vpack.i.b16 %v13126_v20, %v13127_v41 }
 0x1c4   : > { %3238 = vrot.lane.b32.xlu1 %v7704_v47, %s7954_s27  ;;  %3210 = vrot.lane.b32.xlu0 %v7697_v3, %s7954_s27  ;;  %v1625_v3 = vsel %vm483_vm6, %v1521_v18, %v13119_v14 }
 0x1c5   : > { %v1627_v39 = vsel %vm487_vm7, %v1625_v3, %v9624_v55 }
 0x1c6   : > { %v9957_v22 = vpop.permute.xlu1 %1891  ;;  %v1141_v38 = vpop.permute.xlu0 %1140  ;;  %v1629_v27 = vsel %vm490_vm8, %v1627_v39, %v9704_v5  ;;  %v1146_v5 = vsel %vm487_vm7, %v1144_v13, %v9753_v49  ;;  %v1958_v13 = vsel %vm483_vm6, %v13128_v6, %v9872_v31 }
 0x1c7   : > { %v1171_v52 = vsel %vm502_vm12, %v1169_v60, %v1141_v38  ;;  %v1631_v59 = vsel %vm493_vm9, %v1629_v27, %v9780_v19  ;;  %v1148_v57 = vsel %vm490_vm8, %v1146_v5, %v9820_v17 }
 0x1c8   : > { %3242 = vrot.lane.b32.xlu1 %v7705_v62, %s7955_s28  ;;  %3214 = vrot.lane.b32.xlu0 %v7698_v40, %s7955_s28  ;;  %v3305_v47 = vsel %vm3294_vm13, %v1171_v52, %v3285_v9  ;;  %v1633_v55 = vsel %vm496_vm10, %v1631_v59, %v9836_v10  ;;  %v1150_v51 = vsel %vm493_vm9, %v1148_v57, %v9854_v58  ;;  %v13123_v52 = vld [vmem:[#allocation29_spill] sm:$0xff] }
 0x1c9   : > { %3330 = vmatprep.subr.bf16.mxu0 %v3305_v47  ;;  %v1635_v0 = vsel %vm499_vm11, %v1633_v55, %v9862_v7  ;;  %v1152_v10 = vsel %vm496_vm10, %v1150_v51, %v9900_v50  ;;  %v13124_v47 = vld [vmem:[#allocation31_spill] sm:$0xff] }
 0x1ca   : > { %v9967_v34 = vpop.permute.xlu1 %2217  ;;  %v1924_v43 = vpop.permute.xlu0 %1923  ;;  %v1637_v1 = vsel %vm502_vm12, %v1635_v0, %v9910_v30  ;;  %v1154_v49 = vsel %vm499_vm11, %v1152_v10, %v1109_v35  ;;  %v13125_v14 = vpack.i.b16 %v13123_v52, %v13124_v47 }
 0x1cb   : > { %v3284_v36 = vrot.slane %v1637_v1, 4  ;;  %v13130_v1 = vld [vmem:[#allocation51_spill] sm:$0xff] }
 0x1cc   : > { %3246 = vrot.lane.b32.xlu1 %v7706_v32, %s7956_s29  ;;  %3218 = vrot.lane.b32.xlu0 %v7699_v28, %s7956_s29  ;;  %v2276_v3 = vsel %vm483_vm6, %v13125_v14, %v9802_v26 }
 0x1cd   : > { %v2278_v39 = vsel %vm487_vm7, %v2276_v3, %v9856_v44  ;;  %v1960_v44 = vsel %vm487_vm7, %v1958_v13, %v9921_v23 }
 0x1ce   : > { %v9984_v48 = vpop.permute.xlu1 %2904  ;;  %v2250_v19 = vpop.permute.xlu0 %2249  ;;  %v2280_v27 = vsel %vm490_vm8, %v2278_v39, %v9886_v16  ;;  %v1962_v16 = vsel %vm490_vm8, %v1960_v44, %v1924_v43 }
 0x1cf   : > { %v2282_v59 = vsel %vm493_vm9, %v2280_v27, %v9943_v61  ;;  %v13129_v61 = vld [vmem:[#allocation50_spill] sm:$0xff] }
 0x1d0   : > { %v2284_v26 = vsel %vm496_vm10, %v2282_v59, %v2250_v19  ;;  %v13131_v51 = vpack.i.b16 %v13129_v61, %v13130_v1  ;;  %v13138_v1 = vld [vmem:[#allocation25_spill] sm:$0xff] }
 0x1d2   : > { %v1896_v46 = vpop.permute.xlu1 %1895  ;;  %v1113_v29 = vpop.permute.xlu0 %1112  ;;  %v2261_v10 = vsel %vm483_vm6, %v13131_v51, %v9842_v4  ;;  %v2534_v51 = vpack.i.b16 %v13138_v1, %v9518_v15 }
 0x1d3   : > { %v1156_v7 = vsel %vm502_vm12, %v1154_v49, %v1113_v29  ;;  %v2263_v19 = vsel %vm487_vm7, %v2261_v10, %v9888_v37 }
 0x1d4   : > { %v3302_v56 = vsel %vm3294_vm13, %v1156_v7, %v3284_v36  ;;  %v2265_v49 = vsel %vm490_vm8, %v2263_v19, %v9916_v54 }
 0x1d5   : > { %3331 = vmatpush1.bf16.msra.mxu0 %v3302_v56  ;;  %v2267_v56 = vsel %vm493_vm9, %v2265_v49, %v9967_v34  ;;  %v13139_v49 = vld [vmem:[#allocation58_spill] sm:$0xff] }
 0x1d6   : > { %v2222_v17 = vpop.permute.xlu1 %2221  ;;  %v1928_v2 = vpop.permute.xlu0 %1927 }
 0x1d7   : > { %v1964_v31 = vsel %vm493_vm9, %v1962_v16, %v1928_v2  ;;  %v13132_v2 = vld [vmem:[#allocation27_spill] sm:$0xff]  ;;  %v13135_v16 = vld [vmem:[#allocation30_spill] sm:$0xff] }
 0x1da   : > { %v10001_v12 = vpop.permute.xlu1 %2876  ;;  %v2254_v30 = vpop.permute.xlu0 %2253 }
 0x1db   : > { %v2286_v5 = vsel %vm499_vm11, %v2284_v26, %v2254_v30  ;;  %v13133_v30 = vld [vmem:[#allocation28_spill] sm:$0xff] }
 0x1de   : > { %v1900_v18 = vpop.permute.xlu1 %1899  ;;  %v10003_v58 = vpop.permute.xlu0 %2908 }
 0x1e2   : > { %v2226_v45 = vpop.permute.xlu1 %2225  ;;  %v1932_v50 = vpop.permute.xlu0 %1931 }
 0x1e3   : > { %v1966_v23 = vsel %vm496_vm10, %v1964_v31, %v1932_v50  ;;  %v2269_v50 = vsel %vm496_vm10, %v2267_v56, %v2222_v17  ;;  %v13142_v56 = vld [vmem:[#allocation10_spill] sm:$0xff] }
 0x1e6   : > { %v10005_v62 = vpop.permute.xlu1 %2586  ;;  %v2258_v63 = vpop.permute.xlu0 %2257 }
 0x1e7   : > { %v2288_v57 = vsel %vm502_vm12, %v2286_v5, %v2258_v63  ;;  %v13134_v63 = vpack.i.b16 %v13132_v2, %v13133_v30  ;;  %v2629_v15 = vsel %vm483_vm6, %v2534_v51, %v10005_v62 }
 0x1e8   : > { %v3289_v43 = vrot.slane %v2288_v57, 4 }
 0x1e9   : > { %v1943_v37 = vsel %vm483_vm6, %v13134_v63, %v9908_v25 }
 0x1ea   : > { %v10007_v35 = vpop.permute.xlu1 %2912  ;;  %v10009_v9 = vpop.permute.xlu0 %2880  ;;  %v1945_v54 = vsel %vm487_vm7, %v1943_v37, %v9957_v22 }
 0x1eb   : > { %v1947_v34 = vsel %vm490_vm8, %v1945_v54, %v1896_v46 }
 0x1ec   : > { %v1949_v39 = vsel %vm493_vm9, %v1947_v34, %v1900_v18 }
 0x1ee   : > { %v1936_v60 = vpop.permute.xlu1 %1935  ;;  %v1904_v38 = vpop.permute.xlu0 %1903 }
 0x1ef   : > { %v1968_v29 = vsel %vm499_vm11, %v1966_v23, %v1936_v60  ;;  %v2271_v60 = vsel %vm499_vm11, %v2269_v50, %v2226_v45  ;;  %v1951_v25 = vsel %vm496_vm10, %v1949_v39, %v1904_v38 }
 0x1f2   : > { %v10011_v40 = vpop.permute.xlu1 %2558  ;;  %v2230_v42 = vpop.permute.xlu0 %2229 }
 0x1f3   : > { %v2273_v14 = vsel %vm502_vm12, %v2271_v60, %v2230_v42 }
 0x1f4   : > { %v3288_v27 = vrot.slane %v2273_v14, 4 }
 0x1f6   : > { %v10018_v32 = vpop.permute.xlu1 %2884  ;;  %v10022_v28 = vpop.permute.xlu0 %2590 }
 0x1fa   : > { %v1908_v55 = vpop.permute.xlu1 %1907  ;;  %v2917_v0 = vpop.permute.xlu0 %2916 }
 0x1fb   : > { %v1953_v17 = vsel %vm499_vm11, %v1951_v25, %v1908_v55  ;;  %v13136_v55 = vld [vmem:[#allocation34_spill] sm:$0xff] }
 0x1fc   : > { %v13137_v57 = vpack.i.b16 %v13135_v16, %v13136_v55  ;;  %v13145_v55 = vpack.i.b16 %v13098_v21, %v13099_v11 }
 0x1fe   : > { %v2563_v36 = vpop.permute.xlu1 %2562  ;;  %v1940_v7 = vpop.permute.xlu0 %1939  ;;  %v2947_v61 = vsel %vm483_vm6, %v13137_v57, %v9984_v48 }
 0x1ff   : > { %v1970_v4 = vsel %vm502_vm12, %v1968_v29, %v1940_v7  ;;  %v2949_v31 = vsel %vm487_vm7, %v2947_v61, %v10003_v58 }
 0x200   : > { %v3311_v52 = vsel %vm3294_vm13, %v1970_v4, %v3289_v43  ;;  %v2951_v23 = vsel %vm490_vm8, %v2949_v31, %v10007_v35  ;;  %v13140_v43 = vld [vmem:[#allocation59_spill] sm:$0xff]  ;;  %v13143_v4 = vld [vmem:[#allocation53_spill] sm:$0xff] }
 0x201   : > { %3332 = vmatprep.subr.bf16.mxu0 %v3311_v52  ;;  %v13141_v29 = vpack.i.b16 %v13139_v49, %v13140_v43  ;;  %v2510_v48 = vpack.i.b16 %v13143_v4, %v13142_v56  ;;  %v2953_v2 = vsel %vm493_vm9, %v2951_v23, %v2917_v0 }
 0x202   : > { %v2889_v47 = vpop.permute.xlu1 %2888  ;;  %v2595_v3 = vpop.permute.xlu0 %2594 }
 0x203   : > { %v2932_v7 = vsel %vm483_vm6, %v13141_v29, %v10001_v12  ;;  %v2631_v12 = vsel %vm487_vm7, %v2629_v15, %v10022_v28 }
 0x204   : > { %v2934_v58 = vsel %vm487_vm7, %v2932_v7, %v10009_v9  ;;  %v2633_v52 = vsel %vm490_vm8, %v2631_v12, %v2595_v3  ;;  %v2614_v9 = vsel %vm483_vm6, %v2510_v48, %v10011_v40  ;;  %v3319_v48 = vld [vmem:[%s12747_s2] sm:$0xf] }
 0x205   : > { %v2936_v63 = vsel %vm490_vm8, %v2934_v58, %v10018_v32  ;;  %v2616_v32 = vsel %vm487_vm7, %v2614_v9, %v2563_v36 }
 0x206   : > { %v1912_v59 = vpop.permute.xlu1 %1911  ;;  %v2921_v22 = vpop.permute.xlu0 %2920  ;;  %v2938_v0 = vsel %vm493_vm9, %v2936_v63, %v2889_v47 }
 0x207   : > { %v1955_v20 = vsel %vm502_vm12, %v1953_v17, %v1912_v59  ;;  %v2955_v30 = vsel %vm496_vm10, %v2953_v2, %v2921_v22 }
 0x208   : > { %v3308_v45 = vsel %vm3294_vm13, %v1955_v20, %v3288_v27 }
 0x209   : > { %3333 = vmatpush1.bf16.msra.mxu0 %v3308_v45 }
 0x20a   : > { %v2599_v41 = vpop.permute.xlu1 %2598  ;;  %v2567_v6 = vpop.permute.xlu0 %2566 }
 0x20b   : > { %v2635_v54 = vsel %vm493_vm9, %v2633_v52, %v2599_v41  ;;  %v2618_v47 = vsel %vm490_vm8, %v2616_v32, %v2567_v6 }
 0x20e   : > { %v2925_v46 = vpop.permute.xlu1 %2924  ;;  %v2893_v13 = vpop.permute.xlu0 %2892 }
 0x20f   : > { %v2957_v37 = vsel %vm499_vm11, %v2955_v30, %v2925_v46  ;;  %v2940_v60 = vsel %vm496_vm10, %v2938_v0, %v2893_v13 }
 0x212   : > { %v2603_v42 = vpop.permute.xlu1 %2602  ;;  %v2571_v26 = vpop.permute.xlu0 %2570 }
 0x213   : > { %v2637_v28 = vsel %vm496_vm10, %v2635_v54, %v2603_v42  ;;  %v2620_v40 = vsel %vm493_vm9, %v2618_v47, %v2571_v26 }
 0x216   : > { %v2929_v44 = vpop.permute.xlu1 %2928  ;;  %v2897_v18 = vpop.permute.xlu0 %2896 }
 0x217   : > { %v2959_v62 = vsel %vm502_vm12, %v2957_v37, %v2929_v44  ;;  %v2942_v34 = vsel %vm499_vm11, %v2940_v60, %v2897_v18 }
 0x218   : > { %v3293_v39 = vrot.slane %v2959_v62, 4 }
 0x21a   : > { %v2607_v5 = vpop.permute.xlu1 %2606  ;;  %v2575_v38 = vpop.permute.xlu0 %2574 }
 0x21b   : > { %v2639_v3 = vsel %vm499_vm11, %v2637_v28, %v2607_v5  ;;  %v2622_v59 = vsel %vm496_vm10, %v2620_v40, %v2575_v38  ;;  %v13144_v38 = vpack.i.b16 %v13100_v53, %v13101_v33 }
 0x21e   : > { %v3195_v10 = vpop.permute.xlu1 %3194  ;;  %v2901_v19 = vpop.permute.xlu0 %2900 }
 0x21f   : > { %v2944_v25 = vsel %vm502_vm12, %v2942_v34, %v2901_v19  ;;  %v3250_v57 = vsel %vm483_vm6, %v13145_v55, %v3195_v10 }
 0x220   : > { %v3292_v20 = vrot.slane %v2944_v25, 4 }
 0x222   : > { %v2579_v35 = vpop.permute.xlu1 %2578  ;;  %v3223_v50 = vpop.permute.xlu0 %3222 }
 0x223   : > { %v2624_v22 = vsel %vm499_vm11, %v2622_v59, %v2579_v35  ;;  %v3265_v16 = vsel %vm483_vm6, %v13144_v38, %v3223_v50  ;;  %v13146_v38 = vld [vmem:[#allocation3_spill] sm:$0xff] }
 0x226   : > { %v3199_v14 = vpop.permute.xlu1 %3198  ;;  %v2611_v27 = vpop.permute.xlu0 %2610 }
 0x227   : > { %v2641_v17 = vsel %vm502_vm12, %v2639_v3, %v2611_v27  ;;  %v3252_v51 = vsel %vm487_vm7, %v3250_v57, %v3199_v14 }
 0x228   : > { %v3317_v36 = vsel %vm3294_vm13, %v2641_v17, %v3293_v39 }
 0x229   : > { %3334 = vmatprep.subr.bf16.mxu0 %v3317_v36 }
 0x22a   : > { %v2583_v45 = vpop.permute.xlu1 %2582  ;;  %v3227_v6 = vpop.permute.xlu0 %3226 }
 0x22b   : > { %v2626_v41 = vsel %vm502_vm12, %v2624_v22, %v2583_v45  ;;  %v3267_v61 = vsel %vm487_vm7, %v3265_v16, %v3227_v6 }
 0x22c   : > { %v3314_v46 = vsel %vm3294_vm13, %v2626_v41, %v3292_v20 }
 0x22d   : > { %3335 = vmatpush1.bf16.msra.mxu0 %v3314_v46 }
 0x22e   : > { %v3231_v13 = vpop.permute.xlu1 %3230  ;;  %v3203_v42 = vpop.permute.xlu0 %3202 }
 0x22f   : > { %v3269_v31 = vsel %vm490_vm8, %v3267_v61, %v3231_v13  ;;  %v3254_v23 = vsel %vm490_vm8, %v3252_v51, %v3203_v42 }
 0x232   : > { %v3235_v26 = vpop.permute.xlu1 %3234  ;;  %v3207_v44 = vpop.permute.xlu0 %3206 }
 0x233   : > { %v3271_v49 = vsel %vm493_vm9, %v3269_v31, %v3235_v26  ;;  %v3256_v53 = vsel %vm493_vm9, %v3254_v23, %v3207_v44 }
 0x236   : > { %v3239_v18 = vpop.permute.xlu1 %3238  ;;  %v3211_v5 = vpop.permute.xlu0 %3210 }
 0x237   : > { %v3273_v33 = vsel %vm496_vm10, %v3271_v49, %v3239_v18  ;;  %v3258_v21 = vsel %vm496_vm10, %v3256_v53, %v3211_v5 }
 0x23a   : > { %v3243_v1 = vpop.permute.xlu1 %3242  ;;  %v3215_v19 = vpop.permute.xlu0 %3214 }
 0x23b   : > { %v3275_v11 = vsel %vm499_vm11, %v3273_v33, %v3243_v1  ;;  %v3260_v43 = vsel %vm499_vm11, %v3258_v21, %v3215_v19 }
 0x23e   : > { %v3247_v10 = vpop.permute.xlu1 %3246  ;;  %v3219_v7 = vpop.permute.xlu0 %3218 }
 0x23f   : > { %v3277_v29 = vsel %vm502_vm12, %v3275_v11, %v3247_v10  ;;  %v3262_v56 = vsel %vm502_vm12, %v3260_v43, %v3219_v7 }
 0x240   : > { %7707 = vmatprep.subr.msk.bf16.mxu0 %vm3294_vm13, %v3277_v29  ;;  %v3324_v4 = vsel %vm3294_vm13, %v3262_v56, 0 }
 0x241   : > { %3337 = vmatpush1.bf16.msra.mxu0 %v3324_v4 }
 0x244   : > { %7708 = vmatmul.mubr.msk.bf16.vlgmr.msra.gmra.mrb[0].mxu0 %vm12847_vm14, %v3319_v48 }
 0x317   : > { %v3362_v2 = vpop.f32.mrb[0].mxu0 }
 0x318   : > { %v3372_v15 = vmul.f32 %v3362_v2, %v3362_v2  ;;  %v3364_v58 = vpop.f32.mrb[1].mxu0 }
 0x319   : > { %v3369_v30 = vadd.f32 %v3364_v58, %v3362_v2  ;;  %v3373_v35 = vmul.f32 %v3364_v58, %v3364_v58  ;;  %v3366_v63 = vpop.f32.mrb[2].mxu0 }
 0x31a   : > { %v3367_v12 = vpop.f32.mrb[3].mxu0 }
 0x31b   : > { %3370 = vadd.xlane.f32.xlu0 %v3369_v30  ;;  %v3374_v37 = vadd.f32 %v3373_v35, %v3372_v15 }
 0x31d   : > { %3375 = vadd.xlane.f32.xlu1 %v3374_v37 }
 0x3a8   : > { %v3371_v50 = vpop.xlane.xlu0 %3370 }
 0x3a9   : > { %v3377_v0 = vmul.f32 0.00390625, %v3371_v50 }
 0x3aa   : > { %v3376_v52 = vpop.xlane.xlu1 %3375 }
 0x3ab   : > { %v3378_v62 = vmul.f32 0.00390625, %v3376_v52  ;;  %v3379_v9 = vmul.f32 %v3377_v0, %v3377_v0  ;;  %v3381_v32 = vsub.f32 %v3362_v2, %v3377_v0  ;;  %v3382_v39 = vsub.f32 %v3364_v58, %v3377_v0 }
 0x3ad   : > { %v3380_v54 = vsub.f32 %v3378_v62, %v3379_v9 }
 0x3af   : > { %v3383_v60 = vadd.f32 1e-05, %v3380_v54 }
 0x3b1   : > { %7933 = vrsqrt.f32 %v3383_v60 }
 0x3bb   : > { %v7934_v28 = vpop.eup %7933 }
 0x3bc   : > { %v3385_v34 = vmul.f32 %v7934_v28, %v3381_v32  ;;  %v3386_v3 = vmul.f32 %v7934_v28, %v3382_v39 }
 0x3be   : > { %v3387_v14 = vmax.f32 %v3385_v34, 0.0  ;;  %v3388_v25 = vmax.f32 %v3386_v3, 0.0 }
 0x3c0   : > { %v3389_v47 = vpack.c.bf16 %v3387_v14, %v3387_v14  ;;  %v3390_v27 = vpack.c.bf16 %v3388_v25, %v3388_v25 }
 0x3c2   : > { %3395 = vrot.lane.b32.xlu1 %v3389_v47, %s7955_s28  ;;  %3392 = vrot.lane.b32.xlu0 %v3389_v47, %s7956_s29 }
 0x3c6   : > { %3401 = vrot.lane.b32.xlu1 %v3389_v47, %s7953_s26  ;;  %3398 = vrot.lane.b32.xlu0 %v3389_v47, %s7954_s27 }
 0x3ca   : > { %3407 = vrot.lane.b32.xlu1 %v3389_v47, %s7951_s24  ;;  %3404 = vrot.lane.b32.xlu0 %v3389_v47, %s7952_s25 }
 0x3ce   : > { %3414 = vrot.lane.b32.xlu1 %v3390_v27, %s7956_s29  ;;  %3410 = vrot.lane.b32.xlu0 %v3389_v47, %s7950_s23 }
 0x3d2   : > { %3420 = vrot.lane.b32.xlu1 %v3390_v27, %s7954_s27  ;;  %3417 = vrot.lane.b32.xlu0 %v3390_v27, %s7955_s28 }
 0x3d6   : > { %3426 = vrot.lane.b32.xlu1 %v3390_v27, %s7952_s25  ;;  %3423 = vrot.lane.b32.xlu0 %v3390_v27, %s7953_s26 }
 0x3da   : > { %3432 = vrot.lane.b32.xlu1 %v3390_v27, %s7950_s23  ;;  %3429 = vrot.lane.b32.xlu0 %v3390_v27, %s7951_s24 }
 0x434   : > { %v3396_v40 = vpop.permute.xlu1 %3395  ;;  %v3393_v17 = vpop.permute.xlu0 %3392 }
 0x438   : > { %v3402_v59 = vpop.permute.xlu1 %3401  ;;  %v3399_v36 = vpop.permute.xlu0 %3398 }
 0x439   : > { %v3435_v5 = vcombine.low %v3389_v47, %v3402_v59 }
 0x43b   : > { %v3442_v49 = vrot.slane %v3435_v5, %v13146_v38 }
 0x43c   : > { %v3408_v20 = vpop.permute.xlu1 %3407  ;;  %v3405_v22 = vpop.permute.xlu0 %3404 }
 0x43d   : > { %v3443_v42 = vcombine.low %v3396_v40, %v3408_v20  ;;  %v3503_v26 = vcombine.low %v3393_v17, %v3405_v22 }
 0x43f   : > { %v3450_v61 = vrot.slane %v3443_v42, %v13146_v38  ;;  %v3510_v1 = vrot.slane %v3503_v26, %v13146_v38 }
 0x440   : > { %v3415_v45 = vpop.permute.xlu1 %3414  ;;  %v3411_v41 = vpop.permute.xlu0 %3410 }
 0x441   : > { %v3511_v13 = vcombine.low %v3399_v36, %v3411_v41  ;;  %v3467_v43 = vcombine.low %v3442_v49, %v3450_v61  ;;  %v3468_v29 = vcombine.high %v3442_v49, %v3450_v61 }
 0x443   : > { %v3518_v16 = vrot.slane %v3511_v13, %v13146_v38  ;;  %v3475_v12 = vrot.slane %v3467_v43, %v8464_v8  ;;  %v3482_v37 = vrot.slane %v3468_v29, %v8464_v8 }
 0x444   : > { %v3421_v6 = vpop.permute.xlu1 %3420  ;;  %v3418_v46 = vpop.permute.xlu0 %3417 }
 0x445   : > { %v3535_v53 = vcombine.low %v3510_v1, %v3518_v16  ;;  %v3536_v7 = vcombine.high %v3510_v1, %v3518_v16 }
 0x447   : > { %v3543_v15 = vrot.slane %v3535_v53, %v8464_v8  ;;  %v3550_v50 = vrot.slane %v3536_v7, %v8464_v8 }
 0x448   : > { %v3427_v44 = vpop.permute.xlu1 %3426  ;;  %v3424_v18 = vpop.permute.xlu0 %3423 }
 0x449   : > { %v3519_v55 = vcombine.low %v3415_v45, %v3427_v44  ;;  %v3451_v57 = vcombine.low %v3390_v27, %v3424_v18 }
 0x44b   : > { %v3526_v33 = vrot.slane %v3519_v55, %v13146_v38  ;;  %v3458_v21 = vrot.slane %v3451_v57, %v13146_v38 }
 0x44c   : > { %v3433_v51 = vpop.permute.xlu1 %3432  ;;  %v3430_v31 = vpop.permute.xlu0 %3429 }
 0x44d   : > { %v3527_v19 = vcombine.low %v3421_v6, %v3433_v51  ;;  %v3459_v23 = vcombine.low %v3418_v46, %v3430_v31 }
 0x44f   : > { %v3534_v11 = vrot.slane %v3527_v19, %v13146_v38  ;;  %v3466_v10 = vrot.slane %v3459_v23, %v13146_v38 }
 0x451   : > { %v3551_v56 = vcombine.low %v3526_v33, %v3534_v11  ;;  %v3552_v4 = vcombine.high %v3526_v33, %v3534_v11  ;;  %v3483_v48 = vcombine.low %v3458_v21, %v3466_v10  ;;  %v3484_v2 = vcombine.high %v3458_v21, %v3466_v10 }
 0x453   : > { %v3559_v58 = vrot.slane %v3551_v56, %v8464_v8  ;;  %v3566_v30 = vrot.slane %v3552_v4, %v8464_v8  ;;  %v3491_v35 = vrot.slane %v3483_v48, %v8464_v8  ;;  %v3498_v63 = vrot.slane %v3484_v2, %v8464_v8 }
 0x455   : > { %v3567_v0 = vcombine.low %v3543_v15, %v3559_v58  ;;  %v3568_v52 = vcombine.high %v3543_v15, %v3559_v58  ;;  %v3569_v62 = vcombine.low %v3550_v50, %v3566_v30  ;;  %v3499_v9 = vcombine.low %v3475_v12, %v3491_v35 }
 0x456   : > { %v3500_v54 = vcombine.high %v3475_v12, %v3491_v35  ;;  %v3501_v60 = vcombine.low %v3482_v37, %v3498_v63  ;;  %v3570_v47 = vcombine.high %v3550_v50, %v3566_v30  ;;  %v3502_v39 = vcombine.high %v3482_v37, %v3498_v63 }
 0x457   : > { %v3575_v32 = vshrl.u32 %v3567_v0, 16  ;;  %v3581_v28 = vshrl.u32 %v3568_v52, 16  ;;  %v3574_v34 = vshrl.u32 %v3499_v9, 16  ;;  %v3573_v3 = vpack.i.b16 %v3567_v0, %v3499_v9 }
 0x458   : > { %v3580_v14 = vshrl.u32 %v3500_v54, 16  ;;  %v3579_v25 = vpack.i.b16 %v3568_v52, %v3500_v54  ;;  %v3587_v27 = vshrl.u32 %v3569_v62, 16  ;;  %v3586_v40 = vshrl.u32 %v3501_v60, 16 }
 0x459   : > { %v10176_v17 = vpack.i.b16 %v3575_v32, %v3574_v34  ;;  %v7709_v36 = vcombine.low %v3573_v3, %v3573_v3  ;;  %v3593_v22 = vshrl.u32 %v3570_v47, 16  ;;  %v10182_v6 = vpack.i.b16 %v3569_v62, %v3501_v60 }
 0x45a   : > { %v3582_v59 = vpack.i.b16 %v3581_v28, %v3580_v14  ;;  %v7713_v41 = vcombine.low %v3579_v25, %v3579_v25  ;;  %v3592_v46 = vshrl.u32 %v3502_v39, 16  ;;  %v10187_v26 = vpack.i.b16 %v3587_v27, %v3586_v40 }
 0x45b   : > { %v10180_v20 = vcombine.low %v10176_v17, %v10176_v17  ;;  %v3631_v45 = vshrl.u32 %v7709_v36, 16  ;;  %v7717_v18 = vcombine.low %v10182_v6, %v10182_v6  ;;  %v3591_v5 = vpack.i.b16 %v3570_v47, %v3502_v39 }
 0x45c   : > { %v10185_v42 = vcombine.low %v3582_v59, %v3582_v59  ;;  %v3665_v44 = vshrl.u32 %v7713_v41, 16  ;;  %v10196_v55 = vcombine.low %v10187_v26, %v10187_v26  ;;  %v3594_v57 = vpack.i.b16 %v3593_v22, %v3592_v46 }
 0x45d   : > { %v3648_v13 = vshrl.u32 %v10180_v20, 16  ;;  %3916 = vrot.lane.b32.xlu0 %v3631_v45, %s7957_s6  ;;  %v10198_v61 = vcombine.high %v3582_v59, %v3582_v59  ;;  %v10202_v1 = vcombine.high %v3579_v25, %v3579_v25  ;;  %v3699_v51 = vshrl.u32 %v7717_v18, 16 }
 0x45e   : > { %v3682_v16 = vshrl.u32 %v10185_v42, 16  ;;  %v7721_v31 = vcombine.low %v3591_v5, %v3591_v5  ;;  %v3716_v19 = vshrl.u32 %v10196_v55, 16  ;;  %v10205_v23 = vcombine.low %v3594_v57, %v3594_v57 }
 0x45f   : > { %3918 = vrot.lane.b32.xlu1 %v3648_v13, %s7957_s6  ;;  %v3693_v49 = vshll.u32 %v10198_v61, 16  ;;  %v10208_v53 = vcombine.high %v3594_v57, %v3594_v57  ;;  %v3676_v33 = vshll.u32 %v10202_v1, 16  ;;  %v10213_v21 = vcombine.high %v3591_v5, %v3591_v5 }
 0x460   : > { %v3733_v11 = vshrl.u32 %v7721_v31, 16  ;;  %v10215_v10 = vrot.slane %v3631_v45, 7  ;;  %v3750_v43 = vshrl.u32 %v10205_v23, 16  ;;  %v3634_v56 = vshll.u32 %v7709_v36, 16 }
 0x461   : > { %3920 = vrot.lane.b32.xlu0 %v3665_v44, %s7957_s6  ;;  %v7736_v29 = vrot.slane %v3693_v49, 11  ;;  %v3761_v7 = vshll.u32 %v10208_v53, 16  ;;  %v7735_v4 = vrot.slane %v3676_v33, 11  ;;  %v3744_v48 = vshll.u32 %v10213_v21, 16 }
 0x462   : > { %v3636_v2 = vor.u32 %v3634_v56, %v10215_v10  ;;  %v10227_v15 = vrot.slane %v3665_v44, 7  ;;  %v3668_v35 = vshll.u32 %v7713_v41, 16  ;;  %v10236_v37 = vrot.slane %v3699_v51, 7 }
 0x463   : > { %3922 = vrot.lane.b32.xlu1 %v3682_v16, %s7957_s6  ;;  %v7909_v58 = vpack.i.bf16 %v7736_v29, %v7735_v4  ;;  %v7740_v30 = vrot.slane %v3761_v7, 11  ;;  %v7739_v63 = vrot.slane %v3744_v48, 11  ;;  %v10238_v50 = vcombine.high %v3573_v3, %v3573_v3 }
 0x464   : > { %v3670_v12 = vor.u32 %v3668_v35, %v10227_v15  ;;  %v10240_v52 = vrot.slane %v3648_v13, 7  ;;  %v3702_v62 = vshll.u32 %v7717_v18, 16  ;;  %v3651_v9 = vshll.u32 %v10180_v20, 16 }
 0x465   : > { %3924 = vrot.lane.b32.xlu0 %v3699_v51, %s7957_s6  ;;  %v7919_v0 = vpack.i.bf16 %v7740_v30, %v7739_v63  ;;  %v10246_v60 = vrot.slane %v3733_v11, 7  ;;  %v3639_v32 = vshrl.u32 %v10238_v50, 16  ;;  %v10250_v34 = vrot.slane %v3682_v16, 7 }
 0x466   : > { %v3704_v54 = vor.u32 %v3702_v62, %v10236_v37  ;;  %v3653_v28 = vor.u32 %v3651_v9, %v10240_v52  ;;  %v3736_v14 = vshll.u32 %v7721_v31, 16  ;;  %v3685_v47 = vshll.u32 %v10185_v42, 16 }
 0x467   : > { %3926 = vrot.lane.b32.xlu1 %v3716_v19, %s7957_s6  ;;  %v3641_v3 = vrot.slane %v3639_v32, 7  ;;  %v3673_v25 = vshrl.u32 %v10202_v1, 16  ;;  %v10259_v27 = vcombine.high %v10182_v6, %v10182_v6  ;;  %v10262_v59 = vrot.slane %v3716_v19, 7 }
 0x468   : > { %v3738_v39 = vor.u32 %v3736_v14, %v10246_v60  ;;  %v3687_v40 = vor.u32 %v3685_v47, %v10250_v34  ;;  %v7712_v36 = vcombine.high %v10176_v17, %v10176_v17  ;;  %v3719_v20 = vshll.u32 %v10196_v55, 16 }
 0x469   : > { %3928 = vrot.lane.b32.xlu0 %v3733_v11, %s7957_s6  ;;  %v3646_v22 = vrot.slane %v3641_v3, 4  ;;  %v3675_v45 = vrot.slane %v3673_v25, 7  ;;  %v3707_v41 = vshrl.u32 %v10259_v27, 16  ;;  %v10271_v46 = vrot.slane %v3750_v43, 7 }
 0x46a   : > { %v3721_v6 = vor.u32 %v3719_v20, %v10262_v59  ;;  %v3656_v13 = vshrl.u32 %v7712_v36, 16  ;;  %v3753_v17 = vshll.u32 %v10205_v23, 16  ;;  %v3741_v18 = vshrl.u32 %v10213_v21, 16 }
 0x46b   : > { %3930 = vrot.lane.b32.xlu1 %v3750_v43, %s7957_s6  ;;  %v3680_v42 = vrot.slane %v3675_v45, 4  ;;  %v3709_v44 = vrot.slane %v3707_v41, 7  ;;  %v3690_v55 = vshrl.u32 %v10198_v61, 16  ;;  %v7720_v57 = vcombine.high %v10187_v26, %v10187_v26 }
 0x46c   : > { %v3755_v5 = vor.u32 %v3753_v17, %v10271_v46  ;;  %v3658_v16 = vrot.slane %v3656_v13, 7  ;;  %v3743_v31 = vrot.slane %v3741_v18, 7  ;;  %v3659_v19 = vshll.u32 %v7712_v36, 16  ;;  %v3841_v18 = vld [vmem:[#allocation2] sm:$0xf] }
 0x46d   : > { %3766 = vrot.lane.b32.xlu0 %v3636_v2, %s7957_s6  ;;  %v3714_v51 = vrot.slane %v3709_v44, 4  ;;  %v3692_v11 = vrot.slane %v3690_v55, 7  ;;  %v3724_v43 = vshrl.u32 %v7720_v57, 16  ;;  %v3642_v29 = vshll.u32 %v10238_v50, 16 }
 0x46e   : > { %v3663_v23 = vrot.slane %v3658_v16, 4  ;;  %v3748_v56 = vrot.slane %v3743_v31, 4  ;;  %v7734_v4 = vrot.slane %v3659_v19, 11  ;;  %v3727_v2 = vshll.u32 %v7720_v57, 16  ;;  %v3858_v57 = vld [vmem:[#allocation2 + $0x18] sm:$0xf] }
 0x46f   : > { %7910 = vrot.lane.b32.xlu1 %v7909_v58, %s7957_s6  ;;  %v3697_v26 = vrot.slane %v3692_v11, 4  ;;  %v3726_v58 = vrot.slane %v3724_v43, 7  ;;  %v3758_v30 = vshrl.u32 %v10208_v53, 16  ;;  %v7733_v35 = vrot.slane %v3642_v29, 11  ;;  %v3851_v43 = vld [vmem:[#allocation2 + $0xc] sm:$0xf] }
 0x470   : > { %v3710_v63 = vshll.u32 %v10259_v27, 16  ;;  %v3644_v14 = vor.u32 %v3642_v29, %v3641_v3  ;;  %v3661_v25 = vor.u32 %v3659_v19, %v3658_v16  ;;  %v3688_v36 = vrot.slane %v10250_v34, 4 }
 0x471   : > { %3778 = vrot.lane.b32.xlu0 %v3670_v12, %s7957_s6  ;;  %v7904_v12 = vpack.i.bf16 %v7734_v4, %v7733_v35  ;;  %v3731_v62 = vrot.slane %v3726_v58, 4  ;;  %v3760_v50 = vrot.slane %v3758_v30, 7  ;;  %v3746_v34 = vor.u32 %v3744_v48, %v3743_v31  ;;  %v3886_v30 = vld [vmem:[#allocation2 + $0x48] sm:$0xf]  ;;  %v3865_v35 = vld [vmem:[#allocation2 + $0x24] sm:$0xf] }
 0x472   : > { %v7737_v9 = vrot.slane %v3710_v63, 11  ;;  %v3756_v41 = vrot.slane %v10271_v46, 4 }
 0x473   : > { %7920 = vrot.lane.b32.xlu1 %v7919_v0, %s7957_s6  ;;  %v7738_v0 = vrot.slane %v3727_v2, 11  ;;  %v3765_v32 = vrot.slane %v3760_v50, 4 }
 0x475   : > { %3790 = vrot.lane.b32.xlu0 %v3704_v54, %s7957_s6  ;;  %v7914_v54 = vpack.i.bf16 %v7738_v0, %v7737_v9 }
 0x477   : > { %3772 = vrot.lane.b32.xlu1 %v3653_v28, %s7957_s6  ;;  %v3637_v28 = vrot.slane %v10215_v10, 4  ;;  %v3678_v10 = vor.u32 %v3676_v33, %v3675_v45  ;;  %v3722_v33 = vrot.slane %v10262_v59, 4  ;;  %v3729_v45 = vor.u32 %v3727_v2, %v3726_v58 }
 0x478   : > { %v3763_v59 = vor.u32 %v3761_v7, %v3760_v50 }
 0x479   : > { %3802 = vrot.lane.b32.xlu0 %v3738_v39, %s7957_s6  ;;  %v3654_v39 = vrot.slane %v10240_v52, 4  ;;  %v3645_v27 = vsel %vm10295_vm1, %v3637_v28, %v3644_v14  ;;  %v3695_v52 = vor.u32 %v3693_v49, %v3692_v11  ;;  %v3739_v49 = vrot.slane %v10246_v60, 4 }
 0x47a   : > { %v3764_v21 = vsel %vm10295_vm1, %v3756_v41, %v3763_v59 }
 0x47b   : > { %3784 = vrot.lane.b32.xlu1 %v3687_v40, %s7957_s6  ;;  %v3671_v40 = vrot.slane %v10227_v15, 4  ;;  %v3662_v3 = vsel %vm10295_vm1, %v3654_v39, %v3661_v25  ;;  %v3705_v15 = vrot.slane %v10236_v37, 4  ;;  %v3696_v1 = vsel %vm10295_vm1, %v3688_v36, %v3695_v52  ;;  %v3893_v36 = vld [vmem:[#allocation2 + $0x54] sm:$0xf] }
 0x47c   : > { %v3730_v37 = vsel %vm10295_vm1, %v3722_v33, %v3729_v45 }
 0x47d   : > { %3770 = vrot.lane.b32.xlu0 %v3646_v22, %s7957_s6  ;;  %v3679_v20 = vsel %vm10295_vm1, %v3671_v40, %v3678_v10  ;;  %v3712_v22 = vor.u32 %v3710_v63, %v3709_v44  ;;  %v3862_v10 = vld [vmem:[#allocation2 + $0x20] sm:$0x1] }
 0x47f   : > { %3796 = vrot.lane.b32.xlu1 %v3721_v6, %s7957_s6  ;;  %v3713_v61 = vsel %vm10295_vm1, %v3705_v15, %v3712_v22  ;;  %v3747_v6 = vsel %vm10295_vm1, %v3739_v49, %v3746_v34  ;;  %vm3846_vm1 = vcmask 131080   ;;  %v3855_v34 = vld [vmem:[#allocation2 + $0x14] sm:$0x1] }
 0x480   : > { %vm10361_vm14 = vmand %vm3846_vm1, %vm3627_vm15 }
 0x481   : > { %3782 = vrot.lane.b32.xlu0 %v3680_v42, %s7957_s6  ;;  %vm10400_vm15 = vmand %vm3846_vm1, %vm3839_vm3  ;;  %vm4295_vm3 = vcmask 142472  }
 0x483   : > { %3808 = vrot.lane.b32.xlu1 %v3755_v5, %s7957_s6 }
 0x485   : > { %3794 = vrot.lane.b32.xlu0 %v3714_v51, %s7957_s6 }
 0x487   : > { %3776 = vrot.lane.b32.xlu1 %v3663_v23, %s7957_s6  ;;  %v3872_v23 = vld [vmem:[#allocation2 + $0x30] sm:$0xf] }
 0x489   : > { %3806 = vrot.lane.b32.xlu0 %v3748_v56, %s7957_s6 }
 0x48b   : > { %3788 = vrot.lane.b32.xlu1 %v3697_v26, %s7957_s6 }
 0x48d   : > { %7905 = vrot.lane.b32.xlu0 %v7904_v12, %s7957_s6 }
 0x48f   : > { %3800 = vrot.lane.b32.xlu1 %v3731_v62, %s7957_s6 }
 0x491   : > { %7915 = vrot.lane.b32.xlu0 %v7914_v54, %s7957_s6  ;;  %v3848_v54 = vld [vmem:[#allocation2 + $0x8] sm:$0x1] }
 0x493   : > { %3812 = vrot.lane.b32.xlu1 %v3765_v32, %s7957_s6  ;;  %v3879_v32 = vld [vmem:[#allocation2 + $0x3c] sm:$0xf] }
 0x495   : > { %3768 = vrot.lane.b32.xlu0 %v3645_v27, %s7957_s6 }
 0x497   : > { %3774 = vrot.lane.b32.xlu1 %v3662_v3, %s7957_s6 }
 0x499   : > { %3780 = vrot.lane.b32.xlu0 %v3679_v20, %s7957_s6 }
 0x49b   : > { %3786 = vrot.lane.b32.xlu1 %v3696_v1, %s7957_s6 }
 0x49d   : > { %3792 = vrot.lane.b32.xlu0 %v3713_v61, %s7957_s6  ;;  %v3876_v61 = vld [vmem:[#allocation2 + $0x38] sm:$0x1] }
 0x49f   : > { %3798 = vrot.lane.b32.xlu1 %v3730_v37, %s7957_s6 }
 0x4a1   : > { %3804 = vrot.lane.b32.xlu0 %v3747_v6, %s7957_s6 }
 0x4a3   : > { %3810 = vrot.lane.b32.xlu1 %v3764_v21, %s7957_s6 }
 0x4cf   : > { %v3917_v48 = vpop.permute.xlu0 %3916 }
 0x4d1   : > { %v3919_v60 = vpop.permute.xlu1 %3918 }
 0x4d3   : > { %v3921_v13 = vpop.permute.xlu0 %3920 }
 0x4d5   : > { %v10339_v17 = vpop.permute.xlu1 %3922 }
 0x4d7   : > { %v3925_v46 = vpop.permute.xlu0 %3924 }
 0x4d9   : > { %v10341_v53 = vpop.permute.xlu1 %3926 }
 0x4db   : > { %v3929_v7 = vpop.permute.xlu0 %3928 }
 0x4dd   : > { %v10343_v42 = vpop.permute.xlu1 %3930 }
 0x4df   : > { %v3767_v5 = vpop.permute.xlu0 %3766 }
 0x4e0   : > { %v3842_v16 = vsel %vm10347_vm0, %v3767_v5, %v3841_v18 }
 0x4e1   : > { %v10353_v55 = vpop.permute.xlu1 %7910  ;;  %3843 = vst [vmem:[#allocation2] sm:$0xf] %v3842_v16 }
 0x4e3   : > { %v3779_v51 = vpop.permute.xlu0 %3778 }
 0x4e4   : > { %v3859_v31 = vsel %vm10347_vm0, %v3779_v51, %v3858_v57 }
 0x4e5   : > { %v10357_v19 = vpop.permute.xlu1 %7920  ;;  %3860 = vst [vmem:[#allocation2 + $0x18] sm:$0xf] %v3859_v31  ;;  %v3883_v31 = vld [vmem:[#allocation2 + $0x44] sm:$0x1] }
 0x4e7   : > { %v3791_v29 = vpop.permute.xlu0 %3790 }
 0x4e8   : > { %v3940_v56 = vld [vmem:[#allocation2] sm:$0x1]  ;;  %v3873_v4 = vsel %vm10347_vm0, %v3791_v29, %v3872_v23 }
 0x4e9   : > { %v3773_v2 = vpop.permute.xlu1 %3772  ;;  %v3941_v26 = vsel %vm10361_vm14, %v3917_v48, %v3940_v56  ;;  %3874 = vst [vmem:[#allocation2 + $0x30] sm:$0xf] %v3873_v4  ;;  %v3890_v48 = vld [vmem:[#allocation2 + $0x50] sm:$0x1] }
 0x4ea   : > { %v3852_v58 = vsel %vm10347_vm0, %v3773_v2, %v3851_v43  ;;  %3942 = vst [vmem:[#allocation2] sm:$0x1] %v3941_v26 }
 0x4eb   : > { %3853 = vst [vmem:[#allocation2 + $0xc] sm:$0xf] %v3852_v58  ;;  %v3803_v63 = vpop.permute.xlu0 %3802 }
 0x4ec   : > { %v3946_v12 = vld [vmem:[#allocation2 + $0x18] sm:$0x1]  ;;  %v3887_v0 = vsel %vm10347_vm0, %v3803_v63, %v3886_v30 }
 0x4ed   : > { %v3785_v62 = vpop.permute.xlu1 %3784  ;;  %v3947_v50 = vsel %vm10361_vm14, %v3921_v13, %v3946_v12  ;;  %3888 = vst [vmem:[#allocation2 + $0x48] sm:$0xf] %v3887_v0  ;;  %v7913_v12 = vunpack.i.h.bf16 %v10353_v55 }
 0x4ee   : > { %v3866_v9 = vsel %vm10347_vm0, %v3785_v62, %v3865_v35  ;;  %3948 = vst [vmem:[#allocation2 + $0x18] sm:$0x1] %v3947_v50  ;;  %v7922_v35 = vunpack.i.l.bf16 %v10357_v19 }
 0x4ef   : > { %3867 = vst [vmem:[#allocation2 + $0x24] sm:$0xf] %v3866_v9  ;;  %v3771_v28 = vpop.permute.xlu0 %3770 }
 0x4f0   : > { %v3952_v14 = vld [vmem:[#allocation2 + $0x30] sm:$0x1]  ;;  %v3849_v47 = vsel %vm10361_vm14, %v3771_v28, %v3848_v54 }
 0x4f1   : > { %v3797_v39 = vpop.permute.xlu1 %3796  ;;  %v3953_v25 = vsel %vm10361_vm14, %v3925_v46, %v3952_v14  ;;  %3850 = vst [vmem:[#allocation2 + $0x8] sm:$0x1] %v3849_v47  ;;  %v7912_v46 = vunpack.i.l.bf16 %v10353_v55 }
 0x4f2   : > { %v3943_v27 = vld [vmem:[#allocation2 + $0xc] sm:$0x1]  ;;  %v3880_v40 = vsel %vm10347_vm0, %v3797_v39, %v3879_v32  ;;  %3954 = vst [vmem:[#allocation2 + $0x30] sm:$0x1] %v3953_v25 }
 0x4f3   : > { %v3944_v3 = vsel %vm10361_vm14, %v3919_v60, %v3943_v27  ;;  %3881 = vst [vmem:[#allocation2 + $0x3c] sm:$0xf] %v3880_v40  ;;  %v3783_v52 = vpop.permute.xlu0 %3782 }
 0x4f4   : > { %3945 = vst [vmem:[#allocation2 + $0xc] sm:$0x1] %v3944_v3  ;;  %v3958_v20 = vld [vmem:[#allocation2 + $0x48] sm:$0x1]  ;;  %v3863_v15 = vsel %vm10361_vm14, %v3783_v52, %v3862_v10  ;;  %v7923_v10 = vunpack.i.h.bf16 %v10357_v19 }
 0x4f5   : > { %v3809_v22 = vpop.permute.xlu1 %3808  ;;  %v3959_v1 = vsel %vm10361_vm14, %v3929_v7, %v3958_v20  ;;  %3864 = vst [vmem:[#allocation2 + $0x20] sm:$0x1] %v3863_v15 }
 0x4f6   : > { %v3949_v33 = vld [vmem:[#allocation2 + $0x24] sm:$0x1]  ;;  %v3894_v45 = vsel %vm10347_vm0, %v3809_v22, %v3893_v36  ;;  %3960 = vst [vmem:[#allocation2 + $0x48] sm:$0x1] %v3959_v1  ;;  %vm4298_vm0 = vcmask 139400  }
 0x4f7   : > { %v3950_v49 = vsel %vm10361_vm14, %v10339_v17, %v3949_v33  ;;  %3895 = vst [vmem:[#allocation2 + $0x54] sm:$0xf] %v3894_v45  ;;  %v3795_v37 = vpop.permute.xlu0 %3794  ;;  %v3869_v17 = vld [vmem:[#allocation2 + $0x2c] sm:$0x1] }
 0x4f8   : > { %3951 = vst [vmem:[#allocation2 + $0x24] sm:$0x1] %v3950_v49  ;;  %v3877_v41 = vsel %vm10361_vm14, %v3795_v37, %v3876_v61  ;;  %v4005_v4 = vld [vmem:[#allocation2 + $0x8] sm:$0x1] }
 0x4f9   : > { %v3777_v59 = vpop.permute.xlu1 %3776  ;;  %3878 = vst [vmem:[#allocation2 + $0x38] sm:$0x1] %v3877_v41  ;;  %v4041_v60 = vld [vmem:[#allocation2 + $0x30] sm:$0xf] }
 0x4fa   : > { %v3955_v6 = vld [vmem:[#allocation2 + $0x3c] sm:$0x1]  ;;  %v3856_v21 = vsel %vm10361_vm14, %v3777_v59, %v3855_v34  ;;  %v4029_v59 = vld [vmem:[#allocation2] sm:$0xf] }
 0x4fb   : > { %v3956_v13 = vsel %vm10361_vm14, %v10341_v53, %v3955_v6  ;;  %3857 = vst [vmem:[#allocation2 + $0x14] sm:$0x1] %v3856_v21  ;;  %v3807_v7 = vpop.permute.xlu0 %3806  ;;  %v4032_v6 = vld [vmem:[#allocation2 + $0xc] sm:$0xf]  ;;  %v4035_v21 = vld [vmem:[#allocation2 + $0x18] sm:$0xf] }
 0x4fc   : > { %3957 = vst [vmem:[#allocation2 + $0x3c] sm:$0x1] %v3956_v13  ;;  %v4011_v44 = vld [vmem:[#allocation2 + $0x20] sm:$0x1]  ;;  %v3891_v18 = vsel %vm10361_vm14, %v3807_v7, %v3890_v48 }
 0x4fd   : > { %v3789_v5 = vpop.permute.xlu1 %3788  ;;  %v4012_v16 = vsel %vm10400_vm15, %v7912_v46, %v4011_v44  ;;  %3892 = vst [vmem:[#allocation2 + $0x50] sm:$0x1] %v3891_v18 }
 0x4fe   : > { %v3961_v57 = vld [vmem:[#allocation2 + $0x54] sm:$0x1]  ;;  %v3870_v51 = vsel %vm10361_vm14, %v3789_v5, %v3869_v17  ;;  %4013 = vst [vmem:[#allocation2 + $0x20] sm:$0x1] %v4012_v16  ;;  %v4047_v17 = vld [vmem:[#allocation2 + $0x48] sm:$0xf] }
 0x4ff   : > { %v3962_v53 = vsel %vm10361_vm14, %v10343_v42, %v3961_v57  ;;  %3871 = vst [vmem:[#allocation2 + $0x2c] sm:$0x1] %v3870_v51  ;;  %v7906_v23 = vpop.permute.xlu0 %7905  ;;  %v3897_v42 = vld [vmem:[#allocation2 + $0x5c] sm:$0x1]  ;;  %v4038_v48 = vld [vmem:[#allocation2 + $0x24] sm:$0xf] }
 0x500   : > { %3963 = vst [vmem:[#allocation2 + $0x54] sm:$0x1] %v3962_v53  ;;  %v7908_v43 = vunpack.i.h.bf16 %v7906_v23  ;;  %v7907_v29 = vunpack.i.l.bf16 %v7906_v23  ;;  %v4017_v32 = vld [vmem:[#allocation2 + $0x38] sm:$0x1] }
 0x501   : > { %v3801_v56 = vpop.permute.xlu1 %3800 }
 0x502   : > { %v4008_v2 = vld [vmem:[#allocation2 + $0x14] sm:$0x1]  ;;  %v3884_v26 = vsel %vm10361_vm14, %v3801_v56, %v3883_v31  ;;  %v4006_v30 = vsel %vm10400_vm15, %v7907_v29, %v4005_v4 }
 0x503   : > { %v4009_v58 = vsel %vm10400_vm15, %v7908_v43, %v4008_v2  ;;  %3885 = vst [vmem:[#allocation2 + $0x44] sm:$0x1] %v3884_v26  ;;  %4007 = vst [vmem:[#allocation2 + $0x8] sm:$0x1] %v4006_v30  ;;  %v7916_v63 = vpop.permute.xlu0 %7915  ;;  %v4044_v13 = vld [vmem:[#allocation2 + $0x3c] sm:$0xf] }
 0x504   : > { %4010 = vst [vmem:[#allocation2 + $0x14] sm:$0x1] %v4009_v58  ;;  %v4023_v0 = vld [vmem:[#allocation2 + $0x50] sm:$0x1]  ;;  %v7917_v62 = vunpack.i.l.bf16 %v7916_v63  ;;  %v7918_v39 = vunpack.i.h.bf16 %v7916_v63 }
 0x505   : > { %v3813_v50 = vpop.permute.xlu1 %3812  ;;  %v4024_v9 = vsel %vm10400_vm15, %v7922_v35, %v4023_v0  ;;  %v4037_v18 = vld [vmem:[#allocation2 + $0x20] sm:$0x1] }
 0x506   : > { %v4014_v54 = vld [vmem:[#allocation2 + $0x2c] sm:$0x1]  ;;  %v3898_v28 = vsel %vm10361_vm14, %v3813_v50, %v3897_v42  ;;  %4025 = vst [vmem:[#allocation2 + $0x50] sm:$0x1] %v4024_v9  ;;  %v4018_v47 = vsel %vm10400_vm15, %v7917_v62, %v4017_v32  ;;  %vm4149_vm14 = vcmask 3072  }
 0x507   : > { %v4015_v14 = vsel %vm10400_vm15, %v7913_v12, %v4014_v54  ;;  %3899 = vst [vmem:[#allocation2 + $0x5c] sm:$0x1] %v3898_v28  ;;  %4019 = vst [vmem:[#allocation2 + $0x38] sm:$0x1] %v4018_v47  ;;  %v3769_v55 = vpop.permute.xlu0 %3768  ;;  %v4050_v46 = vld [vmem:[#allocation2 + $0x54] sm:$0xf] }
 0x508   : > { %4016 = vst [vmem:[#allocation2 + $0x2c] sm:$0x1] %v4015_v14  ;;  %3845 = vst.msk [vmem:[#allocation2 + $0x4] sm:$0xf] %vm3838_vm2, %v3769_v55 }
 0x509   : > { %v3775_v25 = vpop.permute.xlu1 %3774 }
 0x50a   : > { %v4020_v27 = vld [vmem:[#allocation2 + $0x44] sm:$0x1]  ;;  %3854 = vst.msk [vmem:[#allocation2 + $0x10] sm:$0xf] %vm3838_vm2, %v3775_v25  ;;  %v4031_v7 = vld [vmem:[#allocation2 + $0x8] sm:$0x1] }
 0x50b   : > { %v4021_v11 = vsel %vm10400_vm15, %v7918_v39, %v4020_v27  ;;  %v3781_v40 = vpop.permute.xlu0 %3780  ;;  %v4034_v44 = vld [vmem:[#allocation2 + $0x14] sm:$0x1] }
 0x50c   : > { %4022 = vst [vmem:[#allocation2 + $0x44] sm:$0x1] %v4021_v11  ;;  %3861 = vst.msk [vmem:[#allocation2 + $0x1c] sm:$0xf] %vm3838_vm2, %v3781_v40 }
 0x50d   : > { %v3787_v3 = vpop.permute.xlu1 %3786  ;;  %v4049_v51 = vld [vmem:[#allocation2 + $0x50] sm:$0x1] }
 0x50e   : > { %v4026_v36 = vld [vmem:[#allocation2 + $0x5c] sm:$0x1]  ;;  %3868 = vst.msk [vmem:[#allocation2 + $0x28] sm:$0xf] %vm3838_vm2, %v3787_v3  ;;  %v4043_v16 = vld [vmem:[#allocation2 + $0x38] sm:$0x1] }
 0x50f   : > { %v4027_v52 = vsel %vm10400_vm15, %v7923_v10, %v4026_v36  ;;  %v3793_v20 = vpop.permute.xlu0 %3792  ;;  %v4030_v15 = vld [vmem:[#allocation2 + $0x4] sm:$0xf]  ;;  %v4040_v5 = vld [vmem:[#allocation2 + $0x2c] sm:$0x1] }
 0x510   : > { %4028 = vst [vmem:[#allocation2 + $0x5c] sm:$0x1] %v4027_v52  ;;  %3875 = vst.msk [vmem:[#allocation2 + $0x34] sm:$0xf] %vm3838_vm2, %v3793_v20  ;;  %4079 = vrot.lane.b32.xlu0 %v4030_v15, %s7947_s22 }
 0x511   : > { %v3799_v22 = vpop.permute.xlu1 %3798  ;;  %v4033_v1 = vld [vmem:[#allocation2 + $0x10] sm:$0xf] }
 0x512   : > { %3882 = vst.msk [vmem:[#allocation2 + $0x40] sm:$0xf] %vm3838_vm2, %v3799_v22  ;;  %4085 = vrot.lane.b32.xlu1 %v4033_v1, %s7947_s22 }
 0x513   : > { %v3805_v19 = vpop.permute.xlu0 %3804  ;;  %v4036_v33 = vld [vmem:[#allocation2 + $0x1c] sm:$0xf]  ;;  %v4046_v57 = vld [vmem:[#allocation2 + $0x44] sm:$0x1] }
 0x514   : > { %3889 = vst.msk [vmem:[#allocation2 + $0x4c] sm:$0xf] %vm3838_vm2, %v3805_v19  ;;  %4091 = vrot.lane.b32.xlu0 %v4036_v33, %s7947_s22 }
 0x515   : > { %v3811_v45 = vpop.permute.xlu1 %3810  ;;  %v4039_v61 = vld [vmem:[#allocation2 + $0x28] sm:$0xf] }
 0x516   : > { %3896 = vst.msk [vmem:[#allocation2 + $0x58] sm:$0xf] %vm3838_vm2, %v3811_v45  ;;  %4097 = vrot.lane.b32.xlu1 %v4039_v61, %s7947_s22  ;;  %vm4152_vm2 = vcmask 0  }
 0x517   : > { %v4042_v49 = vld [vmem:[#allocation2 + $0x34] sm:$0xf]  ;;  %v4052_v53 = vld [vmem:[#allocation2 + $0x5c] sm:$0x1] }
 0x518   : > { %4103 = vrot.lane.b32.xlu0 %v4042_v49, %s7947_s22 }
 0x519   : > { %v4045_v34 = vld [vmem:[#allocation2 + $0x40] sm:$0xf] }
 0x51a   : > { %4109 = vrot.lane.b32.xlu1 %v4045_v34, %s7947_s22 }
 0x51b   : > { %v4048_v37 = vld [vmem:[#allocation2 + $0x4c] sm:$0xf] }
 0x51c   : > { %4115 = vrot.lane.b32.xlu0 %v4048_v37, %s7947_s22 }
 0x51d   : > { %v4051_v41 = vld [vmem:[#allocation2 + $0x58] sm:$0xf] }
 0x51e   : > { %4121 = vrot.lane.b32.xlu1 %v4051_v41, %s7947_s22 }
 0x520   : > { %4077 = vrot.lane.b32.xlu0 %v4029_v59, %s7947_s22 }
 0x522   : > { %4083 = vrot.lane.b32.xlu1 %v4032_v6, %s7947_s22 }
 0x524   : > { %4089 = vrot.lane.b32.xlu0 %v4035_v21, %s7947_s22 }
 0x526   : > { %4095 = vrot.lane.b32.xlu1 %v4038_v48, %s7947_s22 }
 0x528   : > { %4101 = vrot.lane.b32.xlu0 %v4041_v60, %s7947_s22 }
 0x52a   : > { %4107 = vrot.lane.b32.xlu1 %v4044_v13, %s7947_s22 }
 0x52c   : > { %4113 = vrot.lane.b32.xlu0 %v4047_v17, %s7947_s22 }
 0x52e   : > { %4119 = vrot.lane.b32.xlu1 %v4050_v46, %s7947_s22 }
 0x530   : > { %4081 = vrot.lane.b32.xlu0 %v4031_v7, %s7947_s22 }
 0x532   : > { %4087 = vrot.lane.b32.xlu1 %v4034_v44, %s7947_s22 }
 0x534   : > { %4093 = vrot.lane.b32.xlu0 %v4037_v18, %s7947_s22 }
 0x536   : > { %4099 = vrot.lane.b32.xlu1 %v4040_v5, %s7947_s22 }
 0x538   : > { %4105 = vrot.lane.b32.xlu0 %v4043_v16, %s7947_s22 }
 0x53a   : > { %4111 = vrot.lane.b32.xlu1 %v4046_v57, %s7947_s22 }
 0x53c   : > { %4117 = vrot.lane.b32.xlu0 %v4049_v51, %s7947_s22 }
 0x53e   : > { %4123 = vrot.lane.b32.xlu1 %v4052_v53, %s7947_s22 }
 0x582   : > { %v4080_v31 = vpop.permute.xlu0 %4079 }
 0x583   : > { %4151 = vst.msk [vmem:[#allocation2 + $0x4] sm:$0xf] %vm4149_vm14, %v4080_v31 }
 0x584   : > { %v4086_v23 = vpop.permute.xlu1 %4085 }
 0x585   : > { %4155 = vst.msk [vmem:[#allocation2 + $0x10] sm:$0xf] %vm4149_vm14, %v4086_v23 }
 0x586   : > { %v4092_v43 = vpop.permute.xlu0 %4091 }
 0x587   : > { %4158 = vst.msk [vmem:[#allocation2 + $0x1c] sm:$0xf] %vm4149_vm14, %v4092_v43 }
 0x588   : > { %v4098_v29 = vpop.permute.xlu1 %4097 }
 0x589   : > { %4161 = vst.msk [vmem:[#allocation2 + $0x28] sm:$0xf] %vm4149_vm14, %v4098_v29 }
 0x58a   : > { %v4104_v56 = vpop.permute.xlu0 %4103  ;;  %v4176_v4 = vld [vmem:[#allocation2 + $0x4] sm:$0xf] }
 0x58b   : > { %4164 = vst.msk [vmem:[#allocation2 + $0x34] sm:$0xf] %vm4149_vm14, %v4104_v56  ;;  %4225 = vrot.lane.b32.xlu0 %v4176_v4, %s7958_s7 }
 0x58c   : > { %v4110_v2 = vpop.permute.xlu1 %4109  ;;  %v4179_v26 = vld [vmem:[#allocation2 + $0x10] sm:$0xf] }
 0x58d   : > { %4167 = vst.msk [vmem:[#allocation2 + $0x40] sm:$0xf] %vm4149_vm14, %v4110_v2  ;;  %4231 = vrot.lane.b32.xlu1 %v4179_v26, %s7958_s7 }
 0x58e   : > { %v4116_v58 = vpop.permute.xlu0 %4115  ;;  %v4182_v30 = vld [vmem:[#allocation2 + $0x1c] sm:$0xf] }
 0x58f   : > { %4170 = vst.msk [vmem:[#allocation2 + $0x4c] sm:$0xf] %vm4149_vm14, %v4116_v58  ;;  %4237 = vrot.lane.b32.xlu0 %v4182_v30, %s7958_s7 }
 0x590   : > { %v4122_v42 = vpop.permute.xlu1 %4121  ;;  %v4185_v35 = vld [vmem:[#allocation2 + $0x28] sm:$0xf] }
 0x591   : > { %4173 = vst.msk [vmem:[#allocation2 + $0x58] sm:$0xf] %vm4149_vm14, %v4122_v42  ;;  %4243 = vrot.lane.b32.xlu1 %v4185_v35, %s7958_s7 }
 0x592   : > { %v4078_v63 = vpop.permute.xlu0 %4077  ;;  %v4188_v12 = vld [vmem:[#allocation2 + $0x34] sm:$0xf] }
 0x593   : > { %4150 = vst.msk [vmem:[#allocation2] sm:$0xf] %vm4149_vm14, %v4078_v63  ;;  %4249 = vrot.lane.b32.xlu0 %v4188_v12, %s7958_s7 }
 0x594   : > { %v4084_v0 = vpop.permute.xlu1 %4083  ;;  %v4191_v62 = vld [vmem:[#allocation2 + $0x40] sm:$0xf] }
 0x595   : > { %4154 = vst.msk [vmem:[#allocation2 + $0xc] sm:$0xf] %vm4149_vm14, %v4084_v0  ;;  %4255 = vrot.lane.b32.xlu1 %v4191_v62, %s7958_s7 }
 0x596   : > { %v4090_v50 = vpop.permute.xlu0 %4089  ;;  %v4194_v9 = vld [vmem:[#allocation2 + $0x4c] sm:$0xf] }
 0x597   : > { %4157 = vst.msk [vmem:[#allocation2 + $0x18] sm:$0xf] %vm4149_vm14, %v4090_v50  ;;  %4261 = vrot.lane.b32.xlu0 %v4194_v9, %s7958_s7 }
 0x598   : > { %v4096_v54 = vpop.permute.xlu1 %4095  ;;  %v4197_v32 = vld [vmem:[#allocation2 + $0x58] sm:$0xf] }
 0x599   : > { %4160 = vst.msk [vmem:[#allocation2 + $0x24] sm:$0xf] %vm4149_vm14, %v4096_v54  ;;  %4267 = vrot.lane.b32.xlu1 %v4197_v32, %s7958_s7 }
 0x59a   : > { %v4102_v28 = vpop.permute.xlu0 %4101  ;;  %v4175_v14 = vld [vmem:[#allocation2] sm:$0xf] }
 0x59b   : > { %4163 = vst.msk [vmem:[#allocation2 + $0x30] sm:$0xf] %vm4149_vm14, %v4102_v28  ;;  %4223 = vrot.lane.b32.xlu0 %v4175_v14, %s7958_s7 }
 0x59c   : > { %v4108_v47 = vpop.permute.xlu1 %4107  ;;  %v4178_v55 = vld [vmem:[#allocation2 + $0xc] sm:$0xf] }
 0x59d   : > { %4166 = vst.msk [vmem:[#allocation2 + $0x3c] sm:$0xf] %vm4149_vm14, %v4108_v47  ;;  %4229 = vrot.lane.b32.xlu1 %v4178_v55, %s7958_s7 }
 0x59e   : > { %v4114_v39 = vpop.permute.xlu0 %4113  ;;  %v4181_v25 = vld [vmem:[#allocation2 + $0x18] sm:$0xf] }
 0x59f   : > { %4169 = vst.msk [vmem:[#allocation2 + $0x48] sm:$0xf] %vm4149_vm14, %v4114_v39  ;;  %4235 = vrot.lane.b32.xlu0 %v4181_v25, %s7958_s7 }
 0x5a0   : > { %v4120_v27 = vpop.permute.xlu1 %4119  ;;  %v4184_v11 = vld [vmem:[#allocation2 + $0x24] sm:$0xf] }
 0x5a1   : > { %4172 = vst.msk [vmem:[#allocation2 + $0x54] sm:$0xf] %vm4149_vm14, %v4120_v27  ;;  %4241 = vrot.lane.b32.xlu1 %v4184_v11, %s7958_s7 }
 0x5a2   : > { %v4082_v40 = vpop.permute.xlu0 %4081  ;;  %v4187_v10 = vld [vmem:[#allocation2 + $0x30] sm:$0xf] }
 0x5a3   : > { %4153 = vst.msk [vmem:[#allocation2 + $0x8] sm:$0x1] %vm4152_vm2, %v4082_v40  ;;  %4247 = vrot.lane.b32.xlu0 %v4187_v10, %s7958_s7 }
 0x5a4   : > { %v4088_v3 = vpop.permute.xlu1 %4087  ;;  %v4190_v36 = vld [vmem:[#allocation2 + $0x3c] sm:$0xf] }
 0x5a5   : > { %4156 = vst.msk [vmem:[#allocation2 + $0x14] sm:$0x1] %vm4152_vm2, %v4088_v3  ;;  %4253 = vrot.lane.b32.xlu1 %v4190_v36, %s7958_s7 }
 0x5a6   : > { %v4094_v52 = vpop.permute.xlu0 %4093  ;;  %v4193_v20 = vld [vmem:[#allocation2 + $0x48] sm:$0xf] }
 0x5a7   : > { %4159 = vst.msk [vmem:[#allocation2 + $0x20] sm:$0x1] %vm4152_vm2, %v4094_v52  ;;  %4259 = vrot.lane.b32.xlu0 %v4193_v20, %s7958_s7 }
 0x5a8   : > { %v4100_v15 = vpop.permute.xlu1 %4099  ;;  %v4196_v22 = vld [vmem:[#allocation2 + $0x54] sm:$0xf] }
 0x5a9   : > { %4162 = vst.msk [vmem:[#allocation2 + $0x2c] sm:$0x1] %vm4152_vm2, %v4100_v15  ;;  %4265 = vrot.lane.b32.xlu1 %v4196_v22, %s7958_s7 }
 0x5aa   : > { %v4106_v1 = vpop.permute.xlu0 %4105  ;;  %v4177_v19 = vld [vmem:[#allocation2 + $0x8] sm:$0x1] }
 0x5ab   : > { %4165 = vst.msk [vmem:[#allocation2 + $0x38] sm:$0x1] %vm4152_vm2, %v4106_v1  ;;  %4227 = vrot.lane.b32.xlu0 %v4177_v19, %s7958_s7 }
 0x5ac   : > { %v4112_v33 = vpop.permute.xlu1 %4111  ;;  %v4180_v45 = vld [vmem:[#allocation2 + $0x14] sm:$0x1] }
 0x5ad   : > { %4168 = vst.msk [vmem:[#allocation2 + $0x44] sm:$0x1] %vm4152_vm2, %v4112_v33  ;;  %4233 = vrot.lane.b32.xlu1 %v4180_v45, %s7958_s7 }
 0x5ae   : > { %v4118_v61 = vpop.permute.xlu0 %4117  ;;  %v4183_v49 = vld [vmem:[#allocation2 + $0x20] sm:$0x1] }
 0x5af   : > { %4171 = vst.msk [vmem:[#allocation2 + $0x50] sm:$0x1] %vm4152_vm2, %v4118_v61  ;;  %4239 = vrot.lane.b32.xlu0 %v4183_v49, %s7958_s7 }
 0x5b0   : > { %v4124_v34 = vpop.permute.xlu1 %4123  ;;  %v4186_v37 = vld [vmem:[#allocation2 + $0x2c] sm:$0x1] }
 0x5b1   : > { %4174 = vst.msk [vmem:[#allocation2 + $0x5c] sm:$0x1] %vm4152_vm2, %v4124_v34  ;;  %4245 = vrot.lane.b32.xlu1 %v4186_v37, %s7958_s7 }
 0x5b2   : > { %v4189_v41 = vld [vmem:[#allocation2 + $0x38] sm:$0x1] }
 0x5b3   : > { %4251 = vrot.lane.b32.xlu0 %v4189_v41, %s7958_s7 }
 0x5b4   : > { %v4192_v59 = vld [vmem:[#allocation2 + $0x44] sm:$0x1] }
 0x5b5   : > { %4257 = vrot.lane.b32.xlu1 %v4192_v59, %s7958_s7 }
 0x5b6   : > { %v4195_v6 = vld [vmem:[#allocation2 + $0x50] sm:$0x1] }
 0x5b7   : > { %4263 = vrot.lane.b32.xlu0 %v4195_v6, %s7958_s7 }
 0x5b8   : > { %v4198_v21 = vld [vmem:[#allocation2 + $0x5c] sm:$0x1] }
 0x5b9   : > { %4269 = vrot.lane.b32.xlu1 %v4198_v21, %s7958_s7 }
 0x5fd   : > { %v4226_v48 = vpop.permute.xlu0 %4225 }
 0x5fe   : > { %4297 = vst.msk [vmem:[#allocation2 + $0x4] sm:$0xf] %vm4295_vm3, %v4226_v48 }
 0x5ff   : > { %v4232_v60 = vpop.permute.xlu1 %4231 }
 0x600   : > { %4301 = vst.msk [vmem:[#allocation2 + $0x10] sm:$0xf] %vm4295_vm3, %v4232_v60 }
 0x601   : > { %v4238_v13 = vpop.permute.xlu0 %4237 }
 0x602   : > { %4304 = vst.msk [vmem:[#allocation2 + $0x1c] sm:$0xf] %vm4295_vm3, %v4238_v13 }
 0x603   : > { %v4244_v17 = vpop.permute.xlu1 %4243 }
 0x604   : > { %4307 = vst.msk [vmem:[#allocation2 + $0x28] sm:$0xf] %vm4295_vm3, %v4244_v17 }
 0x605   : > { %v4250_v46 = vpop.permute.xlu0 %4249  ;;  %v10522_v7 = vld [vmem:[#allocation2 + $0x4] sm:$0xf] }
 0x606   : > { %4310 = vst.msk [vmem:[#allocation2 + $0x34] sm:$0xf] %vm4295_vm3, %v4250_v46  ;;  %4625 = vrot.lane.b32.xlu0 %v10522_v7, %s7945_s21 }
 0x607   : > { %v4256_v44 = vpop.permute.xlu1 %4255  ;;  %v10527_v18 = vld [vmem:[#allocation2 + $0x10] sm:$0xf] }
 0x608   : > { %4313 = vst.msk [vmem:[#allocation2 + $0x40] sm:$0xf] %vm4295_vm3, %v4256_v44  ;;  %4629 = vrot.lane.b32.xlu1 %v10527_v18, %s7945_s21  ;;  %v12851_v44 = vrot.slane %v10522_v7, 5 }
 0x609   : > { %v4262_v5 = vpop.permute.xlu0 %4261  ;;  %v10532_v16 = vld [vmem:[#allocation2 + $0x1c] sm:$0xf] }
 0x60a   : > { %4316 = vst.msk [vmem:[#allocation2 + $0x4c] sm:$0xf] %vm4295_vm3, %v4262_v5  ;;  %4633 = vrot.lane.b32.xlu0 %v10532_v16, %s7945_s21 }
 0x60b   : > { %v4268_v57 = vpop.permute.xlu1 %4267  ;;  %v10537_v51 = vld [vmem:[#allocation2 + $0x28] sm:$0xf] }
 0x60c   : > { %4319 = vst.msk [vmem:[#allocation2 + $0x58] sm:$0xf] %vm4295_vm3, %v4268_v57  ;;  %4637 = vrot.lane.b32.xlu1 %v10537_v51, %s7945_s21 }
 0x60d   : > { %v4224_v53 = vpop.permute.xlu0 %4223  ;;  %v10542_v31 = vld [vmem:[#allocation2 + $0x34] sm:$0xf] }
 0x60e   : > { %4296 = vst.msk [vmem:[#allocation2] sm:$0xf] %vm4295_vm3, %v4224_v53  ;;  %4641 = vrot.lane.b32.xlu0 %v10542_v31, %s7945_s21  ;;  %v4405_v23 = vcombine.low %v10522_v7, %v10542_v31  ;;  %v12848_v53 = vrot.slane %v10542_v31, 5 }
 0x60f   : > { %v4230_v43 = vpop.permute.xlu1 %4229  ;;  %v10549_v29 = vld [vmem:[#allocation2 + $0x40] sm:$0xf] }
 0x610   : > { %4300 = vst.msk [vmem:[#allocation2 + $0xc] sm:$0xf] %vm4295_vm3, %v4230_v43  ;;  %4645 = vrot.lane.b32.xlu1 %v10549_v29, %s7945_s21  ;;  %v4439_v56 = vcombine.low %v10527_v18, %v10549_v29  ;;  %v10571_v63 = vrot.slane %v4405_v23, %v13146_v38  ;;  %v5301_v43 = vshll.u32 %v10527_v18, 16 }
 0x611   : > { %v4236_v4 = vpop.permute.xlu0 %4235  ;;  %v10556_v2 = vld [vmem:[#allocation2 + $0x4c] sm:$0xf] }
 0x612   : > { %4303 = vst.msk [vmem:[#allocation2 + $0x18] sm:$0xf] %vm4295_vm3, %v4236_v4  ;;  %4649 = vrot.lane.b32.xlu0 %v10556_v2, %s7945_s21  ;;  %v4413_v26 = vcombine.low %v10532_v16, %v10556_v2  ;;  %13155 = vst [vmem:[#allocation11_spill] sm:$0xff] %v10571_v63  ;;  %v10585_v9 = vrot.slane %v4439_v56, %v13146_v38  ;;  %v6409_v56 = vrot.slane %v12851_v44, 4 }
 0x613   : > { %v4242_v58 = vpop.permute.xlu1 %4241  ;;  %v10563_v30 = vld [vmem:[#allocation2 + $0x58] sm:$0xf] }
 0x614   : > { %4306 = vst.msk [vmem:[#allocation2 + $0x24] sm:$0xf] %vm4295_vm3, %v4242_v58  ;;  %4653 = vrot.lane.b32.xlu1 %v10563_v30, %s7945_s21  ;;  %v4447_v42 = vcombine.low %v10537_v51, %v10563_v30  ;;  %v10574_v12 = vrot.slane %v4413_v26, %v13146_v38  ;;  %13157 = vst [vmem:[#allocation12_spill] sm:$0xff] %v10585_v9  ;;  %v5277_v26 = vshll.u32 %v10522_v7, 16  ;;  %v5305_v58 = vshrl.u32 %v10527_v18, 16 }
 0x615   : > { %v4248_v35 = vpop.permute.xlu0 %4247  ;;  %v10602_v39 = vld [vmem:[#allocation2] sm:$0xf] }
 0x616   : > { %13156 = vst [vmem:[#allocation7_spill] sm:$0xff] %v10574_v12  ;;  %4309 = vst.msk [vmem:[#allocation2 + $0x30] sm:$0xf] %vm4295_vm3, %v4248_v35  ;;  %4943 = vrot.lane.b32.xlu0 %v10522_v7, %s7947_s22  ;;  %v4422_v62 = vcombine.high %v10571_v63, %v10574_v12  ;;  %v10588_v54 = vrot.slane %v4447_v42, %v13146_v38  ;;  %v12850_v35 = vrot.slane %v10532_v16, 5 }
 0x617   : > { %v4254_v0 = vpop.permute.xlu1 %4253  ;;  %v10615_v10 = vld [vmem:[#allocation2 + $0xc] sm:$0xf] }
 0x618   : > { %4312 = vst.msk [vmem:[#allocation2 + $0x3c] sm:$0xf] %vm4295_vm3, %v4254_v0  ;;  %4947 = vrot.lane.b32.xlu1 %v10527_v18, %s7947_s22  ;;  %13158 = vst [vmem:[#allocation8_spill] sm:$0xff] %v10588_v54  ;;  %v4456_v14 = vcombine.high %v10585_v9, %v10588_v54  ;;  %v10607_v27 = vrot.slane %v4422_v62, %v8464_v8  ;;  %v6437_v62 = vrot.slane %v12848_v53, 4 }
 0x619   : > { %v4260_v50 = vpop.permute.xlu0 %4259  ;;  %v10631_v1 = vld [vmem:[#allocation2 + $0x18] sm:$0xf] }
 0x61a   : > { %4315 = vst.msk [vmem:[#allocation2 + $0x48] sm:$0xf] %vm4295_vm3, %v4260_v50  ;;  %4951 = vrot.lane.b32.xlu0 %v10532_v16, %s7947_s22  ;;  %v10610_v11 = vrot.slane %v4456_v14, %v8464_v8  ;;  %v4512_v33 = vshrl.u32 %v10607_v27, 16  ;;  %v5268_v14 = vshrl.u32 %v10602_v39, 16 }
 0x61b   : > { %v4266_v32 = vpop.permute.xlu1 %4265  ;;  %v10639_v61 = vld [vmem:[#allocation2 + $0x24] sm:$0xf] }
 0x61c   : > { %4318 = vst.msk [vmem:[#allocation2 + $0x54] sm:$0xf] %vm4295_vm3, %v4266_v32  ;;  %4955 = vrot.lane.b32.xlu1 %v10537_v51, %s7947_s22  ;;  %v10628_v20 = vpack.i.b16 %v10610_v11, %v10607_v27  ;;  %v4513_v15 = vshrl.u32 %v10610_v11, 16  ;;  %v12849_v32 = vrot.slane %v10556_v2, 5  ;;  %v10738_v47 = vcombine.high %v10610_v11, %v13002_v24 }
 0x61d   : > { %v4228_v55 = vpop.permute.xlu0 %4227  ;;  %v10604_v25 = vld [vmem:[#allocation2 + $0x30] sm:$0xf]  ;;  %v10758_v11 = vcombine.high %v10607_v27, %v13002_v24 }
 0x61e   : > { %4299 = vst.msk [vmem:[#allocation2 + $0x8] sm:$0x1] %vm4298_vm0, %v4228_v55  ;;  %4959 = vrot.lane.b32.xlu0 %v10542_v31, %s7947_s22  ;;  %v4337_v3 = vcombine.low %v10602_v39, %v10604_v25  ;;  %13159 = vst [vmem:[#allocation16_spill] sm:$0xff] %v10628_v20  ;;  %v10650_v41 = vpack.i.b16 %v4513_v15, %v4512_v33  ;;  %v5271_v55 = vshll.u32 %v10602_v39, 16  ;;  %v10708_v15 = vrot.slane %v5301_v43, 5 }
 0x61f   : > { %v4234_v40 = vpop.permute.xlu1 %4233  ;;  %v10619_v36 = vld [vmem:[#allocation2 + $0x3c] sm:$0xf]  ;;  %v5353_v43 = vshrl.u32 %v10537_v51, 16 }
 0x620   : > { %4302 = vst.msk [vmem:[#allocation2 + $0x14] sm:$0x1] %vm4298_vm0, %v4234_v40  ;;  %4963 = vrot.lane.b32.xlu1 %v10549_v29, %s7947_s22  ;;  %v4371_v52 = vcombine.low %v10615_v10, %v10619_v36  ;;  %13160 = vst [vmem:[#allocation9_spill] sm:$0xff] %v10650_v41  ;;  %v10653_v59 = vrot.slane %v4337_v3, %v13146_v38  ;;  %v5281_v40 = vshrl.u32 %v10522_v7, 16  ;;  %v5325_v3 = vshll.u32 %v10532_v16, 16 }
 0x621   : > { %v4240_v22 = vpop.permute.xlu0 %4239  ;;  %v10633_v19 = vld [vmem:[#allocation2 + $0x48] sm:$0xf] }
 0x622   : > { %4305 = vst.msk [vmem:[#allocation2 + $0x20] sm:$0x1] %vm4298_vm0, %v4240_v22  ;;  %4967 = vrot.lane.b32.xlu0 %v10556_v2, %s7947_s22  ;;  %v4345_v49 = vcombine.low %v10631_v1, %v10633_v19  ;;  %v10659_v48 = vrot.slane %v4371_v52, %v13146_v38  ;;  %v5329_v52 = vshrl.u32 %v10532_v16, 16  ;;  %v5415_v63 = vshll.u32 %v10633_v19, 16 }
 0x623   : > { %v4246_v45 = vpop.permute.xlu1 %4245  ;;  %v10643_v34 = vld [vmem:[#allocation2 + $0x54] sm:$0xf] }
 0x624   : > { %4308 = vst.msk [vmem:[#allocation2 + $0x2c] sm:$0x1] %vm4298_vm0, %v4246_v45  ;;  %4971 = vrot.lane.b32.xlu1 %v10563_v30, %s7947_s22  ;;  %v4379_v37 = vcombine.low %v10639_v61, %v10643_v34  ;;  %v10656_v6 = vrot.slane %v4345_v49, %v13146_v38  ;;  %v5331_v28 = vrot.slane %v5329_v52, 4  ;;  %v12853_v52 = vrot.slane %v10537_v51, 5 }
 0x625   : > { %v4252_v21 = vpop.permute.xlu0 %4251  ;;  %v10675_v57 = vld [vmem:[#allocation2 + $0x8] sm:$0x1] }
 0x626   : > { %v10662_v60 = vrot.slane %v4379_v37, %v13146_v38  ;;  %4311 = vst.msk [vmem:[#allocation2 + $0x38] sm:$0x1] %vm4298_vm0, %v4252_v21  ;;  %4623 = vrot.lane.b32.xlu0 %v10602_v39, %s7945_s21  ;;  %v6410_v4 = vrot.slane %v10675_v57, 5  ;;  %v5307_v37 = vrot.slane %v5305_v58, 4  ;;  %v6423_v21 = vrot.slane %v12850_v35, 4 }
 0x627   : > { %v4258_v13 = vpop.permute.xlu1 %4257  ;;  %v5270_v58 = vrot.slane %v5268_v14, 4  ;;  %v12852_v14 = vrot.slane %v10527_v18, 5  ;;  %v10754_v35 = vrot.slane %v5281_v40, 4 }
 0x628   : > { %4314 = vst.msk [vmem:[#allocation2 + $0x44] sm:$0x1] %vm4298_vm0, %v4258_v13  ;;  %4627 = vrot.lane.b32.xlu1 %v10615_v10, %s7945_s21  ;;  %v10712_v33 = vsel %vm8140_vm5, %v6409_v56, %v6410_v4  ;;  %v6451_v56 = vrot.slane %v12849_v32, 4 }
 0x629   : > { %v4264_v5 = vpop.permute.xlu0 %4263  ;;  %v10690_v42 = vld [vmem:[#allocation2 + $0x20] sm:$0x1] }
 0x62a   : > { %4317 = vst.msk [vmem:[#allocation2 + $0x50] sm:$0x1] %vm4298_vm0, %v4264_v5  ;;  %4631 = vrot.lane.b32.xlu0 %v10631_v1, %s7945_s21  ;;  %v6424_v45 = vrot.slane %v10690_v42, 5 }
 0x62b   : > { %v4270_v23 = vpop.permute.xlu1 %4269 }
 0x62c   : > { %4320 = vst.msk [vmem:[#allocation2 + $0x5c] sm:$0x1] %vm4298_vm0, %v4270_v23  ;;  %4635 = vrot.lane.b32.xlu1 %v10639_v61, %s7945_s21  ;;  %v5349_v23 = vshll.u32 %v10537_v51, 16  ;;  %v10742_v53 = vsel %vm8140_vm5, %v6423_v21, %v6424_v45  ;;  %v5308_v45 = vor.u32 %v5307_v37, %v10708_v15  ;;  %v5421_v37 = vshll.u32 %v10556_v2, 16 }
 0x62d   : > { %v10693_v0 = vld [vmem:[#allocation2 + $0x38] sm:$0x1] }
 0x62e   : > { %4639 = vrot.lane.b32.xlu0 %v10604_v25, %s7945_s21  ;;  %v6438_v50 = vrot.slane %v10693_v0, 5  ;;  %v10763_v21 = vrot.slane %v5349_v23, 5  ;;  %v5373_v23 = vshll.u32 %v10542_v31, 16 }
 0x630   : > { %4643 = vrot.lane.b32.xlu1 %v10619_v36, %s7945_s21  ;;  %v10717_v49 = vsel %vm8140_vm5, %v6437_v62, %v6438_v50  ;;  %v5273_v62 = vrot.slane %v5271_v55, 5  ;;  %v10734_v50 = vrot.slane %v5325_v3, 5  ;;  %v10749_v55 = vrot.slane %v5277_v26, 5 }
 0x631   : > { %v6545_v13 = vcombine.low %v10712_v33, %v10717_v49  ;;  %v10723_v5 = vld [vmem:[#allocation2 + $0x50] sm:$0x1]  ;;  %v5355_v26 = vrot.slane %v5353_v43, 4  ;;  %v5377_v43 = vshrl.u32 %v10542_v31, 16 }
 0x632   : > { %4647 = vrot.lane.b32.xlu0 %v10633_v19, %s7945_s21  ;;  %v6452_v4 = vrot.slane %v10723_v5, 5  ;;  %v5332_v27 = vor.u32 %v5331_v28, %v10734_v50  ;;  %v5319_v28 = vshll.u32 %v10631_v1, 16 }
 0x633   : > { %v5356_v44 = vor.u32 %v5355_v26, %v10763_v21  ;;  %v10807_v26 = vrot.slane %v5308_v45, 4  ;;  %v10835_v45 = vrot.slane %v5421_v37, 5  ;;  %v5340_v37 = vshrl.u32 %v10639_v61, 16 }
 0x634   : > { %4651 = vrot.lane.b32.xlu1 %v10643_v34, %s7945_s21  ;;  %v10746_v32 = vsel %vm8140_vm5, %v6451_v56, %v6452_v4  ;;  %v5274_v56 = vor.u32 %v5273_v62, %v5270_v58  ;;  %v10768_v4 = vrot.slane %v6545_v13, %v13146_v38  ;;  %v10803_v62 = vrot.slane %v12853_v52, 4 }
 0x635   : > { %v6553_v3 = vcombine.low %v10742_v53, %v10746_v32  ;;  %13167 = vst [vmem:[#allocation20_spill] sm:$0xff] %v10807_v26  ;;  %v10809_v13 = vrot.slane %v5373_v23, 5  ;;  %v10819_v20 = vrot.slane %v5332_v27, 4  ;;  %v5321_v12 = vrot.slane %v5319_v28, 5 }
 0x636   : > { %4941 = vrot.lane.b32.xlu0 %v10602_v39, %s7947_s22  ;;  %13162 = vst [vmem:[#allocation18_spill] sm:$0xff] %v10768_v4  ;;  %v10776_v39 = vpack.i.b16 %v10738_v47, %v10758_v11  ;;  %v5275_v58 = vrot.slane %v5274_v56, 4  ;;  %v10799_v56 = vrot.slane %v12852_v14, 4  ;;  %v13168_v14 = vrot.slane %v10549_v29, 5 }
 0x637   : > { %v10771_v40 = vrot.slane %v6553_v3, %v13146_v38  ;;  %v5316_v3 = vshrl.u32 %v10631_v1, 16  ;;  %13169 = vst [vmem:[#allocation15_spill] sm:$0xff] %v10819_v20  ;;  %v5425_v23 = vshrl.u32 %v10556_v2, 16  ;;  %v5364_v27 = vshrl.u32 %v10604_v25, 16 }
 0x638   : > { %4945 = vrot.lane.b32.xlu1 %v10615_v10, %s7947_s22  ;;  %13164 = vst [vmem:[#allocation19_spill] sm:$0xff] %v10776_v39  ;;  %v10793_v17 = vsel %vm8129_vm4, %v5275_v58, %v10749_v55  ;;  %v10811_v58 = vrot.slane %v5377_v43, 4  ;;  %v5397_v39 = vshll.u32 %v10549_v29, 16  ;;  %v10817_v41 = vrot.slane %v13168_v14, 4 }
 0x639   : > { %13163 = vst [vmem:[#allocation13_spill] sm:$0xff] %v10771_v40  ;;  %13166 = vst [vmem:[#allocation14_spill] sm:$0xff] %v10793_v17  ;;  %v5318_v52 = vrot.slane %v5316_v3, 4  ;;  %v10825_v43 = vrot.slane %v5356_v44, 4  ;;  %v5367_v3 = vshll.u32 %v10604_v25, 16  ;;  %v5292_v28 = vshrl.u32 %v10615_v10, 16 }
 0x63a   : > { %4949 = vrot.lane.b32.xlu0 %v10631_v1, %s7947_s22  ;;  %v5401_v1 = vshrl.u32 %v10549_v29, 16  ;;  %v10837_v54 = vrot.slane %v5397_v39, 5  ;;  %v5295_v44 = vshll.u32 %v10615_v10, 16  ;;  %v5366_v40 = vrot.slane %v5364_v27, 4 }
 0x63b   : > { %v5322_v14 = vor.u32 %v5321_v12, %v5318_v52  ;;  %v5369_v4 = vrot.slane %v5367_v3, 5  ;;  %v5294_v17 = vrot.slane %v5292_v28, 4  ;;  %v10842_v12 = vrot.slane %v5425_v23, 4 }
 0x63c   : > { %4953 = vrot.lane.b32.xlu1 %v10639_v61, %s7947_s22  ;;  %v5412_v52 = vshrl.u32 %v10633_v19, 16  ;;  %v5417_v3 = vrot.slane %v5415_v63, 5  ;;  %v5388_v28 = vshrl.u32 %v10619_v36, 16  ;;  %v5391_v20 = vshll.u32 %v10619_v36, 16 }
 0x63d   : > { %v5323_v9 = vrot.slane %v5322_v14, 4  ;;  %v5370_v39 = vor.u32 %v5369_v4, %v5366_v40  ;;  %v5343_v14 = vshll.u32 %v10639_v61, 16  ;;  %v5436_v40 = vshrl.u32 %v10643_v34, 16 }
 0x63e   : > { %4957 = vrot.lane.b32.xlu0 %v10604_v25, %s7947_s22  ;;  %v5297_v25 = vrot.slane %v5295_v44, 5  ;;  %v5414_v27 = vrot.slane %v5412_v52, 4  ;;  %v5390_v4 = vrot.slane %v5388_v28, 4  ;;  %v5445_v52 = vshll.u32 %v10563_v30, 16 }
 0x63f   : > { %v10851_v10 = vsel %vm8129_vm4, %v5323_v9, %v10734_v50  ;;  %v5371_v44 = vrot.slane %v5370_v39, 4  ;;  %v5345_v26 = vrot.slane %v5343_v14, 5  ;;  %v5438_v14 = vrot.slane %v5436_v40, 4 }
 0x640   : > { %4961 = vrot.lane.b32.xlu1 %v10619_v36, %s7947_s22  ;;  %v5298_v23 = vor.u32 %v5297_v25, %v5294_v17  ;;  %v5418_v50 = vor.u32 %v5417_v3, %v5414_v27  ;;  %v5393_v17 = vrot.slane %v5391_v20, 5  ;;  %v5439_v36 = vshll.u32 %v10643_v34, 16  ;;  %v6381_v25 = vld [vmem:[#allocation2] sm:$0xe] }
 0x641   : > { %v10865_v63 = vsel %vm8129_vm4, %v5371_v44, %v10809_v13  ;;  %v7825_v28 = vrot.slane %v6381_v25, 9 }
 0x642   : > { %4965 = vrot.lane.b32.xlu0 %v10633_v19, %s7947_s22  ;;  %v5342_v19 = vrot.slane %v5340_v37, 4  ;;  %v5299_v9 = vrot.slane %v5298_v23, 4  ;;  %v5419_v37 = vrot.slane %v5418_v50, 4  ;;  %v5394_v27 = vor.u32 %v5393_v17, %v5390_v4 }
 0x643   : > { %v5441_v3 = vrot.slane %v5439_v36, 5  ;;  %v13175_v4 = vcombine.low %v10659_v48, %v10662_v60 }
 0x644   : > { %4969 = vrot.lane.b32.xlu1 %v10643_v34, %s7947_s22  ;;  %v5346_v61 = vor.u32 %v5345_v26, %v5342_v19  ;;  %v10872_v39 = vsel %vm8129_vm4, %v5299_v9, %v10708_v15  ;;  %v10881_v20 = vsel %vm8129_vm4, %v5419_v37, %v10835_v45  ;;  %v4518_v34 = vshrl.u32 %v10758_v11, 16 }
 0x645   : > { %13170 = vst [vmem:[#allocation21_spill] sm:$0xff] %v10872_v39  ;;  %v4519_v15 = vshrl.u32 %v10738_v47, 16  ;;  %v5395_v19 = vrot.slane %v5394_v27, 4  ;;  %v5442_v9 = vor.u32 %v5441_v3, %v5438_v14  ;;  %v5428_v47 = vor.u32 %v10842_v12, %v10835_v45  ;;  %v10920_v12 = vld [vmem:[#allocation2 + $0xc] sm:$0xe] }
 0x646   : > { %6749 = vrot.lane.b32.xlu0 %v10712_v33, %s7945_s21  ;;  %v5347_v23 = vrot.slane %v5346_v61, 4  ;;  %v10900_v11 = vrot.slane %v5445_v52, 5  ;;  %v4354_v45 = vcombine.high %v10653_v59, %v10656_v6  ;;  %v5449_v14 = vshrl.u32 %v10563_v30, 16  ;;  %v6383_v3 = vld [vmem:[#allocation2 + $0x18] sm:$0xe] }
 0x647   : > { %v10902_v50 = vpack.i.b16 %v4519_v15, %v4518_v34  ;;  %v5443_v40 = vrot.slane %v5442_v9, 4  ;;  %v13180_v34 = vor.u32 %v10811_v58, %v10809_v13  ;;  %v13183_v9 = vrot.slane %v10522_v7, 5  ;;  %v6385_v13 = vld [vmem:[#allocation2 + $0x30] sm:$0xe] }
 0x648   : > { %7067 = vrot.lane.b32.xlu1 %v10712_v33, %s7947_s22  ;;  %v10874_v33 = vrot.slane %v5401_v1, 4  ;;  %v13171_v1 = vcombine.low %v10653_v59, %v10656_v6  ;;  %v10896_v44 = vsel %vm8129_vm4, %v5347_v23, %v10763_v21  ;;  %v10913_v21 = vsel %vm8129_vm4, %v5395_v19, %v10837_v54  ;;  %v10931_v59 = vld [vmem:[#allocation2 + $0x14] sm:$0x1] }
 0x649   : > { %13173 = vst [vmem:[#allocation35_spill] sm:$0xff] %v10896_v44  ;;  %13174 = vst [vmem:[#allocation56_spill] sm:$0xff] %v10902_v50  ;;  %v5509_v17 = vcombine.low %v10872_v39, %v10913_v21  ;;  %v13178_v6 = vrot.slane %v10563_v30, 5  ;;  %v10941_v23 = vsel %vm8129_vm4, %v5443_v40, %v10900_v11  ;;  %v4368_v27 = vrot.slane %v4354_v45, %v8464_v8 }
 0x64a   : > { %6757 = vrot.lane.b32.xlu0 %v10742_v53, %s7945_s21  ;;  %v10889_v26 = vrot.slane %v13171_v1, %v8464_v8  ;;  %13177 = vst [vmem:[#allocation57_spill] sm:$0xff] %v10913_v21  ;;  %13179 = vst [vmem:[#allocation41_spill] sm:$0xff] %v10941_v23  ;;  %v5517_v15 = vcombine.low %v10896_v44, %v10941_v23  ;;  %v4388_v58 = vcombine.high %v10659_v48, %v10662_v60 }
 0x64b   : > { %v10935_v37 = vrot.slane %v13178_v6, 4  ;;  %v10969_v45 = vrot.slane %v5428_v47, 4  ;;  %v10972_v7 = vrot.slane %v5509_v17, %v13146_v38  ;;  %v5262_v6 = vld [vmem:[#allocation2 + $0x2c] sm:$0x1]  ;;  %v5451_v48 = vrot.slane %v5449_v14, 4 }
 0x64c   : > { %13172 = vst [vmem:[#allocation17_spill] sm:$0xff] %v10889_v26  ;;  %7075 = vrot.lane.b32.xlu1 %v10742_v53, %s7947_s22  ;;  %v10908_v53 = vrot.slane %v13175_v4, %v8464_v8  ;;  %v4476_v61 = vshrl.u32 %v10889_v26, 16  ;;  %v4369_v25 = vcombine.high %v10889_v26, %v13002_v24  ;;  %v10959_v4 = vsel %vm8140_vm5, %v7825_v28, %v13183_v9  ;;  %v5264_v17 = vld [vmem:[#allocation2 + $0x44] sm:$0x1] }
 0x64d   : > { %v10975_v28 = vrot.slane %v5517_v15, %v13146_v38  ;;  %v4402_v60 = vrot.slane %v4388_v58, %v8464_v8  ;;  %v4370_v9 = vcombine.high %v4368_v27, %v13002_v24  ;;  %v6431_v47 = vrot.slane %v5262_v6, 5 }
 0x64e   : > { %13176 = vst [vmem:[#allocation55_spill] sm:$0xff] %v10908_v53  ;;  %6765 = vrot.lane.b32.xlu0 %v10717_v49, %s7945_s21  ;;  %v4477_v36 = vshrl.u32 %v10908_v53, 16  ;;  %v4403_v52 = vcombine.high %v10908_v53, %v13002_v24  ;;  %v4482_v40 = vshrl.u32 %v4369_v25, 16  ;;  %v13187_v21 = vrot.slane %v10532_v16, 5 }
 0x64f   : > { %v4404_v14 = vcombine.high %v4402_v60, %v13002_v24  ;;  %v4494_v50 = vshrl.u32 %v4370_v9, 16  ;;  %v5431_v39 = vshll.u32 %v10723_v5, 16  ;;  %v11018_v16 = vsel %vm8140_vm5, %v10803_v62, %v6431_v47 }
 0x650   : > { %7083 = vrot.lane.b32.xlu1 %v10717_v49, %s7947_s22  ;;  %v10947_v49 = vrot.slane %v13180_v34, 4  ;;  %v10951_v1 = vpack.i.b16 %v4477_v36, %v4476_v61  ;;  %v10953_v19 = vpack.i.b16 %v4403_v52, %v4369_v25  ;;  %v6417_v61 = vrot.slane %v10931_v59, 5  ;;  %v5266_v34 = vld [vmem:[#allocation2 + $0x5c] sm:$0x1] }
 0x651   : > { %v7827_v36 = vrot.slane %v6383_v3, 9  ;;  %v4483_v15 = vshrl.u32 %v4403_v52, 16  ;;  %v4489_v3 = vshrl.u32 %v4402_v60, 16  ;;  %v5455_v25 = vshll.u32 %v5266_v34, 16 }
 0x652   : > { %13181 = vst [vmem:[#allocation42_spill] sm:$0xff] %v10951_v1  ;;  %13182 = vst [vmem:[#allocation32_spill] sm:$0xff] %v10953_v19  ;;  %6773 = vrot.lane.b32.xlu0 %v10746_v32, %s7945_s21  ;;  %v6384_v19 = vld [vmem:[#allocation2 + $0x24] sm:$0xe]  ;;  %v10985_v1 = vpack.i.b16 %v4402_v60, %v4368_v27  ;;  %v10993_v58 = vsel %vm8140_vm5, %v10799_v56, %v6417_v61  ;;  %v11001_v60 = vpack.i.b16 %v4404_v14, %v4370_v9 }
 0x653   : > { %v10995_v52 = vpack.i.b16 %v4483_v15, %v4482_v40  ;;  %v4495_v23 = vshrl.u32 %v4404_v14, 16  ;;  %v11007_v56 = vsel %vm8140_vm5, %v7827_v36, %v13187_v21  ;;  %v7829_v61 = vrot.slane %v6385_v13, 9  ;;  %v6386_v40 = vld [vmem:[#allocation2 + $0x3c] sm:$0xe] }
 0x654   : > { %7091 = vrot.lane.b32.xlu1 %v10746_v32, %s7947_s22  ;;  %13184 = vst [vmem:[#allocation33_spill] sm:$0xff] %v10985_v1  ;;  %v4488_v32 = vshrl.u32 %v4368_v27, 16  ;;  %v6388_v27 = vld [vmem:[#allocation2 + $0x54] sm:$0xe]  ;;  %v7828_v44 = vrot.slane %v6384_v19, 9  ;;  %v5452_v15 = vor.u32 %v5451_v48, %v10900_v11  ;;  %v6445_v21 = vrot.slane %v5264_v17, 5 }
 0x655   : > { %13185 = vst [vmem:[#allocation43_spill] sm:$0xff] %v10995_v52  ;;  %v6387_v52 = vld [vmem:[#allocation2 + $0x48] sm:$0xe]  ;;  %v6459_v19 = vrot.slane %v5266_v34, 5  ;;  %v7832_v13 = vrot.slane %v6388_v27, 9  ;;  %v5335_v5 = vshll.u32 %v10690_v42, 16 }
 0x656   : > { %6747 = vrot.lane.b32.xlu0 %v10959_v4, %s7945_s21  ;;  %v10999_v1 = vpack.i.b16 %v4489_v3, %v4488_v32  ;;  %v5359_v32 = vshll.u32 %v5262_v6, 16  ;;  %v5407_v3 = vshll.u32 %v5264_v17, 16  ;;  %v5383_v11 = vshll.u32 %v10693_v0, 16 }
 0x657   : > { %v7831_v36 = vrot.slane %v6387_v52, 9  ;;  %v7830_v6 = vrot.slane %v6386_v40, 9  ;;  %v5287_v48 = vshll.u32 %v10675_v57, 16  ;;  %v5453_v9 = vrot.slane %v5452_v15, 4 }
 0x658   : > { %6753 = vrot.lane.b32.xlu1 %v10993_v58, %s7945_s21  ;;  %13186 = vst [vmem:[#allocation44_spill] sm:$0xff] %v10999_v1  ;;  %v11011_v1 = vpack.i.b16 %v4495_v23, %v4494_v50  ;;  %v5311_v50 = vshll.u32 %v10931_v59, 16  ;;  %v5457_v23 = vrot.slane %v5455_v25, 5  ;;  %v13188_v62 = vrot.slane %v10542_v31, 5 }
 0x659   : > { %v5433_v47 = vrot.slane %v5431_v39, 5  ;;  %v5361_v17 = vrot.slane %v5359_v32, 5  ;;  %v5409_v14 = vrot.slane %v5407_v3, 5  ;;  %v11037_v42 = vsel %vm8140_vm5, %v10817_v41, %v6445_v21 }
 0x65a   : > { %6755 = vrot.lane.b32.xlu0 %v11007_v56, %s7945_s21  ;;  %v11030_v34 = vsel %vm8140_vm5, %v7829_v61, %v13188_v62  ;;  %v11042_v57 = vsel %vm8140_vm5, %v10935_v37, %v6459_v19  ;;  %v13189_v31 = vrot.slane %v10563_v30, 5  ;;  %v13190_v39 = vor.u32 %v10874_v33, %v10837_v54 }
 0x65b   : > { %v5337_v41 = vrot.slane %v5335_v5, 5  ;;  %v5385_v25 = vrot.slane %v5383_v11, 5  ;;  %v5313_v52 = vrot.slane %v5311_v50, 5  ;;  %v11057_v37 = vsel %vm8129_vm4, %v5453_v9, %v5457_v23 }
 0x65c   : > { %6761 = vrot.lane.b32.xlu1 %v11018_v16, %s7945_s21  ;;  %v11048_v0 = vsel %vm8140_vm5, %v7832_v13, %v13189_v31  ;;  %v5405_v59 = vrot.slane %v13190_v39, 4  ;;  %v13191_v30 = vrot.slane %v10556_v2, 5  ;;  %v13192_v61 = vrot.slane %v10537_v51, 5 }
 0x65d   : > { %v13193_v33 = vrot.slane %v10549_v29, 5  ;;  %v5289_v15 = vrot.slane %v5287_v48, 5  ;;  %v6587_v32 = vcombine.low %v11018_v16, %v11042_v57  ;;  %v11080_v2 = vsel %vm8129_vm4, %v10969_v45, %v5433_v47 }
 0x65e   : > { %6763 = vrot.lane.b32.xlu0 %v11030_v34, %s7945_s21  ;;  %v6450_v27 = vsel %vm8140_vm5, %v7831_v36, %v13191_v30  ;;  %v11067_v54 = vsel %vm8140_vm5, %v7828_v44, %v13192_v61  ;;  %v11085_v51 = vsel %vm8129_vm4, %v10825_v43, %v5361_v17  ;;  %v11089_v29 = vsel %vm8129_vm4, %v5405_v59, %v5409_v14  ;;  %v13199_v14 = vld [vmem:[#allocation14_spill] sm:$0xff] }
 0x65f   : > { %v11073_v40 = vsel %vm8140_vm5, %v7830_v6, %v13193_v33  ;;  %v13194_v44 = vrot.slane %v10527_v18, 5  ;;  %v13195_v3 = vrot.slane %v10920_v12, 9  ;;  %v6519_v45 = vcombine.low %v11067_v54, %v11048_v0  ;;  %v13197_v18 = vld [vmem:[#allocation15_spill] sm:$0xff] }
 0x660   : > { %6769 = vrot.lane.b32.xlu1 %v11037_v42, %s7945_s21  ;;  %v13196_v43 = vor.u32 %v10754_v35, %v10749_v55  ;;  %v5585_v13 = vcombine.low %v11085_v51, %v11057_v37  ;;  %v6579_v5 = vcombine.low %v10993_v58, %v11037_v42  ;;  %v11114_v22 = vsel %vm8129_vm4, %v13197_v18, %v5337_v41  ;;  %v13198_v35 = vld [vmem:[#allocation20_spill] sm:$0xff] }
 0x661   : > { %v11098_v21 = vsel %vm8140_vm5, %v13195_v3, %v13194_v44  ;;  %v11119_v12 = vsel %vm8129_vm4, %v10947_v49, %v5385_v25  ;;  %v11124_v55 = vsel %vm8129_vm4, %v13198_v35, %v5313_v52  ;;  %v6485_v11 = vcombine.low %v11007_v56, %v6450_v27 }
 0x662   : > { %6771 = vrot.lane.b32.xlu0 %v6450_v27, %s7945_s21  ;;  %v5285_v19 = vrot.slane %v13196_v43, 4  ;;  %v6511_v50 = vcombine.low %v11098_v21, %v11073_v40  ;;  %v5551_v23 = vcombine.low %v11114_v22, %v11080_v2  ;;  %v5577_v36 = vcombine.low %v11124_v55, %v11089_v29 }
 0x663   : > { %v11134_v6 = vrot.slane %v6587_v32, %v13146_v38  ;;  %v5483_v48 = vcombine.low %v10851_v10, %v10881_v20  ;;  %v6477_v9 = vcombine.low %v10959_v4, %v11030_v34  ;;  %v11147_v62 = vrot.slane %v6519_v45, %v13146_v38 }
 0x664   : > { %6777 = vrot.lane.b32.xlu1 %v11042_v57, %s7945_s21  ;;  %v11138_v49 = vsel %vm8129_vm4, %v5285_v19, %v5289_v15  ;;  %v11152_v17 = vrot.slane %v5585_v13, %v13146_v38  ;;  %v11155_v46 = vrot.slane %v6579_v5, %v13146_v38  ;;  %v5475_v31 = vcombine.low %v13199_v14, %v10865_v63  ;;  %v13203_v13 = vld [vmem:[#allocation18_spill] sm:$0xff]  ;;  %v13204_v5 = vld [vmem:[#allocation13_spill] sm:$0xff] }
 0x665   : > { %v5543_v47 = vcombine.low %v11138_v49, %v11119_v12  ;;  %v11165_v39 = vrot.slane %v6511_v50, %v13146_v38  ;;  %v11168_v59 = vrot.slane %v5551_v23, %v13146_v38  ;;  %v11171_v41 = vrot.slane %v5577_v36, %v13146_v38 }
 0x666   : > { %7065 = vrot.lane.b32.xlu0 %v10959_v4, %s7947_s22  ;;  %v11162_v4 = vrot.slane %v6485_v11, %v13146_v38  ;;  %v6595_v25 = vcombine.low %v11155_v46, %v11134_v6  ;;  %v11176_v52 = vrot.slane %v5483_v48, %v13146_v38  ;;  %v11179_v30 = vrot.slane %v6477_v9, %v13146_v38 }
 0x667   : > { %v6527_v61 = vcombine.low %v11165_v39, %v11147_v62  ;;  %v11186_v33 = vrot.slane %v5543_v47, %v13146_v38  ;;  %v5593_v15 = vcombine.low %v11171_v41, %v11152_v17  ;;  %v11193_v32 = vrot.slane %v5475_v31, %v13146_v38 }
 0x668   : > { %6751 = vrot.lane.b32.xlu1 %v11098_v21, %s7945_s21  ;;  %v6493_v44 = vcombine.low %v11179_v30, %v11162_v4  ;;  %v11200_v3 = vrot.slane %v6595_v25, %v8464_v8  ;;  %v13205_v18 = vcombine.low %v13203_v13, %v13204_v5  ;;  %v13207_v11 = vcombine.low %v10972_v7, %v10975_v28 }
 0x669   : > { %v5491_v45 = vcombine.low %v11193_v32, %v11176_v52  ;;  %v11207_v43 = vrot.slane %v6527_v61, %v8464_v8  ;;  %v11210_v19 = vrot.slane %v5593_v15, %v8464_v8  ;;  %vm13375_vm4 = vcmask 588800  }
 0x66a   : > { %7073 = vrot.lane.b32.xlu0 %v11007_v56, %s7947_s22  ;;  %v5559_v56 = vcombine.low %v11186_v33, %v11168_v59  ;;  %13200 = vst [vmem:[#allocation37_spill] sm:$0xff] %v11200_v3  ;;  %v11216_v35 = vrot.slane %v13205_v18, %v8464_v8  ;;  %v11227_v50 = vrot.slane %v6493_v44, %v8464_v8 }
 0x66b   : > { %13201 = vst [vmem:[#allocation38_spill] sm:$0xff] %v11207_v43  ;;  %13202 = vst [vmem:[#allocation66_spill] sm:$0xff] %v11210_v19  ;;  %v11233_v36 = vrot.slane %v5491_v45, %v8464_v8 }
 0x66c   : > { %6759 = vrot.lane.b32.xlu1 %v11067_v54, %s7945_s21  ;;  %13206 = vst [vmem:[#allocation68_spill] sm:$0xff] %v11216_v35  ;;  %13208 = vst [vmem:[#allocation67_spill] sm:$0xff] %v11227_v50  ;;  %v11230_v23 = vrot.slane %v5559_v56, %v8464_v8 }
 0x66e   : > { %7081 = vrot.lane.b32.xlu0 %v11030_v34, %s7947_s22  ;;  %v11224_v34 = vrot.slane %v13207_v11, %v8464_v8  ;;  %13209 = vst [vmem:[#allocation69_spill] sm:$0xff] %v11230_v23 }
 0x670   : > { %6767 = vrot.lane.b32.xlu1 %v11073_v40, %s7945_s21 }
 0x672   : > { %7089 = vrot.lane.b32.xlu0 %v6450_v27, %s7947_s22 }
 0x674   : > { %6775 = vrot.lane.b32.xlu1 %v11048_v0, %s7945_s21 }
 0x676   : > { %6065 = vrot.lane.b32.xlu0 %v11138_v49, %s7947_s22 }
 0x678   : > { %7071 = vrot.lane.b32.xlu1 %v10993_v58, %s7947_s22  ;;  %v4626_v61 = vpop.permute.xlu0 %4625 }
 0x67a   : > { %v4630_v27 = vpop.permute.xlu1 %4629  ;;  %6073 = vrot.lane.b32.xlu0 %v11114_v22, %s7947_s22 }
 0x67c   : > { %7079 = vrot.lane.b32.xlu1 %v11018_v16, %s7947_s22  ;;  %v4634_v15 = vpop.permute.xlu0 %4633 }
 0x67e   : > { %v4638_v44 = vpop.permute.xlu1 %4637  ;;  %6081 = vrot.lane.b32.xlu0 %v11119_v12, %s7947_s22 }
 0x680   : > { %7087 = vrot.lane.b32.xlu1 %v11037_v42, %s7947_s22  ;;  %v4642_v56 = vpop.permute.xlu0 %4641 }
 0x681   : > { %v4739_v58 = vcombine.low %v4626_v61, %v4642_v56 }
 0x682   : > { %v4646_v45 = vpop.permute.xlu1 %4645  ;;  %6089 = vrot.lane.b32.xlu0 %v11080_v2, %s7947_s22 }
 0x683   : > { %v4773_v18 = vcombine.low %v4630_v27, %v4646_v45  ;;  %v11267_v47 = vrot.slane %v4739_v58, %v13146_v38 }
 0x684   : > { %7095 = vrot.lane.b32.xlu1 %v11042_v57, %s7947_s22  ;;  %v4650_v11 = vpop.permute.xlu0 %4649 }
 0x685   : > { %v4747_v16 = vcombine.low %v4634_v15, %v4650_v11  ;;  %v11275_v61 = vrot.slane %v4773_v18, %v13146_v38 }
 0x686   : > { %v4654_v48 = vpop.permute.xlu1 %4653  ;;  %5747 = vrot.lane.b32.xlu0 %v11138_v49, %s7945_s21 }
 0x687   : > { %v4781_v25 = vcombine.low %v4638_v44, %v4654_v48  ;;  %v11270_v42 = vrot.slane %v4747_v16, %v13146_v38 }
 0x688   : > { %6069 = vrot.lane.b32.xlu1 %v11124_v55, %s7947_s22  ;;  %v4944_v27 = vpop.permute.xlu0 %4943 }
 0x689   : > { %v11278_v57 = vrot.slane %v4781_v25, %v13146_v38  ;;  %v4755_v48 = vcombine.low %v11267_v47, %v11270_v42 }
 0x68a   : > { %v4948_v49 = vpop.permute.xlu1 %4947  ;;  %5755 = vrot.lane.b32.xlu0 %v11114_v22, %s7945_s21 }
 0x68b   : > { %v4789_v15 = vcombine.low %v11275_v61, %v11278_v57  ;;  %v11292_v25 = vrot.slane %v4755_v48, %v8464_v8 }
 0x68c   : > { %6077 = vrot.lane.b32.xlu1 %v11085_v51, %s7947_s22  ;;  %v4952_v56 = vpop.permute.xlu0 %4951 }
 0x68d   : > { %v11289_v44 = vrot.slane %v4789_v15, %v8464_v8  ;;  %13211 = vst [vmem:[#allocation62_spill] sm:$0xff] %v11292_v25 }
 0x68e   : > { %v4956_v45 = vpop.permute.xlu1 %4955  ;;  %5763 = vrot.lane.b32.xlu0 %v11119_v12, %s7945_s21 }
 0x68f   : > { %13210 = vst [vmem:[#allocation49_spill] sm:$0xff] %v11289_v44  ;;  %v13222_v44 = vld [vmem:[#allocation16_spill] sm:$0xff] }
 0x690   : > { %6085 = vrot.lane.b32.xlu1 %v11089_v29, %s7947_s22  ;;  %v4960_v58 = vpop.permute.xlu0 %4959 }
 0x691   : > { %v5057_v11 = vcombine.low %v4944_v27, %v4960_v58 }
 0x692   : > { %v4964_v18 = vpop.permute.xlu1 %4963  ;;  %5771 = vrot.lane.b32.xlu0 %v11080_v2, %s7945_s21 }
 0x693   : > { %v5091_v16 = vcombine.low %v4948_v49, %v4964_v18  ;;  %v11307_v9 = vrot.slane %v5057_v11, %v13146_v38  ;;  %v13216_v11 = vld [vmem:[#allocation11_spill] sm:$0xff] }
 0x694   : > { %6093 = vrot.lane.b32.xlu1 %v11057_v37, %s7947_s22  ;;  %v4968_v48 = vpop.permute.xlu0 %4967 }
 0x695   : > { %v5065_v15 = vcombine.low %v4952_v56, %v4968_v48  ;;  %v11315_v2 = vrot.slane %v5091_v16, %v13146_v38  ;;  %v13212_v56 = vld [vmem:[#allocation12_spill] sm:$0xff]  ;;  %v13217_v16 = vld [vmem:[#allocation7_spill] sm:$0xff] }
 0x696   : > { %v4972_v31 = vpop.permute.xlu1 %4971  ;;  %7069 = vrot.lane.b32.xlu0 %v11098_v21, %s7947_s22  ;;  %v13218_v48 = vcombine.low %v13216_v11, %v13217_v16 }
 0x697   : > { %v5099_v12 = vcombine.low %v4956_v45, %v4972_v31  ;;  %v11310_v22 = vrot.slane %v5065_v15, %v13146_v38  ;;  %v13213_v45 = vld [vmem:[#allocation8_spill] sm:$0xff] }
 0x698   : > { %5751 = vrot.lane.b32.xlu1 %v11124_v55, %s7945_s21  ;;  %v4624_v49 = vpop.permute.xlu0 %4623  ;;  %v13214_v58 = vcombine.low %v13212_v56, %v13213_v45  ;;  %v11338_v15 = vrot.slane %v13218_v48, %v8464_v8 }
 0x699   : > { %v11318_v27 = vrot.slane %v5099_v12, %v13146_v38  ;;  %v5073_v31 = vcombine.low %v11307_v9, %v11310_v22 }
 0x69a   : > { %v4628_v21 = vpop.permute.xlu1 %4627  ;;  %v11326_v18 = vrot.slane %v13214_v58, %v8464_v8  ;;  %7077 = vrot.lane.b32.xlu0 %v11067_v54, %s7947_s22  ;;  %13219 = vst [vmem:[#allocation60_spill] sm:$0xff] %v11338_v15  ;;  %v4500_v54 = vshrl.u32 %v11338_v15, 16 }
 0x69b   : > { %v5107_v55 = vcombine.low %v11315_v2, %v11318_v27  ;;  %v11344_v45 = vrot.slane %v5073_v31, %v8464_v8 }
 0x69c   : > { %13215 = vst [vmem:[#allocation36_spill] sm:$0xff] %v11326_v18  ;;  %5759 = vrot.lane.b32.xlu1 %v11085_v51, %s7945_s21  ;;  %v4632_v56 = vpop.permute.xlu0 %4631  ;;  %v4501_v26 = vshrl.u32 %v11326_v18, 16  ;;  %v4471_v31 = vcombine.high %v11326_v18, %v13002_v24  ;;  %v7751_v51 = vcombine.low %v13222_v44, %v13222_v44 }
 0x69d   : > { %v11341_v12 = vrot.slane %v5107_v55, %v8464_v8  ;;  %13221 = vst [vmem:[#allocation65_spill] sm:$0xff] %v11344_v45 }
 0x69e   : > { %v4636_v58 = vpop.permute.xlu1 %4635  ;;  %7085 = vrot.lane.b32.xlu0 %v11073_v40, %s7947_s22  ;;  %v4502_v16 = vpack.i.b16 %v4501_v26, %v4500_v54  ;;  %v4437_v40 = vcombine.high %v11338_v15, %v13002_v24 }
 0x69f   : > { %13220 = vst [vmem:[#allocation63_spill] sm:$0xff] %v11341_v12 }
 0x6a0   : > { %5767 = vrot.lane.b32.xlu1 %v11089_v29, %s7945_s21  ;;  %v4640_v55 = vpop.permute.xlu0 %4639  ;;  %v7748_v54 = vcombine.low %v4502_v16, %v4502_v16  ;;  %v4505_v12 = vpack.i.b16 %v4471_v31, %v4437_v40  ;;  %v4506_v16 = vshrl.u32 %v4437_v40, 16 }
 0x6a1   : > { %v4671_v48 = vcombine.low %v4624_v49, %v4640_v55 }
 0x6a2   : > { %v4644_v11 = vpop.permute.xlu1 %4643  ;;  %7093 = vrot.lane.b32.xlu0 %v11048_v0, %s7947_s22  ;;  %v7749_v55 = vcombine.low %v4505_v12, %v4505_v12 }
 0x6a3   : > { %v4705_v29 = vcombine.low %v4628_v21, %v4644_v11  ;;  %v11366_v0 = vrot.slane %v4671_v48, %v13146_v38  ;;  %v13227_v21 = vld [vmem:[#allocation9_spill] sm:$0xff]  ;;  %v4507_v11 = vshrl.u32 %v4471_v31, 16 }
 0x6a4   : > { %5775 = vrot.lane.b32.xlu1 %v11057_v37, %s7945_s21  ;;  %v4648_v53 = vpop.permute.xlu0 %4647 }
 0x6a5   : > { %v4679_v45 = vcombine.low %v4632_v56, %v4648_v53  ;;  %13223 = vst [vmem:[#allocation61_spill] sm:$0xff] %v11366_v0  ;;  %v11373_v49 = vrot.slane %v4705_v29, %v13146_v38  ;;  %v7752_v56 = vcombine.low %v13227_v21, %v13227_v21  ;;  %v4508_v31 = vpack.i.b16 %v4507_v11, %v4506_v16 }
 0x6a6   : > { %v4652_v26 = vpop.permute.xlu1 %4651  ;;  %4563 = vrot.lane.b32.xlu0 %v7751_v51, %s7953_s26 }
 0x6a7   : > { %v4713_v18 = vcombine.low %v4636_v58, %v4652_v26  ;;  %v11369_v37 = vrot.slane %v4679_v45, %v13146_v38  ;;  %13225 = vst [vmem:[#allocation22_spill] sm:$0xff] %v11373_v49 }
 0x6a8   : > { %4551 = vrot.lane.b32.xlu1 %v7748_v54, %s7950_s23  ;;  %v4942_v53 = vpop.permute.xlu0 %4941  ;;  %v13230_v54 = vld [vmem:[#allocation19_spill] sm:$0xff] }
 0x6a9   : > { %13224 = vst [vmem:[#allocation64_spill] sm:$0xff] %v11369_v37  ;;  %v11376_v44 = vrot.slane %v4713_v18, %v13146_v38  ;;  %v4687_v58 = vcombine.low %v11366_v0, %v11369_v37  ;;  %v7753_v12 = vcombine.low %v13230_v54, %v13230_v54 }
 0x6aa   : > { %v4946_v51 = vpop.permute.xlu1 %4945  ;;  %4567 = vrot.lane.b32.xlu0 %v7752_v56, %s7954_s27 }
 0x6ab   : > { %13226 = vst [vmem:[#allocation23_spill] sm:$0xff] %v11376_v44  ;;  %v4721_v45 = vcombine.low %v11373_v49, %v11376_v44  ;;  %v11390_v29 = vrot.slane %v4687_v58, %v8464_v8 }
 0x6ac   : > { %4555 = vrot.lane.b32.xlu1 %v7749_v55, %s7951_s24  ;;  %v4950_v48 = vpop.permute.xlu0 %4949  ;;  %v7750_v55 = vcombine.low %v4508_v31, %v4508_v31  ;;  %v13233_v31 = vld [vmem:[#allocation21_spill] sm:$0xff] }
 0x6ad   : > { %v11387_v18 = vrot.slane %v4721_v45, %v8464_v8  ;;  %13229 = vst [vmem:[#allocation6_spill] sm:$0xff] %v11390_v29 }
 0x6ae   : > { %v4954_v26 = vpop.permute.xlu1 %4953  ;;  %6063 = vrot.lane.b32.xlu0 %v13199_v14, %s7947_s22 }
 0x6af   : > { %13228 = vst [vmem:[#allocation24_spill] sm:$0xff] %v11387_v18 }
 0x6b0   : > { %4571 = vrot.lane.b32.xlu1 %v7753_v12, %s7955_s28  ;;  %v4958_v21 = vpop.permute.xlu0 %4957 }
 0x6b1   : > { %v4989_v58 = vcombine.low %v4942_v53, %v4958_v21 }
 0x6b2   : > { %v4962_v56 = vpop.permute.xlu1 %4961  ;;  %6071 = vrot.lane.b32.xlu0 %v10851_v10, %s7947_s22 }
 0x6b3   : > { %v5023_v45 = vcombine.low %v4946_v51, %v4962_v56  ;;  %v11405_v12 = vrot.slane %v4989_v58, %v13146_v38 }
 0x6b4   : > { %4559 = vrot.lane.b32.xlu1 %v7750_v55, %s7952_s25  ;;  %v4966_v54 = vpop.permute.xlu0 %4965  ;;  %v13234_v55 = vld [vmem:[#allocation35_spill] sm:$0xff] }
 0x6b5   : > { %v4997_v11 = vcombine.low %v4950_v48, %v4966_v54  ;;  %13231 = vst [vmem:[#allocation39_spill] sm:$0xff] %v11405_v12  ;;  %v11413_v53 = vrot.slane %v5023_v45, %v13146_v38 }
 0x6b6   : > { %v4970_v16 = vpop.permute.xlu1 %4969  ;;  %6079 = vrot.lane.b32.xlu0 %v10865_v63, %s7947_s22 }
 0x6b7   : > { %v5031_v15 = vcombine.low %v4954_v26, %v4970_v16  ;;  %v11408_v40 = vrot.slane %v4997_v11, %v13146_v38  ;;  %v13237_v11 = vld [vmem:[#allocation57_spill] sm:$0xff] }
 0x6b8   : > { %6067 = vrot.lane.b32.xlu1 %v13233_v31, %s7947_s22  ;;  %v6750_v48 = vpop.permute.xlu0 %6749 }
 0x6b9   : > { %13232 = vst [vmem:[#allocation40_spill] sm:$0xff] %v11408_v40  ;;  %v11416_v51 = vrot.slane %v5031_v15, %v13146_v38  ;;  %v5005_v26 = vcombine.low %v11405_v12, %v11408_v40 }
 0x6ba   : > { %v11420_v21 = vpop.permute.xlu1 %7067  ;;  %6087 = vrot.lane.b32.xlu0 %v10881_v20, %s7947_s22 }
 0x6bb   : > { %v5039_v56 = vcombine.low %v11413_v53, %v11416_v51  ;;  %v11432_v45 = vrot.slane %v5005_v26, %v8464_v8  ;;  %v13238_v26 = vld [vmem:[#allocation41_spill] sm:$0xff] }
 0x6bc   : > { %6075 = vrot.lane.b32.xlu1 %v13234_v55, %s7947_s22  ;;  %v6758_v15 = vpop.permute.xlu0 %6757 }
 0x6bd   : > { %v11429_v58 = vrot.slane %v5039_v56, %v8464_v8  ;;  %13236 = vst [vmem:[#allocation47_spill] sm:$0xff] %v11432_v45  ;;  %v13239_v45 = vld [vmem:[#allocation56_spill] sm:$0xff] }
 0x6be   : > { %v11434_v54 = vpop.permute.xlu1 %7075  ;;  %5745 = vrot.lane.b32.xlu0 %v13199_v14, %s7945_s21 }
 0x6bf   : > { %13235 = vst [vmem:[#allocation48_spill] sm:$0xff] %v11429_v58  ;;  %v7754_v58 = vcombine.low %v13239_v45, %v13239_v45  ;;  %v6494_v45 = vcombine.high %v11179_v30, %v11162_v4  ;;  %v13243_v30 = vld [vmem:[#allocation33_spill] sm:$0xff] }
 0x6c0   : > { %6083 = vrot.lane.b32.xlu1 %v13237_v11, %s7947_s22  ;;  %v6766_v29 = vpop.permute.xlu0 %6765 }
 0x6c2   : > { %v11442_v18 = vpop.permute.xlu1 %7083  ;;  %5753 = vrot.lane.b32.xlu0 %v10851_v10, %s7945_s21 }
 0x6c4   : > { %6091 = vrot.lane.b32.xlu1 %v13238_v26, %s7947_s22  ;;  %v6774_v56 = vpop.permute.xlu0 %6773 }
 0x6c5   : > { %v6871_v44 = vcombine.low %v6758_v15, %v6774_v56  ;;  %v13246_v56 = vld [vmem:[#allocation44_spill] sm:$0xff] }
 0x6c6   : > { %v11448_v0 = vpop.permute.xlu1 %7091  ;;  %5761 = vrot.lane.b32.xlu0 %v10865_v63, %s7945_s21  ;;  %v6528_v63 = vcombine.high %v11165_v39, %v11147_v62 }
 0x6c8   : > { %5749 = vrot.lane.b32.xlu1 %v13233_v31, %s7945_s21  ;;  %v11454_v14 = vpop.permute.xlu0 %6747  ;;  %v11481_v62 = vrot.slane %v6528_v63, %v8464_v8  ;;  %v7746_v63 = vcombine.low %v11001_v60, %v11001_v60 }
 0x6ca   : > { %v6754_v16 = vpop.permute.xlu1 %6753  ;;  %5769 = vrot.lane.b32.xlu0 %v10881_v20, %s7945_s21  ;;  %v13240_v20 = vld [vmem:[#allocation42_spill] sm:$0xff] }
 0x6cb   : > { %v7741_v49 = vcombine.low %v13240_v20, %v13240_v20  ;;  %v13241_v20 = vld [vmem:[#allocation32_spill] sm:$0xff] }
 0x6cc   : > { %5757 = vrot.lane.b32.xlu1 %v13234_v55, %s7945_s21  ;;  %v11460_v10 = vpop.permute.xlu0 %6755  ;;  %v6596_v55 = vcombine.high %v11155_v46, %v11134_v6  ;;  %v7742_v40 = vcombine.low %v13241_v20, %v13241_v20  ;;  %v11489_v46 = vrot.slane %v6871_v44, %v13146_v38  ;;  %v5594_v44 = vcombine.high %v11171_v41, %v11152_v17 }
 0x6ce   : > { %v6762_v37 = vpop.permute.xlu1 %6761  ;;  %4575 = vrot.lane.b32.xlu0 %v7754_v58, %s7956_s29  ;;  %v6863_v58 = vcombine.low %v6750_v48, %v6766_v29  ;;  %v11486_v6 = vrot.slane %v6596_v55, %v8464_v8  ;;  %13242 = vst [vmem:[#allocation52_spill] sm:$0xff] %v11489_v46  ;;  %v11494_v29 = vrot.slane %v6494_v45, %v8464_v8 }
 0x6cf   : > { %v5560_v45 = vcombine.high %v11186_v33, %v11168_v59 }
 0x6d0   : > { %5765 = vrot.lane.b32.xlu1 %v13237_v11, %s7945_s21  ;;  %v11469_v31 = vpop.permute.xlu0 %6763 }
 0x6d2   : > { %v6770_v12 = vpop.permute.xlu1 %6769  ;;  %4523 = vrot.lane.b32.xlu0 %v7741_v49, %s7950_s23  ;;  %v7744_v49 = vcombine.low %v13243_v30, %v13243_v30 }
 0x6d3   : > { %v6897_v39 = vcombine.low %v6754_v16, %v6770_v12  ;;  %v13244_v12 = vcombine.high %v13203_v13, %v13204_v5  ;;  %v11506_v16 = vrot.slane %v6863_v58, %v13146_v38  ;;  %v7745_v13 = vcombine.low %v13246_v56, %v13246_v56 }
 0x6d4   : > { %5773 = vrot.lane.b32.xlu1 %v13238_v26, %s7945_s21  ;;  %v6772_v11 = vpop.permute.xlu0 %6771  ;;  %v6627_v5 = vpack.i.b16 %v11481_v62, %v11494_v29 }
 0x6d5   : > { %v11501_v15 = vrot.slane %v13244_v12, %v8464_v8  ;;  %13245 = vst [vmem:[#allocation45_spill] sm:$0xff] %v11506_v16  ;;  %v11510_v26 = vrot.slane %v6897_v39, %v13146_v38  ;;  %v6879_v17 = vcombine.low %v11506_v16, %v11489_v46  ;;  %v11534_v39 = vrot.slane %v5594_v44, %v8464_v8 }
 0x6d6   : > { %v6778_v4 = vpop.permute.xlu1 %6777  ;;  %4527 = vrot.lane.b32.xlu0 %v7742_v40, %s7951_s24  ;;  %v6640_v12 = vshrl.u32 %v11216_v35, 16  ;;  %v6795_v44 = vcombine.low %v11454_v14, %v11469_v31  ;;  %v11634_v46 = vcombine.high %v11486_v6, %v13002_v24 }
 0x6d7   : > { %v6905_v48 = vcombine.low %v6762_v37, %v6778_v4  ;;  %v6651_v55 = vpack.i.b16 %v11486_v6, %v11501_v15  ;;  %v7836_v4 = vcombine.low %v6627_v5, %v6627_v5  ;;  %v11542_v30 = vrot.slane %v6879_v17, %v8464_v8 }
 0x6d8   : > { %4535 = vrot.lane.b32.xlu1 %v7744_v49, %s7953_s26  ;;  %v11515_v40 = vpop.permute.xlu0 %7065  ;;  %v6641_v49 = vshrl.u32 %v11200_v3, 16  ;;  %v11561_v17 = vcombine.high %v11200_v3, %v13002_v24 }
 0x6d9   : > { %v11513_v37 = vrot.slane %v6905_v48, %v13146_v38  ;;  %13248 = vst [vmem:[#allocation29_spill] sm:$0xff] %v11542_v30  ;;  %v7843_v33 = vcombine.low %v6651_v55, %v6651_v55  ;;  %v11546_v48 = vrot.slane %v5560_v45, %v8464_v8  ;;  %v13249_v45 = vld [vmem:[#allocation43_spill] sm:$0xff] }
 0x6da   : > { %v6752_v41 = vpop.permute.xlu1 %6751  ;;  %4539 = vrot.lane.b32.xlu0 %v7745_v13, %s7954_s27  ;;  %v7747_v13 = vcombine.low %v11011_v1, %v11011_v1  ;;  %v11570_v1 = vcombine.high %v11216_v35, %v13002_v24 }
 0x6db   : > { %v6913_v58 = vcombine.low %v11510_v26, %v11513_v37  ;;  %v5649_v5 = vpack.i.b16 %v11534_v39, %v11546_v48 }
 0x6dc   : > { %4543 = vrot.lane.b32.xlu1 %v7746_v63, %s7955_s28  ;;  %v11539_v60 = vpop.permute.xlu0 %7073  ;;  %v6803_v63 = vcombine.low %v11460_v10, %v6772_v11  ;;  %v6616_v10 = vshrl.u32 %v11227_v50, 16  ;;  %v6629_v11 = vshrl.u32 %v11481_v62, 16 }
 0x6dd   : > { %v11537_v20 = vrot.slane %v6913_v58, %v8464_v8  ;;  %v7743_v58 = vcombine.low %v13249_v45, %v13249_v45 }
 0x6de   : > { %v6760_v59 = vpop.permute.xlu1 %6759  ;;  %6675 = vrot.lane.b32.xlu0 %v7836_v4, %s7953_s26  ;;  %v6642_v4 = vpack.i.b16 %v6641_v49, %v6640_v12  ;;  %v7793_v49 = vcombine.low %v5649_v5, %v5649_v5  ;;  %v6645_v12 = vpack.i.b16 %v11561_v17, %v11570_v1  ;;  %v11583_v35 = vrot.slane %v6803_v63, %v13146_v38 }
 0x6df   : > { %13247 = vst [vmem:[#allocation46_spill] sm:$0xff] %v11537_v20  ;;  %v11596_v63 = vcombine.high %v11227_v50, %v13002_v24 }
 0x6e0   : > { %6703 = vrot.lane.b32.xlu1 %v7843_v33, %s7953_s26  ;;  %v11553_v56 = vpop.permute.xlu0 %7081  ;;  %v6617_v33 = vshrl.u32 %v11207_v43, 16  ;;  %13250 = vst [vmem:[#allocation31_spill] sm:$0xff] %v11583_v35  ;;  %v7840_v14 = vcombine.low %v6642_v4, %v6642_v4 }
 0x6e2   : > { %v6768_v55 = vpop.permute.xlu1 %6767  ;;  %4547 = vrot.lane.b32.xlu0 %v7747_v13, %s7956_s29  ;;  %v6628_v13 = vshrl.u32 %v11494_v29, 16  ;;  %v6618_v31 = vpack.i.b16 %v6617_v33, %v6616_v10 }
 0x6e3   : > { %v6829_v3 = vcombine.low %v6752_v41, %v6768_v55  ;;  %v11591_v41 = vrot.slane %v6795_v44, %v13146_v38 }
 0x6e4   : > { %4531 = vrot.lane.b32.xlu1 %v7743_v58, %s7952_s25  ;;  %v11577_v45 = vpop.permute.xlu0 %7089  ;;  %v11587_v58 = vcombine.high %v11207_v43, %v13002_v24  ;;  %v6630_v5 = vpack.i.b16 %v6629_v11, %v6628_v13  ;;  %v7833_v11 = vcombine.low %v6618_v31, %v6618_v31  ;;  %v6653_v13 = vshrl.u32 %v11486_v6, 16 }
 0x6e5   : > { %13251 = vst [vmem:[#allocation26_spill] sm:$0xff] %v11591_v41  ;;  %v11599_v55 = vrot.slane %v6829_v3, %v13146_v38  ;;  %v6811_v44 = vcombine.low %v11591_v41, %v11583_v35  ;;  %v7189_v31 = vcombine.low %v11434_v54, %v11448_v0  ;;  %v11627_v35 = vcombine.high %v11210_v19, %v13002_v24 }
 0x6e6   : > { %v6776_v30 = vpop.permute.xlu1 %6775  ;;  %5701 = vrot.lane.b32.xlu0 %v7793_v49, %s7953_s26  ;;  %v6621_v49 = vpack.i.b16 %v11587_v58, %v11596_v63  ;;  %v7181_v0 = vcombine.low %v11420_v21, %v11442_v18  ;;  %v5575_v54 = vcombine.high %v11230_v23, %v13002_v24 }
 0x6e7   : > { %v6837_v20 = vcombine.low %v6760_v59, %v6776_v30  ;;  %v7841_v30 = vcombine.low %v6645_v12, %v6645_v12  ;;  %v5639_v59 = vshrl.u32 %v11210_v19, 16  ;;  %v7837_v12 = vcombine.low %v6630_v5, %v6630_v5 }
 0x6e8   : > { %6691 = vrot.lane.b32.xlu1 %v7840_v14, %s7950_s23  ;;  %v11604_v33 = vpop.permute.xlu0 %6065  ;;  %v6652_v14 = vshrl.u32 %v11501_v15, 16  ;;  %v7834_v5 = vcombine.low %v6621_v49, %v6621_v49  ;;  %v7196_v49 = vrot.slane %v7189_v31, %v13146_v38  ;;  %v5643_v21 = vpack.i.b16 %v11627_v35, %v5575_v54 }
 0x6e9   : > { %v11602_v4 = vrot.slane %v6837_v20, %v13146_v38  ;;  %v5638_v20 = vshrl.u32 %v11230_v23, 16 }
 0x6ea   : > { %v7072_v10 = vpop.permute.xlu1 %7071  ;;  %6695 = vrot.lane.b32.xlu0 %v7841_v30, %s7951_s24  ;;  %v11630_v30 = vrot.slane %v6811_v44, %v8464_v8  ;;  %v6654_v16 = vpack.i.b16 %v6653_v13, %v6652_v14  ;;  %v5651_v44 = vshrl.u32 %v11534_v39, 16  ;;  %v6544_v14 = vcombine.high %v11481_v62, %v13002_v24 }
 0x6eb   : > { %v6845_v3 = vcombine.low %v11599_v55, %v11602_v4  ;;  %v5640_v41 = vpack.i.b16 %v5639_v59, %v5638_v20  ;;  %v11644_v59 = vcombine.high %v11501_v15, %v13002_v24  ;;  %v5650_v15 = vshrl.u32 %v11546_v48, 16 }
 0x6ec   : > { %6663 = vrot.lane.b32.xlu1 %v7833_v11, %s7950_s23  ;;  %v11623_v43 = vpop.permute.xlu0 %6073  ;;  %13253 = vst [vmem:[#allocation50_spill] sm:$0xff] %v11630_v30  ;;  %v7844_v20 = vcombine.low %v6654_v16, %v6654_v16  ;;  %v11665_v16 = vcombine.high %v11534_v39, %v13002_v24  ;;  %v7791_v30 = vcombine.low %v5643_v21, %v5643_v21 }
 0x6ed   : > { %v11621_v50 = vrot.slane %v6845_v3, %v8464_v8  ;;  %v7790_v18 = vcombine.low %v5640_v41, %v5640_v41  ;;  %v5652_v31 = vpack.i.b16 %v5651_v44, %v5650_v15  ;;  %v6510_v41 = vcombine.high %v11494_v29, %v13002_v24 }
 0x6ee   : > { %v7080_v11 = vpop.permute.xlu1 %7079  ;;  %6679 = vrot.lane.b32.xlu0 %v7837_v12, %s7954_s27  ;;  %v6657_v12 = vpack.i.b16 %v11634_v46, %v11644_v59  ;;  %v6635_v44 = vshrl.u32 %v6544_v14, 16  ;;  %v5492_v29 = vcombine.high %v11193_v32, %v11176_v52  ;;  %v13254_v39 = vcombine.high %v10972_v7, %v10975_v28 }
 0x6ef   : > { %13252 = vst [vmem:[#allocation54_spill] sm:$0xff] %v11621_v50  ;;  %v7794_v21 = vcombine.low %v5652_v31, %v5652_v31  ;;  %v6646_v31 = vshrl.u32 %v11570_v1, 16 }
 0x6f0   : > { %6667 = vrot.lane.b32.xlu1 %v7834_v5, %s7951_s24  ;;  %v11650_v13 = vpop.permute.xlu0 %6081  ;;  %v7188_v5 = vrot.slane %v7181_v0, %v13146_v38  ;;  %v7845_v50 = vcombine.low %v6657_v12, %v6657_v12  ;;  %v6633_v0 = vpack.i.b16 %v6544_v14, %v6510_v41  ;;  %v6647_v12 = vshrl.u32 %v11561_v17, 16 }
 0x6f2   : > { %v7088_v3 = vpop.permute.xlu1 %7087  ;;  %5689 = vrot.lane.b32.xlu0 %v7790_v18, %s7950_s23  ;;  %v7198_v6 = vcombine.high %v7188_v5, %v7196_v49  ;;  %v11671_v18 = vcombine.high %v11546_v48, %v13002_v24  ;;  %v7838_v15 = vcombine.low %v6633_v0, %v6633_v0 }
 0x6f3   : > { %v7215_v23 = vcombine.low %v7072_v10, %v7088_v3  ;;  %v6634_v3 = vshrl.u32 %v6510_v41, 16 }
 0x6f4   : > { %6707 = vrot.lane.b32.xlu1 %v7844_v20, %s7954_s27  ;;  %v11667_v19 = vpop.permute.xlu0 %6089  ;;  %v11679_v20 = vrot.slane %v13254_v39, %v8464_v8  ;;  %v5655_v48 = vpack.i.b16 %v11665_v16, %v11671_v18  ;;  %v11687_v52 = vrot.slane %v7198_v6, %v8464_v8  ;;  %v5644_v6 = vshrl.u32 %v5575_v54, 16 }
 0x6f5   : > { %v7222_v32 = vrot.slane %v7215_v23, %v13146_v38  ;;  %v6636_v14 = vpack.i.b16 %v6635_v44, %v6634_v3  ;;  %v6623_v23 = vshrl.u32 %v11587_v58, 16  ;;  %v6659_v3 = vshrl.u32 %v11634_v46, 16 }
 0x6f6   : > { %v7096_v62 = vpop.permute.xlu1 %7095  ;;  %5693 = vrot.lane.b32.xlu0 %v7791_v30, %s7951_s24  ;;  %v5645_v30 = vshrl.u32 %v11627_v35, 16  ;;  %v7795_v35 = vcombine.low %v5655_v48, %v5655_v48  ;;  %v7214_v58 = vcombine.high %v11687_v52, %v13002_v24 }
 0x6f7   : > { %v7223_v10 = vcombine.low %v7080_v11, %v7096_v62  ;;  %v7197_v11 = vcombine.low %v7188_v5, %v7196_v49  ;;  %v11700_v62 = vrot.slane %v5492_v29, %v8464_v8  ;;  %v6648_v49 = vpack.i.b16 %v6647_v12, %v6646_v31 }
 0x6f8   : > { %6711 = vrot.lane.b32.xlu1 %v7845_v50, %s7955_s28  ;;  %v11691_v28 = vpop.permute.xlu0 %5747  ;;  %v6622_v5 = vshrl.u32 %v11596_v63, 16  ;;  %v5646_v54 = vpack.i.b16 %v5645_v30, %v5644_v6  ;;  %v7288_v12 = vshrl.u32 %v11687_v52, 16  ;;  %v7294_v31 = vshrl.u32 %v7214_v58, 16 }
 0x6f9   : > { %v7230_v7 = vrot.slane %v7223_v10, %v13146_v38  ;;  %v11715_v29 = vrot.slane %v7197_v11, %v8464_v8  ;;  %v7839_v10 = vcombine.low %v6636_v14, %v6636_v14  ;;  %v7842_v11 = vcombine.low %v6648_v49, %v6648_v49 }
 0x6fa   : > { %v11694_v50 = vpop.permute.xlu1 %6069  ;;  %5705 = vrot.lane.b32.xlu0 %v7794_v21, %s7954_s27  ;;  %v6624_v63 = vpack.i.b16 %v6623_v23, %v6622_v5  ;;  %v5625_v21 = vpack.i.b16 %v11679_v20, %v11700_v62  ;;  %v5615_v14 = vshrl.u32 %v11224_v34, 16  ;;  %v6179_v49 = vcombine.low %v11604_v33, %v11650_v13 }
 0x6fb   : > { %v7231_v41 = vcombine.low %v7222_v32, %v7230_v7  ;;  %v7232_v17 = vcombine.high %v7222_v32, %v7230_v7  ;;  %13256 = vst [vmem:[#allocation27_spill] sm:$0xff] %v11715_v29  ;;  %v5614_v5 = vshrl.u32 %v11233_v36, 16  ;;  %v5656_v13 = vshrl.u32 %v11671_v18, 16 }
 0x6fc   : > { %6683 = vrot.lane.b32.xlu1 %v7838_v15, %s7955_s28  ;;  %v11710_v44 = vpop.permute.xlu0 %5755  ;;  %v7792_v15 = vcombine.low %v5646_v54, %v5646_v54  ;;  %v5657_v54 = vshrl.u32 %v11665_v16, 16  ;;  %v5626_v16 = vshrl.u32 %v11700_v62, 16  ;;  %v5542_v18 = vcombine.high %v11679_v20, %v13002_v24 }
 0x6fd   : > { %v11705_v0 = vrot.slane %v7231_v41, %v8464_v8  ;;  %v11708_v1 = vrot.slane %v7232_v17, %v8464_v8  ;;  %v6187_v41 = vcombine.low %v11623_v43, %v11667_v19  ;;  %v5616_v33 = vpack.i.b16 %v5615_v14, %v5614_v5 }
 0x6fe   : > { %v6078_v39 = vpop.permute.xlu1 %6077  ;;  %5709 = vrot.lane.b32.xlu0 %v7795_v35, %s7955_s28  ;;  %v6658_v35 = vshrl.u32 %v11644_v59, 16  ;;  %v5508_v5 = vcombine.high %v11700_v62, %v13002_v24  ;;  %v5108_v62 = vcombine.high %v11315_v2, %v11318_v27 }
 0x6ff   : > { %13255 = vst [vmem:[#allocation51_spill] sm:$0xff] %v11705_v0  ;;  %v7289_v48 = vshrl.u32 %v11708_v1, 16  ;;  %v7248_v32 = vcombine.high %v11708_v1, %v13002_v24  ;;  %v11750_v59 = vrot.slane %v6187_v41, %v13146_v38 }
 0x700   : > { %6687 = vrot.lane.b32.xlu1 %v7839_v10, %s7956_s29  ;;  %v11728_v30 = vpop.permute.xlu0 %5763  ;;  %v7835_v10 = vcombine.low %v6624_v63, %v6624_v63  ;;  %v11759_v63 = vrot.slane %v6179_v49, %v13146_v38 }
 0x701   : > { %v11733_v46 = vpack.i.b16 %v7289_v48, %v7288_v12  ;;  %v11735_v6 = vpack.i.b16 %v7248_v32, %v7214_v58  ;;  %v7295_v23 = vshrl.u32 %v7248_v32, 16  ;;  %v7786_v48 = vcombine.low %v5625_v21, %v5625_v21 }
 0x702   : > { %v6086_v17 = vpop.permute.xlu1 %6085  ;;  %6699 = vrot.lane.b32.xlu0 %v7842_v11, %s7952_s25  ;;  %v6660_v12 = vpack.i.b16 %v6659_v3, %v6658_v35  ;;  %v5627_v11 = vshrl.u32 %v11679_v20, 16  ;;  %v5658_v21 = vpack.i.b16 %v5657_v54, %v5656_v13  ;;  %v5541_v3 = vcombine.high %v11224_v34, %v13002_v24 }
 0x703   : > { %13257 = vst [vmem:[#allocation28_spill] sm:$0xff] %v11733_v46  ;;  %13258 = vst [vmem:[#allocation30_spill] sm:$0xff] %v11735_v6  ;;  %v11744_v43 = vpack.i.b16 %v7295_v23, %v7294_v31  ;;  %v6213_v19 = vcombine.low %v11694_v50, %v6086_v17  ;;  %v5507_v50 = vcombine.high %v11233_v36, %v13002_v24 }
 0x704   : > { %5697 = vrot.lane.b32.xlu1 %v7792_v15, %s7952_s25  ;;  %v11747_v58 = vpop.permute.xlu0 %5771  ;;  %v7846_v41 = vcombine.low %v6660_v12, %v6660_v12  ;;  %v6195_v17 = vcombine.low %v11759_v63, %v11750_v59  ;;  %v7783_v35 = vcombine.low %v5616_v33, %v5616_v33  ;;  %v5628_v49 = vpack.i.b16 %v5627_v11, %v5626_v16 }
 0x705   : > { %13259 = vst [vmem:[#allocation34_spill] sm:$0xff] %v11744_v43  ;;  %v4790_v20 = vcombine.high %v11275_v61, %v11278_v57  ;;  %v5621_v12 = vshrl.u32 %v5541_v3, 16  ;;  %v5619_v57 = vpack.i.b16 %v5541_v3, %v5507_v50  ;;  %v5631_v16 = vpack.i.b16 %v5542_v18, %v5508_v5 }
 0x706   : > { %v6094_v32 = vpop.permute.xlu1 %6093  ;;  %6671 = vrot.lane.b32.xlu0 %v7835_v10, %s7952_s25  ;;  %v5633_v10 = vshrl.u32 %v5542_v18, 16  ;;  %v11794_v13 = vrot.slane %v6195_v17, %v8464_v8  ;;  %v11805_v3 = vrot.slane %v5108_v62, %v8464_v8 }
 0x707   : > { %v6221_v15 = vcombine.low %v6078_v39, %v6094_v32  ;;  %v11767_v39 = vrot.slane %v6213_v19, %v13146_v38  ;;  %v7796_v19 = vcombine.low %v5658_v21, %v5658_v21  ;;  %v4756_v32 = vcombine.high %v11267_v47, %v11270_v42 }
 0x708   : > { %5673 = vrot.lane.b32.xlu1 %v7786_v48, %s7953_s26  ;;  %v11772_v31 = vpop.permute.xlu0 %7069  ;;  %v5620_v48 = vshrl.u32 %v5507_v50, 16  ;;  %v5632_v21 = vshrl.u32 %v5508_v5, 16  ;;  %v5074_v47 = vcombine.high %v11307_v9, %v11310_v22  ;;  %v7784_v17 = vcombine.low %v5619_v57, %v5619_v57 }
 0x709   : > { %v11770_v14 = vrot.slane %v6221_v15, %v13146_v38  ;;  %v7787_v15 = vcombine.low %v5628_v49, %v5628_v49  ;;  %v4770_v50 = vrot.slane %v4756_v32, %v8464_v8  ;;  %v7788_v22 = vcombine.low %v5631_v16, %v5631_v16 }
 0x70a   : > { %v11776_v23 = vpop.permute.xlu1 %5751  ;;  %6715 = vrot.lane.b32.xlu0 %v7846_v41, %s7956_s29  ;;  %v4804_v41 = vrot.slane %v4790_v20, %v8464_v8  ;;  %v5634_v42 = vpack.i.b16 %v5633_v10, %v5632_v21  ;;  %v5622_v2 = vpack.i.b16 %v5621_v12, %v5620_v48  ;;  %v11810_v49 = vrot.slane %v5074_v47, %v8464_v8  ;;  %v13260_v12 = vld [vmem:[#allocation49_spill] sm:$0xff] }
 0x70b   : > { %v6229_v54 = vcombine.low %v11767_v39, %v11770_v14  ;;  %v7113_v5 = vcombine.low %v11515_v40, %v11553_v56  ;;  %v4835_v32 = vshrl.u32 %v13260_v12, 16 }
 0x70c   : > { %5661 = vrot.lane.b32.xlu1 %v7783_v35, %s7950_s23  ;;  %v7078_v61 = vpop.permute.xlu0 %7077  ;;  %v7121_v35 = vcombine.low %v11539_v60, %v11577_v45  ;;  %v4845_v20 = vpack.i.b16 %v4804_v41, %v4770_v50  ;;  %v7785_v10 = vcombine.low %v5622_v2, %v5622_v2  ;;  %v5163_v60 = vpack.i.b16 %v11805_v3, %v11810_v49 }
 0x70d   : > { %v11791_v33 = vrot.slane %v6229_v54, %v8464_v8  ;;  %v4834_v45 = vshrl.u32 %v11292_v25, 16  ;;  %v4847_v62 = vshrl.u32 %v4804_v41, 16  ;;  %v7120_v16 = vrot.slane %v7113_v5, %v13146_v38 }
 0x70e   : > { %v5760_v11 = vpop.permute.xlu1 %5759  ;;  %5713 = vrot.lane.b32.xlu0 %v7796_v19, %s7956_s29  ;;  %v7789_v19 = vcombine.low %v5634_v42, %v5634_v42  ;;  %v11822_v40 = vrot.slane %v7121_v35, %v13146_v38  ;;  %v7765_v47 = vcombine.low %v4845_v20, %v4845_v20  ;;  %v11832_v42 = vcombine.high %v13260_v12, %v13002_v24  ;;  %v13262_v20 = vld [vmem:[#allocation63_spill] sm:$0xff] }
 0x70f   : > { %v5869_v2 = vcombine.low %v11710_v44, %v11747_v58  ;;  %v5861_v44 = vcombine.low %v11691_v28, %v11728_v30 }
 0x710   : > { %5677 = vrot.lane.b32.xlu1 %v7787_v15, %s7954_s27  ;;  %v7086_v18 = vpop.permute.xlu0 %7085  ;;  %v4846_v15 = vshrl.u32 %v4770_v50, 16 }
 0x711   : > { %v7147_v54 = vcombine.low %v11772_v31, %v7086_v18  ;;  %v11826_v31 = vcombine.high %v11292_v25, %v13002_v24 }
 0x712   : > { %v5768_v9 = vpop.permute.xlu1 %5767  ;;  %5665 = vrot.lane.b32.xlu0 %v7784_v17, %s7951_s24  ;;  %v4848_v5 = vpack.i.b16 %v4847_v62, %v4846_v15 }
 0x713   : > { %v5895_v18 = vcombine.low %v11776_v23, %v5768_v9  ;;  %v4839_v9 = vpack.i.b16 %v11832_v42, %v11826_v31 }
 0x714   : > { %5681 = vrot.lane.b32.xlu1 %v7788_v22, %s7955_s28  ;;  %v7094_v48 = vpop.permute.xlu0 %7093  ;;  %v4836_v22 = vpack.i.b16 %v4835_v32, %v4834_v45  ;;  %v11861_v45 = vrot.slane %v5869_v2, %v13146_v38  ;;  %v13264_v32 = vld [vmem:[#allocation65_spill] sm:$0xff]  ;;  %v7766_v15 = vcombine.low %v4848_v5, %v4848_v5  ;;  %v11881_v2 = vrot.slane %v5861_v44, %v13146_v38 }
 0x715   : > { %v7155_v56 = vcombine.low %v7078_v61, %v7094_v48  ;;  %v7154_v61 = vrot.slane %v7147_v54, %v13146_v38  ;;  %v7130_v48 = vcombine.high %v7120_v16, %v11822_v40  ;;  %v11864_v28 = vrot.slane %v5895_v18, %v13146_v38 }
 0x716   : > { %v5776_v57 = vpop.permute.xlu1 %5775  ;;  %5685 = vrot.lane.b32.xlu0 %v7789_v19, %s7956_s29  ;;  %v5153_v19 = vshrl.u32 %v13262_v20, 16  ;;  %v5152_v62 = vshrl.u32 %v13264_v32, 16  ;;  %v5877_v5 = vcombine.low %v11881_v2, %v11861_v45  ;;  %v5089_v43 = vcombine.high %v13264_v32, %v13002_v24 }
 0x717   : > { %v5903_v21 = vcombine.low %v5760_v11, %v5776_v57  ;;  %v7162_v17 = vrot.slane %v7155_v56, %v13146_v38  ;;  %v7779_v11 = vcombine.low %v5163_v60, %v5163_v60  ;;  %v11858_v60 = vcombine.high %v4804_v41, %v13002_v24 }
 0x718   : > { %5669 = vrot.lane.b32.xlu1 %v7785_v10, %s7952_s25  ;;  %v11840_v35 = vpop.permute.xlu0 %4563  ;;  %v11855_v10 = vcombine.high %v4770_v50, %v13002_v24  ;;  %v7762_v50 = vcombine.low %v4836_v22, %v4836_v22  ;;  %v11875_v41 = vcombine.high %v11805_v3, %v13002_v24  ;;  %v11893_v22 = vcombine.high %v11810_v49, %v13002_v24 }
 0x719   : > { %13261 = vst [vmem:[#allocation25_spill] sm:$0xff] %v11840_v35  ;;  %v7164_v58 = vcombine.high %v7154_v61, %v7162_v17  ;;  %v11847_v54 = vrot.slane %v5903_v21, %v13146_v38  ;;  %v7163_v56 = vcombine.low %v7154_v61, %v7162_v17  ;;  %v11878_v21 = vrot.slane %v7130_v48, %v8464_v8  ;;  %v13278_v35 = vld [vmem:[#allocation61_spill] sm:$0xff] }
 0x71a   : > { %v11849_v23 = vpop.permute.xlu1 %4551  ;;  %5215 = vrot.lane.b32.xlu0 %v7779_v11, %s7953_s26  ;;  %v5154_v61 = vpack.i.b16 %v5153_v19, %v5152_v62  ;;  %v7129_v17 = vcombine.low %v7120_v16, %v11822_v40  ;;  %v4851_v11 = vpack.i.b16 %v11858_v60, %v11855_v10  ;;  %v4840_v48 = vshrl.u32 %v11826_v31, 16 }
 0x71b   : > { %13263 = vst [vmem:[#allocation58_spill] sm:$0xff] %v11849_v23  ;;  %v11867_v30 = vrot.slane %v7164_v58, %v8464_v8  ;;  %v4841_v19 = vshrl.u32 %v11832_v42, 16  ;;  %v11902_v16 = vrot.slane %v7163_v56, %v8464_v8  ;;  %v7763_v58 = vcombine.low %v4839_v9, %v4839_v9 }
 0x71c   : > { %4897 = vrot.lane.b32.xlu1 %v7765_v47, %s7953_s26  ;;  %v11871_v57 = vpop.permute.xlu0 %4567  ;;  %v5911_v47 = vcombine.low %v11864_v28, %v11847_v54  ;;  %v5169_v62 = vpack.i.b16 %v11875_v41, %v11893_v22  ;;  %v5040_v31 = vcombine.high %v11413_v53, %v11416_v51  ;;  %v7776_v56 = vcombine.low %v5154_v61, %v5154_v61  ;;  %v13270_v51 = vld [vmem:[#allocation40_spill] sm:$0xff] }
 0x71d   : > { %13265 = vst [vmem:[#allocation59_spill] sm:$0xff] %v11871_v57  ;;  %v7265_v40 = vshrl.u32 %v11867_v30, 16  ;;  %13267 = vst [vmem:[#allocation53_spill] sm:$0xff] %v11902_v16  ;;  %v7264_v27 = vshrl.u32 %v11878_v21, 16  ;;  %v11921_v9 = vrot.slane %v7129_v17, %v8464_v8  ;;  %v7767_v7 = vcombine.low %v4851_v11, %v4851_v11  ;;  %v13277_v57 = vld [vmem:[#allocation64_spill] sm:$0xff] }
 0x71e   : > { %v11885_v18 = vpop.permute.xlu1 %4555  ;;  %4885 = vrot.lane.b32.xlu0 %v7762_v50, %s7950_s23  ;;  %v11910_v50 = vcombine.high %v13262_v20, %v13002_v24  ;;  %v11915_v42 = vrot.slane %v5911_v47, %v8464_v8  ;;  %v7146_v53 = vcombine.high %v11878_v21, %v13002_v24  ;;  %v13271_v47 = vld [vmem:[#allocation39_spill] sm:$0xff]  ;;  %v11931_v46 = vrot.slane %v5877_v5, %v8464_v8  ;;  %v13274_v5 = vld [vmem:[#allocation22_spill] sm:$0xff] }
 0x71f   : > { %13266 = vst [vmem:[#allocation10_spill] sm:$0xff] %v11885_v18  ;;  %13269 = vst [vmem:[#allocation5_spill] sm:$0xff] %v11921_v9  ;;  %v5006_v6 = vcombine.high %v13271_v47, %v13270_v51  ;;  %v4842_v61 = vpack.i.b16 %v4841_v19, %v4840_v48  ;;  %v11934_v17 = vpack.i.b16 %v7265_v40, %v7264_v27  ;;  %v13273_v47 = vld [vmem:[#allocation23_spill] sm:$0xff]  ;;  %v4853_v19 = vshrl.u32 %v11858_v60, 16  ;;  %v13281_v60 = vld [vmem:[#allocation6_spill] sm:$0xff] }
 0x720   : > { %4901 = vrot.lane.b32.xlu1 %v7766_v15, %s7954_s27  ;;  %v11904_v44 = vpop.permute.xlu0 %6063  ;;  %v5157_v11 = vpack.i.b16 %v11910_v50, %v5089_v43  ;;  %v7180_v32 = vcombine.high %v11867_v30, %v13002_v24  ;;  %v7781_v48 = vcombine.low %v5169_v62, %v5169_v62  ;;  %v5171_v18 = vshrl.u32 %v11875_v41, 16 }
 0x721   : > { %13272 = vst [vmem:[#allocation4_spill] sm:$0xff] %v11934_v17  ;;  %v7270_v17 = vshrl.u32 %v7146_v53, 16 }
 0x722   : > { %v11917_v15 = vpop.permute.xlu1 %4571  ;;  %4889 = vrot.lane.b32.xlu0 %v7763_v58, %s7951_s24  ;;  %v5165_v58 = vshrl.u32 %v11805_v3, 16  ;;  %v5164_v3 = vshrl.u32 %v11810_v49, 16  ;;  %v11955_v40 = vpack.i.b16 %v7180_v32, %v7146_v53  ;;  %v7271_v51 = vshrl.u32 %v7180_v32, 16 }
 0x723   : > { %13268 = vst [vmem:[#allocation3_spill] sm:$0xff] %v11917_v15  ;;  %v4722_v15 = vcombine.high %v13274_v5, %v13273_v47  ;;  %v4688_v47 = vcombine.high %v13278_v35, %v13277_v57  ;;  %v7777_v5 = vcombine.low %v5157_v11, %v5157_v11  ;;  %v7764_v53 = vcombine.low %v4842_v61, %v4842_v61  ;;  %v13280_v35 = vld [vmem:[#allocation24_spill] sm:$0xff] }
 0x724   : > { %5203 = vrot.lane.b32.xlu1 %v7776_v56, %s7950_s23  ;;  %v11936_v20 = vpop.permute.xlu0 %6071  ;;  %v11947_v56 = vrot.slane %v5040_v31, %v8464_v8  ;;  %13276 = vst [vmem:[#allocation20_spill] sm:$0xff] %v11955_v40  ;;  %v11960_v31 = vrot.slane %v5006_v6, %v8464_v8  ;;  %v5166_v25 = vpack.i.b16 %v5165_v58, %v5164_v3  ;;  %v4811_v57 = vshrl.u32 %v13280_v35, 16 }
 0x725   : > { %v4736_v49 = vrot.slane %v4722_v15, %v8464_v8  ;;  %v4852_v6 = vshrl.u32 %v11855_v10, 16  ;;  %v4702_v11 = vrot.slane %v4688_v47, %v8464_v8  ;;  %v5159_v61 = vshrl.u32 %v11910_v50, 16 }
 0x726   : > { %v11949_v27 = vpop.permute.xlu1 %4559  ;;  %4905 = vrot.lane.b32.xlu0 %v7767_v7, %s7955_s28  ;;  %v11964_v7 = vpack.i.b16 %v7271_v51, %v7270_v17  ;;  %v5139_v32 = vpack.i.b16 %v11947_v56, %v11960_v31  ;;  %v4810_v17 = vshrl.u32 %v13281_v60, 16  ;;  %v7780_v51 = vcombine.low %v5166_v25, %v5166_v25 }
 0x727   : > { %13275 = vst [vmem:[#allocation15_spill] sm:$0xff] %v11949_v27  ;;  %v4854_v15 = vpack.i.b16 %v4853_v19, %v4852_v6  ;;  %v4823_v12 = vshrl.u32 %v4736_v49, 16  ;;  %v4822_v10 = vshrl.u32 %v4702_v11, 16 }
 0x728   : > { %5223 = vrot.lane.b32.xlu1 %v7781_v48, %s7955_s28  ;;  %v6080_v62 = vpop.permute.xlu0 %6079  ;;  %13279 = vst [vmem:[#allocation14_spill] sm:$0xff] %v11964_v7  ;;  %v7772_v3 = vcombine.low %v5139_v32, %v5139_v32  ;;  %v4812_v7 = vpack.i.b16 %v4811_v57, %v4810_v17  ;;  %v11983_v32 = vcombine.high %v4736_v49, %v13002_v24 }
 0x729   : > { %v4824_v6 = vpack.i.b16 %v4823_v12, %v4822_v10  ;;  %v6111_v57 = vcombine.low %v11904_v44, %v6080_v62  ;;  %v11990_v17 = vcombine.high %v4702_v11, %v13002_v24 }
 0x72a   : > { %v6068_v40 = vpop.permute.xlu1 %6067  ;;  %5207 = vrot.lane.b32.xlu0 %v7777_v5, %s7951_s24  ;;  %v5158_v5 = vshrl.u32 %v5089_v43, 16  ;;  %v7755_v50 = vcombine.low %v4812_v7, %v4812_v7  ;;  %v5170_v43 = vshrl.u32 %v11893_v22, 16 }
 0x72b   : > { %v4827_v22 = vpack.i.b16 %v11983_v32, %v11990_v17 }
 0x72c   : > { %4893 = vrot.lane.b32.xlu1 %v7764_v53, %s7952_s25  ;;  %v6088_v58 = vpop.permute.xlu0 %6087  ;;  %v7768_v53 = vcombine.low %v4854_v15, %v4854_v15  ;;  %v5160_v27 = vpack.i.b16 %v5159_v61, %v5158_v5  ;;  %v5172_v7 = vpack.i.b16 %v5171_v18, %v5170_v43  ;;  %v7759_v15 = vcombine.low %v4824_v6, %v4824_v6  ;;  %v13282_v61 = vld [vmem:[#allocation48_spill] sm:$0xff]  ;;  %v13283_v18 = vld [vmem:[#allocation47_spill] sm:$0xff] }
 0x72d   : > { %v6119_v25 = vcombine.low %v11936_v20, %v6088_v58  ;;  %v5129_v44 = vshrl.u32 %v13282_v61, 16  ;;  %v12008_v5 = vcombine.high %v13280_v35, %v13002_v24  ;;  %v12024_v43 = vcombine.high %v13282_v61, %v13002_v24 }
 0x72e   : > { %v6076_v48 = vpop.permute.xlu1 %6075  ;;  %5219 = vrot.lane.b32.xlu0 %v7780_v51, %s7954_s27  ;;  %v7778_v20 = vcombine.low %v5160_v27, %v5160_v27  ;;  %v4821_v27 = vpack.i.b16 %v4736_v49, %v4702_v11  ;;  %v5140_v61 = vshrl.u32 %v11960_v31, 16 }
 0x72f   : > { %v11995_v12 = vrot.slane %v6119_v25, %v13146_v38  ;;  %v7782_v25 = vcombine.low %v5172_v7, %v5172_v7  ;;  %v12034_v7 = vcombine.high %v13283_v18, %v13002_v24 }
 0x730   : > { %5187 = vrot.lane.b32.xlu1 %v7772_v3, %s7953_s26  ;;  %v11978_v47 = vpop.permute.xlu0 %5745  ;;  %v12002_v3 = vrot.slane %v6111_v57, %v13146_v38 }
 0x732   : > { %v6084_v19 = vpop.permute.xlu1 %6083  ;;  %4909 = vrot.lane.b32.xlu0 %v7768_v53, %s7956_s29  ;;  %v6127_v49 = vcombine.low %v12002_v3, %v11995_v12 }
 0x733   : > { %v6145_v41 = vcombine.low %v6068_v40, %v6084_v19  ;;  %v5128_v40 = vshrl.u32 %v13283_v18, 16  ;;  %v12018_v19 = vcombine.high %v13281_v60, %v13002_v24  ;;  %v13287_v60 = vld [vmem:[#allocation26_spill] sm:$0xff] }
 0x734   : > { %4857 = vrot.lane.b32.xlu1 %v7755_v50, %s7950_s23  ;;  %v11992_v51 = vpop.permute.xlu0 %5753  ;;  %v7760_v50 = vcombine.low %v4827_v22, %v4827_v22 }
 0x735   : > { %v12011_v10 = vrot.slane %v6145_v41, %v13146_v38  ;;  %v5130_v6 = vpack.i.b16 %v5129_v44, %v5128_v40  ;;  %v7758_v41 = vcombine.low %v4821_v27, %v4821_v27  ;;  %v5141_v44 = vshrl.u32 %v11947_v56, 16 }
 0x736   : > { %v6092_v58 = vpop.permute.xlu1 %6091  ;;  %5211 = vrot.lane.b32.xlu0 %v7778_v20, %s7952_s25  ;;  %v4815_v20 = vpack.i.b16 %v12008_v5, %v12018_v19  ;;  %v6846_v27 = vcombine.high %v11599_v55, %v11602_v4  ;;  %v12049_v40 = vrot.slane %v6127_v49, %v8464_v8  ;;  %v12062_v55 = vcombine.high %v11960_v31, %v13002_v24 }
 0x737   : > { %v6153_v62 = vcombine.low %v6076_v48, %v6092_v58  ;;  %v6914_v58 = vcombine.high %v11510_v26, %v11513_v37  ;;  %v5133_v26 = vpack.i.b16 %v12024_v43, %v12034_v7  ;;  %v13284_v37 = vld [vmem:[#allocation52_spill] sm:$0xff]  ;;  %v6196_v4 = vcombine.high %v11759_v63, %v11750_v59 }
 0x738   : > { %4873 = vrot.lane.b32.xlu1 %v7759_v15, %s7954_s27  ;;  %v5762_v48 = vpop.permute.xlu0 %5761 }
 0x739   : > { %v12014_v53 = vrot.slane %v6153_v62, %v13146_v38  ;;  %v12044_v62 = vcombine.high %v11947_v56, %v13002_v24  ;;  %v13286_v56 = vld [vmem:[#allocation31_spill] sm:$0xff]  ;;  %v12067_v49 = vrot.slane %v6914_v58, %v8464_v8 }
 0x73a   : > { %v5750_v11 = vpop.permute.xlu1 %5749  ;;  %5227 = vrot.lane.b32.xlu0 %v7782_v25, %s7956_s29  ;;  %v6812_v35 = vcombine.high %v13287_v60, %v13286_v56  ;;  %v7770_v56 = vcombine.low %v5133_v26, %v5133_v26 }
 0x73b   : > { %v6161_v57 = vcombine.low %v12011_v10, %v12014_v53  ;;  %v5145_v31 = vpack.i.b16 %v12044_v62, %v12062_v55 }
 0x73c   : > { %4877 = vrot.lane.b32.xlu1 %v7760_v50, %s7955_s28  ;;  %v5770_v22 = vpop.permute.xlu0 %5769  ;;  %v7769_v50 = vcombine.low %v5130_v6, %v5130_v6  ;;  %v12082_v58 = vrot.slane %v6812_v35, %v8464_v8 }
 0x73d   : > { %v12039_v15 = vrot.slane %v6161_v57, %v8464_v8  ;;  %v13285_v57 = vld [vmem:[#allocation45_spill] sm:$0xff]  ;;  %v5801_v60 = vcombine.low %v11992_v51, %v5770_v22  ;;  %v7774_v26 = vcombine.low %v5145_v31, %v5145_v31 }
 0x73e   : > { %v5758_v25 = vpop.permute.xlu1 %5757  ;;  %v6880_v18 = vcombine.high %v13285_v57, %v13284_v37  ;;  %4869 = vrot.lane.b32.xlu0 %v7758_v41, %s7953_s26  ;;  %v7756_v41 = vcombine.low %v4815_v20, %v4815_v20  ;;  %v5142_v37 = vpack.i.b16 %v5141_v44, %v5140_v61  ;;  %v12072_v57 = vrot.slane %v6846_v27, %v8464_v8 }
 0x73f   : > { %v5793_v61 = vcombine.low %v11978_v47, %v5762_v48  ;;  %v12091_v27 = vrot.slane %v5801_v60, %v13146_v38  ;;  %v4817_v48 = vshrl.u32 %v12008_v5, 16  ;;  %v7287_v5 = vpack.i.b16 %v11708_v1, %v11687_v52 }
 0x740   : > { %5175 = vrot.lane.b32.xlu1 %v7769_v50, %s7950_s23  ;;  %v12069_v6 = vpop.permute.xlu0 %4575  ;;  %v12078_v23 = vrot.slane %v6880_v18, %v8464_v8  ;;  %v7773_v51 = vcombine.low %v5142_v37, %v5142_v37  ;;  %v6945_v35 = vpack.i.b16 %v12072_v57, %v12082_v58  ;;  %v4829_v1 = vshrl.u32 %v11983_v32, 16 }
 0x741   : > { %13288 = vst [vmem:[#allocation18_spill] sm:$0xff] %v12069_v6  ;;  %v12097_v47 = vrot.slane %v5793_v61, %v13146_v38  ;;  %v5146_v32 = vshrl.u32 %v12062_v55, 16  ;;  %v12167_v55 = vcombine.high %v12067_v49, %v13002_v24 }
 0x742   : > { %v5766_v50 = vpop.permute.xlu1 %5765  ;;  %4861 = vrot.lane.b32.xlu0 %v7756_v41, %s7951_s24  ;;  %v6969_v22 = vpack.i.b16 %v12067_v49, %v12078_v23  ;;  %v7850_v61 = vcombine.low %v6945_v35, %v6945_v35  ;;  %v7871_v35 = vcombine.low %v7287_v5, %v7287_v5 }
 0x743   : > { %v5827_v20 = vcombine.low %v5750_v11, %v5766_v50 }
 0x744   : > { %5179 = vrot.lane.b32.xlu1 %v7770_v56, %s7951_s24  ;;  %v12086_v44 = vpop.permute.xlu0 %4523  ;;  %v7857_v50 = vcombine.low %v6969_v22, %v6969_v22  ;;  %v5809_v56 = vcombine.low %v12097_v47, %v12091_v27 }
 0x745   : > { %13289 = vst [vmem:[#allocation13_spill] sm:$0xff] %v12086_v44  ;;  %v12102_v11 = vrot.slane %v5827_v20, %v13146_v38  ;;  %v5135_v20 = vshrl.u32 %v12024_v43, 16 }
 0x746   : > { %v5774_v18 = vpop.permute.xlu1 %5773  ;;  %5191 = vrot.lane.b32.xlu0 %v7773_v51, %s7954_s27  ;;  %v4816_v51 = vshrl.u32 %v12018_v19, 16  ;;  %v12131_v43 = vrot.slane %v5809_v56, %v8464_v8 }
 0x747   : > { %v5835_v41 = vcombine.low %v5758_v25, %v5774_v18  ;;  %v7263_v25 = vpack.i.b16 %v11867_v30, %v11878_v21  ;;  %v5134_v30 = vshrl.u32 %v12034_v7, 16  ;;  %v4828_v7 = vshrl.u32 %v11990_v17, 16 }
 0x748   : > { %5195 = vrot.lane.b32.xlu1 %v7774_v26, %s7955_s28  ;;  %v12107_v60 = vpop.permute.xlu0 %4527  ;;  %v4818_v52 = vpack.i.b16 %v4817_v48, %v4816_v51  ;;  %v6230_v48 = vcombine.high %v11767_v39, %v11770_v14  ;;  %v13298_v39 = vld [vmem:[#allocation50_spill] sm:$0xff] }
 0x749   : > { %v12105_v37 = vrot.slane %v5835_v41, %v13146_v38  ;;  %13290 = vst [vmem:[#allocation12_spill] sm:$0xff] %v12107_v60  ;;  %v7864_v18 = vcombine.low %v7263_v25, %v7263_v25  ;;  %v5136_v19 = vpack.i.b16 %v5135_v20, %v5134_v30  ;;  %v13294_v41 = vld [vmem:[#allocation46_spill] sm:$0xff]  ;;  %v4830_v20 = vpack.i.b16 %v4829_v1, %v4828_v7 }
 0x74a   : > { %v12113_v31 = vpop.permute.xlu1 %4535  ;;  %7021 = vrot.lane.b32.xlu0 %v7857_v50, %s7953_s26  ;;  %v6959_v50 = vshrl.u32 %v13294_v41, 16  ;;  %v7757_v5 = vcombine.low %v4818_v52, %v4818_v52  ;;  %v6934_v14 = vshrl.u32 %v13298_v39, 16  ;;  %v12157_v52 = vrot.slane %v6230_v48, %v8464_v8 }
 0x74b   : > { %13291 = vst [vmem:[#allocation8_spill] sm:$0xff] %v12113_v31  ;;  %v5843_v38 = vcombine.low %v12102_v11, %v12105_v37  ;;  %v7771_v30 = vcombine.low %v5136_v19, %v5136_v19  ;;  %v7761_v19 = vcombine.low %v4830_v20, %v4830_v20  ;;  %v5878_v48 = vcombine.high %v11881_v2, %v11861_v45 }
 0x74c   : > { %6993 = vrot.lane.b32.xlu1 %v7850_v61, %s7953_s26  ;;  %v12127_v22 = vpop.permute.xlu0 %4539  ;;  %v13295_v61 = vld [vmem:[#allocation29_spill] sm:$0xff] }
 0x74d   : > { %v12125_v21 = vrot.slane %v5843_v38, %v8464_v8  ;;  %13292 = vst [vmem:[#allocation11_spill] sm:$0xff] %v12127_v22  ;;  %v6958_v25 = vshrl.u32 %v13295_v61, 16  ;;  %v5147_v38 = vshrl.u32 %v12044_v62, 16  ;;  %v5912_v62 = vcombine.high %v11864_v28, %v11847_v54 }
 0x74e   : > { %v12133_v26 = vpop.permute.xlu1 %4543  ;;  %7311 = vrot.lane.b32.xlu0 %v7864_v18, %s7953_s26  ;;  %v13297_v18 = vld [vmem:[#allocation54_spill] sm:$0xff]  ;;  %v12178_v54 = vcombine.high %v12078_v23, %v13002_v24 }
 0x74f   : > { %13293 = vst [vmem:[#allocation7_spill] sm:$0xff] %v12133_v26  ;;  %v6960_v17 = vpack.i.b16 %v6959_v50, %v6958_v25  ;;  %v5148_v50 = vpack.i.b16 %v5147_v38, %v5146_v32  ;;  %v12170_v25 = vrot.slane %v6196_v4, %v8464_v8  ;;  %v12181_v28 = vrot.slane %v5912_v62, %v8464_v8 }
 0x750   : > { %7339 = vrot.lane.b32.xlu1 %v7871_v35, %s7953_s26  ;;  %v12144_v56 = vpop.permute.xlu0 %6675  ;;  %v6935_v35 = vshrl.u32 %v13297_v18, 16  ;;  %v6975_v2 = vpack.i.b16 %v12167_v55, %v12178_v54  ;;  %v7253_v38 = vshrl.u32 %v11902_v16, 16 }
 0x751   : > { %13296 = vst [vmem:[#allocation16_spill] sm:$0xff] %v12144_v56  ;;  %v7854_v59 = vcombine.low %v6960_v17, %v6960_v17  ;;  %v6285_v4 = vpack.i.b16 %v12157_v52, %v12170_v25  ;;  %v7252_v17 = vshrl.u32 %v11921_v9, 16 }
 0x752   : > { %v12147_v51 = vpop.permute.xlu1 %6703  ;;  %4865 = vrot.lane.b32.xlu0 %v7757_v5, %s7952_s25  ;;  %v6936_v63 = vpack.i.b16 %v6935_v35, %v6934_v14  ;;  %v7775_v5 = vcombine.low %v5148_v50, %v5148_v50 }
 0x753   : > { %v7821_v14 = vcombine.low %v6285_v4, %v6285_v4  ;;  %v12216_v4 = vcombine.high %v11921_v9, %v13002_v24  ;;  %v12232_v9 = vcombine.high %v13298_v39, %v13002_v24  ;;  %v6970_v39 = vshrl.u32 %v12078_v23, 16 }
 0x754   : > { %5183 = vrot.lane.b32.xlu1 %v7771_v30, %s7952_s25  ;;  %v12161_v1 = vpop.permute.xlu0 %4547  ;;  %v7847_v45 = vcombine.low %v6936_v63, %v6936_v63  ;;  %v12193_v30 = vrot.slane %v5878_v48, %v8464_v8  ;;  %v7254_v63 = vpack.i.b16 %v7253_v38, %v7252_v17  ;;  %v12208_v48 = vcombine.high %v11902_v16, %v13002_v24 }
 0x755   : > { %13299 = vst [vmem:[#allocation9_spill] sm:$0xff] %v12161_v1  ;;  %v12222_v38 = vcombine.high %v13297_v18, %v13002_v24  ;;  %v6971_v1 = vshrl.u32 %v12067_v49, 16 }
 0x756   : > { %v12163_v7 = vpop.permute.xlu1 %4531  ;;  %4881 = vrot.lane.b32.xlu0 %v7761_v19, %s7956_s29  ;;  %v5967_v62 = vpack.i.b16 %v12181_v28, %v12193_v30  ;;  %v6929_v19 = vcombine.high %v13294_v41, %v13002_v24  ;;  %v7257_v16 = vpack.i.b16 %v12208_v48, %v12216_v4 }
 0x757   : > { %13300 = vst [vmem:[#allocation19_spill] sm:$0xff] %v12163_v7  ;;  %v6972_v31 = vpack.i.b16 %v6971_v1, %v6970_v39  ;;  %v6947_v7 = vshrl.u32 %v12072_v57, 16  ;;  %v12256_v39 = vcombine.high %v12072_v57, %v13002_v24  ;;  %v12272_v57 = vcombine.high %v12193_v30, %v13002_v24 }
 0x758   : > { %7009 = vrot.lane.b32.xlu1 %v7854_v59, %s7950_s23  ;;  %v12183_v32 = vpop.permute.xlu0 %5701  ;;  %v7859_v59 = vcombine.low %v6975_v2, %v6975_v2  ;;  %v7807_v56 = vcombine.low %v5967_v62, %v5967_v62  ;;  %v6274_v62 = vshrl.u32 %v11794_v13, 16  ;;  %v7862_v41 = vcombine.low %v7257_v16, %v7257_v16 }
 0x759   : > { %13304 = vst [vmem:[#allocation41_spill] sm:$0xff] %v12272_v57 }
 0x75a   : > { %v12187_v20 = vpop.permute.xlu1 %6691  ;;  %5199 = vrot.lane.b32.xlu0 %v7775_v5, %s7956_s29  ;;  %v6895_v5 = vcombine.high %v13295_v61, %v13002_v24 }
 0x75c   : > { %6981 = vrot.lane.b32.xlu1 %v7847_v45, %s7950_s23  ;;  %v12198_v35 = vpop.permute.xlu0 %6695  ;;  %v6963_v2 = vpack.i.b16 %v6929_v19, %v6895_v5  ;;  %v6964_v23 = vshrl.u32 %v6895_v5, 16  ;;  %v7277_v5 = vshrl.u32 %v11705_v0, 16 }
 0x75e   : > { %v12204_v50 = vpop.permute.xlu1 %6663  ;;  %6337 = vrot.lane.b32.xlu0 %v7821_v14, %s7953_s26  ;;  %v7861_v14 = vcombine.low %v7254_v63, %v7254_v63  ;;  %v7855_v18 = vcombine.low %v6963_v2, %v6963_v2  ;;  %v6939_v63 = vpack.i.b16 %v12222_v38, %v12232_v9 }
 0x760   : > { %7029 = vrot.lane.b32.xlu1 %v7859_v59, %s7955_s28  ;;  %v12218_v45 = vpop.permute.xlu0 %6679  ;;  %v6275_v59 = vshrl.u32 %v11791_v33, 16  ;;  %v7848_v22 = vcombine.low %v6939_v63, %v6939_v63 }
 0x761   : > { %13301 = vst [vmem:[#allocation21_spill] sm:$0xff] %v12218_v45 }
 0x762   : > { %v12224_v17 = vpop.permute.xlu1 %6667  ;;  %6019 = vrot.lane.b32.xlu0 %v7807_v56, %s7953_s26  ;;  %v6276_v26 = vpack.i.b16 %v6275_v59, %v6274_v62  ;;  %v5957_v56 = vshrl.u32 %v11915_v42, 16  ;;  %v6965_v59 = vshrl.u32 %v6929_v19, 16  ;;  %v7858_v62 = vcombine.low %v6972_v31, %v6972_v31 }
 0x764   : > { %7299 = vrot.lane.b32.xlu1 %v7861_v14, %s7950_s23  ;;  %v5690_v45 = vpop.permute.xlu0 %5689  ;;  %v5956_v14 = vshrl.u32 %v11931_v46, 16  ;;  %v7818_v60 = vcombine.low %v6276_v26, %v6276_v26  ;;  %v6966_v63 = vpack.i.b16 %v6965_v59, %v6964_v23 }
 0x766   : > { %v12239_v61 = vpop.permute.xlu1 %6707  ;;  %7013 = vrot.lane.b32.xlu0 %v7855_v18, %s7951_s24  ;;  %v5958_v16 = vpack.i.b16 %v5957_v56, %v5956_v14  ;;  %v6946_v18 = vshrl.u32 %v12082_v58, 16  ;;  %v13305_v56 = vld [vmem:[#allocation37_spill] sm:$0xff]  ;;  %v13306_v14 = vld [vmem:[#allocation68_spill] sm:$0xff] }
 0x768   : > { %7303 = vrot.lane.b32.xlu1 %v7862_v41, %s7951_s24  ;;  %v5694_v2 = vpop.permute.xlu0 %5693  ;;  %v6948_v44 = vpack.i.b16 %v6947_v7, %v6946_v18  ;;  %v7804_v26 = vcombine.low %v5958_v16, %v5958_v16  ;;  %v13307_v16 = vpack.i.b16 %v13305_v56, %v13306_v14  ;;  %v7856_v18 = vcombine.low %v6966_v63, %v6966_v63 }
 0x769   : > { %v6940_v56 = vshrl.u32 %v12232_v9, 16  ;;  %v6976_v63 = vshrl.u32 %v12178_v54, 16  ;;  %v6977_v14 = vshrl.u32 %v12167_v55, 16 }
 0x76a   : > { %v12247_v49 = vpop.permute.xlu1 %6711  ;;  %6985 = vrot.lane.b32.xlu0 %v7848_v22, %s7951_s24  ;;  %v12262_v22 = vcombine.high %v12181_v28, %v13002_v24  ;;  %v7851_v7 = vcombine.low %v6948_v44, %v6948_v44  ;;  %v7276_v44 = vshrl.u32 %v11715_v29, 16 }
 0x76c   : > { %6325 = vrot.lane.b32.xlu1 %v7818_v60, %s7950_s23  ;;  %v12252_v41 = vpop.permute.xlu0 %5705  ;;  %13303 = vst [vmem:[#allocation57_spill] sm:$0xff] %v12262_v22  ;;  %v12267_v60 = vcombine.high %v12082_v58, %v13002_v24  ;;  %v6734_v58 = vsel %vm483_vm6, %v13307_v16, %v12187_v20  ;;  %v5973_v23 = vpack.i.b16 %v12262_v22, %v12272_v57  ;;  %v13310_v16 = vld [vmem:[#allocation69_spill] sm:$0xff] }
 0x76d   : > { %v7247_v20 = vcombine.high %v11705_v0, %v13002_v24 }
 0x76e   : > { %v12258_v1 = vpop.permute.xlu1 %6683  ;;  %7025 = vrot.lane.b32.xlu0 %v7858_v62, %s7954_s27  ;;  %v6951_v19 = vpack.i.b16 %v12256_v39, %v12267_v60  ;;  %v6941_v62 = vshrl.u32 %v12222_v38, 16  ;;  %v6736_v38 = vsel %vm487_vm7, %v6734_v58, %v12198_v35  ;;  %v7809_v22 = vcombine.low %v5973_v23, %v5973_v23  ;;  %v13312_v58 = vld [vmem:[#allocation38_spill] sm:$0xff] }
 0x76f   : > { %13302 = vst [vmem:[#allocation35_spill] sm:$0xff] %v12258_v1 }
 0x770   : > { %6007 = vrot.lane.b32.xlu1 %v7804_v26, %s7950_s23  ;;  %v12274_v31 = vpop.permute.xlu0 %5709  ;;  %v7213_v26 = vcombine.high %v11715_v29, %v13002_v24  ;;  %v7852_v6 = vcombine.low %v6951_v19, %v6951_v19  ;;  %v6942_v54 = vpack.i.b16 %v6941_v62, %v6940_v56 }
 0x772   : > { %v12284_v59 = vpop.permute.xlu1 %6687  ;;  %6997 = vrot.lane.b32.xlu0 %v7851_v7, %s7954_s27  ;;  %v13309_v7 = vld [vmem:[#allocation66_spill] sm:$0xff]  ;;  %v7849_v62 = vcombine.low %v6942_v54, %v6942_v54 }
 0x773   : > { %13308 = vst [vmem:[#allocation56_spill] sm:$0xff] %v12284_v59  ;;  %v13311_v59 = vpack.i.b16 %v13309_v7, %v13310_v16 }
 0x774   : > { %7017 = vrot.lane.b32.xlu1 %v7856_v18, %s7952_s25  ;;  %v6700_v29 = vpop.permute.xlu0 %6699  ;;  %v7278_v18 = vpack.i.b16 %v7277_v5, %v7276_v44 }
 0x775   : > { %v5732_v1 = vsel %vm483_vm6, %v13311_v59, %v5690_v45  ;;  %v6738_v57 = vsel %vm490_vm8, %v6736_v38, %v6700_v29  ;;  %v13313_v45 = vld [vmem:[#allocation67_spill] sm:$0xff]  ;;  %v7283_v29 = vshrl.u32 %v7247_v20, 16 }
 0x776   : > { %v5734_v9 = vsel %vm487_vm7, %v5732_v1, %v5694_v2  ;;  %v5698_v0 = vpop.permute.xlu1 %5697  ;;  %v6740_v55 = vsel %vm493_vm9, %v6738_v57, %v12147_v51  ;;  %7001 = vrot.lane.b32.xlu0 %v7852_v6, %s7955_s28  ;;  %v13314_v59 = vpack.i.b16 %v13312_v58, %v13313_v45  ;;  %v6978_v2 = vpack.i.b16 %v6977_v14, %v6976_v63 }
 0x777   : > { %v5736_v35 = vsel %vm490_vm8, %v5734_v9, %v5698_v0  ;;  %v7868_v23 = vcombine.low %v7278_v18, %v7278_v18  ;;  %v7281_v51 = vpack.i.b16 %v7247_v20, %v7213_v26  ;;  %v6245_v0 = vcombine.high %v11791_v33, %v13002_v24 }
 0x778   : > { %v6719_v19 = vsel %vm483_vm6, %v13314_v59, %v12204_v50  ;;  %6027 = vrot.lane.b32.xlu1 %v7809_v22, %s7955_s28  ;;  %v6672_v5 = vpop.permute.xlu0 %6671  ;;  %v6742_v50 = vsel %vm496_vm10, %v6740_v55, %v12239_v61  ;;  %v7282_v22 = vshrl.u32 %v7213_v26, 16  ;;  %v5738_v44 = vsel %vm493_vm9, %v5736_v35, %v12183_v32 }
 0x779   : > { %v6721_v1 = vsel %vm487_vm7, %v6719_v19, %v12224_v17  ;;  %v6211_v17 = vcombine.high %v11794_v13, %v13002_v24  ;;  %v7860_v56 = vcombine.low %v6978_v2, %v6978_v2  ;;  %v6744_v63 = vsel %vm499_vm11, %v6742_v50, %v12247_v49 }
 0x77a   : > { %v12322_v6 = vsel %vm490_vm8, %v6721_v1, %v6672_v5  ;;  %v12324_v57 = vpop.permute.xlu1 %5673  ;;  %7327 = vrot.lane.b32.xlu0 %v7868_v23, %s7950_s23  ;;  %v7284_v20 = vpack.i.b16 %v7283_v29, %v7282_v22  ;;  %v7869_v38 = vcombine.low %v7281_v51, %v7281_v51  ;;  %v12338_v61 = vcombine.high %v11915_v42, %v13002_v24 }
 0x77b   : > { %v6279_v7 = vpack.i.b16 %v6245_v0, %v6211_v17  ;;  %v6162_v32 = vcombine.high %v12011_v10, %v12014_v53  ;;  %v5740_v18 = vsel %vm496_vm10, %v5738_v44, %v12252_v41  ;;  %v6281_v9 = vshrl.u32 %v6245_v0, 16 }
 0x77c   : > { %6989 = vrot.lane.b32.xlu1 %v7849_v62, %s7952_s25  ;;  %v6716_v14 = vpop.permute.xlu0 %6715  ;;  %v13315_v49 = vpack.i.b16 %v11224_v34, %v11233_v36  ;;  %v12354_v55 = vcombine.high %v11931_v46, %v13002_v24  ;;  %v6128_v10 = vcombine.high %v12002_v3, %v11995_v12  ;;  %v7870_v53 = vcombine.low %v7284_v20, %v7284_v20 }
 0x77d   : > { %v12343_v26 = vsel %vm502_vm12, %v6744_v63, %v6716_v14  ;;  %v6280_v35 = vshrl.u32 %v6211_v17, 16  ;;  %v5742_v41 = vsel %vm499_vm11, %v5740_v18, %v12274_v31  ;;  %v7819_v34 = vcombine.low %v6279_v7, %v6279_v7 }
 0x77e   : > { %v5662_v16 = vpop.permute.xlu1 %5661  ;;  %7331 = vrot.lane.b32.xlu0 %v7869_v38, %s7951_s24  ;;  %v5961_v36 = vpack.i.b16 %v12338_v61, %v12354_v55  ;;  %v6287_v45 = vshrl.u32 %v12157_v52, 16  ;;  %v12365_v59 = vrot.slane %v6162_v32, %v8464_v8  ;;  %v5844_v12 = vcombine.high %v12102_v11, %v12105_v37 }
 0x77f   : > { %v5717_v54 = vsel %vm483_vm6, %v13315_v49, %v5662_v16  ;;  %v6282_v2 = vpack.i.b16 %v6281_v9, %v6280_v35  ;;  %v6286_v31 = vshrl.u32 %v12170_v25, 16  ;;  %v12375_v29 = vrot.slane %v6128_v10, %v8464_v8 }
 0x780   : > { %7033 = vrot.lane.b32.xlu1 %v7860_v56, %s7956_s29  ;;  %v5714_v58 = vpop.permute.xlu0 %5713  ;;  %v5810_v1 = vcombine.high %v12097_v47, %v12091_v27  ;;  %v7805_v23 = vcombine.low %v5961_v36, %v5961_v36  ;;  %v12382_v37 = vcombine.high %v12157_v52, %v13002_v24  ;;  %v12385_v51 = vrot.slane %v5844_v12, %v8464_v8 }
 0x781   : > { %v12370_v3 = vsel %vm502_vm12, %v5742_v41, %v5714_v58  ;;  %v6288_v11 = vpack.i.b16 %v6287_v45, %v6286_v31  ;;  %v7820_v50 = vcombine.low %v6282_v2, %v6282_v2  ;;  %v6261_v22 = vpack.i.b16 %v12365_v59, %v12375_v29 }
 0x782   : > { %v5678_v19 = vpop.permute.xlu1 %5677  ;;  %6329 = vrot.lane.b32.xlu0 %v7819_v34, %s7951_s24  ;;  %v12393_v27 = vcombine.high %v12170_v25, %v13002_v24  ;;  %v12396_v47 = vrot.slane %v5810_v1, %v8464_v8  ;;  %v5969_v56 = vshrl.u32 %v12181_v28, 16  ;;  %v6251_v25 = vshrl.u32 %v12039_v15, 16 }
 0x783   : > { %v7822_v44 = vcombine.low %v6288_v11, %v6288_v11  ;;  %v7814_v63 = vcombine.low %v6261_v22, %v6261_v22  ;;  %v5968_v8 = vshrl.u32 %v12193_v30, 16  ;;  %v6250_v28 = vshrl.u32 %v12049_v40, 16 }
 0x784   : > { %7335 = vrot.lane.b32.xlu1 %v7870_v53, %s7952_s25  ;;  %v5666_v5 = vpop.permute.xlu0 %5665  ;;  %v6291_v17 = vpack.i.b16 %v12382_v37, %v12393_v27  ;;  %v5943_v14 = vpack.i.b16 %v12385_v51, %v12396_v47  ;;  %v6953_v49 = vshrl.u32 %v12256_v39, 16  ;;  %v6952_v35 = vshrl.u32 %v12267_v60, 16 }
 0x785   : > { %v5719_v0 = vsel %vm487_vm7, %v5717_v54, %v5666_v5  ;;  %v5970_v9 = vpack.i.b16 %v5969_v56, %v5968_v8  ;;  %v6252_v53 = vpack.i.b16 %v6251_v25, %v6250_v28  ;;  %v5932_v58 = vshrl.u32 %v12131_v43, 16  ;;  %v13318_v28 = vld [vmem:[#allocation58_spill] sm:$0xff] }
 0x786   : > { %v5682_v62 = vpop.permute.xlu1 %5681  ;;  %6011 = vrot.lane.b32.xlu0 %v7805_v23, %s7951_s24  ;;  %v7823_v18 = vcombine.low %v6291_v17, %v6291_v17  ;;  %v7800_v30 = vcombine.low %v5943_v14, %v5943_v14  ;;  %v6954_v36 = vpack.i.b16 %v6953_v49, %v6952_v35  ;;  %v7259_v45 = vshrl.u32 %v12208_v48, 16  ;;  %v13316_v17 = vld [vmem:[#allocation60_spill] sm:$0xff] }
 0x787   : > { %v7808_v34 = vcombine.low %v5970_v9, %v5970_v9  ;;  %v12430_v31 = vcombine.high %v12125_v21, %v13002_v24  ;;  %v7258_v60 = vshrl.u32 %v12216_v4, 16  ;;  %v12437_v1 = vcombine.high %v12131_v43, %v13002_v24 }
 0x788   : > { %6333 = vrot.lane.b32.xlu1 %v7820_v50, %s7952_s25  ;;  %v5686_v52 = vpop.permute.xlu0 %5685  ;;  %v7853_v23 = vcombine.low %v6954_v36, %v6954_v36  ;;  %v5963_v11 = vshrl.u32 %v12338_v61, 16  ;;  %v6263_v22 = vshrl.u32 %v12365_v59, 16  ;;  %v5962_v4 = vshrl.u32 %v12354_v55, 16  ;;  %v13317_v61 = vld [vmem:[#allocation36_spill] sm:$0xff] }
 0x789   : > { %v7260_v48 = vpack.i.b16 %v7259_v45, %v7258_v60  ;;  %v5937_v50 = vpack.i.b16 %v12430_v31, %v12437_v1  ;;  %v4499_v56 = vpack.i.b16 %v13317_v61, %v13316_v17  ;;  %v12457_v55 = vcombine.high %v12365_v59, %v13002_v24 }
 0x78a   : > { %v5670_v20 = vpop.permute.xlu1 %5669  ;;  %6341 = vrot.lane.b32.xlu0 %v7822_v44, %s7954_s27  ;;  %v6293_v44 = vshrl.u32 %v12382_v37, 16  ;;  %v5964_v14 = vpack.i.b16 %v5963_v11, %v5962_v4  ;;  %v13319_v37 = vld [vmem:[#allocation10_spill] sm:$0xff]  ;;  %v12467_v49 = vcombine.high %v12375_v29, %v13002_v24  ;;  %v6177_v45 = vcombine.high %v12039_v15, %v13002_v24 }
 0x78b   : > { %v5721_v38 = vsel %vm490_vm8, %v5719_v0, %v5670_v20 }
 0x78c   : > { %v5723_v7 = vsel %vm493_vm9, %v5721_v38, %v12324_v57  ;;  %6309 = vrot.lane.b32.xlu1 %v7814_v63, %s7953_s26  ;;  %v12413_v16 = vpop.permute.xlu0 %5215  ;;  %v5933_v57 = vshrl.u32 %v12125_v21, 16  ;;  %v7863_v63 = vcombine.low %v7260_v48, %v7260_v48  ;;  %v7798_v38 = vcombine.low %v5937_v50, %v5937_v50 }
 0x78d   : > { %v5725_v32 = vsel %vm496_vm10, %v5723_v7, %v5678_v19  ;;  %v7811_v19 = vcombine.low %v6252_v53, %v6252_v53  ;;  %v6292_v7 = vshrl.u32 %v12393_v27, 16  ;;  %v13320_v27 = vld [vmem:[#allocation57_spill] sm:$0xff]  ;;  %v7806_v36 = vcombine.low %v5964_v14, %v5964_v14 }
 0x78e   : > { %v5727_v54 = vsel %vm499_vm11, %v5725_v32, %v5682_v62  ;;  %v12417_v10 = vpop.permute.xlu1 %4897  ;;  %6345 = vrot.lane.b32.xlu0 %v7823_v18, %s7955_s28  ;;  %v5934_v2 = vpack.i.b16 %v5933_v57, %v5932_v58  ;;  %v4594_v32 = vsel %vm483_vm6, %v4499_v56, %v13318_v28  ;;  %v13322_v53 = vld [vmem:[#allocation49_spill] sm:$0xff]  ;;  %v13323_v57 = vld [vmem:[#allocation62_spill] sm:$0xff]  ;;  %v6267_v60 = vpack.i.b16 %v12457_v55, %v12467_v49 }
 0x78f   : > { %v12423_v41 = vsel %vm502_vm12, %v5727_v54, %v5686_v52  ;;  %v6262_v52 = vshrl.u32 %v12375_v29, 16  ;;  %v4596_v18 = vsel %vm487_vm7, %v4594_v32, %v13319_v37  ;;  %v6294_v9 = vpack.i.b16 %v6293_v44, %v6292_v7 }
 0x790   : > { %5991 = vrot.lane.b32.xlu1 %v7800_v30, %s7953_s26  ;;  %v4886_v39 = vpop.permute.xlu0 %4885  ;;  %v7797_v62 = vcombine.low %v5934_v2, %v5934_v2  ;;  %v5975_v54 = vshrl.u32 %v13320_v27, 16  ;;  %v13321_v30 = vld [vmem:[#allocation15_spill] sm:$0xff]  ;;  %v13324_v35 = vpack.i.b16 %v13322_v53, %v13323_v57  ;;  %v6143_v50 = vcombine.high %v12049_v40, %v13002_v24 }
 0x791   : > { %v6264_v8 = vpack.i.b16 %v6263_v22, %v6262_v52  ;;  %v4598_v59 = vsel %vm490_vm8, %v4596_v18, %v13321_v30  ;;  %v13326_v22 = vld [vmem:[#allocation25_spill] sm:$0xff]  ;;  %v7824_v44 = vcombine.low %v6294_v9, %v6294_v9  ;;  %v7816_v56 = vcombine.low %v6267_v60, %v6267_v60 }
 0x792   : > { %v4902_v12 = vpop.permute.xlu1 %4901  ;;  %6023 = vrot.lane.b32.xlu0 %v7808_v34, %s7954_s27  ;;  %v4928_v58 = vsel %vm483_vm6, %v13324_v35, %v4886_v39  ;;  %v13325_v39 = vld [vmem:[#allocation41_spill] sm:$0xff]  ;;  %v4600_v4 = vsel %vm493_vm9, %v4598_v59, %v13326_v22  ;;  %v6257_v14 = vshrl.u32 %v6177_v45, 16  ;;  %v6256_v7 = vshrl.u32 %v6143_v50, 16  ;;  %v13328_v59 = vld [vmem:[#allocation3_spill] sm:$0xff]  ;;  %v13329_v35 = vld [vmem:[#allocation18_spill] sm:$0xff] }
 0x793   : > { %v7815_v29 = vcombine.low %v6264_v8, %v6264_v8  ;;  %v5974_v11 = vshrl.u32 %v13325_v39, 16  ;;  %v6255_v8 = vpack.i.b16 %v6177_v45, %v6143_v50  ;;  %v5945_v18 = vshrl.u32 %v12385_v51, 16 }
 0x794   : > { %6297 = vrot.lane.b32.xlu1 %v7811_v19, %s7950_s23  ;;  %v4890_v5 = vpop.permute.xlu0 %4889  ;;  %v5939_v30 = vshrl.u32 %v12430_v31, 16  ;;  %v6269_v39 = vshrl.u32 %v12457_v55, 16  ;;  %v7390_v55 = vrot.slane %v12370_v3, 4 }
 0x795   : > { %v4930_v19 = vsel %vm487_vm7, %v4928_v58, %v4890_v5  ;;  %v12493_v5 = vcombine.high %v12396_v47, %v13002_v24  ;;  %v5976_v17 = vpack.i.b16 %v5975_v54, %v5974_v11  ;;  %v6258_v54 = vpack.i.b16 %v6257_v14, %v6256_v7 }
 0x796   : > { %v12440_v0 = vpop.permute.xlu1 %5203  ;;  %7005 = vrot.lane.b32.xlu0 %v7853_v23, %s7956_s29  ;;  %v12483_v23 = vcombine.high %v12385_v51, %v13002_v24  ;;  %v13330_v51 = vld [vmem:[#allocation63_spill] sm:$0xff]  ;;  %v7812_v31 = vcombine.low %v6255_v8, %v6255_v8 }
 0x797   : > { %v7810_v37 = vcombine.low %v5976_v17, %v5976_v17  ;;  %v7813_v50 = vcombine.low %v6258_v54, %v6258_v54  ;;  %v5950_v3 = vshrl.u32 %v12493_v5, 16 }
 0x798   : > { %5979 = vrot.lane.b32.xlu1 %v7797_v62, %s7950_s23  ;;  %v4906_v20 = vpop.permute.xlu0 %4905  ;;  %v5951_v14 = vshrl.u32 %v12483_v23, 16 }
 0x79a   : > { %v12452_v25 = vpop.permute.xlu1 %5223  ;;  %7307 = vrot.lane.b32.xlu0 %v7863_v63, %s7952_s25  ;;  %v5949_v63 = vpack.i.b16 %v12483_v23, %v12493_v5  ;;  %v5952_v7 = vpack.i.b16 %v5951_v14, %v5950_v3  ;;  %v13352_v14 = vld [vmem:[#allocation11_spill] sm:$0xff] }
 0x79c   : > { %5983 = vrot.lane.b32.xlu1 %v7798_v38, %s7951_s24  ;;  %v5208_v34 = vpop.permute.xlu0 %5207  ;;  %v13327_v38 = vld [vmem:[#allocation59_spill] sm:$0xff]  ;;  %v7802_v27 = vcombine.low %v5949_v63, %v5949_v63 }
 0x79d   : > { %v4602_v24 = vsel %vm496_vm10, %v4600_v4, %v13327_v38 }
 0x79e   : > { %v4894_v2 = vpop.permute.xlu1 %4893  ;;  %6015 = vrot.lane.b32.xlu0 %v7806_v36, %s7952_s25  ;;  %v4604_v53 = vsel %vm499_vm11, %v4602_v24, %v13328_v59  ;;  %v13331_v36 = vld [vmem:[#allocation65_spill] sm:$0xff]  ;;  %v13333_v24 = vld [vmem:[#allocation28_spill] sm:$0xff] }
 0x79f   : > { %v4932_v48 = vsel %vm490_vm8, %v4930_v19, %v4894_v2  ;;  %v4606_v58 = vsel %vm502_vm12, %v4604_v53, %v13329_v35  ;;  %v13332_v45 = vpack.i.b16 %v13330_v51, %v13331_v36  ;;  %v5938_v2 = vshrl.u32 %v12437_v1, 16  ;;  %v13338_v35 = vld [vmem:[#allocation13_spill] sm:$0xff] }
 0x7a0   : > { %v4934_v62 = vsel %vm493_vm9, %v4932_v48, %v12417_v10  ;;  %6313 = vrot.lane.b32.xlu1 %v7815_v29, %s7954_s27  ;;  %v5220_v52 = vpop.permute.xlu0 %5219  ;;  %v6268_v1 = vshrl.u32 %v12467_v49, 16  ;;  %v7872_v8 = vcombine.low %v13333_v24, %v13333_v24  ;;  %v13340_v51 = vld [vmem:[#allocation17_spill] sm:$0xff] }
 0x7a1   : > { %v4936_v10 = vsel %vm496_vm10, %v4934_v62, %v4902_v12  ;;  %v5246_v19 = vsel %vm483_vm6, %v13332_v45, %v12440_v0  ;;  %v5940_v0 = vpack.i.b16 %v5939_v30, %v5938_v2  ;;  %v13336_v30 = vld [vmem:[#allocation30_spill] sm:$0xff] }
 0x7a2   : > { %v12499_v61 = vpop.permute.xlu1 %5187  ;;  %6349 = vrot.lane.b32.xlu0 %v7824_v44, %s7956_s29  ;;  %v4938_v28 = vsel %vm499_vm11, %v4936_v10, %v4906_v20  ;;  %v5944_v20 = vshrl.u32 %v12396_v47, 16  ;;  %v5248_v29 = vsel %vm487_vm7, %v5246_v19, %v5208_v34  ;;  %v7873_v59 = vcombine.low %v13336_v30, %v13336_v30 }
 0x7a4   : > { %6317 = vrot.lane.b32.xlu1 %v7816_v56, %s7955_s28  ;;  %v4910_v32 = vpop.permute.xlu0 %4909  ;;  %v5946_v47 = vpack.i.b16 %v5945_v18, %v5944_v20  ;;  %v6270_v56 = vpack.i.b16 %v6269_v39, %v6268_v1  ;;  %v7803_v18 = vcombine.low %v5952_v7, %v5952_v7  ;;  %v13347_v1 = vld [vmem:[#allocation6_spill] sm:$0xff] }
 0x7a5   : > { %v4940_v12 = vsel %vm502_vm12, %v4938_v28, %v4910_v32  ;;  %v13334_v28 = vld [vmem:[#allocation4_spill] sm:$0xff] }
 0x7a6   : > { %v12511_v9 = vpop.permute.xlu1 %4857  ;;  %v7386_v57 = vrot.slane %v4940_v12, 4  ;;  %6031 = vrot.lane.b32.xlu0 %v7810_v37, %s7956_s29  ;;  %v7801_v17 = vcombine.low %v5946_v47, %v5946_v47  ;;  %v7865_v32 = vcombine.low %v13334_v28, %v13334_v28  ;;  %v13335_v12 = vld [vmem:[#allocation20_spill] sm:$0xff] }
 0x7a8   : > { %5999 = vrot.lane.b32.xlu1 %v7802_v27, %s7955_s28  ;;  %v5212_v60 = vpop.permute.xlu0 %5211  ;;  %v7403_v48 = vsel %vm3294_vm13, %v4606_v58, %v7386_v57  ;;  %v7866_v27 = vcombine.low %v13335_v12, %v13335_v12  ;;  %v13337_v57 = vld [vmem:[#allocation14_spill] sm:$0xff]  ;;  %v13339_v58 = vld [vmem:[#allocation55_spill] sm:$0xff] }
 0x7a9   : > { %v5250_v11 = vsel %vm490_vm8, %v5248_v29, %v5212_v60  ;;  %7431 = vmatprep.subr.bf16.mxu1 %v7403_v48  ;;  %v7867_v20 = vcombine.low %v13337_v57, %v13337_v57  ;;  %v13341_v36 = vpack.i.b16 %v13339_v58, %v13340_v51  ;;  %v13343_v29 = vld [vmem:[#allocation12_spill] sm:$0xff]  ;;  %v13344_v48 = vld [vmem:[#allocation19_spill] sm:$0xff]  ;;  %v13355_v57 = vld [vmem:[#allocation29_spill] sm:$0xff] }
 0x7aa   : > { %v12531_v62 = vpop.permute.xlu1 %4873  ;;  %v5252_v22 = vsel %vm493_vm9, %v5250_v11, %v12413_v16  ;;  %6301 = vrot.lane.b32.xlu0 %v7812_v31, %s7951_s24  ;;  %v7799_v16 = vcombine.low %v5940_v0, %v5940_v0  ;;  %v13342_v31 = vld [vmem:[#allocation34_spill] sm:$0xff] }
 0x7ab   : > { %v5254_v34 = vsel %vm496_vm10, %v5252_v22, %v5220_v52  ;;  %v4579_v45 = vsel %vm483_vm6, %v13341_v36, %v13338_v35  ;;  %v7874_v2 = vcombine.low %v13342_v31, %v13342_v31  ;;  %v13346_v22 = vld [vmem:[#allocation24_spill] sm:$0xff]  ;;  %v13357_v35 = vld [vmem:[#allocation9_spill] sm:$0xff]  ;;  %v7389_v36 = vrot.slane %v12423_v41, 4  ;;  %v13358_v31 = vld [vmem:[#allocation54_spill] sm:$0xff] }
 0x7ac   : > { %6305 = vrot.lane.b32.xlu1 %v7813_v50, %s7952_s25  ;;  %v5256_v4 = vsel %vm499_vm11, %v5254_v34, %v12452_v25  ;;  %v5228_v44 = vpop.permute.xlu0 %5227  ;;  %v7817_v25 = vcombine.low %v6270_v56, %v6270_v56  ;;  %v4581_v60 = vsel %vm487_vm7, %v4579_v45, %v13343_v29  ;;  %v13345_v50 = vld [vmem:[#allocation8_spill] sm:$0xff]  ;;  %v13348_v34 = vpack.i.b16 %v13346_v22, %v13347_v1  ;;  %v13361_v41 = vld [vmem:[#allocation53_spill] sm:$0xff] }
 0x7ad   : > { %v5258_v10 = vsel %vm502_vm12, %v5256_v4, %v5228_v44  ;;  %v4583_v47 = vsel %vm490_vm8, %v4581_v60, %v13344_v48  ;;  %v13349_v4 = vld [vmem:[#allocation48_spill] sm:$0xff]  ;;  %v13350_v44 = vld [vmem:[#allocation47_spill] sm:$0xff]  ;;  %v13362_v22 = vld [vmem:[#allocation5_spill] sm:$0xff] }
 0x7ae   : > { %v4878_v63 = vpop.permute.xlu1 %4877  ;;  %5995 = vrot.lane.b32.xlu0 %v7801_v17, %s7954_s27  ;;  %v12546_v49 = vsel %vm3294_vm13, %v5258_v10, %v7390_v55  ;;  %v4585_v0 = vsel %vm493_vm9, %v4583_v47, %v13345_v50  ;;  %v4913_v55 = vsel %vm483_vm6, %v13348_v34, %v12511_v9  ;;  %v13351_v17 = vpack.i.b16 %v13349_v4, %v13350_v44 }
 0x7af   : > { %v4587_v3 = vsel %vm496_vm10, %v4585_v0, %v13352_v14  ;;  %v13363_v1 = vpack.i.b16 %v13361_v41, %v13362_v22  ;;  %v13368_v22 = vld [vmem:[#allocation16_spill] sm:$0xff] }
 0x7b0   : > { %5987 = vrot.lane.b32.xlu1 %v7799_v16, %s7952_s25  ;;  %v4870_v52 = vpop.permute.xlu0 %4869 }
 0x7b2   : > { %v5176_v38 = vpop.permute.xlu1 %5175  ;;  %6321 = vrot.lane.b32.xlu0 %v7817_v25, %s7956_s29 }
 0x7b3   : > { %v5231_v56 = vsel %vm483_vm6, %v13351_v17, %v5176_v38 }
 0x7b4   : > { %7343 = vrot.lane.b32.xlu1 %v7872_v8, %s7954_s27  ;;  %v4862_v23 = vpop.permute.xlu0 %4861 }
 0x7b5   : > { %v4915_v10 = vsel %vm487_vm7, %v4913_v55, %v4862_v23 }
 0x7b6   : > { %v5180_v37 = vpop.permute.xlu1 %5179  ;;  %7315 = vrot.lane.b32.xlu0 %v7865_v32, %s7954_s27 }
 0x7b7   : > { %v5233_v25 = vsel %vm487_vm7, %v5231_v56, %v5180_v37 }
 0x7b8   : > { %6003 = vrot.lane.b32.xlu1 %v7803_v18, %s7956_s29  ;;  %v5192_v5 = vpop.permute.xlu0 %5191  ;;  %v13353_v18 = vld [vmem:[#allocation7_spill] sm:$0xff] }
 0x7b9   : > { %v4589_v12 = vsel %vm499_vm11, %v4587_v3, %v13353_v18 }
 0x7ba   : > { %v5196_v54 = vpop.permute.xlu1 %5195  ;;  %7319 = vrot.lane.b32.xlu0 %v7866_v27, %s7955_s28 }
 0x7bc   : > { %7347 = vrot.lane.b32.xlu1 %v7873_v59, %s7955_s28  ;;  %v7022_v53 = vpop.permute.xlu0 %7021  ;;  %v13354_v59 = vld [vmem:[#allocation46_spill] sm:$0xff] }
 0x7be   : > { %v12571_v19 = vpop.permute.xlu1 %6993  ;;  %7323 = vrot.lane.b32.xlu0 %v7867_v20, %s7956_s29  ;;  %v13356_v20 = vpack.i.b16 %v13354_v59, %v13355_v57  ;;  %v13364_v57 = vld [vmem:[#allocation51_spill] sm:$0xff] }
 0x7c0   : > { %7351 = vrot.lane.b32.xlu1 %v7874_v2, %s7956_s29  ;;  %v12581_v39 = vpop.permute.xlu0 %7311  ;;  %v13359_v2 = vld [vmem:[#allocation50_spill] sm:$0xff] }
 0x7c1   : > { %v13360_v29 = vpack.i.b16 %v13358_v31, %v13359_v2 }
 0x7c2   : > { %v12583_v11 = vpop.permute.xlu1 %7339 }
 0x7c4   : > { %v4866_v16 = vpop.permute.xlu0 %4865 }
 0x7c5   : > { %v4917_v24 = vsel %vm490_vm8, %v4915_v10, %v4866_v16 }
 0x7c6   : > { %v5184_v8 = vpop.permute.xlu1 %5183  ;;  %v4919_v7 = vsel %vm493_vm9, %v4917_v24, %v4870_v52 }
 0x7c7   : > { %v5235_v9 = vsel %vm490_vm8, %v5233_v25, %v5184_v8  ;;  %v4921_v38 = vsel %vm496_vm10, %v4919_v7, %v12531_v62  ;;  %v4591_v62 = vsel %vm502_vm12, %v4589_v12, %v13357_v35 }
 0x7c8   : > { %v5237_v28 = vsel %vm493_vm9, %v5235_v9, %v12499_v61  ;;  %v4923_v23 = vsel %vm499_vm11, %v4921_v38, %v4878_v63  ;;  %v4882_v32 = vpop.permute.xlu0 %4881 }
 0x7c9   : > { %v4925_v37 = vsel %vm502_vm12, %v4923_v23, %v4882_v32  ;;  %v5239_v30 = vsel %vm496_vm10, %v5237_v28, %v5192_v5 }
 0x7ca   : > { %v7010_v27 = vpop.permute.xlu1 %7009  ;;  %v7385_v52 = vrot.slane %v4925_v37, 4  ;;  %v5241_v63 = vsel %vm499_vm11, %v5239_v30, %v5196_v54 }
 0x7cb   : > { %v7052_v61 = vsel %vm483_vm6, %v13356_v20, %v7010_v27  ;;  %v13365_v20 = vld [vmem:[#allocation27_spill] sm:$0xff] }
 0x7cc   : > { %v5200_v58 = vpop.permute.xlu0 %5199  ;;  %v7400_v51 = vsel %vm3294_vm13, %v4591_v62, %v7385_v52 }
 0x7cd   : > { %v5243_v45 = vsel %vm502_vm12, %v5241_v63, %v5200_v58  ;;  %7432 = vmatpush1.bf16.msra.mxu1 %v7400_v51 }
 0x7ce   : > { %v6982_v5 = vpop.permute.xlu1 %6981  ;;  %7433 = vmatprep.subr.bf16.mxu1 %v12546_v49  ;;  %v7406_v48 = vsel %vm3294_vm13, %v5243_v45, %v7389_v36  ;;  %v13367_v45 = vpack.i.b16 %v11791_v33, %v11794_v13  ;;  %v13369_v33 = vld [vmem:[#allocation21_spill] sm:$0xff] }
 0x7cf   : > { %v7037_v60 = vsel %vm483_vm6, %v13360_v29, %v6982_v5 }
 0x7d0   : > { %v6338_v47 = vpop.permute.xlu0 %6337 }
 0x7d1   : > { %7434 = vmatpush1.bf16.msra.mxu1 %v7406_v48 }
 0x7d2   : > { %v7030_v54 = vpop.permute.xlu1 %7029 }
 0x7d4   : > { %v12628_v50 = vpop.permute.xlu0 %6019 }
 0x7d6   : > { %v7300_v0 = vpop.permute.xlu1 %7299 }
 0x7d7   : > { %v7355_v34 = vsel %vm483_vm6, %v13363_v1, %v7300_v0 }
 0x7d8   : > { %v7014_v55 = vpop.permute.xlu0 %7013 }
 0x7d9   : > { %v7054_v4 = vsel %vm487_vm7, %v7052_v61, %v7014_v55  ;;  %v13366_v61 = vpack.i.b16 %v13364_v57, %v13365_v20 }
 0x7da   : > { %v7304_v44 = vpop.permute.xlu1 %7303 }
 0x7db   : > { %v12636_v17 = vsel %vm487_vm7, %v7355_v34, %v7304_v44 }
 0x7dc   : > { %v6986_v49 = vpop.permute.xlu0 %6985 }
 0x7dd   : > { %v7039_v56 = vsel %vm487_vm7, %v7037_v60, %v6986_v49 }
 0x7de   : > { %v6326_v10 = vpop.permute.xlu1 %6325 }
 0x7df   : > { %v6368_v5 = vsel %vm483_vm6, %v13367_v45, %v6326_v10  ;;  %v13371_v10 = vld [vmem:[#allocation56_spill] sm:$0xff] }
 0x7e0   : > { %v7026_v16 = vpop.permute.xlu0 %7025 }
 0x7e2   : > { %v6008_v14 = vpop.permute.xlu1 %6007 }
 0x7e4   : > { %v6998_v3 = vpop.permute.xlu0 %6997 }
 0x7e6   : > { %v7018_v25 = vpop.permute.xlu1 %7017 }
 0x7e7   : > { %v7056_v24 = vsel %vm490_vm8, %v7054_v4, %v7018_v25  ;;  %v13370_v4 = vld [vmem:[#allocation35_spill] sm:$0xff] }
 0x7e8   : > { %v7058_v8 = vsel %vm493_vm9, %v7056_v24, %v7022_v53  ;;  %v7002_v7 = vpop.permute.xlu0 %7001  ;;  %v13372_v24 = vpack.i.b16 %v11915_v42, %v11931_v46 }
 0x7e9   : > { %v7060_v9 = vsel %vm496_vm10, %v7058_v8, %v7026_v16 }
 0x7ea   : > { %v6028_v28 = vpop.permute.xlu1 %6027  ;;  %v7062_v38 = vsel %vm499_vm11, %v7060_v9, %v7030_v54  ;;  %v6050_v8 = vsel %vm483_vm6, %v13372_v24, %v6008_v14 }
 0x7ec   : > { %v7328_v23 = vpop.permute.xlu0 %7327 }
 0x7ed   : > { %v7370_v35 = vsel %vm483_vm6, %v13366_v61, %v7328_v23 }
 0x7ee   : > { %v6990_v32 = vpop.permute.xlu1 %6989 }
 0x7ef   : > { %v7041_v18 = vsel %vm490_vm8, %v7039_v56, %v6990_v32 }
 0x7f0   : > { %v7043_v12 = vsel %vm493_vm9, %v7041_v18, %v12571_v19  ;;  %v7332_v37 = vpop.permute.xlu0 %7331 }
 0x7f1   : > { %v7045_v27 = vsel %vm496_vm10, %v7043_v12, %v6998_v3  ;;  %v7372_v63 = vsel %vm487_vm7, %v7370_v35, %v7332_v37 }
 0x7f2   : > { %v7034_v30 = vpop.permute.xlu1 %7033  ;;  %v7047_v52 = vsel %vm499_vm11, %v7045_v27, %v7002_v7 }
 0x7f3   : > { %v7064_v53 = vsel %vm502_vm12, %v7062_v38, %v7034_v30 }
 0x7f4   : > { %v7398_v59 = vrot.slane %v7064_v53, 4  ;;  %v6330_v62 = vpop.permute.xlu0 %6329 }
 0x7f5   : > { %v6370_v2 = vsel %vm487_vm7, %v6368_v5, %v6330_v62 }
 0x7f6   : > { %v7336_v58 = vpop.permute.xlu1 %7335  ;;  %v12656_v19 = vsel %vm3294_vm13, %v12343_v26, %v7398_v59 }
 0x7f7   : > { %v7374_v51 = vsel %vm490_vm8, %v7372_v63, %v7336_v58  ;;  %v13374_v58 = vpack.i.b16 %v12125_v21, %v12131_v43 }
 0x7f8   : > { %v12661_v36 = vsel %vm493_vm9, %v7374_v51, %v12583_v11  ;;  %v6012_v31 = vpop.permute.xlu0 %6011  ;;  %v6725_v11 = vsel %vm493_vm9, %v12322_v6, %v13368_v22 }
 0x7f9   : > { %v6727_v13 = vsel %vm496_vm10, %v6725_v11, %v13369_v33  ;;  %v6052_v7 = vsel %vm487_vm7, %v6050_v8, %v6012_v31 }
 0x7fa   : > { %v6334_v29 = vpop.permute.xlu1 %6333  ;;  %v6729_v44 = vsel %vm499_vm11, %v6727_v13, %v13370_v4 }
 0x7fb   : > { %v6372_v60 = vsel %vm490_vm8, %v6370_v2, %v6334_v29  ;;  %v6731_v16 = vsel %vm502_vm12, %v6729_v44, %v13371_v10 }
 0x7fc   : > { %v6374_v26 = vsel %vm493_vm9, %v6372_v60, %v6338_v47  ;;  %v6342_v48 = vpop.permute.xlu0 %6341 }
 0x7fd   : > { %v6376_v18 = vsel %vm496_vm10, %v6374_v26, %v6342_v48 }
 0x7fe   : > { %v6310_v54 = vpop.permute.xlu1 %6309 }
 0x800   : > { %v6346_v0 = vpop.permute.xlu0 %6345 }
 0x801   : > { %v6378_v12 = vsel %vm499_vm11, %v6376_v18, %v6346_v0 }
 0x802   : > { %v5992_v41 = vpop.permute.xlu1 %5991 }
 0x804   : > { %v6024_v1 = vpop.permute.xlu0 %6023 }
 0x806   : > { %v6298_v34 = vpop.permute.xlu1 %6297 }
 0x808   : > { %v7006_v55 = vpop.permute.xlu0 %7005 }
 0x809   : > { %v7049_v49 = vsel %vm502_vm12, %v7047_v52, %v7006_v55 }
 0x80a   : > { %v5980_v47 = vpop.permute.xlu1 %5979  ;;  %v7397_v56 = vrot.slane %v7049_v49, 4 }
 0x80b   : > { %v6035_v51 = vsel %vm483_vm6, %v13374_v58, %v5980_v47 }
 0x80c   : > { %v7308_v3 = vpop.permute.xlu0 %7307  ;;  %v7418_v25 = vsel %vm3294_vm13, %v6731_v16, %v7397_v56 }
 0x80e   : > { %v5984_v6 = vpop.permute.xlu1 %5983 }
 0x80f   : > { %v6037_v5 = vsel %vm487_vm7, %v6035_v51, %v5984_v6 }
 0x810   : > { %v6016_v9 = vpop.permute.xlu0 %6015 }
 0x811   : > { %v6054_v38 = vsel %vm490_vm8, %v6052_v7, %v6016_v9 }
 0x812   : > { %v6314_v23 = vpop.permute.xlu1 %6313  ;;  %v6056_v32 = vsel %vm493_vm9, %v6054_v38, %v12628_v50  ;;  %v13373_v50 = vpack.i.b16 %v12039_v15, %v12049_v40 }
 0x813   : > { %v6058_v46 = vsel %vm496_vm10, %v6056_v32, %v6024_v1  ;;  %v7359_v1 = vsel %vm490_vm8, %v12636_v17, %v7308_v3 }
 0x814   : > { %v6350_v37 = vpop.permute.xlu0 %6349  ;;  %v6060_v14 = vsel %vm499_vm11, %v6058_v46, %v6028_v28  ;;  %v6353_v20 = vsel %vm483_vm6, %v13373_v50, %v6298_v34  ;;  %v7361_v34 = vsel %vm493_vm9, %v7359_v1, %v12581_v39 }
 0x815   : > { %v6380_v27 = vsel %vm502_vm12, %v6378_v12, %v6350_v37 }
 0x816   : > { %v6318_v30 = vpop.permute.xlu1 %6317  ;;  %v7394_v42 = vrot.slane %v6380_v27, 4 }
 0x818   : > { %v6032_v52 = vpop.permute.xlu0 %6031 }
 0x819   : > { %v6062_v53 = vsel %vm502_vm12, %v6060_v14, %v6032_v52  ;;  %v7473_v14 = vld [vmem:[%s212_s13 + $0x8] sm:$0xff] }
 0x81a   : > { %v6000_v59 = vpop.permute.xlu1 %5999  ;;  %v7415_v57 = vsel %vm3294_vm13, %v6062_v53, %v7394_v42  ;;  %v7472_v42 = vld [vmem:[%s212_s13] sm:$0xff] }
 0x81b   : > { %7435 = vmatprep.subr.bf16.mxu1 %v7415_v57 }
 0x81c   : > { %v6302_v61 = vpop.permute.xlu0 %6301 }
 0x81d   : > { %v6355_v35 = vsel %vm487_vm7, %v6353_v20, %v6302_v61 }
 0x81e   : > { %v6306_v62 = vpop.permute.xlu1 %6305 }
 0x81f   : > { %v6357_v63 = vsel %vm490_vm8, %v6355_v35, %v6306_v62 }
 0x820   : > { %v6359_v28 = vsel %vm493_vm9, %v6357_v63, %v6310_v54  ;;  %v5996_v45 = vpop.permute.xlu0 %5995 }
 0x821   : > { %v6361_v40 = vsel %vm496_vm10, %v6359_v28, %v6314_v23 }
 0x822   : > { %v5988_v31 = vpop.permute.xlu1 %5987  ;;  %v6363_v60 = vsel %vm499_vm11, %v6361_v40, %v6318_v30 }
 0x823   : > { %v6039_v15 = vsel %vm490_vm8, %v6037_v5, %v5988_v31 }
 0x824   : > { %v6041_v2 = vsel %vm493_vm9, %v6039_v15, %v5992_v41  ;;  %v6322_v29 = vpop.permute.xlu0 %6321 }
 0x825   : > { %v6365_v48 = vsel %vm502_vm12, %v6363_v60, %v6322_v29  ;;  %v6043_v21 = vsel %vm496_vm10, %v6041_v2, %v5996_v45 }
 0x826   : > { %v7344_v26 = vpop.permute.xlu1 %7343  ;;  %v7393_v54 = vrot.slane %v6365_v48, 4  ;;  %v6045_v22 = vsel %vm499_vm11, %v6043_v21, %v6000_v59 }
 0x827   : > { %v7378_v4 = vsel %vm496_vm10, %v12661_v36, %v7344_v26 }
 0x828   : > { %v7316_v43 = vpop.permute.xlu0 %7315 }
 0x829   : > { %v7363_v55 = vsel %vm496_vm10, %v7361_v34, %v7316_v43 }
 0x82a   : > { %v6004_v0 = vpop.permute.xlu1 %6003 }
 0x82b   : > { %v6047_v11 = vsel %vm502_vm12, %v6045_v22, %v6004_v0 }
 0x82c   : > { %v7412_v41 = vsel %vm3294_vm13, %v6047_v11, %v7393_v54  ;;  %v7320_v33 = vpop.permute.xlu0 %7319 }
 0x82d   : > { %7436 = vmatpush1.bf16.msra.mxu1 %v7412_v41  ;;  %v7365_v44 = vsel %vm499_vm11, %v7363_v55, %v7320_v33 }
 0x82e   : > { %v7348_v13 = vpop.permute.xlu1 %7347  ;;  %7437 = vmatprep.subr.bf16.mxu1 %v12656_v19  ;;  %v7423_v19 = vld [vmem:[%s12748_s3] sm:$0xf] }
 0x82f   : > { %v7380_v17 = vsel %vm499_vm11, %v7378_v4, %v7348_v13 }
 0x830   : > { %v7324_v49 = vpop.permute.xlu0 %7323 }
 0x831   : > { %7438 = vmatpush1.bf16.msra.mxu1 %v7418_v25  ;;  %v7367_v47 = vsel %vm502_vm12, %v7365_v44, %v7324_v49 }
 0x832   : > { %v7352_v56 = vpop.permute.xlu1 %7351  ;;  %v7427_v39 = vsel %vm3294_vm13, %v7367_v47, 0 }
 0x833   : > { %v7382_v10 = vsel %vm502_vm12, %v7380_v17, %v7352_v56 }
 0x834   : > { %7875 = vmatprep.subr.msk.bf16.mxu1 %vm3294_vm13, %v7382_v10 }
 0x835   : > { %7440 = vmatpush1.bf16.msra.mxu1 %v7427_v39 }
 0x838   : > { %7876 = vmatmul.mubr.msk.bf16.vlgmr.msra.gmra.mrb[0].mxu1 %vm13375_vm4, %v7423_v19 }
 0x90b   : > { %v7465_v36 = vpop.f32.mrb[0].mxu1 }
 0x90c   : > { %v7477_v16 = vmul.f32 %v7465_v36, %v7465_v36  ;;  %v7467_v3 = vpop.f32.mrb[1].mxu1 }
 0x90d   : > { %v7474_v25 = vadd.f32 %v7467_v3, %v7465_v36  ;;  %v7478_v6 = vmul.f32 %v7467_v3, %v7467_v3  ;;  %v7469_v24 = vpop.f32.mrb[2].mxu1 }
 0x90e   : > { %v7470_v8 = vpop.f32.mrb[3].mxu1 }
 0x90f   : > { %7475 = vadd.xlane.f32.xlu0 %v7474_v25  ;;  %v7479_v7 = vadd.f32 %v7478_v6, %v7477_v16 }
 0x911   : > { %7480 = vadd.xlane.f32.xlu1 %v7479_v7 }
 0x99c   : > { %v7476_v9 = vpop.xlane.xlu0 %7475 }
 0x99d   : > { %v7482_v38 = vmul.f32 0.00390625, %v7476_v9 }
 0x99e   : > { %v7481_v23 = vpop.xlane.xlu1 %7480 }
 0x99f   : > { %v7483_v32 = vmul.f32 0.00390625, %v7481_v23  ;;  %v7484_v18 = vmul.f32 %v7482_v38, %v7482_v38  ;;  %v7486_v27 = vsub.f32 %v7465_v36, %v7482_v38  ;;  %v7487_v30 = vsub.f32 %v7467_v3, %v7482_v38 }
 0x9a1   : > { %v7485_v12 = vsub.f32 %v7483_v32, %v7484_v18 }
 0x9a3   : > { %v7488_v37 = vadd.f32 1e-05, %v7485_v12 }
 0x9a5   : > { %7935 = vrsqrt.f32 %v7488_v37 }
 0x9af   : > { %v7936_v46 = vpop.eup %7935 }
 0x9b0   : > { %v7490_v52 = vmul.f32 %v7936_v46, %v7486_v27  ;;  %v7491_v53 = vmul.f32 %v7936_v46, %v7487_v30 }
 0x9b2   : > { %v7492_v59 = vadd.f32 %v7490_v52, %v7472_v42  ;;  %v7493_v57 = vadd.f32 %v7491_v53, %v7473_v14 }
 0x9b4   : > { %7494 = vst [vmem:[%s217_s18] sm:$0xff] %v7492_v59  ;;  %7495 = vst [vmem:[%s217_s18 + $0x8] sm:$0xff] %v7493_v57 }
 0x9b5 PF: > { %s14_s15 = sadd.s32 1, %s7943_s15  }
 0x9b6   : > { %p11_p4 = scmp.ge.s32.totalorder %s14_s15, 4  }
 0x9b8   :  { %13 = sbr.rel (!%p11_p4) target bundleno = 1 (0x1), region = 69 }

</bundles_post_ra>
